<compile_context>
chip_gen: v5e
topology: v5e:2x2
jax: 0.10.0
libtpu: 0.0.40
codegen_flags: <defaults>
</compile_context>

<pallas_src>
import numpy as np
import jax
import jax.numpy as jnp
from jax.experimental import pallas as pl
from jax.experimental.pallas import tpu as pltpu

INV_SQRT2 = float(1.0 / np.sqrt(2.0))


def _softplus100(x):
    # PyTorch nn.Softplus(beta=100), threshold=20
    z = 100.0 * x
    soft = jnp.log1p(jnp.exp(jnp.minimum(z, 20.0))) * 0.01
    return jnp.where(z > 20.0, x, soft)


def _matmul_fm(w, x):
    """Feature-major matmul: w (out, k) @ x (k, tile_n) -> (out, tile_n).

    For tiny contraction dims (K = d_in = 3) a padded MXU push is wasteful, so
    lower those to K broadcast multiply-adds on the VPU; otherwise use the MXU.
    """
    k = w.shape[1]
    if k <= 8:
        acc = w[:, 0:1] * x[0:1, :]
        for j in range(1, k):
            acc = acc + w[:, j:j + 1] * x[j:j + 1, :]
        return acc
    return jnp.dot(w, x, preferred_element_type=jnp.float32)


def make_sdf_kernel(layer_is_skip):
    """Build the kernel for a fixed (static) layer structure.

    Per-layer params in `refs` (flat, in order), feature-major:
      non-skip layer: (W  (out, in),            b (out, 1))
      skip layer:     (Wa (out, x_w) * 1/sqrt2, Wb (out, d_in) * 1/sqrt2, b (out, 1))
    Last ref is the output (d_out, tile_n).
    """

    def kernel(x_ref, *refs):
        out_ref = refs[-1]
        params = refs[:-1]
        inputs = x_ref[...]                      # (d_in, tile_n), feature-major
        x = inputs
        p = 0
        for is_skip in layer_is_skip:
            if is_skip:
                wa, wb, b = params[p][...], params[p + 1][...], params[p + 2][...]
                p += 3
                # W @ (cat([x, inputs], 0) / sqrt2) + b, 1/sqrt2 folded into wa/wb
                h = _matmul_fm(wa, x) + _matmul_fm(wb, inputs) + b
            else:
                w, b = params[p][...], params[p + 1][...]
                p += 2
                h = _matmul_fm(w, x) + b
            # activation after every layer (matches the reference forward exactly)
            x = _softplus100(h)
        out_ref[...] = x.astype(out_ref.dtype)

    return kernel


def init_params(key, d_in, d_out, d_hidden, n_layers, skip_in):
    """Deterministic init matching the module's shapes (geometric_init, multires=0)."""
    dims = [d_in] + [d_hidden for _ in range(n_layers)] + [d_out]
    num_layers = len(dims)
    layers = []
    for l in range(num_layers - 1):
        if l + 1 in skip_in:
            out_dim = dims[l + 1] - dims[0]
        else:
            out_dim = dims[l + 1]
        in_dim = dims[l]
        key, k1 = jax.random.split(key)
        std = np.sqrt(2.0) / np.sqrt(out_dim)
        v = jax.random.normal(k1, (out_dim, in_dim), jnp.float32) * std
        b = jnp.zeros((out_dim,), jnp.float32)
        # weight_norm reparam: W = g * v / ||v||_row, with g initialized to ||v||_row
        row_norm = jnp.sqrt(jnp.sum(v * v, axis=1, keepdims=True))
        g = row_norm
        W = g * v / jnp.maximum(row_norm, 1e-12)   # == v at init
        layers.append((W, b))                       # W: (out, in) torch layout
    return layers


def pack_params(layers, d_in, skip_in):
    """Flatten params into kernel arg order (feature-major).

    Weights stay in torch (out, in) layout; bias becomes an (out, 1) column.
    The skip layer's 1/sqrt(2) is folded into its weights (NOT the bias).
    """
    params_flat = []
    layer_is_skip = []
    for l, (W, b) in enumerate(layers):
        W = jnp.asarray(W)
        out_dim, in_dim = W.shape
        b2 = jnp.asarray(b).reshape(out_dim, 1)
        if l in skip_in:
            x_width = in_dim - d_in                 # width of x before the concat
            params_flat += [W[:, :x_width] * INV_SQRT2,
                            W[:, x_width:] * INV_SQRT2,
                            b2]
            layer_is_skip.append(True)
        else:
            params_flat += [W, b2]
            layer_is_skip.append(False)
    return params_flat, tuple(layer_is_skip)


def sdf_forward(inputs, params_flat, layer_is_skip, d_out, tile_n=1024):
    """inputs: (N, d_in) row-major (PyTorch layout). Returns (N, d_out)."""
    N, d_in = inputs.shape
    assert tile_n % 128 == 0
    n_pad = pl.cdiv(N, tile_n) * tile_n

    # Feature-major slab (d_in, n_pad): batch on the lane axis -> lane-dense
    # activations and a lane-dense output store.  (Plain-JAX layout plumbing.)
    x_fm = inputs.T
    if n_pad != N:
        x_fm = jnp.pad(x_fm, ((0, 0), (0, n_pad - N)))

    grid = (n_pad // tile_n,)

    in_specs = [pl.BlockSpec((d_in, tile_n), lambda i: (0, i))]
    # Tiny weights/biases: whole-array, VMEM-resident, no per-step tiling/DMA.
    for _ in params_flat:
        in_specs.append(pl.BlockSpec(memory_space=pltpu.MemorySpace.VMEM))
    out_spec = pl.BlockSpec((d_out, tile_n), lambda i: (0, i))

    kernel = make_sdf_kernel(layer_is_skip)
    out_fm = pl.pallas_call(
        kernel,
        out_shape=jax.ShapeDtypeStruct((d_out, n_pad), jnp.float32),
        grid_spec=pltpu.PrefetchScalarGridSpec(
            num_scalar_prefetch=0,
            grid=grid,
            in_specs=in_specs,
            out_specs=out_spec,
        ),
        compiler_params=pltpu.CompilerParams(
            dimension_semantics=("parallel",)),
    )(x_fm, *params_flat)

    return out_fm[:, :N].T                          # back to (N, d_out)


def sdf_reference(inputs, layers, skip_in):
    """Pure-JAX reference mirroring the PyTorch forward (unfolded math)."""
    x = inputs
    for l, (W, b) in enumerate(layers):
        if l in skip_in:
            x = jnp.concatenate([x, inputs], axis=1) / np.sqrt(2.0)
        x = x @ W.T + b
        x = _softplus100(x)
    return x


if __name__ == "__main__":
    # SDFNetwork(d_in=3, d_out=1, d_hidden=32, n_layers=6, skip_in=(4,), multires=0)
    d_in, d_out, d_hidden, n_layers = 3, 1, 32, 6
    skip_in = (4,)

    key = jax.random.PRNGKey(0)
    key, kx, kp = jax.random.split(key, 3)

    N = 2048                      # small demo batch; 2 grid steps at tile_n=1024
    inputs = jax.random.normal(kx, (N, d_in), jnp.float32)

    layers = init_params(kp, d_in, d_out, d_hidden, n_layers, skip_in)
    params_flat, layer_is_skip = pack_params(layers, d_in, skip_in)

    out = sdf_forward(inputs, params_flat, layer_is_skip, d_out, tile_n=1024)
    out = jax.block_until_ready(out)

    ref = jax.block_until_ready(sdf_reference(inputs, layers, skip_in))
    assert out.shape == (N, d_out)
    np.testing.assert_allclose(np.asarray(out), np.asarray(ref), rtol=1e-4, atol=1e-4)

    print("KERNEL_OK")
</pallas_src>

<mosaic_0001>
module attributes {stable_mosaic.version = 11 : i64} {
  func.func @kernel(%arg0: i32, %arg1: memref<3x1024xf32, #tpu.memory_space<vmem>>, %arg2: memref<32x3xf32, #tpu.memory_space<vmem>>, %arg3: memref<32x1xf32, #tpu.memory_space<vmem>>, %arg4: memref<32x32xf32, #tpu.memory_space<vmem>>, %arg5: memref<32x1xf32, #tpu.memory_space<vmem>>, %arg6: memref<32x32xf32, #tpu.memory_space<vmem>>, %arg7: memref<32x1xf32, #tpu.memory_space<vmem>>, %arg8: memref<29x32xf32, #tpu.memory_space<vmem>>, %arg9: memref<29x1xf32, #tpu.memory_space<vmem>>, %arg10: memref<32x29xf32, #tpu.memory_space<vmem>>, %arg11: memref<32x3xf32, #tpu.memory_space<vmem>>, %arg12: memref<32x1xf32, #tpu.memory_space<vmem>>, %arg13: memref<32x32xf32, #tpu.memory_space<vmem>>, %arg14: memref<32x1xf32, #tpu.memory_space<vmem>>, %arg15: memref<1x32xf32, #tpu.memory_space<vmem>>, %arg16: memref<1x1xf32, #tpu.memory_space<vmem>>, %arg17: memref<1x1024xf32, #tpu.memory_space<vmem>>) attributes {dimension_semantics = [#tpu.dimension_semantics<parallel>], iteration_bounds = array<i64: 2>, scalar_prefetch = 0 : i64, scratch_operands = 0 : i64, tpu.core_type = #tpu.core_type<tc>, window_params = [{transform_indices = @transform_0, window_bounds = array<i64: 3, 1024>}, {pipeline_mode = #tpu.pipeline_mode<synchronous>, transform_indices = @transform_1, window_bounds = array<i64: 32, 3>}, {pipeline_mode = #tpu.pipeline_mode<synchronous>, transform_indices = @transform_2, window_bounds = array<i64: 32, 1>}, {pipeline_mode = #tpu.pipeline_mode<synchronous>, transform_indices = @transform_3, window_bounds = array<i64: 32, 32>}, {pipeline_mode = #tpu.pipeline_mode<synchronous>, transform_indices = @transform_4, window_bounds = array<i64: 32, 1>}, {pipeline_mode = #tpu.pipeline_mode<synchronous>, transform_indices = @transform_5, window_bounds = array<i64: 32, 32>}, {pipeline_mode = #tpu.pipeline_mode<synchronous>, transform_indices = @transform_6, window_bounds = array<i64: 32, 1>}, {pipeline_mode = #tpu.pipeline_mode<synchronous>, transform_indices = @transform_7, window_bounds = array<i64: 29, 32>}, {pipeline_mode = #tpu.pipeline_mode<synchronous>, transform_indices = @transform_8, window_bounds = array<i64: 29, 1>}, {pipeline_mode = #tpu.pipeline_mode<synchronous>, transform_indices = @transform_9, window_bounds = array<i64: 32, 29>}, {pipeline_mode = #tpu.pipeline_mode<synchronous>, transform_indices = @transform_10, window_bounds = array<i64: 32, 3>}, {pipeline_mode = #tpu.pipeline_mode<synchronous>, transform_indices = @transform_11, window_bounds = array<i64: 32, 1>}, {pipeline_mode = #tpu.pipeline_mode<synchronous>, transform_indices = @transform_12, window_bounds = array<i64: 32, 32>}, {pipeline_mode = #tpu.pipeline_mode<synchronous>, transform_indices = @transform_13, window_bounds = array<i64: 32, 1>}, {pipeline_mode = #tpu.pipeline_mode<synchronous>, transform_indices = @transform_14, window_bounds = array<i64: 1, 32>}, {pipeline_mode = #tpu.pipeline_mode<synchronous>, transform_indices = @transform_15, window_bounds = array<i64: 1, 1>}, {transform_indices = @transform_16, window_bounds = array<i64: 1, 1024>}]} {
    %c0 = arith.constant 0 : index
    %c0_0 = arith.constant 0 : index
    %0 = vector.load %arg1[%c0, %c0_0] : memref<3x1024xf32, #tpu.memory_space<vmem>>, vector<3x1024xf32>
    %c0_1 = arith.constant 0 : index
    %c0_2 = arith.constant 0 : index
    %1 = vector.load %arg2[%c0_1, %c0_2] : memref<32x3xf32, #tpu.memory_space<vmem>>, vector<32x3xf32>
    %c0_3 = arith.constant 0 : index
    %c0_4 = arith.constant 0 : index
    %2 = vector.load %arg3[%c0_3, %c0_4] : memref<32x1xf32, #tpu.memory_space<vmem>>, vector<32x1xf32>
    %3 = vector.extract_strided_slice %1 {offsets = [0, 0], sizes = [32, 1], strides = [1, 1]} : vector<32x3xf32> to vector<32x1xf32>
    %4 = vector.extract_strided_slice %0 {offsets = [0, 0], sizes = [1, 1024], strides = [1, 1]} : vector<3x1024xf32> to vector<1x1024xf32>
    %5 = vector.broadcast %3 : vector<32x1xf32> to vector<32x1024xf32>
    %6 = vector.broadcast %4 : vector<1x1024xf32> to vector<32x1024xf32>
    %7 = arith.mulf %5, %6 : vector<32x1024xf32>
    %8 = vector.extract_strided_slice %1 {offsets = [0, 1], sizes = [32, 1], strides = [1, 1]} : vector<32x3xf32> to vector<32x1xf32>
    %9 = vector.extract_strided_slice %0 {offsets = [1, 0], sizes = [1, 1024], strides = [1, 1]} : vector<3x1024xf32> to vector<1x1024xf32>
    %10 = vector.broadcast %8 : vector<32x1xf32> to vector<32x1024xf32>
    %11 = vector.broadcast %9 : vector<1x1024xf32> to vector<32x1024xf32>
    %12 = arith.mulf %10, %11 : vector<32x1024xf32>
    %13 = arith.addf %7, %12 : vector<32x1024xf32>
    %14 = vector.extract_strided_slice %1 {offsets = [0, 2], sizes = [32, 1], strides = [1, 1]} : vector<32x3xf32> to vector<32x1xf32>
    %15 = vector.extract_strided_slice %0 {offsets = [2, 0], sizes = [1, 1024], strides = [1, 1]} : vector<3x1024xf32> to vector<1x1024xf32>
    %16 = vector.broadcast %14 : vector<32x1xf32> to vector<32x1024xf32>
    %17 = vector.broadcast %15 : vector<1x1024xf32> to vector<32x1024xf32>
    %18 = arith.mulf %16, %17 : vector<32x1024xf32>
    %19 = arith.addf %13, %18 : vector<32x1024xf32>
    %20 = vector.broadcast %2 : vector<32x1xf32> to vector<32x1024xf32>
    %21 = arith.addf %19, %20 : vector<32x1024xf32>
    %cst = arith.constant 1.000000e+02 : f32
    %22 = vector.broadcast %cst : f32 to vector<32x1024xf32>
    %23 = arith.mulf %22, %21 : vector<32x1024xf32>
    %cst_5 = arith.constant 2.000000e+01 : f32
    %24 = vector.broadcast %cst_5 : f32 to vector<32x1024xf32>
    %25 = arith.minimumf %23, %24 : vector<32x1024xf32>
    %26 = math.exp %25 : vector<32x1024xf32>
    %27 = math.log1p %26 : vector<32x1024xf32>
    %cst_6 = arith.constant 0.00999999977 : f32
    %28 = vector.broadcast %cst_6 : f32 to vector<32x1024xf32>
    %29 = arith.mulf %27, %28 : vector<32x1024xf32>
    %cst_7 = arith.constant 2.000000e+01 : f32
    %30 = vector.broadcast %cst_7 : f32 to vector<32x1024xf32>
    %31 = arith.cmpf ogt, %23, %30 : vector<32x1024xf32>
    %32 = arith.select %31, %21, %29 : vector<32x1024xi1>, vector<32x1024xf32>
    %c0_8 = arith.constant 0 : index
    %c0_9 = arith.constant 0 : index
    %33 = vector.load %arg4[%c0_8, %c0_9] : memref<32x32xf32, #tpu.memory_space<vmem>>, vector<32x32xf32>
    %c0_10 = arith.constant 0 : index
    %c0_11 = arith.constant 0 : index
    %34 = vector.load %arg5[%c0_10, %c0_11] : memref<32x1xf32, #tpu.memory_space<vmem>>, vector<32x1xf32>
    %cst_12 = arith.constant dense<0.000000e+00> : vector<32x1024xf32>
    %35 = tpu.matmul %33, %32, %cst_12 {dimension_numbers = #tpu.dot_dimension_numbers<[1], [0], [0], [1], [0, 0, 1, 1], [], []>} : vector<32x32xf32>, vector<32x1024xf32>, vector<32x1024xf32> -> vector<32x1024xf32>
    %36 = vector.broadcast %34 : vector<32x1xf32> to vector<32x1024xf32>
    %37 = arith.addf %35, %36 : vector<32x1024xf32>
    %cst_13 = arith.constant 1.000000e+02 : f32
    %38 = vector.broadcast %cst_13 : f32 to vector<32x1024xf32>
    %39 = arith.mulf %38, %37 : vector<32x1024xf32>
    %cst_14 = arith.constant 2.000000e+01 : f32
    %40 = vector.broadcast %cst_14 : f32 to vector<32x1024xf32>
    %41 = arith.minimumf %39, %40 : vector<32x1024xf32>
    %42 = math.exp %41 : vector<32x1024xf32>
    %43 = math.log1p %42 : vector<32x1024xf32>
    %cst_15 = arith.constant 0.00999999977 : f32
    %44 = vector.broadcast %cst_15 : f32 to vector<32x1024xf32>
    %45 = arith.mulf %43, %44 : vector<32x1024xf32>
    %cst_16 = arith.constant 2.000000e+01 : f32
    %46 = vector.broadcast %cst_16 : f32 to vector<32x1024xf32>
    %47 = arith.cmpf ogt, %39, %46 : vector<32x1024xf32>
    %48 = arith.select %47, %37, %45 : vector<32x1024xi1>, vector<32x1024xf32>
    %c0_17 = arith.constant 0 : index
    %c0_18 = arith.constant 0 : index
    %49 = vector.load %arg6[%c0_17, %c0_18] : memref<32x32xf32, #tpu.memory_space<vmem>>, vector<32x32xf32>
    %c0_19 = arith.constant 0 : index
    %c0_20 = arith.constant 0 : index
    %50 = vector.load %arg7[%c0_19, %c0_20] : memref<32x1xf32, #tpu.memory_space<vmem>>, vector<32x1xf32>
    %cst_21 = arith.constant dense<0.000000e+00> : vector<32x1024xf32>
    %51 = tpu.matmul %49, %48, %cst_21 {dimension_numbers = #tpu.dot_dimension_numbers<[1], [0], [0], [1], [0, 0, 1, 1], [], []>} : vector<32x32xf32>, vector<32x1024xf32>, vector<32x1024xf32> -> vector<32x1024xf32>
    %52 = vector.broadcast %50 : vector<32x1xf32> to vector<32x1024xf32>
    %53 = arith.addf %51, %52 : vector<32x1024xf32>
    %cst_22 = arith.constant 1.000000e+02 : f32
    %54 = vector.broadcast %cst_22 : f32 to vector<32x1024xf32>
    %55 = arith.mulf %54, %53 : vector<32x1024xf32>
    %cst_23 = arith.constant 2.000000e+01 : f32
    %56 = vector.broadcast %cst_23 : f32 to vector<32x1024xf32>
    %57 = arith.minimumf %55, %56 : vector<32x1024xf32>
    %58 = math.exp %57 : vector<32x1024xf32>
    %59 = math.log1p %58 : vector<32x1024xf32>
    %cst_24 = arith.constant 0.00999999977 : f32
    %60 = vector.broadcast %cst_24 : f32 to vector<32x1024xf32>
    %61 = arith.mulf %59, %60 : vector<32x1024xf32>
    %cst_25 = arith.constant 2.000000e+01 : f32
    %62 = vector.broadcast %cst_25 : f32 to vector<32x1024xf32>
    %63 = arith.cmpf ogt, %55, %62 : vector<32x1024xf32>
    %64 = arith.select %63, %53, %61 : vector<32x1024xi1>, vector<32x1024xf32>
    %c0_26 = arith.constant 0 : index
    %c0_27 = arith.constant 0 : index
    %65 = vector.load %arg8[%c0_26, %c0_27] : memref<29x32xf32, #tpu.memory_space<vmem>>, vector<29x32xf32>
    %c0_28 = arith.constant 0 : index
    %c0_29 = arith.constant 0 : index
    %66 = vector.load %arg9[%c0_28, %c0_29] : memref<29x1xf32, #tpu.memory_space<vmem>>, vector<29x1xf32>
    %cst_30 = arith.constant dense<0.000000e+00> : vector<29x1024xf32>
    %67 = tpu.matmul %65, %64, %cst_30 {dimension_numbers = #tpu.dot_dimension_numbers<[1], [0], [0], [1], [0, 0, 1, 1], [], []>} : vector<29x32xf32>, vector<32x1024xf32>, vector<29x1024xf32> -> vector<29x1024xf32>
    %68 = vector.broadcast %66 : vector<29x1xf32> to vector<29x1024xf32>
    %69 = arith.addf %67, %68 : vector<29x1024xf32>
    %cst_31 = arith.constant 1.000000e+02 : f32
    %70 = vector.broadcast %cst_31 : f32 to vector<29x1024xf32>
    %71 = arith.mulf %70, %69 : vector<29x1024xf32>
    %cst_32 = arith.constant 2.000000e+01 : f32
    %72 = vector.broadcast %cst_32 : f32 to vector<29x1024xf32>
    %73 = arith.minimumf %71, %72 : vector<29x1024xf32>
    %74 = math.exp %73 : vector<29x1024xf32>
    %75 = math.log1p %74 : vector<29x1024xf32>
    %cst_33 = arith.constant 0.00999999977 : f32
    %76 = vector.broadcast %cst_33 : f32 to vector<29x1024xf32>
    %77 = arith.mulf %75, %76 : vector<29x1024xf32>
    %cst_34 = arith.constant 2.000000e+01 : f32
    %78 = vector.broadcast %cst_34 : f32 to vector<29x1024xf32>
    %79 = arith.cmpf ogt, %71, %78 : vector<29x1024xf32>
    %80 = arith.select %79, %69, %77 : vector<29x1024xi1>, vector<29x1024xf32>
    %c0_35 = arith.constant 0 : index
    %c0_36 = arith.constant 0 : index
    %81 = vector.load %arg10[%c0_35, %c0_36] : memref<32x29xf32, #tpu.memory_space<vmem>>, vector<32x29xf32>
    %c0_37 = arith.constant 0 : index
    %c0_38 = arith.constant 0 : index
    %82 = vector.load %arg11[%c0_37, %c0_38] : memref<32x3xf32, #tpu.memory_space<vmem>>, vector<32x3xf32>
    %c0_39 = arith.constant 0 : index
    %c0_40 = arith.constant 0 : index
    %83 = vector.load %arg12[%c0_39, %c0_40] : memref<32x1xf32, #tpu.memory_space<vmem>>, vector<32x1xf32>
    %cst_41 = arith.constant dense<0.000000e+00> : vector<32x1024xf32>
    %84 = tpu.matmul %81, %80, %cst_41 {dimension_numbers = #tpu.dot_dimension_numbers<[1], [0], [0], [1], [0, 0, 1, 1], [], []>} : vector<32x29xf32>, vector<29x1024xf32>, vector<32x1024xf32> -> vector<32x1024xf32>
    %85 = vector.extract_strided_slice %82 {offsets = [0, 0], sizes = [32, 1], strides = [1, 1]} : vector<32x3xf32> to vector<32x1xf32>
    %86 = vector.extract_strided_slice %0 {offsets = [0, 0], sizes = [1, 1024], strides = [1, 1]} : vector<3x1024xf32> to vector<1x1024xf32>
    %87 = vector.broadcast %85 : vector<32x1xf32> to vector<32x1024xf32>
    %88 = vector.broadcast %86 : vector<1x1024xf32> to vector<32x1024xf32>
    %89 = arith.mulf %87, %88 : vector<32x1024xf32>
    %90 = vector.extract_strided_slice %82 {offsets = [0, 1], sizes = [32, 1], strides = [1, 1]} : vector<32x3xf32> to vector<32x1xf32>
    %91 = vector.extract_strided_slice %0 {offsets = [1, 0], sizes = [1, 1024], strides = [1, 1]} : vector<3x1024xf32> to vector<1x1024xf32>
    %92 = vector.broadcast %90 : vector<32x1xf32> to vector<32x1024xf32>
    %93 = vector.broadcast %91 : vector<1x1024xf32> to vector<32x1024xf32>
    %94 = arith.mulf %92, %93 : vector<32x1024xf32>
    %95 = arith.addf %89, %94 : vector<32x1024xf32>
    %96 = vector.extract_strided_slice %82 {offsets = [0, 2], sizes = [32, 1], strides = [1, 1]} : vector<32x3xf32> to vector<32x1xf32>
    %97 = vector.extract_strided_slice %0 {offsets = [2, 0], sizes = [1, 1024], strides = [1, 1]} : vector<3x1024xf32> to vector<1x1024xf32>
    %98 = vector.broadcast %96 : vector<32x1xf32> to vector<32x1024xf32>
    %99 = vector.broadcast %97 : vector<1x1024xf32> to vector<32x1024xf32>
    %100 = arith.mulf %98, %99 : vector<32x1024xf32>
    %101 = arith.addf %95, %100 : vector<32x1024xf32>
    %102 = arith.addf %84, %101 : vector<32x1024xf32>
    %103 = vector.broadcast %83 : vector<32x1xf32> to vector<32x1024xf32>
    %104 = arith.addf %102, %103 : vector<32x1024xf32>
    %cst_42 = arith.constant 1.000000e+02 : f32
    %105 = vector.broadcast %cst_42 : f32 to vector<32x1024xf32>
    %106 = arith.mulf %105, %104 : vector<32x1024xf32>
    %cst_43 = arith.constant 2.000000e+01 : f32
    %107 = vector.broadcast %cst_43 : f32 to vector<32x1024xf32>
    %108 = arith.minimumf %106, %107 : vector<32x1024xf32>
    %109 = math.exp %108 : vector<32x1024xf32>
    %110 = math.log1p %109 : vector<32x1024xf32>
    %cst_44 = arith.constant 0.00999999977 : f32
    %111 = vector.broadcast %cst_44 : f32 to vector<32x1024xf32>
    %112 = arith.mulf %110, %111 : vector<32x1024xf32>
    %cst_45 = arith.constant 2.000000e+01 : f32
    %113 = vector.broadcast %cst_45 : f32 to vector<32x1024xf32>
    %114 = arith.cmpf ogt, %106, %113 : vector<32x1024xf32>
    %115 = arith.select %114, %104, %112 : vector<32x1024xi1>, vector<32x1024xf32>
    %c0_46 = arith.constant 0 : index
    %c0_47 = arith.constant 0 : index
    %116 = vector.load %arg13[%c0_46, %c0_47] : memref<32x32xf32, #tpu.memory_space<vmem>>, vector<32x32xf32>
    %c0_48 = arith.constant 0 : index
    %c0_49 = arith.constant 0 : index
    %117 = vector.load %arg14[%c0_48, %c0_49] : memref<32x1xf32, #tpu.memory_space<vmem>>, vector<32x1xf32>
    %cst_50 = arith.constant dense<0.000000e+00> : vector<32x1024xf32>
    %118 = tpu.matmul %116, %115, %cst_50 {dimension_numbers = #tpu.dot_dimension_numbers<[1], [0], [0], [1], [0, 0, 1, 1], [], []>} : vector<32x32xf32>, vector<32x1024xf32>, vector<32x1024xf32> -> vector<32x1024xf32>
    %119 = vector.broadcast %117 : vector<32x1xf32> to vector<32x1024xf32>
    %120 = arith.addf %118, %119 : vector<32x1024xf32>
    %cst_51 = arith.constant 1.000000e+02 : f32
    %121 = vector.broadcast %cst_51 : f32 to vector<32x1024xf32>
    %122 = arith.mulf %121, %120 : vector<32x1024xf32>
    %cst_52 = arith.constant 2.000000e+01 : f32
    %123 = vector.broadcast %cst_52 : f32 to vector<32x1024xf32>
    %124 = arith.minimumf %122, %123 : vector<32x1024xf32>
    %125 = math.exp %124 : vector<32x1024xf32>
    %126 = math.log1p %125 : vector<32x1024xf32>
    %cst_53 = arith.constant 0.00999999977 : f32
    %127 = vector.broadcast %cst_53 : f32 to vector<32x1024xf32>
    %128 = arith.mulf %126, %127 : vector<32x1024xf32>
    %cst_54 = arith.constant 2.000000e+01 : f32
    %129 = vector.broadcast %cst_54 : f32 to vector<32x1024xf32>
    %130 = arith.cmpf ogt, %122, %129 : vector<32x1024xf32>
    %131 = arith.select %130, %120, %128 : vector<32x1024xi1>, vector<32x1024xf32>
    %c0_55 = arith.constant 0 : index
    %c0_56 = arith.constant 0 : index
    %132 = vector.load %arg15[%c0_55, %c0_56] : memref<1x32xf32, #tpu.memory_space<vmem>>, vector<1x32xf32>
    %c0_57 = arith.constant 0 : index
    %c0_58 = arith.constant 0 : index
    %133 = vector.load %arg16[%c0_57, %c0_58] : memref<1x1xf32, #tpu.memory_space<vmem>>, vector<1x1xf32>
    %cst_59 = arith.constant dense<0.000000e+00> : vector<1x1024xf32>
    %134 = tpu.matmul %132, %131, %cst_59 {dimension_numbers = #tpu.dot_dimension_numbers<[1], [0], [0], [1], [0, 0, 1, 1], [], []>} : vector<1x32xf32>, vector<32x1024xf32>, vector<1x1024xf32> -> vector<1x1024xf32>
    %135 = vector.broadcast %133 : vector<1x1xf32> to vector<1x1024xf32>
    %136 = arith.addf %134, %135 : vector<1x1024xf32>
    %cst_60 = arith.constant 1.000000e+02 : f32
    %137 = vector.broadcast %cst_60 : f32 to vector<1x1024xf32>
    %138 = arith.mulf %137, %136 : vector<1x1024xf32>
    %cst_61 = arith.constant 2.000000e+01 : f32
    %139 = vector.broadcast %cst_61 : f32 to vector<1x1024xf32>
    %140 = arith.minimumf %138, %139 : vector<1x1024xf32>
    %141 = math.exp %140 : vector<1x1024xf32>
    %142 = math.log1p %141 : vector<1x1024xf32>
    %cst_62 = arith.constant 0.00999999977 : f32
    %143 = vector.broadcast %cst_62 : f32 to vector<1x1024xf32>
    %144 = arith.mulf %142, %143 : vector<1x1024xf32>
    %cst_63 = arith.constant 2.000000e+01 : f32
    %145 = vector.broadcast %cst_63 : f32 to vector<1x1024xf32>
    %146 = arith.cmpf ogt, %138, %145 : vector<1x1024xf32>
    %147 = arith.select %146, %136, %144 : vector<1x1024xi1>, vector<1x1024xf32>
    %c0_64 = arith.constant 0 : index
    %c0_65 = arith.constant 0 : index
    %148 = vector.load %arg17[%c0_64, %c0_65] : memref<1x1024xf32, #tpu.memory_space<vmem>>, vector<1x1024xf32>
    tpu.vector_store %arg17[%c0_64, %c0_65], %147 {strides = array<i32>} : memref<1x1024xf32, #tpu.memory_space<vmem>>, vector<1x1024xf32>,
    return
  }
  func.func @transform_0(%arg0: i32) -> (i32, i32) {
    %c0_i32 = arith.constant 0 : i32
    %c0_i32_0 = arith.constant 0 : i32
    return %c0_i32, %arg0 : i32, i32
  }
  func.func @transform_1(%arg0: i32) -> (i32, i32) {
    %c0_i32 = arith.constant 0 : i32
    %c0_i32_0 = arith.constant 0 : i32
    %c0_i32_1 = arith.constant 0 : i32
    return %c0_i32, %c0_i32_0 : i32, i32
  }
  func.func @transform_2(%arg0: i32) -> (i32, i32) {
    %c0_i32 = arith.constant 0 : i32
    %c0_i32_0 = arith.constant 0 : i32
    %c0_i32_1 = arith.constant 0 : i32
    return %c0_i32, %c0_i32_0 : i32, i32
  }
  func.func @transform_3(%arg0: i32) -> (i32, i32) {
    %c0_i32 = arith.constant 0 : i32
    %c0_i32_0 = arith.constant 0 : i32
    %c0_i32_1 = arith.constant 0 : i32
    return %c0_i32, %c0_i32_0 : i32, i32
  }
  func.func @transform_4(%arg0: i32) -> (i32, i32) {
    %c0_i32 = arith.constant 0 : i32
    %c0_i32_0 = arith.constant 0 : i32
    %c0_i32_1 = arith.constant 0 : i32
    return %c0_i32, %c0_i32_0 : i32, i32
  }
  func.func @transform_5(%arg0: i32) -> (i32, i32) {
    %c0_i32 = arith.constant 0 : i32
    %c0_i32_0 = arith.constant 0 : i32
    %c0_i32_1 = arith.constant 0 : i32
    return %c0_i32, %c0_i32_0 : i32, i32
  }
  func.func @transform_6(%arg0: i32) -> (i32, i32) {
    %c0_i32 = arith.constant 0 : i32
    %c0_i32_0 = arith.constant 0 : i32
    %c0_i32_1 = arith.constant 0 : i32
    return %c0_i32, %c0_i32_0 : i32, i32
  }
  func.func @transform_7(%arg0: i32) -> (i32, i32) {
    %c0_i32 = arith.constant 0 : i32
    %c0_i32_0 = arith.constant 0 : i32
    %c0_i32_1 = arith.constant 0 : i32
    return %c0_i32, %c0_i32_0 : i32, i32
  }
  func.func @transform_8(%arg0: i32) -> (i32, i32) {
    %c0_i32 = arith.constant 0 : i32
    %c0_i32_0 = arith.constant 0 : i32
    %c0_i32_1 = arith.constant 0 : i32
    return %c0_i32, %c0_i32_0 : i32, i32
  }
  func.func @transform_9(%arg0: i32) -> (i32, i32) {
    %c0_i32 = arith.constant 0 : i32
    %c0_i32_0 = arith.constant 0 : i32
    %c0_i32_1 = arith.constant 0 : i32
    return %c0_i32, %c0_i32_0 : i32, i32
  }
  func.func @transform_10(%arg0: i32) -> (i32, i32) {
    %c0_i32 = arith.constant 0 : i32
    %c0_i32_0 = arith.constant 0 : i32
    %c0_i32_1 = arith.constant 0 : i32
    return %c0_i32, %c0_i32_0 : i32, i32
  }
  func.func @transform_11(%arg0: i32) -> (i32, i32) {
    %c0_i32 = arith.constant 0 : i32
    %c0_i32_0 = arith.constant 0 : i32
    %c0_i32_1 = arith.constant 0 : i32
    return %c0_i32, %c0_i32_0 : i32, i32
  }
  func.func @transform_12(%arg0: i32) -> (i32, i32) {
    %c0_i32 = arith.constant 0 : i32
    %c0_i32_0 = arith.constant 0 : i32
    %c0_i32_1 = arith.constant 0 : i32
    return %c0_i32, %c0_i32_0 : i32, i32
  }
  func.func @transform_13(%arg0: i32) -> (i32, i32) {
    %c0_i32 = arith.constant 0 : i32
    %c0_i32_0 = arith.constant 0 : i32
    %c0_i32_1 = arith.constant 0 : i32
    return %c0_i32, %c0_i32_0 : i32, i32
  }
  func.func @transform_14(%arg0: i32) -> (i32, i32) {
    %c0_i32 = arith.constant 0 : i32
    %c0_i32_0 = arith.constant 0 : i32
    %c0_i32_1 = arith.constant 0 : i32
    return %c0_i32, %c0_i32_0 : i32, i32
  }
  func.func @transform_15(%arg0: i32) -> (i32, i32) {
    %c0_i32 = arith.constant 0 : i32
    %c0_i32_0 = arith.constant 0 : i32
    %c0_i32_1 = arith.constant 0 : i32
    return %c0_i32, %c0_i32_0 : i32, i32
  }
  func.func @transform_16(%arg0: i32) -> (i32, i32) {
    %c0_i32 = arith.constant 0 : i32
    %c0_i32_0 = arith.constant 0 : i32
    return %c0_i32, %arg0 : i32, i32
  }
}

</mosaic_0001>

<bundles_post_ra>
// kernel: tpu_custom_call.1
= control target key start
LH: loop header
LB: loop body
LE: loop exit
PB: predicated region body
PF: predicated region fallthrough
CT: control target
= control target key end

     0   :  { %s11980_s0 = inlined_call_operand.vmem [shape: f32[3,2048], index: 0, kind: input, shape index: {}]   ;;  %s11981_s1 = inlined_call_operand.vmem [shape: f32[32,3], index: 1, kind: input, shape index: {}]   ;;  %s11982_s2 = inlined_call_operand.vmem [shape: f32[32,1], index: 2, kind: input, shape index: {}]   ;;  %s11983_s3 = inlined_call_operand.vmem [shape: f32[32,32], index: 3, kind: input, shape index: {}]   ;;  %s11984_s4 = inlined_call_operand.vmem [shape: f32[32,1], index: 4, kind: input, shape index: {}]   ;;  %s11985_s5 = inlined_call_operand.vmem [shape: f32[32,32], index: 5, kind: input, shape index: {}]   ;;  %s11986_s6 = inlined_call_operand.vmem [shape: f32[32,1], index: 6, kind: input, shape index: {}]   ;;  %s11987_s7 = inlined_call_operand.vmem [shape: f32[29,32], index: 7, kind: input, shape index: {}]   ;;  %s11988_s8 = inlined_call_operand.vmem [shape: f32[29,1], index: 8, kind: input, shape index: {}]   ;;  %s11989_s9 = inlined_call_operand.vmem [shape: f32[32,29], index: 9, kind: input, shape index: {}]   ;;  %s11990_s10 = inlined_call_operand.vmem [shape: f32[32,3], index: 10, kind: input, shape index: {}]   ;;  %s11991_s11 = inlined_call_operand.vmem [shape: f32[32,1], index: 11, kind: input, shape index: {}]   ;;  %s11992_s12 = inlined_call_operand.vmem [shape: f32[32,32], index: 12, kind: input, shape index: {}]   ;;  %s11993_s13 = inlined_call_operand.vmem [shape: f32[32,1], index: 13, kind: input, shape index: {}]   ;;  %s11994_s14 = inlined_call_operand.vmem [shape: f32[1,32], index: 14, kind: input, shape index: {}]   ;;  %s11995_s15 = inlined_call_operand.<no memory space> [shape: f32[1,1], index: 15, kind: input, shape index: {}]   ;;  %s11996_s16 = inlined_call_operand.hbm [shape: f32[1,2048], index: 16, kind: output, shape index: {}]  }
   0x1   :  { %12285 = sst [smem:[#allocation65_spill]] %s11980_s0  ;;  %v21_v0 = vstv %s11995_s15 }
   0x2   :  { %12286 = sst [smem:[#allocation66_spill]] %s11981_s1  ;;  %22 = vst [vmem:[#allocation2] sm:$0x1] %v21_v0 }
   0x3   :  { %12287 = sst [smem:[#allocation67_spill]] %s11982_s2 }
   0x4   :  { %12288 = sst [smem:[#allocation68_spill]] %s11983_s3 }
   0x5   :  { %12289 = sst [smem:[#allocation69_spill]] %s11984_s4 }
   0x6   :  { %23 = vsyncpa [#allocation4], 0 }
   0x7   :  { %25 = vsyncpa [#allocation4 + $0x1], 0  ;;  %s7191_s23 = smov 0   ;;  %s7193_s24 = smov 0  }
   0x8   :  { %s7195_s25 = smov 0   ;;  %s7197_s26 = smov 0  }
   0x9 LB: > { %s11997_s15 = sadd.s32 4294967295, %s7098_s26   ;;  %s5989_s27 = sadd.s32 4294967294, %s7098_s26   ;;  %s7098_s26 = sphi %s7197_s26, %s12908_s26   ;;  %s7094_s25 = sphi %s7195_s25, %s12907_s25   ;;  %s7090_s24 = sphi %s7193_s24, %s12906_s24   ;;  %s7086_s23 = sphi %s7191_s23, %s12905_s23  }
   0xa   : > { %s7214_s28 = sadd.s32 1, %s7098_s26   ;;  %s379_s29 = sadd.s32 1, %s7094_s25 }
   0xb   : > { %s376_s30 = ssub.s32 %s7098_s26, %s7214_s28  ;;  %p389_p0 = scmp.ne.s32.totalorder %s7094_s25, %s7090_s24 }
   0xc   : > { %p377_p1 = scmp.eq.s32.totalorder %s376_s30, 0  ;;  %p390_p2 = scmp.eq.s32.totalorder %s11997_s15, 1 }
   0xd   : > { %p395_p3 = scmp.ne.s32.totalorder %s7090_s24, %s7086_s23  ;;  %p396_p4 = scmp.eq.s32.totalorder %s5989_s27, 1 }
   0xe   : > { %s7226_s0 = scalar_select %p377_p1, %s7094_s25, %s379_s29  }
   0xf   : > { %p7228_p5 = por %p390_p2, %p389_p0  ;;  %p7232_p6 = por %p396_p4, %p395_p3 }
  0x10   : > { %p5992_p7 = scmp.ge.s32.totalorder %s7098_s26, 1  ;;  %p468_p8 = scmp.lt.s32.totalorder %s7098_s26, 3 }
  0x12   : > { %p469_p9 = pnand %p5992_p7, %p468_p8 }
  0x14   : > { %472 = sbr.rel (%p469_p9) target bundleno = 1713 (0x6b1), region = 84 }
  0x19   : > { %s12292_s1 = sld [smem:[#allocation66_spill]]  ;;  %v11999_v3 = vmov 2   ;;  %v7101_v4 = vmov 1   ;;  %v11998_v5 = vmov 0   ;;  %v2179_v14 = vld [vmem:[%s11986_s6 + $0x8] sm:$0xff]  ;;  %v2964_v17 = vld [vmem:[%s11988_s8 + $0x10] sm:$0xff] }
  0x1a   : > { %6222 = vset.pattern.permute.xlu2 %v11999_v3  ;;  %6218 = vset.pattern.permute.xlu0 %v7101_v4  ;;  %s12293_s2 = sld [smem:[#allocation67_spill]]  ;;  %v2181_v18 = vld [vmem:[%s11986_s6 + $0x18] sm:$0xff]  ;;  %v2180_v19 = vld [vmem:[%s11986_s6 + $0x10] sm:$0xff]  ;;  %v2178_v20 = vld [vmem:[%s11986_s6] sm:$0xff]  ;;  %s12296_s21 = sadd.s32 4294967295, %s7098_s26  }
  0x1b   : > { %6220 = vset.pattern.permute.xlu1 %v11998_v5  ;;  %s12294_s4 = sld [smem:[#allocation69_spill]]  ;;  %v3748_v21 = vld [vmem:[%s11990_s10 + $0x10] sm:$0xff]  ;;  %v2965_v22 = vld [vmem:[%s11988_s8 + $0x18] sm:$0x1f]  ;;  %v2963_v23 = vld [vmem:[%s11988_s8 + $0x8] sm:$0xff]  ;;  %s515_s29 = sand.u32 1, %s7090_s24  }
  0x1c   : > { %v2962_v24 = vld [vmem:[%s11988_s8] sm:$0xff]  ;;  %v3749_v25 = vld [vmem:[%s11990_s10 + $0x18] sm:$0xff]  ;;  %v3747_v26 = vld [vmem:[%s11990_s10 + $0x8] sm:$0xff]  ;;  %s12369_s3 = sld [smem:[#allocation68_spill]] }
  0x1f   : > { %v532_v1 = vld [vmem:[%s12292_s1 + $0x18] sm:$0xff]  ;;  %v531_v2 = vld [vmem:[%s12292_s1 + $0x10] sm:$0xff]  ;;  %v530_v6 = vld [vmem:[%s12292_s1 + $0x8] sm:$0xff] }
  0x20   : > { %734 = vperm.xlu2 %6222, %v532_v1   ;;  %630 = vperm.xlu0 %6218, %v532_v1   ;;  %v529_v7 = vld [vmem:[%s12292_s1] sm:$0xff]  ;;  %v535_v8 = vld [vmem:[%s12293_s2 + $0x10] sm:$0xff]  ;;  %v536_v10 = vld [vmem:[%s12293_s2 + $0x18] sm:$0xff]  ;;  %s12300_s1 = sld [smem:[#allocation65_spill]] }
  0x21   : > { %549 = vperm.xlu1 %6220, %v531_v2   ;;  %v1396_v9 = vld [vmem:[%s12294_s4 + $0x18] sm:$0xff]  ;;  %v1393_v11 = vld [vmem:[%s12294_s4] sm:$0xff]  ;;  %v534_v12 = vld [vmem:[%s12293_s2 + $0x8] sm:$0xff] }
  0x22   : > { %v533_v13 = vld [vmem:[%s12293_s2] sm:$0xff]  ;;  %v1395_v15 = vld [vmem:[%s12294_s4 + $0x10] sm:$0xff]  ;;  %v1394_v16 = vld [vmem:[%s12294_s4 + $0x8] sm:$0xff]  ;;  %s7326_s2 = sshll.u32 %s12296_s21, 3 }
  0x23   : > { %p519_p10 = scmp.lt.s32.totalorder %s7326_s2, 15  ;;  %s5925_s20 = scalar_lea.hbm %s11996_s16, %s7326_s2 }
  0x25   : > { %s520_s22 = scalar_select %p519_p10, %s7326_s2, 15 }
  0x26   : > { %s5915_s2 = scalar_lea.sflag [#allocation4], %s515_s29 }
  0x27   : > { %s5995_s27 = sshll.u32 %s520_s22, 2 }
  0x28   : > { %6223 = vset.pattern.permute.xlu2 %v11998_v5  ;;  %6219 = vset.pattern.permute.xlu0 %v11998_v5  ;;  %s7339_s30 = scalar_lea.vmem %s12300_s1, %s5995_s27  ;;  %s11934_s1 = sshll.u32 %s515_s29, 3 }
  0x29   : > { %6221 = vset.pattern.permute.xlu1 %v7101_v4  ;;  %554 = vperm.xlu0 %6219, %v532_v1   ;;  %v525_v31 = vld [vmem:[%s7339_s30] sm:$0x77]  ;;  %v526_v33 = vld [vmem:[%s7339_s30 + $0x8] sm:$0x77]  ;;  %s517_s21 = scalar_lea.vmem [#allocation3], %s11934_s1  ;;  %s5929_s27 = sshll.u32 %s5925_s20, 4  ;;  %s5930_s27 = int_to_ptr.hbm [resolvable:$true] %s5929_s27 }
  0x2a   : > { %626 = vperm.xlu1 %6221, %v531_v2   ;;  %544 = vperm.xlu2 %6223, %v530_v6   ;;  %v737_v34 = vperm.slane %v525_v31, 2  ;;  %v738_v35 = vperm.slane %v525_v31, 6  ;;  %v739_v36 = vperm.slane %v526_v33, 2  ;;  %v740_v37 = vperm.slane %v526_v33, 6  ;;  %s5927_s22 = sshll.u32 %s517_s21, 4  ;;  %s7050_s15 = sshra.s32 %s5930_s27, 4  ;;  %s5928_s22 = int_to_ptr.vmem [resolvable:$true] %s5927_s22  ;;  %s7051_s15 = int_to_ptr.hbm [resolvable:$true] %s7050_s15 }
  0x2b   : > { %v633_v38 = vperm.slane %v525_v31, 1  ;;  %v634_v39 = vperm.slane %v525_v31, 5  ;;  %v635_v40 = vperm.slane %v526_v33, 1  ;;  %v636_v41 = vperm.slane %v526_v33, 5  ;;  %s7052_s1 = scalar_lea.hbm %s7051_s15, 8  ;;  %s7056_s20 = scalar_lea.hbm %s11996_s16, 16 }
  0x2c   : > { %v561_v44 = vperm.slane %v525_v31, 0  ;;  %v562_v45 = vperm.slane %v525_v31, 4  ;;  %v7350_v46 = vperm.slane %v737_v34, 2  ;;  %v7352_v47 = vperm.slane %v738_v35, 2  ;;  %p7053_p11 = scmp.ne.s32.totalorder %s7051_s15, %s7052_s1  ;;  %p7057_p0 = scmp.lt.s32.totalorder %s7051_s15, %s11996_s16 }
  0x2d   : > { %v563_v48 = vperm.slane %v526_v33, 0  ;;  %v564_v49 = vperm.slane %v526_v33, 4  ;;  %v7354_v50 = vperm.slane %v739_v36, 2  ;;  %v7356_v51 = vperm.slane %v740_v37, 2  ;;  %p7058_p1 = scmp.lt.s32.totalorder %s7056_s20, %s7052_s1 }
  0x2e   : > { %12304 = vst [vmem:[#allocation13_spill] sm:$0xff] %v7350_v46  ;;  %v7358_v52 = vperm.slane %v633_v38, 1  ;;  %v7360_v53 = vperm.slane %v634_v39, 1  ;;  %v7362_v54 = vperm.slane %v635_v40, 1  ;;  %v7364_v55 = vperm.slane %v636_v41, 1  ;;  %p7054_p12 = pnand %p7053_p11, %p7228_p5 }
  0x2f   : > { %12305 = vst [vmem:[#allocation14_spill] sm:$0xff] %v7352_v47  ;;  %v7366_v56 = vperm.slane %v561_v44, 0  ;;  %v7368_v57 = vperm.slane %v562_v45, 0  ;;  %v7376_v61 = vperm.slane %v563_v48, 0  ;;  %v7378_v62 = vperm.slane %v564_v49, 0  ;;  %p7059_p2 = por %p7058_p1, %p7057_p0 }
  0x30   : > { %12306 = vst [vmem:[#allocation15_spill] sm:$0xff] %v7354_v50  ;;  %p7055_p13 = pneg %p7054_p12 }
  0x31   : > { %539 = vperm.xlu0 %6219, %v529_v7   ;;  %12307 = vst [vmem:[#allocation16_spill] sm:$0xff] %v7356_v51 }
  0x32   : > { %622 = vperm.xlu1 %6221, %v530_v6   ;;  %6224 = vset.pattern.permute.xlu2 %v11999_v3  ;;  %12308 = vst [vmem:[#allocation17_spill] sm:$0xff] %v7358_v52  ;;  %p7060_p3 = pnand %p7059_p2, %p7055_p13 }
  0x33   : > { %730 = vperm.xlu2 %6224, %v531_v2   ;;  %12309 = vst [vmem:[#allocation18_spill] sm:$0xff] %v7360_v53 }
  0x34   : > { %12310 = vst [vmem:[#allocation19_spill] sm:$0xff] %v7362_v54 }
  0x35   : > { %12311 = vst [vmem:[#allocation20_spill] sm:$0xff] %v7364_v55 }
  0x36   : > { %12312 = vst [vmem:[#allocation21_spill] sm:$0xff] %v7366_v56 }
  0x37   : > { %12313 = vst [vmem:[#allocation22_spill] sm:$0xff] %v7368_v57 }
  0x38   : > { %12315 = vst [vmem:[#allocation24_spill] sm:$0xff] %v7376_v61 }
  0x39   : > { %837 = vperm.xlu0 %6219, %v535_v8   ;;  %12316 = vst [vmem:[#allocation25_spill] sm:$0xff] %v7378_v62 }
  0x3a   : > { %618 = vperm.xlu1 %6221, %v529_v7  }
  0x3b   : > { %726 = vperm.xlu2 %6224, %v530_v6  }
  0x41   : > { %1414 = vperm.xlu0 %6219, %v1396_v9  }
  0x42   : > { %6225 = vset.pattern.permute.xlu1 %v11998_v5 }
  0x43   : > { %842 = vperm.xlu1 %6225, %v536_v10   ;;  %722 = vperm.xlu2 %6224, %v529_v7  }
  0x49   : > { %1399 = vperm.xlu0 %6219, %v1393_v11  }
  0x4b   : > { %832 = vperm.xlu1 %6225, %v534_v12   ;;  %6226 = vset.pattern.permute.xlu2 %v11998_v5 }
  0x4c   : > { %827 = vperm.xlu2 %6226, %v533_v13  }
  0x51   : > { %2189 = vperm.xlu0 %6219, %v2179_v14  }
  0x53   : > { %1409 = vperm.xlu1 %6225, %v1395_v15  }
  0x54   : > { %1404 = vperm.xlu2 %6226, %v1394_v16  }
  0x59   : > { %2978 = vperm.xlu0 %6219, %v2964_v17  }
  0x5b   : > { %2199 = vperm.xlu1 %6225, %v2181_v18  }
  0x5c   : > { %2194 = vperm.xlu2 %6226, %v2180_v19  }
  0x61   : > { %6228 = vset.pattern.permute.xlu0 %v7101_v4 }
  0x62   : > { %3815 = vperm.xlu0 %6228, %v3748_v21  }
  0x63   : > { %2184 = vperm.xlu1 %6225, %v2178_v20  }
  0x64   : > { %2983 = vperm.xlu2 %6226, %v2965_v22  }
  0x6a   : > { %6229 = vset.pattern.permute.xlu0 %v11998_v5 }
  0x6b   : > { %2973 = vperm.xlu1 %6225, %v2963_v23   ;;  %3771 = vperm.xlu0 %6229, %v3749_v25  }
  0x6c   : > { %2968 = vperm.xlu2 %6226, %v2962_v24  }
  0x73   : > { %6227 = vset.pattern.permute.xlu1 %v7101_v4 }
  0x74   : > { %3819 = vperm.xlu1 %6227, %v3749_v25   ;;  %3766 = vperm.xlu2 %6226, %v3748_v21  }
  0x7a   : > { %v7320_v27 = vpop.permute.xlu2 %734 }
  0x7b   : > { %12295 = vst [vmem:[#allocation6_spill] sm:$0xff] %v7320_v27  ;;  %v785_v59 = vmul.f32 %v7350_v46, %v7320_v27  ;;  %v786_v60 = vmul.f32 %v7352_v47, %v7320_v27  ;;  %v7382_v63 = vmul.f32 %v7354_v50, %v7320_v27  ;;  %v7386_v0 = vmul.f32 %v7356_v51, %v7320_v27 }
  0x7c   : > { %6230 = vset.pattern.permute.xlu1 %v11999_v3  ;;  %3761 = vperm.xlu2 %6226, %v3747_v26  }
  0x7d   : > { %3899 = vperm.xlu1 %6230, %v3749_v25  }
  0x84   : > { %6232 = vset.pattern.permute.xlu2 %v11999_v3  ;;  %v7330_v28 = vpop.permute.xlu2 %544 }
  0x85   : > { %6231 = vset.pattern.permute.xlu1 %v7101_v4  ;;  %3895 = vperm.xlu2 %6232, %v3748_v21   ;;  %12297 = vst [vmem:[#allocation7_spill] sm:$0xff] %v7330_v28  ;;  %v593_v35 = vmul.f32 %v7366_v56, %v7330_v28  ;;  %v594_v37 = vmul.f32 %v7368_v57, %v7330_v28 }
  0x86   : > { %3811 = vperm.xlu1 %6231, %v3747_v26   ;;  %v595_v38 = vmul.f32 %v7376_v61, %v7330_v28  ;;  %v596_v39 = vmul.f32 %v7378_v62, %v7330_v28 }
  0x8d   : > { %3891 = vperm.xlu2 %6232, %v3747_v26   ;;  %v7343_v32 = vpop.permute.xlu2 %730 }
  0x8e   : > { %12301 = vst [vmem:[#allocation10_spill] sm:$0xff] %v7343_v32  ;;  %v777_v1 = vmul.f32 %v7350_v46, %v7343_v32  ;;  %v778_v2 = vmul.f32 %v7352_v47, %v7343_v32  ;;  %v779_v13 = vmul.f32 %v7354_v50, %v7343_v32  ;;  %v780_v14 = vmul.f32 %v7356_v51, %v7343_v32 }
  0x92   : > { %v7334_v30 = vpop.permute.xlu0 %630 }
  0x93   : > { %v7332_v29 = vpop.permute.xlu1 %549  ;;  %12299 = vst [vmem:[#allocation9_spill] sm:$0xff] %v7334_v30  ;;  %v681_v12 = vmul.f32 %v7358_v52, %v7334_v30  ;;  %v682_v20 = vmul.f32 %v7360_v53, %v7334_v30  ;;  %v683_v22 = vmul.f32 %v7362_v54, %v7334_v30  ;;  %v684_v34 = vmul.f32 %v7364_v55, %v7334_v30 }
  0x94   : > { %12298 = vst [vmem:[#allocation8_spill] sm:$0xff] %v7332_v29  ;;  %v601_v15 = vmul.f32 %v7366_v56, %v7332_v29  ;;  %v602_v16 = vmul.f32 %v7368_v57, %v7332_v29  ;;  %v603_v17 = vmul.f32 %v7376_v61, %v7332_v29  ;;  %v604_v18 = vmul.f32 %v7378_v62, %v7332_v29 }
  0x95   : > { %6234 = vset.pattern.permute.xlu2 %v11998_v5  ;;  %v7370_v58 = vpop.permute.xlu2 %726 }
  0x96   : > { %12314 = vst [vmem:[#allocation23_spill] sm:$0xff] %v7370_v58  ;;  %v769_v36 = vmul.f32 %v7350_v46, %v7370_v58  ;;  %v770_v44 = vmul.f32 %v7352_v47, %v7370_v58  ;;  %v7446_v45 = vmul.f32 %v7354_v50, %v7370_v58 }
  0x9b   : > { %v7346_v42 = vpop.permute.xlu0 %554 }
  0x9c   : > { %12302 = vst [vmem:[#allocation11_spill] sm:$0xff] %v7346_v42  ;;  %v7348_v43 = vpop.permute.xlu1 %626  ;;  %v609_v11 = vmul.f32 %v7366_v56, %v7346_v42  ;;  %v610_v19 = vmul.f32 %v7368_v57, %v7346_v42  ;;  %v611_v21 = vmul.f32 %v7376_v61, %v7346_v42  ;;  %v612_v33 = vmul.f32 %v7378_v62, %v7346_v42 }
  0x9d   : > { %12303 = vst [vmem:[#allocation12_spill] sm:$0xff] %v7348_v43  ;;  %v673_v4 = vmul.f32 %v7358_v52, %v7348_v43  ;;  %v674_v6 = vmul.f32 %v7360_v53, %v7348_v43  ;;  %v675_v7 = vmul.f32 %v7362_v54, %v7348_v43  ;;  %v676_v8 = vmul.f32 %v7364_v55, %v7348_v43  ;;  %v7448_v48 = vpop.permute.xlu2 %722 }
  0x9e   : > { %v713_v31 = vadd.f32 %v681_v12, %v609_v11  ;;  %v714_v40 = vadd.f32 %v682_v20, %v610_v19  ;;  %v715_v41 = vadd.f32 %v683_v22, %v611_v21  ;;  %12318 = vst [vmem:[#allocation27_spill] sm:$0xff] %v7448_v48  ;;  %v762_v5 = vmul.f32 %v7352_v47, %v7448_v48 }
  0x9f   : > { %v705_v23 = vadd.f32 %v673_v4, %v601_v15  ;;  %v706_v24 = vadd.f32 %v674_v6, %v602_v16  ;;  %v707_v25 = vadd.f32 %v675_v7, %v603_v17  ;;  %v708_v26 = vadd.f32 %v676_v8, %v604_v18 }
  0xa0   : > { %v817_v12 = vadd.f32 %v785_v59, %v713_v31  ;;  %v716_v15 = vadd.f32 %v684_v34, %v612_v33  ;;  %v818_v59 = vadd.f32 %v786_v60, %v714_v40  ;;  %v761_v31 = vmul.f32 %v7350_v46, %v7448_v48 }
  0xa1   : > { %v809_v49 = vadd.f32 %v777_v1, %v705_v23  ;;  %v810_v4 = vadd.f32 %v778_v2, %v706_v24  ;;  %v811_v6 = vadd.f32 %v779_v13, %v707_v25  ;;  %v812_v7 = vadd.f32 %v780_v14, %v708_v26 }
  0xa3   : > { %v7402_v10 = vpop.permute.xlu0 %539 }
  0xa4   : > { %v7400_v9 = vpop.permute.xlu1 %622  ;;  %v585_v16 = vmul.f32 %v7366_v56, %v7402_v10  ;;  %v586_v17 = vmul.f32 %v7368_v57, %v7402_v10  ;;  %v820_v57 = vadd.f32 %v7386_v0, %v716_v15 }
  0xa5   : > { %12317 = vst [vmem:[#allocation26_spill] sm:$0xff] %v7400_v9  ;;  %v665_v14 = vmul.f32 %v7358_v52, %v7400_v9  ;;  %v666_v60 = vmul.f32 %v7360_v53, %v7400_v9  ;;  %v667_v24 = vmul.f32 %v7362_v54, %v7400_v9  ;;  %v668_v25 = vmul.f32 %v7364_v55, %v7400_v9 }
  0xa7   : > { %v698_v3 = vadd.f32 %v666_v60, %v594_v37  ;;  %v699_v56 = vadd.f32 %v667_v24, %v595_v38 }
  0xa9   : > { %v802_v60 = vadd.f32 %v770_v44, %v698_v3  ;;  %v803_v3 = vadd.f32 %v7446_v45, %v699_v56 }
  0xab   : > { %v7452_v11 = vpop.permute.xlu0 %837 }
  0xac   : > { %v7450_v8 = vpop.permute.xlu1 %618  ;;  %12320 = vst [vmem:[#allocation29_spill] sm:$0xff] %v7452_v11  ;;  %v7459_v18 = vadd.f32 %v7452_v11, %v809_v49  ;;  %v7462_v1 = vadd.f32 %v7452_v11, %v810_v4  ;;  %v7465_v2 = vadd.f32 %v7452_v11, %v811_v6  ;;  %v7468_v13 = vadd.f32 %v7452_v11, %v812_v7 }
  0xad   : > { %12319 = vst [vmem:[#allocation28_spill] sm:$0xff] %v7450_v8  ;;  %v657_v19 = vmul.f32 %v7358_v52, %v7450_v8  ;;  %v658_v20 = vmul.f32 %v7360_v53, %v7450_v8  ;;  %v819_v4 = vadd.f32 %v7382_v63, %v715_v41  ;;  %v697_v7 = vadd.f32 %v665_v14, %v593_v35  ;;  %v7508_v14 = vpop.permute.xlu2 %827 }
  0xae   : > { %v7477_v21 = vmul.f32 100.0, %v7459_v18  ;;  %v7480_v22 = vmul.f32 100.0, %v7462_v1  ;;  %v7483_v23 = vmul.f32 100.0, %v7465_v2  ;;  %v7496_v40 = vmul.f32 100.0, %v7468_v13  ;;  %12322 = vst [vmem:[#allocation31_spill] sm:$0xff] %v7508_v14 }
  0xaf   : > { %v689_v26 = vadd.f32 %v657_v19, %v585_v16  ;;  %v690_v49 = vadd.f32 %v658_v20, %v586_v17  ;;  %v700_v53 = vadd.f32 %v668_v25, %v596_v39  ;;  %v772_v17 = vmul.f32 %v7356_v51, %v7370_v58 }
  0xb0   : > { %v925_v33 = vmin.f32 %v7477_v21, 20.0  ;;  %v926_v34 = vmin.f32 %v7480_v22, 20.0  ;;  %v927_v6 = vmin.f32 %v7483_v23, 20.0  ;;  %v928_v35 = vmin.f32 %v7496_v40, 20.0 }
  0xb1   : > { %v793_v46 = vadd.f32 %v761_v31, %v689_v26  ;;  %v794_v41 = vadd.f32 %v762_v5, %v690_v49  ;;  %v801_v15 = vadd.f32 %v769_v36, %v697_v7  ;;  %v7526_v5 = vld [vmem:[%s7339_s30 + $0x10] sm:$0x77]  ;;  %v7546_v31 = vadd.f32 %v772_v17, %v700_v53 }
  0xb2   : > { %v973_v16 = vmul.f32 1.442695, %v925_v33  ;;  %v975_v19 = vmul.f32 1.442695, %v926_v34  ;;  %v977_v63 = vmul.f32 1.442695, %v927_v6  ;;  %v587_v6 = vmul.f32 %v7376_v61, %v7402_v10 }
  0xb3   : > { %v7523_v24 = vadd.f32 %v7508_v14, %v793_v46  ;;  %12324 = vst [vmem:[#allocation33_spill] sm:$0xff] %v7526_v5  ;;  %v979_v36 = vmul.f32 1.442695, %v928_v35  ;;  %v7542_v46 = vadd.f32 %v7508_v14, %v794_v41  ;;  %v659_v56 = vmul.f32 %v7362_v54, %v7450_v8 }
  0xb4   : > { %6236 = vpow2.f32 %v973_v16  ;;  %vm1341_vm4 = vcmp.gt.f32.partialorder %v7477_v21, 20.0  ;;  %vm1342_vm8 = vcmp.gt.f32.partialorder %v7480_v22, 20.0  ;;  %vm1343_vm12 = vcmp.gt.f32.partialorder %v7483_v23, 20.0 }
  0xb5   : > { %v7505_v20 = vpop.permute.xlu1 %842  ;;  %6238 = vpow2.f32 %v975_v19  ;;  %12323 = vst [vmem:[#allocation32_spill] sm:$0xff] %v7523_v24  ;;  %v7556_v19 = vmul.f32 100.0, %v7523_v24  ;;  %v7561_v41 = vmul.f32 100.0, %v7542_v46  ;;  %vm1344_vm15 = vcmp.gt.f32.partialorder %v7496_v40, 20.0 }
  0xb6   : > { %12321 = vst [vmem:[#allocation30_spill] sm:$0xff] %v7505_v20  ;;  %v7511_v37 = vadd.f32 %v7505_v20, %v817_v12  ;;  %v7514_v0 = vadd.f32 %v7505_v20, %v818_v59  ;;  %v7517_v38 = vadd.f32 %v7505_v20, %v819_v4  ;;  %v7520_v39 = vadd.f32 %v7505_v20, %v820_v57 }
  0xb7   : > { %6240 = vpow2.f32 %v977_v63  ;;  %12325 = vst [vmem:[#allocation34_spill] sm:$0xff] %v7542_v46  ;;  %v588_v40 = vmul.f32 %v7378_v62, %v7402_v10 }
  0xb8   : > { %v7529_v12 = vmul.f32 100.0, %v7511_v37  ;;  %v7532_v59 = vmul.f32 100.0, %v7514_v0  ;;  %v7535_v25 = vmul.f32 100.0, %v7517_v38  ;;  %v7538_v57 = vmul.f32 100.0, %v7520_v39 }
  0xb9   : > { %6242 = vpow2.f32 %v979_v36 }
  0xba   : > { %v933_v44 = vmin.f32 %v7529_v12, 20.0  ;;  %v934_v26 = vmin.f32 %v7532_v59, 20.0  ;;  %v6237_v34 = vpop.eup %6236  ;;  %v935_v49 = vmin.f32 %v7535_v25, 20.0  ;;  %v936_v4 = vmin.f32 %v7538_v57, 20.0 }
  0xbb   : > { %v1152_v16 = vmul.f32 -0.5, %v6237_v34  ;;  %v6239_v53 = vpop.eup %6238  ;;  %v1149_v33 = vadd.f32 1.0, %v6237_v34  ;;  %vm1349_vm5 = vcmp.gt.f32.partialorder %v7529_v12, 20.0  ;;  %vm1350_vm7 = vcmp.gt.f32.partialorder %v7532_v59, 20.0 }
  0xbc   : > { %v989_v45 = vmul.f32 1.442695, %v933_v44  ;;  %v991_v7 = vmul.f32 1.442695, %v934_v26  ;;  %v993_v63 = vmul.f32 1.442695, %v935_v49 }
  0xbd   : > { %v7558_v17 = vpop.permute.xlu1 %832  ;;  %v995_v35 = vmul.f32 1.442695, %v936_v4  ;;  %v1153_v61 = vadd.f32 1.0, %v1152_v16  ;;  %v1161_v47 = vmul.f32 -0.5, %v6239_v53  ;;  %v6241_v54 = vpop.eup %6240  ;;  %v1155_v44 = vand.u32 2147483647, %v6237_v34 }
  0xbe   : > { %6244 = vpow2.f32 %v989_v45  ;;  %v1158_v26 = vadd.f32 1.0, %v6239_v53  ;;  %v7564_v52 = vadd.f32 %v7558_v17, %v801_v15  ;;  %v1164_v9 = vand.u32 2147483647, %v6239_v53 }
  0xbf   : > { %6246 = vpow2.f32 %v991_v7  ;;  %v1162_v58 = vadd.f32 1.0, %v1161_v47  ;;  %v1167_v49 = vadd.f32 1.0, %v6241_v54  ;;  %v1170_v36 = vmul.f32 -0.5, %v6241_v54  ;;  %v7576_v28 = vpop.eup %6242 }
  0xc0   : > { %12326 = vst [vmem:[#allocation35_spill] sm:$0xff] %v7564_v52  ;;  %6248 = vpow2.f32 %v993_v63  ;;  %v7566_v4 = vadd.f32 %v659_v56, %v587_v6  ;;  %v7570_v45 = vmul.f32 %v7354_v50, %v7448_v48  ;;  %v7572_v16 = vmul.f32 %v6237_v34, %v1153_v61 }
  0xc1   : > { %6250 = vpow2.f32 %v995_v35  ;;  %v7578_v47 = vmul.f32 %v6239_v53, %v1162_v58  ;;  %v1173_v63 = vand.u32 2147483647, %v6241_v54  ;;  %v7581_v6 = vmul.f32 100.0, %v7564_v52 }
  0xc2   : > { %6252 = vlog2.f32 %v1149_v33  ;;  %vm7583_vm0 = vcmp.lt.f32.partialorder %v1155_v44, 0.0004427343  ;;  %vm7587_vm1 = vcmp.lt.f32.partialorder %v1164_v9, 0.0004427343  ;;  %v1171_v33 = vadd.f32 1.0, %v1170_v36 }
  0xc3   : > { %6254 = vlog2.f32 %v1158_v26  ;;  %v1176_v34 = vadd.f32 1.0, %v7576_v28  ;;  %v7593_v58 = vadd.f32 %v7558_v17, %v802_v60  ;;  %v7596_v44 = vadd.f32 %v7558_v17, %v803_v3 }
  0xc4   : > { %v6245_v56 = vpop.eup %6244  ;;  %6256 = vlog2.f32 %v1167_v49  ;;  %vm7598_vm2 = vcmp.lt.f32.partialorder %v1173_v63, 0.0004427343  ;;  %v1179_v60 = vmul.f32 -0.5, %v7576_v28  ;;  %v1182_v29 = vand.u32 2147483647, %v7576_v28 }
  0xc5   : > { %v6247_v53 = vpop.eup %6246  ;;  %v1221_v26 = vadd.f32 1.0, %v6245_v56  ;;  %v1224_v15 = vmul.f32 -0.5, %v6245_v56  ;;  %v1227_v7 = vand.u32 2147483647, %v6245_v56  ;;  %6258 = vlog2.f32 %v1176_v34 }
  0xc6   : > { %v6249_v50 = vpop.eup %6248  ;;  %v1230_v11 = vadd.f32 1.0, %v6247_v53  ;;  %v1233_v9 = vmul.f32 -0.5, %v6247_v53  ;;  %v1236_v32 = vand.u32 2147483647, %v6247_v53  ;;  %v1172_v63 = vmul.f32 %v6241_v54, %v1171_v33 }
  0xc7   : > { %v6251_v43 = vpop.eup %6250  ;;  %6260 = vlog2.f32 %v1221_v26  ;;  %v1239_v49 = vadd.f32 1.0, %v6249_v50  ;;  %v1225_v46 = vadd.f32 1.0, %v1224_v15  ;;  %v1242_v27 = vmul.f32 -0.5, %v6249_v50 }
  0xc8   : > { %v6253_v20 = vpop.eup %6252  ;;  %6262 = vlog2.f32 %v1230_v11  ;;  %v1234_v3 = vadd.f32 1.0, %v1233_v9  ;;  %vm7604_vm3 = vcmp.lt.f32.partialorder %v1227_v7, 0.0004427343  ;;  %v1248_v34 = vadd.f32 1.0, %v6251_v43 }
  0xc9   : > { %v6255_v30 = vpop.eup %6254  ;;  %6264 = vlog2.f32 %v1239_v49  ;;  %vm7610_vm6 = vcmp.lt.f32.partialorder %v1236_v32, 0.0004427343  ;;  %v1243_v11 = vadd.f32 1.0, %v1242_v27  ;;  %v1245_v15 = vand.u32 2147483647, %v6249_v50 }
  0xca   : > { %v6257_v26 = vpop.eup %6256  ;;  %v1251_v9 = vmul.f32 -0.5, %v6251_v43  ;;  %6266 = vlog2.f32 %v1248_v34  ;;  %v1254_v7 = vand.u32 2147483647, %v6251_v43  ;;  %v1151_v42 = vmul.f32 0.6931472, %v6253_v20 }
  0xcb   : > { %v1160_v49 = vmul.f32 0.6931472, %v6255_v30  ;;  %v6259_v51 = vpop.eup %6258  ;;  %v1226_v54 = vmul.f32 %v6245_v56, %v1225_v46  ;;  %v1235_v33 = vmul.f32 %v6247_v53, %v1234_v3  ;;  %vm1351_vm9 = vcmp.gt.f32.partialorder %v7535_v25, 20.0 }
  0xcc   : > { %v1252_v32 = vadd.f32 1.0, %v1251_v9  ;;  %v1169_v48 = vmul.f32 0.6931472, %v6257_v26  ;;  %v1157_v27 = vsel %vm7583_vm0, %v7572_v16, %v1151_v42  ;;  %v1178_v20 = vmul.f32 0.6931472, %v6259_v51 }
  0xcd   : > { %v6261_v55 = vpop.eup %6260  ;;  %v1166_v34 = vsel %vm7587_vm1, %v7578_v47, %v1160_v49  ;;  %v1180_v30 = vadd.f32 1.0, %v1179_v60  ;;  %v1244_v5 = vmul.f32 %v6249_v50, %v1243_v11  ;;  %vm7623_vm10 = vcmp.lt.f32.partialorder %v1245_v15, 0.0004427343 }
  0xce   : > { %v6263_v8 = vpop.eup %6262  ;;  %v1223_v14 = vmul.f32 0.6931472, %v6261_v55  ;;  %vm1352_vm11 = vcmp.gt.f32.partialorder %v7538_v57, 20.0  ;;  %v1309_v56 = vmul.f32 0.01, %v1157_v27  ;;  %v1175_v61 = vsel %vm7598_vm2, %v1172_v63, %v1169_v48  ;;  %v12345_v27 = vld [vmem:[#allocation33_spill] sm:$0xff] }
  0xcf   : > { %v6265_v35 = vpop.eup %6264  ;;  %v1232_v42 = vmul.f32 0.6931472, %v6263_v8  ;;  %vm7629_vm13 = vcmp.lt.f32.partialorder %v1254_v7, 0.0004427343  ;;  %v1310_v51 = vmul.f32 0.01, %v1166_v34  ;;  %v1181_v47 = vmul.f32 %v7576_v28, %v1180_v30 }
  0xd0   : > { %v1229_v50 = vsel %vm7604_vm3, %v1226_v54, %v1223_v14  ;;  %v1241_v55 = vmul.f32 0.6931472, %v6265_v35  ;;  %vm7638_vm14 = vcmp.lt.f32.partialorder %v1182_v29, 0.0004427343  ;;  %v6267_v60 = vpop.eup %6266  ;;  %v1253_v26 = vmul.f32 %v6251_v43, %v1252_v32  ;;  %v12348_v30 = vld [vmem:[#allocation31_spill] sm:$0xff] }
  0xd1   : > { %v1317_v8 = vmul.f32 0.01, %v1229_v50  ;;  %v1238_v3 = vsel %vm7610_vm6, %v1235_v33, %v1232_v42  ;;  %v1184_v28 = vsel %vm7638_vm14, %v1181_v47, %v1178_v20  ;;  %v1250_v24 = vmul.f32 0.6931472, %v6267_v60  ;;  %v12352_v42 = vld [vmem:[#allocation16_spill] sm:$0xff] }
  0xd2   : > { %v1318_v11 = vmul.f32 0.01, %v1238_v3  ;;  %v1247_v14 = vsel %vm7623_vm10, %v1244_v5, %v1241_v55  ;;  %v1373_v29 = vsel %vm1341_vm4, %v7459_v18, %v1309_v56  ;;  %v1311_v52 = vmul.f32 0.01, %v1175_v61  ;;  %v12350_v56 = vld [vmem:[#allocation20_spill] sm:$0xff] }
  0xd3   : > { %v1381_v48 = vsel %vm1349_vm5, %v7511_v37, %v1317_v8  ;;  %v1319_v36 = vmul.f32 0.01, %v1247_v14  ;;  %v917_v43 = vmin.f32 %v7581_v6, 20.0  ;;  %v1256_v5 = vsel %vm7629_vm13, %v1253_v26, %v1250_v24 }
  0xd4   : > { %1442 = vmatpush.msra.mxu0 %v1381_v48  ;;  %v1382_v63 = vsel %vm1350_vm7, %v7514_v0, %v1318_v11  ;;  %v1374_v18 = vsel %vm1342_vm8, %v7462_v1, %v1310_v51  ;;  %v1312_v21 = vmul.f32 0.01, %v1184_v28  ;;  %v1320_v12 = vmul.f32 0.01, %v1256_v5  ;;  %v12353_v51 = vld [vmem:[#allocation11_spill] sm:$0xff] }
  0xd5   : > { %1471 = vmatpush.msra.mxu1 %v1382_v63  ;;  %v1383_v37 = vsel %vm1351_vm9, %v7517_v38, %v1319_v36  ;;  %v957_v15 = vmul.f32 1.442695, %v917_v43  ;;  %v7667_v9 = vmul.f32 100.0, %v7593_v58  ;;  %v7670_v0 = vmul.f32 100.0, %v7596_v44 }
  0xd6   : > { %1500 = vmatpush.msra.mxu2 %v1383_v37  ;;  %1443 = vmatpush.msra.mxu0 %v1373_v29  ;;  %v7674_v22 = vadd.f32 %v7558_v17, %v7546_v31  ;;  %v12343_v1 = vmin.f32 %v7556_v19, 20.0  ;;  %v12344_v25 = vmin.f32 %v7561_v41, 20.0  ;;  %v1384_v7 = vsel %vm1352_vm11, %v7520_v39, %v1320_v12 }
  0xd7   : > { %1472 = vmatpush.msra.mxu1 %v1374_v18  ;;  %v1375_v49 = vsel %vm1343_vm12, %v7465_v2, %v1311_v52  ;;  %6268 = vpow2.f32 %v957_v15  ;;  %v918_v54 = vmin.f32 %v7667_v9, 20.0  ;;  %1529 = vmatpush.msra.mxu3 %v1384_v7  ;;  %v919_v31 = vmin.f32 %v7670_v0, 20.0 }
  0xd8   : > { %v941_v59 = vmul.f32 1.442695, %v12343_v1  ;;  %v943_v38 = vmul.f32 1.442695, %v12344_v25  ;;  %1501 = vmatpush.msra.mxu2 %v1375_v49  ;;  %v7690_v33 = vmul.f32 100.0, %v7674_v22  ;;  %v1376_v39 = vsel %vm1344_vm15, %v7468_v13, %v1312_v21  ;;  %v12349_v13 = vld [vmem:[#allocation28_spill] sm:$0xff] }
  0xd9   : > { %v959_v57 = vmul.f32 1.442695, %v918_v54  ;;  %v795_v2 = vadd.f32 %v7570_v45, %v7566_v4  ;;  %1530 = vmatpush.msra.mxu3 %v1376_v39  ;;  %v961_v23 = vmul.f32 1.442695, %v919_v31  ;;  %v12346_v34 = vperm.slane %v12345_v27, 0  ;;  %v12351_v45 = vld [vmem:[#allocation27_spill] sm:$0xff] }
  0xda   : > { %6270 = vpow2.f32 %v941_v59  ;;  %v920_v32 = vmin.f32 %v7690_v33, 20.0  ;;  %v660_v35 = vmul.f32 %v12350_v56, %v12349_v13  ;;  %v7709_v16 = vmul.f32 %v12352_v42, %v12351_v45 }
  0xdb   : > { %6272 = vpow2.f32 %v943_v38  ;;  %v7700_v20 = vperm.slane %v12346_v34, 0  ;;  %v7703_v46 = vadd.f32 %v12348_v30, %v795_v2  ;;  %v637_v53 = vperm.slane %v12345_v27, 1 }
  0xdc   : > { %6274 = vpow2.f32 %v959_v57  ;;  %v963_v4 = vmul.f32 1.442695, %v920_v32  ;;  %v692_v61 = vadd.f32 %v660_v35, %v588_v40  ;;  %v741_v60 = vperm.slane %v12345_v27, 2 }
  0xdd   : > { %12347 = vst [vmem:[#allocation33_spill] sm:$0xff] %v7700_v20  ;;  %6276 = vpow2.f32 %v961_v23  ;;  %v7713_v47 = vmul.f32 %v7700_v20, %v12353_v51  ;;  %v6269_v50 = vpop.eup %6268  ;;  %v7716_v55 = vmul.f32 100.0, %v7703_v46  ;;  %v566_v48 = vperm.slane %v12345_v27, 4 }
  0xde   : > { %v1077_v3 = vadd.f32 1.0, %v6269_v50  ;;  %v1080_v26 = vmul.f32 -0.5, %v6269_v50  ;;  %v1083_v28 = vand.u32 2147483647, %v6269_v50  ;;  %6278 = vpow2.f32 %v963_v4 }
  0xdf   : > { %v911_v43 = vmin.f32 %v7716_v55, 20.0  ;;  %vm1333_vm2 = vcmp.gt.f32.partialorder %v7581_v6, 20.0  ;;  %vm1325_vm3 = vcmp.gt.f32.partialorder %v7556_v19, 20.0  ;;  %vm1334_vm6 = vcmp.gt.f32.partialorder %v7667_v9, 20.0  ;;  %v7773_v6 = vld [vmem:[%s12369_s3] sm:$0xff] }
  0xe0   : > { %v6271_v8 = vpop.eup %6270  ;;  %6280 = vlog2.f32 %v1077_v3  ;;  %v1081_v36 = vadd.f32 1.0, %v1080_v26  ;;  %vm7721_vm0 = vcmp.lt.f32.partialorder %v1083_v28, 0.0004427343  ;;  %vm1335_vm7 = vcmp.gt.f32.partialorder %v7670_v0, 20.0  ;;  %v528_v0 = vld [vmem:[%s7339_s30 + $0x18] sm:$0x77] }
  0xe1   : > { %v6273_v11 = vpop.eup %6272  ;;  %v1005_v14 = vadd.f32 1.0, %v6271_v8  ;;  %v1008_v24 = vmul.f32 -0.5, %v6271_v8  ;;  %v1011_v29 = vand.u32 2147483647, %v6271_v8  ;;  %vm1417_vm10 = vcmask 261120  }
  0xe2   : > { %v6275_v63 = vpop.eup %6274  ;;  %v1014_v18 = vadd.f32 1.0, %v6273_v11  ;;  %v1017_v21 = vmul.f32 -0.5, %v6273_v11  ;;  %v1082_v25 = vmul.f32 %v6269_v50, %v1081_v36  ;;  %vm1326_vm11 = vcmp.gt.f32.partialorder %v7561_v41, 20.0 }
  0xe3   : > { %6282 = vlog2.f32 %v1005_v14  ;;  %v1009_v5 = vadd.f32 1.0, %v1008_v24  ;;  %v6277_v37 = vpop.eup %6276  ;;  %v1086_v12 = vadd.f32 1.0, %v6275_v63  ;;  %v1089_v15 = vmul.f32 -0.5, %v6275_v63  ;;  %v12373_v14 = vld [vmem:[#allocation34_spill] sm:$0xff] }
  0xe4   : > { %v1092_v1 = vand.u32 2147483647, %v6275_v63  ;;  %vm7726_vm1 = vcmp.lt.f32.partialorder %v1011_v29, 0.0004427343  ;;  %v1095_v38 = vadd.f32 1.0, %v6277_v37  ;;  %v1098_v7 = vmul.f32 -0.5, %v6277_v37  ;;  %v6279_v54 = vpop.eup %6278 }
  0xe5   : > { %v1101_v49 = vand.u32 2147483647, %v6277_v37  ;;  %6284 = vlog2.f32 %v1086_v12  ;;  %v1090_v31 = vadd.f32 1.0, %v1089_v15  ;;  %v1010_v39 = vmul.f32 %v6271_v8, %v1009_v5 }
  0xe6   : > { %v1018_v57 = vadd.f32 1.0, %v1017_v21  ;;  %vm7732_vm4 = vcmp.lt.f32.partialorder %v1092_v1, 0.0004427343  ;;  %6286 = vlog2.f32 %v1095_v38  ;;  %v1099_v23 = vadd.f32 1.0, %v1098_v7  ;;  %v6281_v40 = vpop.eup %6280 }
  0xe7   : > { %v1104_v32 = vadd.f32 1.0, %v6279_v54  ;;  %vm7736_vm5 = vcmp.lt.f32.partialorder %v1101_v49, 0.0004427343  ;;  %v1107_v35 = vmul.f32 -0.5, %v6279_v54  ;;  %v1110_v4 = vand.u32 2147483647, %v6279_v54 }
  0xe8   : > { %6288 = vlog2.f32 %v1014_v18  ;;  %v1079_v8 = vmul.f32 0.6931472, %v6281_v40  ;;  %v1091_v3 = vmul.f32 %v6275_v63, %v1090_v31  ;;  %v1100_v26 = vmul.f32 %v6277_v37, %v1099_v23 }
  0xe9   : > { %v6283_v50 = vpop.eup %6282  ;;  %6290 = vlog2.f32 %v1104_v32  ;;  %v1108_v28 = vadd.f32 1.0, %v1107_v35  ;;  %vm7742_vm8 = vcmp.lt.f32.partialorder %v1110_v4, 0.0004427343  ;;  %v1019_v29 = vmul.f32 %v6273_v11, %v1018_v57  ;;  %v12370_v57 = vld [vmem:[#allocation9_spill] sm:$0xff] }
  0xea   : > { %v1007_v24 = vmul.f32 0.6931472, %v6283_v50  ;;  %v1085_v36 = vsel %vm7721_vm0, %v1082_v25, %v1079_v8  ;;  %v1020_v5 = vand.u32 2147483647, %v6273_v11  ;;  %v945_v18 = vmul.f32 1.442695, %v911_v43 }
  0xeb   : > { %v796_v63 = vadd.f32 %v7709_v16, %v692_v61  ;;  %v6285_v21 = vpop.eup %6284  ;;  %v1301_v12 = vmul.f32 0.01, %v1085_v36  ;;  %v1109_v37 = vmul.f32 %v6279_v54, %v1108_v28  ;;  %v7753_v1 = vperm.slane %v637_v53, 1  ;;  %v12367_v16 = vld [vmem:[#allocation35_spill] sm:$0xff]  ;;  %v12368_v54 = vld [vmem:[#allocation32_spill] sm:$0xff] }
  0xec   : > { %v1013_v15 = vsel %vm7726_vm1, %v1010_v39, %v1007_v24  ;;  %v6287_v38 = vpop.eup %6286  ;;  %v1088_v7 = vmul.f32 0.6931472, %v6285_v21  ;;  %vm7755_vm9 = vcmp.lt.f32.partialorder %v1020_v5, 0.0004427343  ;;  %6292 = vpow2.f32 %v945_v18 }
  0xed   : > { %12364 = vst [vmem:[#allocation31_spill] sm:$0xff] %v7753_v1  ;;  %v1293_v49 = vmul.f32 0.01, %v1013_v15  ;;  %v1365_v61 = vsel %vm1333_vm2, %v12367_v16, %v1301_v12  ;;  %v1097_v43 = vmul.f32 0.6931472, %v6287_v38  ;;  %v7763_v59 = vadd.f32 %v12348_v30, %v796_v63 }
  0xee   : > { %v6289_v11 = vpop.eup %6288  ;;  %1444 = vmatpush.msra.mxu0 %v1365_v61  ;;  %v1094_v25 = vsel %vm7732_vm4, %v1091_v3, %v1088_v7  ;;  %v685_v23 = vmul.f32 %v7753_v1, %v12370_v57  ;;  %v7787_v8 = vperm.slane %v741_v60, 2  ;;  %vm1336_vm12 = vcmp.gt.f32.partialorder %v7690_v33, 20.0 }
  0xef   : > { %v6291_v53 = vpop.eup %6290  ;;  %v1357_v31 = vsel %vm1325_vm3, %v12368_v54, %v1293_v49  ;;  %v1016_v39 = vmul.f32 0.6931472, %v6289_v11  ;;  %v1302_v32 = vmul.f32 0.01, %v1094_v25  ;;  %v1103_v40 = vsel %vm7736_vm5, %v1100_v26, %v1097_v43 }
  0xf0   : > { %v1106_v35 = vmul.f32 0.6931472, %v6291_v53  ;;  %v7780_v2 = vmul.f32 100.0, %v7763_v59  ;;  %v1303_v4 = vmul.f32 0.01, %v1103_v40  ;;  %1445 = vmatpush.msra.mxu0 %v1357_v31  ;;  %v717_v50 = vadd.f32 %v685_v23, %v7713_v47  ;;  %12371 = vst [vmem:[#allocation28_spill] sm:$0xff] %v7787_v8 }
  0xf1   : > { %v1022_v19 = vsel %vm7755_vm9, %v1019_v29, %v1016_v39  ;;  %v1366_v34 = vsel %vm1334_vm6, %v7593_v58, %v1302_v32  ;;  %5996 = vmatmul.msk.f32.vlgmr.msra.gmra.mxu0 %vm1417_vm10, %v7773_v6  ;;  %v12372_v58 = vld [vmem:[#allocation6_spill] sm:$0xff]  ;;  %v7811_v41 = vperm.slane %v566_v48, 0  ;;  %v638_v33 = vperm.slane %v12345_v27, 5 }
  0xf2   : > { %v1112_v3 = vsel %vm7742_vm8, %v1109_v37, %v1106_v35  ;;  %v1294_v26 = vmul.f32 0.01, %v1022_v19  ;;  %v912_v28 = vmin.f32 %v7780_v2, 20.0  ;;  %v6293_v24 = vpop.eup %6292  ;;  %1473 = vmatpush.msra.mxu1 %v1366_v34  ;;  %v1367_v47 = vsel %vm1335_vm7, %v7596_v44, %v1303_v4  ;;  %v12375_v37 = vld [vmem:[#allocation30_spill] sm:$0xff] }
  0xf3   : > { %v1304_v60 = vmul.f32 0.01, %v1112_v3  ;;  %v789_v9 = vmul.f32 %v7787_v8, %v12372_v58  ;;  %1502 = vmatpush.msra.mxu2 %v1367_v47  ;;  %v1023_v36 = vadd.f32 1.0, %v6293_v24  ;;  %v1026_v5 = vmul.f32 -0.5, %v6293_v24  ;;  %12374 = vst [vmem:[#allocation27_spill] sm:$0xff] %v7811_v41 }
  0xf4   : > { %v1358_v29 = vsel %vm1326_vm11, %v12373_v14, %v1294_v26  ;;  %v947_v63 = vmul.f32 1.442695, %v912_v28  ;;  %v1029_v44 = vand.u32 2147483647, %v6293_v24  ;;  %v742_v15 = vperm.slane %v12345_v27, 6 }
  0xf5   : > { %v1368_v18 = vsel %vm1336_vm12, %v7674_v22, %v1304_v60  ;;  %1474 = vmatpush.msra.mxu1 %v1358_v29  ;;  %v821_v21 = vadd.f32 %v789_v9, %v717_v50  ;;  %6294 = vlog2.f32 %v1023_v36  ;;  %v1027_v12 = vadd.f32 1.0, %v1026_v5 }
  0xf6   : > { %1531 = vmatpush.msra.mxu3 %v1368_v18  ;;  %6000 = vmatmul.msk.f32.vlgmr.msra.gmra.mxu1 %vm1417_vm10, %v7773_v6  ;;  %6296 = vpow2.f32 %v947_v63  ;;  %v614_v38 = vmul.f32 %v7811_v41, %v12353_v51  ;;  %v7820_v7 = vperm.slane %v638_v33, 1  ;;  %v567_v49 = vperm.slane %v528_v0, 0 }
  0xf7   : > { %v7815_v22 = vadd.f32 %v12375_v37, %v821_v21  ;;  %v639_v52 = vperm.slane %v528_v0, 1  ;;  %v7825_v48 = vperm.slane %v742_v15, 2  ;;  %v743_v16 = vperm.slane %v528_v0, 2  ;;  %v12385_v15 = vld [vmem:[#allocation8_spill] sm:$0xff] }
  0xf8   : > { %12376 = vst [vmem:[#allocation11_spill] sm:$0xff] %v7820_v7  ;;  %v568_v61 = vperm.slane %v528_v0, 4  ;;  %v686_v43 = vmul.f32 %v7820_v7, %v12370_v57  ;;  %v7829_v53 = vperm.slane %v567_v49, 0  ;;  %v640_v25 = vperm.slane %v528_v0, 5  ;;  %v12386_v49 = vld [vmem:[#allocation12_spill] sm:$0xff] }
  0xf9   : > { %v7823_v11 = vmul.f32 100.0, %v7815_v22  ;;  %12377 = vst [vmem:[#allocation35_spill] sm:$0xff] %v7825_v48  ;;  %v7831_v27 = vperm.slane %v639_v52, 1  ;;  %vm7833_vm13 = vcmp.lt.f32.partialorder %v1029_v44, 0.0004427343  ;;  %vm1327_vm14 = vcmp.gt.f32.partialorder %v7716_v55, 20.0 }
  0xfa   : > { %12378 = vst [vmem:[#allocation32_spill] sm:$0xff] %v7829_v53  ;;  %v7839_v39 = vperm.slane %v743_v16, 2  ;;  %v1028_v32 = vmul.f32 %v6293_v24, %v1027_v12  ;;  %v718_v40 = vadd.f32 %v686_v43, %v614_v38  ;;  %v615_v35 = vmul.f32 %v7829_v53, %v12353_v51 }
  0xfb   : > { %12379 = vst [vmem:[#allocation9_spill] sm:$0xff] %v7831_v27  ;;  %v937_v31 = vmin.f32 %v7823_v11, 20.0  ;;  %v6295_v23 = vpop.eup %6294  ;;  %v687_v4 = vmul.f32 %v7831_v27, %v12370_v57  ;;  %v790_v3 = vmul.f32 %v7825_v48, %v12372_v58  ;;  %v7847_v26 = vperm.slane %v640_v25, 1 }
  0xfc   : > { %12382 = vst [vmem:[#allocation6_spill] sm:$0xff] %v7839_v39  ;;  %v6297_v19 = vpop.eup %6296  ;;  %v1025_v50 = vmul.f32 0.6931472, %v6295_v23  ;;  %v791_v24 = vmul.f32 %v7839_v39, %v12372_v58  ;;  %v7851_v60 = vperm.slane %v568_v61, 0  ;;  %v744_v33 = vperm.slane %v528_v0, 6  ;;  %v12388_v0 = vld [vmem:[#allocation10_spill] sm:$0xff] }
  0xfd   : > { %v997_v34 = vmul.f32 1.442695, %v937_v31  ;;  %12383 = vst [vmem:[#allocation34_spill] sm:$0xff] %v7847_v26  ;;  %v1032_v28 = vadd.f32 1.0, %v6297_v19  ;;  %v1035_v47 = vmul.f32 -0.5, %v6297_v19  ;;  %v822_v14 = vadd.f32 %v790_v3, %v718_v40 }
  0xfe   : > { %12384 = vst [vmem:[#allocation30_spill] sm:$0xff] %v7851_v60  ;;  %v1031_v9 = vsel %vm7833_vm13, %v1028_v32, %v1025_v50  ;;  %v719_v29 = vadd.f32 %v687_v4, %v615_v35  ;;  %v616_v18 = vmul.f32 %v7851_v60, %v12353_v51  ;;  %v688_v44 = vmul.f32 %v7847_v26, %v12370_v57 }
  0xff   : > { %6298 = vpow2.f32 %v997_v34  ;;  %v1295_v36 = vmul.f32 0.01, %v1031_v9  ;;  %v1036_v5 = vadd.f32 1.0, %v1035_v47  ;;  %v7858_v63 = vadd.f32 %v12375_v37, %v822_v14 }
 0x100   : > { %6300 = vlog2.f32 %v1032_v28  ;;  %v823_v21 = vadd.f32 %v791_v24, %v719_v29  ;;  %v605_v38 = vmul.f32 %v7700_v20, %v12385_v15  ;;  %v677_v52 = vmul.f32 %v7753_v1, %v12386_v49  ;;  %v12389_v29 = vld [vmem:[#allocation29_spill] sm:$0xff] }
 0x101   : > { %v1359_v12 = vsel %vm1327_vm14, %v7703_v46, %v1295_v36  ;;  %v7870_v51 = vmul.f32 100.0, %v7858_v63  ;;  %v7875_v61 = vperm.slane %v744_v33, 2  ;;  %v1038_v57 = vand.u32 2147483647, %v6297_v19 }
 0x102   : > { %1503 = vmatpush.msra.mxu2 %v1359_v12  ;;  %v7873_v16 = vadd.f32 %v12375_v37, %v823_v21  ;;  %v720_v46 = vadd.f32 %v688_v44, %v616_v18  ;;  %v709_v55 = vadd.f32 %v677_v52, %v605_v38  ;;  %v781_v43 = vmul.f32 %v7787_v8, %v12388_v0 }
 0x103   : > { %12387 = vst [vmem:[#allocation8_spill] sm:$0xff] %v7875_v61  ;;  %6004 = vmatmul.msk.f32.vlgmr.msra.gmra.mxu2 %vm1417_vm10, %v7773_v6  ;;  %v1037_v54 = vmul.f32 %v6297_v19, %v1036_v5  ;;  %vm1328_vm15 = vcmp.gt.f32.partialorder %v7780_v2, 20.0  ;;  %v938_v31 = vmin.f32 %v7870_v51, 20.0  ;;  %v792_v4 = vmul.f32 %v7875_v61, %v12372_v58 }
 0x104   : > { %v7884_v23 = vmul.f32 100.0, %v7873_v16  ;;  %v678_v50 = vmul.f32 %v7820_v7, %v12386_v49  ;;  %v813_v28 = vadd.f32 %v781_v43, %v709_v55  ;;  %vm1039_vm0 = vcmp.lt.f32.partialorder %v1038_v57, 0.0004427343 }
 0x105   : > { %v6299_v25 = vpop.eup %6298  ;;  %v999_v3 = vmul.f32 1.442695, %v938_v31  ;;  %v824_v47 = vadd.f32 %v792_v4, %v720_v46  ;;  %v606_v24 = vmul.f32 %v7811_v41, %v12385_v15  ;;  %v782_v12 = vmul.f32 %v7825_v48, %v12388_v0 }
 0x106   : > { %v6301_v32 = vpop.eup %6300  ;;  %v1257_v40 = vadd.f32 1.0, %v6299_v25  ;;  %v1260_v35 = vmul.f32 -0.5, %v6299_v25  ;;  %v939_v19 = vmin.f32 %v7884_v23, 20.0  ;;  %v7894_v36 = vadd.f32 %v12389_v29, %v813_v28 }
 0x107   : > { %v1034_v34 = vmul.f32 0.6931472, %v6301_v32  ;;  %v1263_v5 = vand.u32 2147483647, %v6299_v25  ;;  %v7897_v18 = vadd.f32 %v12375_v37, %v824_v47  ;;  %v710_v21 = vadd.f32 %v678_v50, %v606_v24 }
 0x108   : > { %6302 = vlog2.f32 %v1257_v40  ;;  %v1001_v14 = vmul.f32 1.442695, %v939_v19  ;;  %v1261_v44 = vadd.f32 1.0, %v1260_v35  ;;  %v7900_v33 = vmul.f32 100.0, %v7894_v36 }
 0x109   : > { %v1040_v9 = vsel %vm1039_vm0, %v1037_v54, %v1034_v34  ;;  %6304 = vpow2.f32 %v999_v3  ;;  %v7908_v52 = vmul.f32 100.0, %v7897_v18  ;;  %v607_v37 = vmul.f32 %v7829_v53, %v12385_v15 }
 0x10a   : > { %v1296_v58 = vmul.f32 0.01, %v1040_v9  ;;  %6306 = vpow2.f32 %v1001_v14  ;;  %v679_v57 = vmul.f32 %v7831_v27, %v12386_v49  ;;  %vm1353_vm1 = vcmp.gt.f32.partialorder %v7823_v11, 20.0 }
 0x10b   : > { %v929_v46 = vmin.f32 %v7900_v33, 20.0  ;;  %v814_v55 = vadd.f32 %v782_v12, %v710_v21  ;;  %vm7918_vm2 = vcmp.lt.f32.partialorder %v1263_v5, 0.0004427343  ;;  %v940_v2 = vmin.f32 %v7908_v52, 20.0 }
 0x10c   : > { %v1360_v38 = vsel %vm1328_vm15, %v7763_v59, %v1296_v58  ;;  %v711_v54 = vadd.f32 %v679_v57, %v607_v37  ;;  %v783_v31 = vmul.f32 %v7839_v39, %v12388_v0  ;;  %v1262_v35 = vmul.f32 %v6299_v25, %v1261_v44 }
 0x10d   : > { %1532 = vmatpush.msra.mxu3 %v1360_v38  ;;  %v981_v4 = vmul.f32 1.442695, %v929_v46  ;;  %v7926_v50 = vadd.f32 %v12389_v29, %v814_v55  ;;  %v1003_v19 = vmul.f32 1.442695, %v940_v2  ;;  %v680_v28 = vmul.f32 %v7847_v26, %v12386_v49 }
 0x10e   : > { %v6303_v43 = vpop.eup %6302  ;;  %6008 = vmatmul.msk.f32.vlgmr.msra.gmra.mxu3 %vm1417_vm10, %v7773_v6  ;;  %v815_v5 = vadd.f32 %v783_v31, %v711_v54  ;;  %v608_v46 = vmul.f32 %v7851_v60, %v12385_v15  ;;  %vm1354_vm4 = vcmp.gt.f32.partialorder %v7870_v51, 20.0  ;;  %vm1355_vm6 = vcmp.gt.f32.partialorder %v7884_v23, 20.0 }
 0x10f   : > { %v6305_v32 = vpop.eup %6304  ;;  %v1259_v40 = vmul.f32 0.6931472, %v6303_v43  ;;  %6308 = vpow2.f32 %v981_v4  ;;  %v7933_v14 = vmul.f32 100.0, %v7926_v50  ;;  %v12396_v4 = vld [vmem:[#allocation7_spill] sm:$0xff]  ;;  %vm1345_vm7 = vcmp.gt.f32.partialorder %v7900_v33, 20.0 }
 0x110   : > { %v1266_v34 = vadd.f32 1.0, %v6305_v32  ;;  %v1269_v3 = vmul.f32 -0.5, %v6305_v32  ;;  %v6307_v47 = vpop.eup %6306  ;;  %v1272_v9 = vand.u32 2147483647, %v6305_v32  ;;  %v7940_v57 = vadd.f32 %v12389_v29, %v815_v5 }
 0x111   : > { %v1265_v24 = vsel %vm7918_vm2, %v1262_v35, %v1259_v40  ;;  %v1275_v21 = vadd.f32 1.0, %v6307_v47  ;;  %v1278_v44 = vmul.f32 -0.5, %v6307_v47  ;;  %v1281_v12 = vand.u32 2147483647, %v6307_v47 }
 0x112   : > { %v1321_v25 = vmul.f32 0.01, %v1265_v24  ;;  %6310 = vlog2.f32 %v1266_v34  ;;  %v1270_v58 = vadd.f32 1.0, %v1269_v3  ;;  %v930_v38 = vmin.f32 %v7933_v14, 20.0  ;;  %v12397_v24 = vld [vmem:[#allocation26_spill] sm:$0xff] }
 0x113   : > { %6312 = vpow2.f32 %v1003_v19  ;;  %v1279_v37 = vadd.f32 1.0, %v1278_v44  ;;  %vm7944_vm3 = vcmp.lt.f32.partialorder %v1272_v9, 0.0004427343  ;;  %vm7951_vm5 = vcmp.lt.f32.partialorder %v1281_v12, 0.0004427343 }
 0x114   : > { %v1385_v49 = vsel %vm1353_vm1, %v7815_v22, %v1321_v25  ;;  %6314 = vlog2.f32 %v1275_v21  ;;  %v983_v43 = vmul.f32 1.442695, %v930_v38  ;;  %v784_v22 = vmul.f32 %v7875_v61, %v12388_v0 }
 0x115   : > { %1558 = vmatpush.msrb.mxu0 %v1385_v49  ;;  %v6309_v11 = vpop.eup %6308  ;;  %v1271_v59 = vmul.f32 %v6305_v32, %v1270_v58  ;;  %v7956_v54 = vmul.f32 100.0, %v7940_v57  ;;  %v712_v15 = vadd.f32 %v680_v28, %v608_v46  ;;  %v597_v34 = vmul.f32 %v7700_v20, %v12396_v4  ;;  %v12398_v28 = vld [vmem:[#allocation23_spill] sm:$0xff] }
 0x116   : > { %v1185_v40 = vadd.f32 1.0, %v6309_v11  ;;  %v1188_v35 = vmul.f32 -0.5, %v6309_v11  ;;  %6316 = vpow2.f32 %v983_v43  ;;  %v1280_v32 = vmul.f32 %v6307_v47, %v1279_v37 }
 0x117   : > { %v931_v19 = vmin.f32 %v7956_v54, 20.0  ;;  %v669_v9 = vmul.f32 %v7753_v1, %v12397_v24  ;;  %v773_v5 = vmul.f32 %v7787_v8, %v12398_v28  ;;  %v1191_v12 = vand.u32 2147483647, %v6309_v11 }
 0x118   : > { %v6311_v31 = vpop.eup %6310  ;;  %6318 = vlog2.f32 %v1185_v40  ;;  %v816_v38 = vadd.f32 %v784_v22, %v712_v15  ;;  %v1189_v37 = vadd.f32 1.0, %v1188_v35  ;;  %v598_v40 = vmul.f32 %v7811_v41, %v12396_v4 }
 0x119   : > { %v6313_v0 = vpop.eup %6312  ;;  %v1268_v3 = vmul.f32 0.6931472, %v6311_v31  ;;  %v985_v49 = vmul.f32 1.442695, %v931_v19  ;;  %v701_v15 = vadd.f32 %v669_v9, %v597_v34  ;;  %vm1356_vm8 = vcmp.gt.f32.partialorder %v7908_v52, 20.0 }
 0x11a   : > { %v1284_v25 = vadd.f32 1.0, %v6313_v0  ;;  %v1287_v58 = vmul.f32 -0.5, %v6313_v0  ;;  %v6315_v21 = vpop.eup %6314  ;;  %v1290_v43 = vand.u32 2147483647, %v6313_v0  ;;  %v7970_v31 = vadd.f32 %v12389_v29, %v816_v38 }
 0x11b   : > { %v1274_v44 = vsel %vm7944_vm3, %v1271_v59, %v1268_v3  ;;  %v1277_v47 = vmul.f32 0.6931472, %v6315_v21  ;;  %vm7980_vm9 = vcmp.lt.f32.partialorder %v1191_v12, 0.0004427343  ;;  %v1190_v21 = vmul.f32 %v6309_v11, %v1189_v37 }
 0x11c   : > { %v1322_v46 = vmul.f32 0.01, %v1274_v44  ;;  %6320 = vlog2.f32 %v1284_v25  ;;  %v6317_v42 = vpop.eup %6316  ;;  %v1288_v59 = vadd.f32 1.0, %v1287_v58  ;;  %v7985_v51 = vmul.f32 100.0, %v7970_v31 }
 0x11d   : > { %6322 = vpow2.f32 %v985_v49  ;;  %v1283_v22 = vsel %vm7951_vm5, %v1280_v32, %v1277_v47  ;;  %v1194_v3 = vadd.f32 1.0, %v6317_v42  ;;  %v1197_v19 = vmul.f32 -0.5, %v6317_v42 }
 0x11e   : > { %v1386_v55 = vsel %vm1354_vm4, %v7858_v63, %v1322_v46  ;;  %v1323_v35 = vmul.f32 0.01, %v1283_v22  ;;  %v6319_v25 = vpop.eup %6318  ;;  %v805_v63 = vadd.f32 %v773_v5, %v701_v15  ;;  %v670_v2 = vmul.f32 %v7820_v7, %v12397_v24 }
 0x11f   : > { %1587 = vmatpush.msrb.mxu1 %v1386_v55  ;;  %v1187_v32 = vmul.f32 0.6931472, %v6319_v25  ;;  %6324 = vlog2.f32 %v1194_v3  ;;  %v1200_v9 = vand.u32 2147483647, %v6317_v42  ;;  %v1289_v44 = vmul.f32 %v6313_v0, %v1288_v59 }
 0x120   : > { %v1387_v34 = vsel %vm1355_vm6, %v7873_v16, %v1323_v35  ;;  %v932_v12 = vmin.f32 %v7985_v51, 20.0  ;;  %v7994_v11 = vadd.f32 %v7558_v17, %v805_v63  ;;  %v774_v5 = vmul.f32 %v7825_v48, %v12398_v28 }
 0x121   : > { %1616 = vmatpush.msrb.mxu2 %v1387_v34  ;;  %v1193_v23 = vsel %vm7980_vm9, %v1190_v21, %v1187_v32  ;;  %v1198_v16 = vadd.f32 1.0, %v1197_v19  ;;  %v702_v46 = vadd.f32 %v670_v2, %v598_v40  ;;  %vm1291_vm11 = vcmp.lt.f32.partialorder %v1290_v43, 0.0004427343 }
 0x122   : > { %v6321_v58 = vpop.eup %6320  ;;  %v1313_v47 = vmul.f32 0.01, %v1193_v23  ;;  %vm1346_vm12 = vcmp.gt.f32.partialorder %v7933_v14, 20.0  ;;  %vm8001_vm13 = vcmp.lt.f32.partialorder %v1200_v9, 0.0004427343  ;;  %v8006_v15 = vmul.f32 100.0, %v7994_v11 }
 0x123   : > { %v6323_v49 = vpop.eup %6322  ;;  %v1286_v38 = vmul.f32 0.6931472, %v6321_v58  ;;  %v987_v59 = vmul.f32 1.442695, %v932_v12  ;;  %v806_v43 = vadd.f32 %v774_v5, %v702_v46  ;;  %v1199_v3 = vmul.f32 %v6317_v42, %v1198_v16 }
 0x124   : > { %v1203_v0 = vadd.f32 1.0, %v6323_v49  ;;  %v1206_v37 = vmul.f32 -0.5, %v6323_v49  ;;  %v1377_v40 = vsel %vm1345_vm7, %v7894_v36, %v1313_v47  ;;  %v1209_v19 = vand.u32 2147483647, %v6323_v49 }
 0x125   : > { %v1292_v55 = vsel %vm1291_vm11, %v1289_v44, %v1286_v38  ;;  %v6325_v29 = vpop.eup %6324  ;;  %1559 = vmatpush.msrb.mxu0 %v1377_v40  ;;  %v921_v25 = vmin.f32 %v8006_v15, 20.0  ;;  %v8016_v34 = vadd.f32 %v7558_v17, %v806_v43  ;;  %v599_v33 = vmul.f32 %v7829_v53, %v12396_v4 }
 0x126   : > { %v1324_v35 = vmul.f32 0.01, %v1292_v55  ;;  %6326 = vlog2.f32 %v1203_v0  ;;  %v1196_v63 = vmul.f32 0.6931472, %v6325_v29  ;;  %v1207_v2 = vadd.f32 1.0, %v1206_v37 }
 0x127   : > { %6328 = vpow2.f32 %v987_v59  ;;  %v965_v36 = vmul.f32 1.442695, %v921_v25  ;;  %v671_v42 = vmul.f32 %v7831_v27, %v12397_v24  ;;  %v775_v32 = vmul.f32 %v7839_v39, %v12398_v28 }
 0x128   : > { %v1388_v21 = vsel %vm1356_vm8, %v7897_v18, %v1324_v35  ;;  %v1202_v52 = vsel %vm8001_vm13, %v1199_v3, %v1196_v63  ;;  %v8027_v18 = vmul.f32 100.0, %v8016_v34  ;;  %v600_v9 = vmul.f32 %v7851_v60, %v12396_v4 }
 0x129   : > { %1645 = vmatpush.msrb.mxu3 %v1388_v21  ;;  %v672_v58 = vmul.f32 %v7847_v26, %v12397_v24  ;;  %v1314_v44 = vmul.f32 0.01, %v1202_v52  ;;  %6330 = vpow2.f32 %v965_v36  ;;  %v703_v12 = vadd.f32 %v671_v42, %v599_v33 }
 0x12a   : > { %v776_v5 = vmul.f32 %v7875_v61, %v12398_v28  ;;  %v1208_v23 = vmul.f32 %v6323_v49, %v1207_v2  ;;  %v922_v16 = vmin.f32 %v8027_v18, 20.0  ;;  %v589_v47 = vmul.f32 %v7700_v20, %v7402_v10 }
 0x12b   : > { %v704_v46 = vadd.f32 %v672_v58, %v600_v9  ;;  %v1378_v4 = vsel %vm1346_vm12, %v7926_v50, %v1314_v44  ;;  %v807_v37 = vadd.f32 %v775_v32, %v703_v12  ;;  %v661_v55 = vmul.f32 %v7753_v1, %v12349_v13 }
 0x12c   : > { %v6327_v38 = vpop.eup %6326  ;;  %1588 = vmatpush.msrb.mxu1 %v1378_v4  ;;  %vm1210_vm14 = vcmp.lt.f32.partialorder %v1209_v19, 0.0004427343  ;;  %v967_v22 = vmul.f32 1.442695, %v922_v16  ;;  %vm1347_vm15 = vcmp.gt.f32.partialorder %v7956_v54, 20.0  ;;  %v765_v2 = vmul.f32 %v7787_v8, %v12351_v45 }
 0x12d   : > { %v6329_v0 = vpop.eup %6328  ;;  %v1205_v24 = vmul.f32 0.6931472, %v6327_v38  ;;  %v8045_v35 = vadd.f32 %v7558_v17, %v807_v37  ;;  %v808_v40 = vadd.f32 %v776_v5, %v704_v46  ;;  %v693_v14 = vadd.f32 %v661_v55, %v589_v47 }
 0x12e   : > { %v1212_v28 = vadd.f32 1.0, %v6329_v0  ;;  %v1215_v49 = vmul.f32 -0.5, %v6329_v0  ;;  %v1218_v50 = vand.u32 2147483647, %v6329_v0  ;;  %v590_v9 = vmul.f32 %v7811_v41, %v7402_v10 }
 0x12f   : > { %v1211_v59 = vsel %vm1210_vm14, %v1208_v23, %v1205_v24  ;;  %v6331_v29 = vpop.eup %6330  ;;  %v8048_v25 = vmul.f32 100.0, %v8045_v35  ;;  %v8051_v19 = vadd.f32 %v7558_v17, %v808_v40  ;;  %v797_v17 = vadd.f32 %v765_v2, %v693_v14 }
 0x130   : > { %v1315_v43 = vmul.f32 0.01, %v1211_v59  ;;  %6332 = vlog2.f32 %v1212_v28  ;;  %v1216_v3 = vadd.f32 1.0, %v1215_v49  ;;  %v1113_v54 = vadd.f32 1.0, %v6331_v29 }
 0x131   : > { %6334 = vpow2.f32 %v967_v22  ;;  %v1116_v63 = vmul.f32 -0.5, %v6331_v29  ;;  %v923_v36 = vmin.f32 %v8048_v25, 20.0  ;;  %v8058_v33 = vmul.f32 100.0, %v8051_v19 }
 0x132   : > { %v1379_v21 = vsel %vm1347_vm15, %v7940_v57, %v1315_v43  ;;  %vm8060_vm0 = vcmp.lt.f32.partialorder %v1218_v50, 0.0004427343  ;;  %6336 = vlog2.f32 %v1113_v54  ;;  %v1217_v32 = vmul.f32 %v6329_v0, %v1216_v3 }
 0x133   : > { %1617 = vmatpush.msrb.mxu2 %v1379_v21  ;;  %v969_v52 = vmul.f32 1.442695, %v923_v36  ;;  %v924_v57 = vmin.f32 %v8058_v33, 20.0  ;;  %v1117_v44 = vadd.f32 1.0, %v1116_v63  ;;  %v1119_v12 = vand.u32 2147483647, %v6331_v29 }
 0x134   : > { %v8068_v5 = vadd.f32 %v12348_v30, %v797_v17  ;;  %v662_v38 = vmul.f32 %v7820_v7, %v12349_v13  ;;  %v766_v47 = vmul.f32 %v7825_v48, %v12351_v45  ;;  %v591_v37 = vmul.f32 %v7829_v53, %v7402_v10 }
 0x135   : > { %6338 = vpow2.f32 %v969_v52  ;;  %v971_v46 = vmul.f32 1.442695, %v924_v57  ;;  %v663_v49 = vmul.f32 %v7831_v27, %v12349_v13  ;;  %vm1348_vm1 = vcmp.gt.f32.partialorder %v7985_v51, 20.0 }
 0x136   : > { %v6333_v58 = vpop.eup %6332  ;;  %v8075_v24 = vmul.f32 100.0, %v8068_v5  ;;  %v694_v28 = vadd.f32 %v662_v38, %v590_v9  ;;  %v1118_v43 = vmul.f32 %v6331_v29, %v1117_v44  ;;  %vm1120_vm2 = vcmp.lt.f32.partialorder %v1119_v12, 0.0004427343 }
 0x137   : > { %v6335_v23 = vpop.eup %6334  ;;  %v1214_v16 = vmul.f32 0.6931472, %v6333_v58  ;;  %6340 = vpow2.f32 %v971_v46  ;;  %v695_v54 = vadd.f32 %v663_v49, %v591_v37  ;;  %v767_v51 = vmul.f32 %v7839_v39, %v12351_v45 }
 0x138   : > { %v1122_v0 = vadd.f32 1.0, %v6335_v23  ;;  %v1125_v4 = vmul.f32 -0.5, %v6335_v23  ;;  %v6337_v22 = vpop.eup %6336  ;;  %v913_v50 = vmin.f32 %v8075_v24, 20.0  ;;  %v798_v14 = vadd.f32 %v766_v47, %v694_v28 }
 0x139   : > { %v1220_v55 = vsel %vm8060_vm0, %v1217_v32, %v1214_v16  ;;  %v1115_v40 = vmul.f32 0.6931472, %v6337_v22  ;;  %v1128_v29 = vand.u32 2147483647, %v6335_v23  ;;  %vm1337_vm3 = vcmp.gt.f32.partialorder %v8006_v15, 20.0 }
 0x13a   : > { %v1316_v59 = vmul.f32 0.01, %v1220_v55  ;;  %6342 = vlog2.f32 %v1122_v0  ;;  %v1126_v21 = vadd.f32 1.0, %v1125_v4  ;;  %v949_v36 = vmul.f32 1.442695, %v913_v50 }
 0x13b   : > { %v6339_v63 = vpop.eup %6338  ;;  %v1121_v2 = vsel %vm1120_vm2, %v1118_v43, %v1115_v40  ;;  %v8087_v42 = vadd.f32 %v12348_v30, %v798_v14  ;;  %v799_v9 = vadd.f32 %v767_v51, %v695_v54  ;;  %v592_v12 = vmul.f32 %v7851_v60, %v7402_v10 }
 0x13c   : > { %v1380_v3 = vsel %vm1348_vm1, %v7970_v31, %v1316_v59  ;;  %v1305_v17 = vmul.f32 0.01, %v1121_v2  ;;  %v1131_v32 = vadd.f32 1.0, %v6339_v63  ;;  %v1134_v52 = vmul.f32 -0.5, %v6339_v63 }
 0x13d   : > { %1646 = vmatpush.msrb.mxu3 %v1380_v3  ;;  %v6341_v57 = vpop.eup %6340  ;;  %6344 = vpow2.f32 %v949_v36  ;;  %v8093_v31 = vmul.f32 100.0, %v8087_v42  ;;  %v664_v38 = vmul.f32 %v7847_v26, %v12349_v13  ;;  %v1127_v46 = vmul.f32 %v6335_v23, %v1126_v21 }
 0x13e   : > { %v1369_v44 = vsel %vm1337_vm3, %v7994_v11, %v1305_v17  ;;  %6346 = vlog2.f32 %v1131_v32  ;;  %v1135_v47 = vadd.f32 1.0, %v1134_v52  ;;  %v1140_v15 = vadd.f32 1.0, %v6341_v57 }
 0x13f   : > { %1560 = vmatpush.msrb.mxu0 %v1369_v44  ;;  %vm1129_vm4 = vcmp.lt.f32.partialorder %v1128_v29, 0.0004427343  ;;  %v1143_v0 = vmul.f32 -0.5, %v6341_v57  ;;  %v914_v4 = vmin.f32 %v8093_v31, 20.0  ;;  %v8102_v37 = vadd.f32 %v12348_v30, %v799_v9 }
 0x140   : > { %v6343_v58 = vpop.eup %6342  ;;  %v1137_v55 = vand.u32 2147483647, %v6339_v63  ;;  %6348 = vlog2.f32 %v1140_v15  ;;  %v696_v13 = vadd.f32 %v664_v38, %v592_v12  ;;  %vm1338_vm5 = vcmp.gt.f32.partialorder %v8027_v18, 20.0 }
 0x141   : > { %v1124_v16 = vmul.f32 0.6931472, %v6343_v58  ;;  %v951_v10 = vmul.f32 1.442695, %v914_v4  ;;  %v8105_v49 = vmul.f32 100.0, %v8102_v37  ;;  %v1136_v23 = vmul.f32 %v6339_v63, %v1135_v47 }
 0x142   : > { %v1146_v59 = vand.u32 2147483647, %v6341_v57  ;;  %v1144_v50 = vadd.f32 1.0, %v1143_v0  ;;  %v768_v3 = vmul.f32 %v7875_v61, %v12351_v45  ;;  %vm1138_vm6 = vcmp.lt.f32.partialorder %v1137_v55, 0.0004427343 }
 0x143   : > { %v1130_v11 = vsel %vm1129_vm4, %v1127_v46, %v1124_v16  ;;  %v6345_v22 = vpop.eup %6344  ;;  %6350 = vpow2.f32 %v951_v10  ;;  %v915_v2 = vmin.f32 %v8105_v49, 20.0  ;;  %vm1339_vm7 = vcmp.gt.f32.partialorder %v8048_v25, 20.0 }
 0x144   : > { %v1306_v28 = vmul.f32 0.01, %v1130_v11  ;;  %v6347_v40 = vpop.eup %6346  ;;  %v1041_v14 = vadd.f32 1.0, %v6345_v22  ;;  %v1044_v54 = vmul.f32 -0.5, %v6345_v22  ;;  %v800_v36 = vadd.f32 %v768_v3, %v696_v13 }
 0x145   : > { %v1133_v21 = vmul.f32 0.6931472, %v6347_v40  ;;  %v953_v51 = vmul.f32 1.442695, %v915_v2  ;;  %v1145_v45 = vmul.f32 %v6341_v57, %v1144_v50  ;;  %vm1147_vm8 = vcmp.lt.f32.partialorder %v1146_v59, 0.0004427343 }
 0x146   : > { %v1370_v43 = vsel %vm1338_vm5, %v8016_v34, %v1306_v28  ;;  %6352 = vlog2.f32 %v1041_v14  ;;  %v6349_v18 = vpop.eup %6348  ;;  %v8115_v34 = vld [vmem:[%s12369_s3 + $0x8] sm:$0xff]  ;;  %v8118_v32 = vadd.f32 %v12348_v30, %v800_v36  ;;  %v1045_v52 = vadd.f32 1.0, %v1044_v54 }
 0x147   : > { %1589 = vmatpush.msrb.mxu1 %v1370_v43  ;;  %v1139_v63 = vsel %vm1138_vm6, %v1136_v23, %v1133_v21  ;;  %v1142_v29 = vmul.f32 0.6931472, %v6349_v18  ;;  %5997 = vmatmul.msk.f32.gmra.mxu0 %vm1417_vm10, %v8115_v34  ;;  %6354 = vpow2.f32 %v953_v51  ;;  %v1047_v9 = vand.u32 2147483647, %v6345_v22 }
 0x148   : > { %v1307_v17 = vmul.f32 0.01, %v1139_v63  ;;  %6001 = vmatmul.msk.f32.gmra.mxu1 %vm1417_vm10, %v8115_v34  ;;  %6005 = vmatmul.msk.f32.gmra.mxu2 %vm1417_vm10, %v8115_v34  ;;  %v8131_v58 = vmul.f32 100.0, %v8118_v32  ;;  %vm1340_vm9 = vcmp.gt.f32.partialorder %v8058_v33, 20.0  ;;  %v1046_v15 = vmul.f32 %v6345_v22, %v1045_v52 }
 0x149   : > { %6009 = vmatmul.msk.f32.gmra.mxu3 %vm1417_vm10, %v8115_v34  ;;  %v1148_v57 = vsel %vm1147_vm8, %v1145_v45, %v1142_v29  ;;  %v6351_v44 = vpop.eup %6350  ;;  %vm1048_vm11 = vcmp.lt.f32.partialorder %v1047_v9, 0.0004427343  ;;  %vm1329_vm12 = vcmp.gt.f32.partialorder %v8075_v24, 20.0  ;;  %v1392_v24 = vld [vmem:[%s12369_s3 + $0x18] sm:$0xff]  ;;  %vm1330_vm14 = vcmp.gt.f32.partialorder %v8093_v31, 20.0 }
 0x14a   : > { %v1371_v30 = vsel %vm1339_vm7, %v8045_v35, %v1307_v17  ;;  %v1308_v12 = vmul.f32 0.01, %v1148_v57  ;;  %v1050_v38 = vadd.f32 1.0, %v6351_v44  ;;  %v916_v16 = vmin.f32 %v8131_v58, 20.0  ;;  %v8139_v35 = vld [vmem:[%s12369_s3 + $0x10] sm:$0xff] }
 0x14b   : > { %1618 = vmatpush.msrb.mxu2 %v1371_v30  ;;  %v1053_v0 = vmul.f32 -0.5, %v6351_v44  ;;  %v1056_v22 = vand.u32 2147483647, %v6351_v44  ;;  %vm1331_vm0 = vcmp.gt.f32.partialorder %v8105_v49, 20.0  ;;  %vm1332_vm2 = vcmp.gt.f32.partialorder %v8131_v58, 20.0 }
 0x14c   : > { %v6353_v25 = vpop.eup %6352  ;;  %v1372_v46 = vsel %vm1340_vm9, %v8051_v19, %v1308_v12  ;;  %6356 = vlog2.f32 %v1050_v38  ;;  %v955_v4 = vmul.f32 1.442695, %v916_v16 }
 0x14d   : > { %v1043_v47 = vmul.f32 0.6931472, %v6353_v25  ;;  %1647 = vmatpush.msrb.mxu3 %v1372_v46  ;;  %v6355_v11 = vpop.eup %6354  ;;  %v1054_v19 = vadd.f32 1.0, %v1053_v0  ;;  %vm1057_vm13 = vcmp.lt.f32.partialorder %v1056_v22, 0.0004427343 }
 0x14e   : > { %v1059_v28 = vadd.f32 1.0, %v6355_v11  ;;  %v1062_v10 = vmul.f32 -0.5, %v6355_v11  ;;  %6358 = vpow2.f32 %v955_v4  ;;  %v1065_v50 = vand.u32 2147483647, %v6355_v11  ;;  %v8216_v4 = vpop.permute.xlu1 %1409 }
 0x14f   : > { %v1049_v55 = vsel %vm1048_vm11, %v1046_v15, %v1043_v47  ;;  %5998 = vmatmul.msk.f32.gmra.mxu0 %vm1417_vm10, %v8139_v35  ;;  %v1055_v40 = vmul.f32 %v6351_v44, %v1054_v19 }
 0x150   : > { %v1297_v33 = vmul.f32 0.01, %v1049_v55  ;;  %6002 = vmatmul.msk.f32.gmra.mxu1 %vm1417_vm10, %v8139_v35  ;;  %6006 = vmatmul.msk.f32.gmra.mxu2 %vm1417_vm10, %v8139_v35  ;;  %6360 = vlog2.f32 %v1059_v28  ;;  %v1063_v43 = vadd.f32 1.0, %v1062_v10  ;;  %vm1066_vm15 = vcmp.lt.f32.partialorder %v1065_v50, 0.0004427343 }
 0x151   : > { %6010 = vmatmul.msk.f32.gmra.mxu3 %vm1417_vm10, %v8139_v35 }
 0x152   : > { %v1361_v13 = vsel %vm1329_vm12, %v8068_v5, %v1297_v33  ;;  %v6357_v23 = vpop.eup %6356  ;;  %v1064_v36 = vmul.f32 %v6355_v11, %v1063_v43 }
 0x153   : > { %1561 = vmatpush.msrb.mxu0 %v1361_v13  ;;  %v1052_v59 = vmul.f32 0.6931472, %v6357_v23 }
 0x154   : > { %v6359_v14 = vpop.eup %6358 }
 0x155   : > { %v1058_v3 = vsel %vm1057_vm13, %v1055_v40, %v1052_v59  ;;  %v1068_v2 = vadd.f32 1.0, %v6359_v14  ;;  %v1071_v18 = vmul.f32 -0.5, %v6359_v14  ;;  %v1074_v31 = vand.u32 2147483647, %v6359_v14 }
 0x156   : > { %v6361_v21 = vpop.eup %6360  ;;  %v1298_v54 = vmul.f32 0.01, %v1058_v3 }
 0x157   : > { %5999 = vmatmul.msk.f32.gmra.mxu0 %vm1417_vm10, %v1392_v24  ;;  %v1061_v5 = vmul.f32 0.6931472, %v6361_v21  ;;  %6362 = vlog2.f32 %v1068_v2  ;;  %v1072_v29 = vadd.f32 1.0, %v1071_v18  ;;  %vm1075_vm1 = vcmp.lt.f32.partialorder %v1074_v31, 0.0004427343 }
 0x158   : > { %6003 = vmatmul.msk.f32.gmra.mxu1 %vm1417_vm10, %v1392_v24  ;;  %6007 = vmatmul.msk.f32.gmra.mxu2 %vm1417_vm10, %v1392_v24  ;;  %v1362_v63 = vsel %vm1330_vm14, %v8087_v42, %v1298_v54 }
 0x159   : > { %6011 = vmatmul.msk.f32.gmra.mxu3 %vm1417_vm10, %v1392_v24  ;;  %1590 = vmatpush.msrb.mxu1 %v1362_v63  ;;  %v1067_v51 = vsel %vm1066_vm15, %v1064_v36, %v1061_v5  ;;  %v1073_v30 = vmul.f32 %v6359_v14, %v1072_v29 }
 0x15a   : > { %v1299_v17 = vmul.f32 0.01, %v1067_v51 }
 0x15c   : > { %v1363_v45 = vsel %vm1331_vm0, %v8102_v37, %v1299_v17 }
 0x15d   : > { %1619 = vmatpush.msrb.mxu2 %v1363_v45  ;;  %v6363_v52 = vpop.eup %6362 }
 0x15e   : > { %v1070_v42 = vmul.f32 0.6931472, %v6363_v52 }
 0x15f   : > { %6012 = vmatmul.msk.f32.vlgmr.msrb.gmra.mxu0 %vm1417_vm10, %v7773_v6 }
 0x160   : > { %6016 = vmatmul.msk.f32.vlgmr.msrb.gmra.mxu1 %vm1417_vm10, %v7773_v6  ;;  %6020 = vmatmul.msk.f32.vlgmr.msrb.gmra.mxu2 %vm1417_vm10, %v7773_v6  ;;  %v1076_v57 = vsel %vm1075_vm1, %v1073_v30, %v1070_v42 }
 0x161   : > { %v1300_v49 = vmul.f32 0.01, %v1076_v57 }
 0x163   : > { %v1364_v37 = vsel %vm1332_vm2, %v8118_v32, %v1300_v49 }
 0x164   : > { %1648 = vmatpush.msrb.mxu3 %v1364_v37 }
 0x165   : > { %6024 = vmatmul.msk.f32.vlgmr.msrb.gmra.mxu3 %vm1417_vm10, %v7773_v6  ;;  %v8192_v6 = vpop.permute.xlu0 %1414 }
 0x167   : > { %6013 = vmatmul.msk.f32.gmra.mxu0 %vm1417_vm10, %v8115_v34 }
 0x168   : > { %6017 = vmatmul.msk.f32.gmra.mxu1 %vm1417_vm10, %v8115_v34  ;;  %6021 = vmatmul.msk.f32.gmra.mxu2 %vm1417_vm10, %v8115_v34 }
 0x16d   : > { %6025 = vmatmul.msk.f32.gmra.mxu3 %vm1417_vm10, %v8115_v34  ;;  %v8194_v9 = vpop.permute.xlu0 %1399 }
 0x16e   : > { %v1447_v34 = vpop.f32.mrf.mxu0 }
 0x16f   : > { %6014 = vmatmul.msk.f32.gmra.mxu0 %vm1417_vm10, %v8139_v35  ;;  %v8197_v12 = vadd.f32 %v1447_v34, %v8194_v9 }
 0x170   : > { %6018 = vmatmul.msk.f32.gmra.mxu1 %vm1417_vm10, %v8139_v35  ;;  %6022 = vmatmul.msk.f32.gmra.mxu2 %vm1417_vm10, %v8139_v35 }
 0x171   : > { %v8203_v46 = vmul.f32 100.0, %v8197_v12 }
 0x173   : > { %v1476_v32 = vpop.f32.mrf.mxu1  ;;  %v1694_v11 = vmin.f32 %v8203_v46, 20.0  ;;  %vm2110_vm15 = vcmp.gt.f32.partialorder %v8203_v46, 20.0 }
 0x174   : > { %v8200_v25 = vadd.f32 %v1476_v32, %v8194_v9 }
 0x175   : > { %6026 = vmatmul.msk.f32.gmra.mxu3 %vm1417_vm10, %v8139_v35  ;;  %v8214_v35 = vpop.permute.xlu2 %1404 }
 0x176   : > { %v8209_v15 = vmul.f32 100.0, %v8200_v25 }
 0x177   : > { %6015 = vmatmul.msk.f32.gmra.mxu0 %vm1417_vm10, %v1392_v24 }
 0x178   : > { %6019 = vmatmul.msk.f32.gmra.mxu1 %vm1417_vm10, %v1392_v24  ;;  %6023 = vmatmul.msk.f32.gmra.mxu2 %vm1417_vm10, %v1392_v24  ;;  %v1695_v28 = vmin.f32 %v8209_v15, 20.0  ;;  %vm2111_vm2 = vcmp.gt.f32.partialorder %v8209_v15, 20.0 }
 0x17a   : > { %v1728_v3 = vmul.f32 1.442695, %v1695_v28 }
 0x17d   : > { %6027 = vmatmul.msk.f32.gmra.mxu3 %vm1417_vm10, %v1392_v24  ;;  %v1726_v24 = vmul.f32 1.442695, %v1694_v11 }
 0x17f   : > { %6364 = vpow2.f32 %v1726_v24 }
 0x180   : > { %6366 = vpow2.f32 %v1728_v3 }
 0x186   : > { %v1505_v58 = vpop.f32.mrf.mxu2 }
 0x187   : > { %v8206_v47 = vadd.f32 %v1505_v58, %v8194_v9 }
 0x189   : > { %12405 = vst [vmem:[#allocation12_spill] sm:$0xff] %v8206_v47  ;;  %v8220_v55 = vmul.f32 100.0, %v8206_v47 }
 0x18b   : > { %12407 = vst [vmem:[#allocation29_spill] sm:$0xff] %v8220_v55  ;;  %v1696_v50 = vmin.f32 %v8220_v55, 20.0 }
 0x18d   : > { %v1730_v18 = vmul.f32 1.442695, %v1696_v50 }
 0x18f   : > { %6368 = vpow2.f32 %v1730_v18 }
 0x191   : > { %v1534_v44 = vpop.f32.mrf.mxu3 }
 0x192   : > { %v8212_v0 = vadd.f32 %v1534_v44, %v8194_v9 }
 0x194   : > { %12406 = vst [vmem:[#allocation10_spill] sm:$0xff] %v8212_v0  ;;  %v8230_v22 = vmul.f32 100.0, %v8212_v0 }
 0x196   : > { %12408 = vst [vmem:[#allocation7_spill] sm:$0xff] %v8230_v22  ;;  %v1697_v54 = vmin.f32 %v8230_v22, 20.0 }
 0x198   : > { %v1732_v31 = vmul.f32 1.442695, %v1697_v54 }
 0x19a   : > { %6370 = vpow2.f32 %v1732_v31 }
 0x1c4   : > { %v1450_v38 = vpop.f32.mrf.mxu0 }
 0x1c5   : > { %v1479_v16 = vpop.f32.mrf.mxu1  ;;  %v8223_v33 = vadd.f32 %v1450_v38, %v8214_v35 }
 0x1c6   : > { %v8227_v19 = vadd.f32 %v1479_v16, %v8214_v35 }
 0x1c7   : > { %v8240_v14 = vmul.f32 100.0, %v8223_v33 }
 0x1c8   : > { %v8243_v21 = vmul.f32 100.0, %v8227_v19 }
 0x1c9   : > { %v1702_v63 = vmin.f32 %v8240_v14, 20.0  ;;  %vm2118_vm13 = vcmp.gt.f32.partialorder %v8240_v14, 20.0 }
 0x1ca   : > { %v1703_v17 = vmin.f32 %v8243_v21, 20.0  ;;  %vm2119_vm14 = vcmp.gt.f32.partialorder %v8243_v21, 20.0 }
 0x1cb   : > { %v1508_v10 = vpop.f32.mrf.mxu2  ;;  %v1742_v44 = vmul.f32 1.442695, %v1702_v63 }
 0x1cc   : > { %v1537_v13 = vpop.f32.mrf.mxu3  ;;  %v8233_v23 = vadd.f32 %v1508_v10, %v8214_v35  ;;  %v1453_v59 = vpop.f32.mrf.mxu0  ;;  %v1744_v16 = vmul.f32 1.442695, %v1703_v17 }
 0x1cd   : > { %v1482_v40 = vpop.f32.mrf.mxu1  ;;  %v8236_v43 = vadd.f32 %v1453_v59, %v8216_v4  ;;  %v8250_v5 = vadd.f32 %v1537_v13, %v8214_v35  ;;  %v8289_v13 = vpop.eup %6364  ;;  %6372 = vpow2.f32 %v1742_v44 }
 0x1ce   : > { %12409 = vst [vmem:[#allocation26_spill] sm:$0xff] %v8233_v23  ;;  %v8247_v2 = vmul.f32 100.0, %v8233_v23  ;;  %v8257_v51 = vadd.f32 %v1482_v40, %v8216_v4  ;;  %v8294_v24 = vpop.eup %6366  ;;  %6374 = vpow2.f32 %v1744_v16 }
 0x1cf   : > { %12411 = vst [vmem:[#allocation36_spill] sm:$0xff] %v8250_v5  ;;  %v8253_v36 = vmul.f32 100.0, %v8236_v43  ;;  %v8268_v37 = vmul.f32 100.0, %v8250_v5 }
 0x1d0   : > { %12410 = vst [vmem:[#allocation23_spill] sm:$0xff] %v8247_v2  ;;  %v1704_v52 = vmin.f32 %v8247_v2, 20.0  ;;  %v8278_v38 = vmul.f32 100.0, %v8257_v51 }
 0x1d1   : > { %12414 = vst [vmem:[#allocation39_spill] sm:$0xff] %v8268_v37  ;;  %v1710_v34 = vmin.f32 %v8253_v36, 20.0  ;;  %v1705_v50 = vmin.f32 %v8268_v37, 20.0  ;;  %vm2126_vm8 = vcmp.gt.f32.partialorder %v8253_v36, 20.0 }
 0x1d2   : > { %v1746_v59 = vmul.f32 1.442695, %v1704_v52  ;;  %v1711_v63 = vmin.f32 %v8278_v38, 20.0  ;;  %vm2127_vm11 = vcmp.gt.f32.partialorder %v8278_v38, 20.0 }
 0x1d3   : > { %v1511_v29 = vpop.f32.mrf.mxu2  ;;  %v1758_v3 = vmul.f32 1.442695, %v1710_v34  ;;  %v1748_v16 = vmul.f32 1.442695, %v1705_v50 }
 0x1d4   : > { %v1540_v45 = vpop.f32.mrf.mxu3  ;;  %v8262_v42 = vadd.f32 %v1511_v29, %v8216_v4  ;;  %v1456_v57 = vpop.f32.mrf.mxu0  ;;  %6376 = vpow2.f32 %v1746_v59  ;;  %v1760_v59 = vmul.f32 1.442695, %v1711_v63 }
 0x1d5   : > { %v8265_v30 = vadd.f32 %v1540_v45, %v8216_v4  ;;  %v1485_v49 = vpop.f32.mrf.mxu1  ;;  %v8272_v32 = vadd.f32 %v1456_v57, %v8192_v6  ;;  %v8301_v57 = vpop.eup %6368  ;;  %6378 = vpow2.f32 %v1758_v3 }
 0x1d6   : > { %12412 = vst [vmem:[#allocation37_spill] sm:$0xff] %v8262_v42  ;;  %v8275_v58 = vadd.f32 %v1485_v49, %v8192_v6  ;;  %v8281_v11 = vmul.f32 100.0, %v8262_v42  ;;  %v8316_v39 = vpop.eup %6370 }
 0x1d7   : > { %12413 = vst [vmem:[#allocation38_spill] sm:$0xff] %v8265_v30  ;;  %v8284_v28 = vmul.f32 100.0, %v8272_v32  ;;  %v8292_v40 = vmul.f32 100.0, %v8265_v30  ;;  %v8327_v3 = vpop.eup %6372 }
 0x1d8   : > { %v8287_v10 = vmul.f32 100.0, %v8275_v58  ;;  %v1712_v17 = vmin.f32 %v8281_v11, 20.0  ;;  %12415 = vst [vmem:[#allocation40_spill] sm:$0xff] %v8301_v57 }
 0x1d9   : > { %v1718_v54 = vmin.f32 %v8284_v28, 20.0  ;;  %v1713_v49 = vmin.f32 %v8292_v40, 20.0  ;;  %12418 = vst [vmem:[#allocation43_spill] sm:$0xff] %v8316_v39  ;;  %vm2134_vm3 = vcmp.gt.f32.partialorder %v8284_v28, 20.0 }
 0x1da   : > { %v1719_v18 = vmin.f32 %v8287_v10, 20.0  ;;  %v1762_v27 = vmul.f32 1.442695, %v1712_v17  ;;  %vm2135_vm4 = vcmp.gt.f32.partialorder %v8287_v10, 20.0 }
 0x1db   : > { %v1774_v29 = vmul.f32 1.442695, %v1718_v54  ;;  %v1514_v31 = vpop.f32.mrf.mxu2 }
 0x1dc   : > { %v1776_v45 = vmul.f32 1.442695, %v1719_v18  ;;  %v1543_v52 = vpop.f32.mrf.mxu3  ;;  %v8305_v34 = vadd.f32 %v1514_v31, %v8192_v6  ;;  %v1563_v44 = vpop.f32.mrf.mxu0 }
 0x1dd   : > { %v8308_v61 = vadd.f32 %v1543_v52, %v8192_v6  ;;  %v1592_v26 = vpop.f32.mrf.mxu1  ;;  %v8311_v54 = vadd.f32 %v1563_v44, %v8194_v9  ;;  %6380 = vpow2.f32 %v1774_v29  ;;  %v1764_v44 = vmul.f32 1.442695, %v1713_v49  ;;  %v8334_v29 = vpop.eup %6374 }
 0x1de   : > { %v8314_v18 = vadd.f32 %v1592_v26, %v8194_v9  ;;  %v8319_v31 = vmul.f32 100.0, %v8305_v34  ;;  %6382 = vpow2.f32 %v1776_v45  ;;  %v8336_v53 = vpop.eup %6376 }
 0x1df   : > { %12416 = vst [vmem:[#allocation41_spill] sm:$0xff] %v8311_v54  ;;  %v8322_v52 = vmul.f32 100.0, %v8308_v61  ;;  %v8325_v50 = vmul.f32 100.0, %v8311_v54  ;;  %6384 = vpow2.f32 %v1748_v16  ;;  %v8338_v45 = vpop.eup %6378 }
 0x1e0   : > { %12417 = vst [vmem:[#allocation42_spill] sm:$0xff] %v8314_v18  ;;  %v1720_v26 = vmin.f32 %v8319_v31, 20.0  ;;  %v8332_v63 = vmul.f32 100.0, %v8314_v18  ;;  %6386 = vpow2.f32 %v1760_v59  ;;  %v1934_v62 = vadd.f32 1.0, %v8338_v45 }
 0x1e1   : > { %12419 = vst [vmem:[#allocation44_spill] sm:$0xff] %v8325_v50  ;;  %v1721_v60 = vmin.f32 %v8322_v52, 20.0  ;;  %6388 = vpow2.f32 %v1762_v27  ;;  %v1698_v49 = vmin.f32 %v8325_v50, 20.0 }
 0x1e2   : > { %12420 = vst [vmem:[#allocation45_spill] sm:$0xff] %v8332_v63  ;;  %v1778_v17 = vmul.f32 1.442695, %v1720_v26  ;;  %6390 = vpow2.f32 %v1764_v44  ;;  %v1699_v1 = vmin.f32 %v8332_v63, 20.0 }
 0x1e3   : > { %v1780_v48 = vmul.f32 1.442695, %v1721_v60  ;;  %v1621_v7 = vpop.f32.mrf.mxu2  ;;  %v6381_v8 = vpop.eup %6380  ;;  %v1734_v18 = vmul.f32 1.442695, %v1698_v49 }
 0x1e4   : > { %v8343_v41 = vadd.f32 %v1621_v7, %v8194_v9  ;;  %v1566_v20 = vpop.f32.mrf.mxu0  ;;  %v8345_v16 = vpop.eup %6382  ;;  %6392 = vpow2.f32 %v1778_v17  ;;  %v2006_v27 = vadd.f32 1.0, %v6381_v8  ;;  %v2009_v44 = vmul.f32 -0.5, %v6381_v8 }
 0x1e5   : > { %v8348_v59 = vadd.f32 %v1566_v20, %v8214_v35  ;;  %v1595_v26 = vpop.f32.mrf.mxu1  ;;  %v8357_v7 = vpop.eup %6384  ;;  %6394 = vpow2.f32 %v1780_v48  ;;  %v2015_v20 = vadd.f32 1.0, %v8345_v16  ;;  %v1736_v63 = vmul.f32 1.442695, %v1699_v1 }
 0x1e6   : > { %12421 = vst [vmem:[#allocation46_spill] sm:$0xff] %v8343_v41  ;;  %v8351_v60 = vmul.f32 100.0, %v8343_v41  ;;  %v8354_v56 = vadd.f32 %v1595_v26, %v8214_v35  ;;  %v8363_v54 = vpop.eup %6386  ;;  %6396 = vlog2.f32 %v2006_v27  ;;  %v2012_v48 = vand.u32 2147483647, %v6381_v8 }
 0x1e7   : > { %12422 = vst [vmem:[#allocation47_spill] sm:$0xff] %v8348_v59  ;;  %v8360_v17 = vmul.f32 100.0, %v8348_v59  ;;  %v8369_v50 = vpop.eup %6388  ;;  %6398 = vlog2.f32 %v2015_v20  ;;  %v2018_v49 = vmul.f32 -0.5, %v8345_v16  ;;  %v2010_v47 = vadd.f32 1.0, %v2009_v44 }
 0x1e8   : > { %12423 = vst [vmem:[#allocation48_spill] sm:$0xff] %v8351_v60  ;;  %v1700_v41 = vmin.f32 %v8351_v60, 20.0  ;;  %v8367_v26 = vmul.f32 100.0, %v8354_v56  ;;  %v8373_v59 = vpop.eup %6390  ;;  %v1650_v22 = vpop.f32.mrf.mxu3  ;;  %6400 = vlog2.f32 %v1934_v62  ;;  %v1937_v27 = vmul.f32 -0.5, %v8338_v45 }
 0x1e9   : > { %12424 = vst [vmem:[#allocation49_spill] sm:$0xff] %v8354_v56  ;;  %v1706_v0 = vmin.f32 %v8360_v17, 20.0  ;;  %6402 = vpow2.f32 %v1734_v18  ;;  %v2019_v23 = vadd.f32 1.0, %v2018_v49  ;;  %vm8389_vm5 = vcmp.lt.f32.partialorder %v2012_v48, 0.0004427343 }
 0x1ea   : > { %12425 = vst [vmem:[#allocation50_spill] sm:$0xff] %v8360_v17  ;;  %v8375_v1 = vpop.eup %6392  ;;  %v1707_v60 = vmin.f32 %v8367_v26, 20.0  ;;  %6404 = vpow2.f32 %v1736_v63  ;;  %v1738_v17 = vmul.f32 1.442695, %v1700_v41  ;;  %v2021_v41 = vand.u32 2147483647, %v8345_v16 }
 0x1eb   : > { %12426 = vst [vmem:[#allocation51_spill] sm:$0xff] %v8367_v26  ;;  %v1624_v56 = vpop.f32.mrf.mxu2  ;;  %v8384_v62 = vpop.eup %6394  ;;  %v1750_v44 = vmul.f32 1.442695, %v1706_v0  ;;  %v2011_v0 = vmul.f32 %v6381_v8, %v2010_v47  ;;  %v1938_v2 = vadd.f32 1.0, %v1937_v27  ;;  %v1949_v36 = vand.u32 2147483647, %v8363_v54 }
 0x1ec   : > { %v8381_v20 = vadd.f32 %v1624_v56, %v8214_v35  ;;  %v1569_v5 = vpop.f32.mrf.mxu0  ;;  %v6397_v63 = vpop.eup %6396  ;;  %v8395_v56 = vadd.f32 %v1650_v22, %v8194_v9  ;;  %v1752_v37 = vmul.f32 1.442695, %v1707_v60  ;;  %6406 = vpow2.f32 %v1738_v17 }
 0x1ed   : > { %v8387_v18 = vadd.f32 %v1569_v5, %v8216_v4  ;;  %v1598_v26 = vpop.f32.mrf.mxu1  ;;  %v6399_v5 = vpop.eup %6398  ;;  %v2008_v39 = vmul.f32 0.6931472, %v6397_v63  ;;  %v2020_v22 = vmul.f32 %v8345_v16, %v2019_v23  ;;  %6408 = vpow2.f32 %v1750_v44 }
 0x1ee   : > { %12427 = vst [vmem:[#allocation52_spill] sm:$0xff] %v8381_v20  ;;  %v8398_v49 = vmul.f32 100.0, %v8381_v20  ;;  %v8401_v55 = vadd.f32 %v1598_v26, %v8216_v4  ;;  %v6401_v57 = vpop.eup %6400  ;;  %v2017_v9 = vmul.f32 0.6931472, %v6399_v5  ;;  %vm2022_vm6 = vcmp.lt.f32.partialorder %v2021_v41, 0.0004427343 }
 0x1ef   : > { %12430 = vst [vmem:[#allocation53_spill] sm:$0xff] %v8395_v56  ;;  %v8404_v48 = vmul.f32 100.0, %v8387_v18  ;;  %v8410_v20 = vpop.eup %6402  ;;  %v2014_v47 = vsel %vm8389_vm5, %v2011_v0, %v2008_v39  ;;  %v1940_v5 = vand.u32 2147483647, %v8338_v45  ;;  %6410 = vpow2.f32 %v1752_v37 }
 0x1f0   : > { %12431 = vst [vmem:[#allocation54_spill] sm:$0xff] %v8398_v49  ;;  %v8407_v42 = vmul.f32 100.0, %v8401_v55  ;;  %v1708_v8 = vmin.f32 %v8398_v49, 20.0  ;;  %v8415_v60 = vpop.eup %6404  ;;  %v1653_v26 = vpop.f32.mrf.mxu3  ;;  %v2102_v27 = vmul.f32 0.01, %v2014_v47  ;;  %v2023_v63 = vsel %vm2022_vm6, %v2020_v22, %v2017_v9 }
 0x1f1   : > { %v1714_v17 = vmin.f32 %v8404_v48, 20.0  ;;  %v8420_v23 = vadd.f32 %v1653_v26, %v8214_v35  ;;  %v2103_v44 = vmul.f32 0.01, %v2023_v63  ;;  %v1936_v49 = vmul.f32 0.6931472, %v6401_v57 }
 0x1f2   : > { %v1715_v30 = vmin.f32 %v8407_v42, 20.0  ;;  %v2166_v41 = vsel %vm2134_vm3, %v8272_v32, %v2102_v27  ;;  %v1939_v9 = vmul.f32 %v8338_v45, %v1938_v2  ;;  %v1754_v22 = vmul.f32 1.442695, %v1708_v8  ;;  %v8439_v26 = vpop.eup %6406 }
 0x1f3   : > { %12432 = vst [vmem:[#allocation55_spill] sm:$0xff] %v8420_v23  ;;  %v1627_v16 = vpop.f32.mrf.mxu2  ;;  %v8431_v37 = vmul.f32 100.0, %v8420_v23  ;;  %2226 = vmatpush.msra.mxu0 %v2166_v41  ;;  %v2167_v35 = vsel %vm2135_vm4, %v8275_v58, %v2103_v44  ;;  %v1766_v28 = vmul.f32 1.442695, %v1714_v17  ;;  %vm1941_vm7 = vcmp.lt.f32.partialorder %v1940_v5, 0.0004427343  ;;  %v8447_v45 = vpop.eup %6408 }
 0x1f4   : > { %v8424_v39 = vadd.f32 %v1627_v16, %v8216_v4  ;;  %v1572_v0 = vpop.f32.mrf.mxu0  ;;  %12435 = vst [vmem:[#allocation58_spill] sm:$0xff] %v8439_v26  ;;  %2255 = vmatpush.msra.mxu1 %v2167_v35  ;;  %v1942_v8 = vsel %vm1941_vm7, %v1939_v9, %v1936_v49  ;;  %v1943_v27 = vadd.f32 1.0, %v8363_v54  ;;  %v1768_v63 = vmul.f32 1.442695, %v1715_v30 }
 0x1f5   : > { %12434 = vst [vmem:[#allocation57_spill] sm:$0xff] %v8431_v37  ;;  %v8437_v57 = vadd.f32 %v1572_v0, %v8192_v6  ;;  %v1601_v47 = vpop.f32.mrf.mxu1  ;;  %v1709_v10 = vmin.f32 %v8431_v37, 20.0  ;;  %v2094_v16 = vmul.f32 0.01, %v1942_v8  ;;  %v1946_v44 = vmul.f32 -0.5, %v8363_v54  ;;  %v8456_v41 = vpop.eup %6410 }
 0x1f6   : > { %12433 = vst [vmem:[#allocation56_spill] sm:$0xff] %v8424_v39  ;;  %v8442_v32 = vmul.f32 100.0, %v8424_v39  ;;  %v8445_v2 = vadd.f32 %v1601_v47, %v8192_v6  ;;  %6412 = vlog2.f32 %v1943_v27  ;;  %v8465_v9 = vmul.f32 100.0, %v8395_v56 }
 0x1f7   : > { %v8451_v58 = vmul.f32 100.0, %v8437_v57  ;;  %6414 = vpow2.f32 %v1754_v22  ;;  %v1756_v0 = vmul.f32 1.442695, %v1709_v10  ;;  %v2158_v30 = vsel %vm2126_vm8, %v8236_v43, %v2094_v16 }
 0x1f8   : > { %12436 = vst [vmem:[#allocation59_spill] sm:$0xff] %v8442_v32  ;;  %v1716_v17 = vmin.f32 %v8442_v32, 20.0  ;;  %v8459_v5 = vmul.f32 100.0, %v8445_v2  ;;  %v1656_v35 = vpop.f32.mrf.mxu3  ;;  %6416 = vpow2.f32 %v1766_v28  ;;  %2227 = vmatpush.msra.mxu0 %v2158_v30  ;;  %v1947_v23 = vadd.f32 1.0, %v1946_v44 }
 0x1f9   : > { %v1722_v49 = vmin.f32 %v8451_v58, 20.0  ;;  %v8468_v47 = vadd.f32 %v1656_v35, %v8216_v4  ;;  %6418 = vpow2.f32 %v1768_v63  ;;  %v1862_v43 = vadd.f32 1.0, %v8327_v3 }
 0x1fa   : > { %v1770_v8 = vmul.f32 1.442695, %v1716_v17  ;;  %v1723_v10 = vmin.f32 %v8459_v5, 20.0  ;;  %v1865_v27 = vmul.f32 -0.5, %v8327_v3  ;;  %6420 = vpow2.f32 %v1756_v0 }
 0x1fb   : > { %12437 = vst [vmem:[#allocation60_spill] sm:$0xff] %v8468_v47  ;;  %v8472_v22 = vmul.f32 100.0, %v8468_v47  ;;  %v8477_v28 = vmul.f32 1.442695, %v1722_v49  ;;  %v1868_v4 = vand.u32 2147483647, %v8327_v3  ;;  %6422 = vlog2.f32 %v1862_v43 }
 0x1fc   : > { %v1871_v63 = vadd.f32 1.0, %v8334_v29  ;;  %v6413_v17 = vpop.eup %6412  ;;  %v1866_v44 = vadd.f32 1.0, %v1865_v27  ;;  %v1874_v35 = vmul.f32 -0.5, %v8334_v29  ;;  %v1948_v37 = vmul.f32 %v8363_v54, %v1947_v23 }
 0x1fd   : > { %12438 = vst [vmem:[#allocation61_spill] sm:$0xff] %v8472_v22  ;;  %v1717_v16 = vmin.f32 %v8472_v22, 20.0  ;;  %v8483_v30 = vpop.eup %6414  ;;  %v1945_v56 = vmul.f32 0.6931472, %v6413_v17  ;;  %vm1950_vm9 = vcmp.lt.f32.partialorder %v1949_v36, 0.0004427343 }
 0x1fe   : > { %6424 = vlog2.f32 %v1871_v63  ;;  %v8486_v0 = vpop.eup %6416  ;;  %v8488_v49 = vmul.f32 1.442695, %v1723_v10  ;;  %vm8491_vm12 = vcmp.lt.f32.partialorder %v1868_v4, 0.0004427343  ;;  %v1875_v17 = vadd.f32 1.0, %v1874_v35 }
 0x1ff   : > { %6426 = vpow2.f32 %v1770_v8  ;;  %v8495_v43 = vpop.eup %6418  ;;  %v1951_v27 = vsel %vm1950_vm9, %v1948_v37, %v1945_v56  ;;  %v1790_v54 = vadd.f32 1.0, %v8289_v13  ;;  %v1793_v23 = vmul.f32 -0.5, %v8289_v13 }
 0x200   : > { %v8500_v36 = vmul.f32 1.442695, %v1717_v16  ;;  %v2095_v8 = vmul.f32 0.01, %v1951_v27  ;;  %v1867_v10 = vmul.f32 %v8327_v3, %v1866_v44  ;;  %v1877_v4 = vand.u32 2147483647, %v8334_v29  ;;  %v8504_v63 = vpop.eup %6420 }
 0x201   : > { %12441 = vst [vmem:[#allocation62_spill] sm:$0xff] %v8504_v63  ;;  %6428 = vlog2.f32 %v1790_v54  ;;  %v1796_v22 = vand.u32 2147483647, %v8289_v13  ;;  %v1799_v56 = vadd.f32 1.0, %v8294_v24  ;;  %v1802_v37 = vmul.f32 -0.5, %v8294_v24  ;;  %v6423_v35 = vpop.eup %6422 }
 0x202   : > { %v2159_v16 = vsel %vm2127_vm11, %v8257_v51, %v2095_v8  ;;  %v1794_v27 = vadd.f32 1.0, %v1793_v23  ;;  %v2024_v3 = vadd.f32 1.0, %v8375_v1  ;;  %v1864_v39 = vmul.f32 0.6931472, %v6423_v35 }
 0x203   : > { %2256 = vmatpush.msra.mxu1 %v2159_v16  ;;  %v1876_v54 = vmul.f32 %v8334_v29, %v1875_v17  ;;  %6430 = vlog2.f32 %v1799_v56  ;;  %v1805_v32 = vand.u32 2147483647, %v8294_v24  ;;  %v1803_v38 = vadd.f32 1.0, %v1802_v37  ;;  %v1630_v16 = vpop.f32.mrf.mxu2 }
 0x204   : > { %v6425_v44 = vpop.eup %6424  ;;  %6432 = vlog2.f32 %v2024_v3  ;;  %v2027_v51 = vmul.f32 -0.5, %v8375_v1  ;;  %v1870_v23 = vsel %vm8491_vm12, %v1867_v10, %v1864_v39  ;;  %vm1878_vm0 = vcmp.lt.f32.partialorder %v1877_v4, 0.0004427343  ;;  %v1659_v10 = vpop.f32.mrf.mxu3 }
 0x205   : > { %v8516_v26 = vpop.eup %6426  ;;  %v1873_v63 = vmul.f32 0.6931472, %v6425_v44  ;;  %vm8522_vm1 = vcmp.lt.f32.partialorder %v1796_v22, 0.0004427343  ;;  %v2030_v29 = vand.u32 2147483647, %v8375_v1  ;;  %v1795_v35 = vmul.f32 %v8289_v13, %v1794_v27 }
 0x206   : > { %v2086_v17 = vmul.f32 0.01, %v1870_v23  ;;  %v2033_v37 = vadd.f32 1.0, %v8384_v62  ;;  %vm8530_vm3 = vcmp.lt.f32.partialorder %v1805_v32, 0.0004427343  ;;  %v2028_v47 = vadd.f32 1.0, %v2027_v51 }
 0x207   : > { %v1879_v56 = vsel %vm1878_vm0, %v1876_v54, %v1873_v63  ;;  %v6429_v3 = vpop.eup %6428  ;;  %v2036_v22 = vmul.f32 -0.5, %v8384_v62  ;;  %v1804_v63 = vmul.f32 %v8294_v24, %v1803_v38  ;;  %vm8542_vm4 = vcmp.lt.f32.partialorder %v2030_v29, 0.0004427343 }
 0x208   : > { %v2087_v44 = vmul.f32 0.01, %v1879_v56  ;;  %v2150_v4 = vsel %vm2118_vm13, %v8223_v33, %v2086_v17  ;;  %v1792_v13 = vmul.f32 0.6931472, %v6429_v3  ;;  %6434 = vlog2.f32 %v2033_v37 }
 0x209   : > { %v6431_v27 = vpop.eup %6430  ;;  %2228 = vmatpush.msra.mxu0 %v2150_v4  ;;  %v2037_v51 = vadd.f32 1.0, %v2036_v22  ;;  %v8547_v23 = vadd.f32 %v1630_v16, %v8192_v6  ;;  %v8552_v38 = vadd.f32 %v1659_v10, %v8192_v6  ;;  %v1952_v21 = vadd.f32 1.0, %v8369_v50  ;;  %v8568_v6 = vld [vmem:[%s11985_s5] sm:$0xff] }
 0x20a   : > { %v2151_v32 = vsel %vm2119_vm14, %v8227_v19, %v2087_v44  ;;  %v6433_v14 = vpop.eup %6432  ;;  %v1798_v33 = vsel %vm8522_vm1, %v1795_v35, %v1792_v13  ;;  %v1801_v24 = vmul.f32 0.6931472, %v6431_v27  ;;  %v2029_v17 = vmul.f32 %v8375_v1, %v2028_v47 }
 0x20b   : > { %2257 = vmatpush.msra.mxu1 %v2151_v32  ;;  %v2078_v19 = vmul.f32 0.01, %v1798_v33  ;;  %v2026_v29 = vmul.f32 0.6931472, %v6433_v14  ;;  %v2039_v56 = vand.u32 2147483647, %v8384_v62  ;;  %6436 = vlog2.f32 %v1952_v21 }
 0x20c   : > { %v1807_v37 = vsel %vm8530_vm3, %v1804_v63, %v1801_v24  ;;  %v8560_v16 = vmul.f32 100.0, %v8547_v23  ;;  %v8563_v8 = vmul.f32 100.0, %v8552_v38  ;;  %v1955_v44 = vmul.f32 -0.5, %v8369_v50 }
 0x20d   : > { %v2142_v1 = vsel %vm2110_vm15, %v8197_v12, %v2078_v19  ;;  %v2079_v35 = vmul.f32 0.01, %v1807_v37  ;;  %v2032_v3 = vsel %vm8542_vm4, %v2029_v17, %v2026_v29  ;;  %vm2136_vm5 = vcmp.gt.f32.partialorder %v8319_v31, 20.0 }
 0x20e   : > { %v6435_v39 = vpop.eup %6434  ;;  %2229 = vmatpush.msra.mxu0 %v2142_v1  ;;  %v2104_v47 = vmul.f32 0.01, %v2032_v3  ;;  %v2038_v22 = vmul.f32 %v8384_v62, %v2037_v51  ;;  %v1724_v10 = vmin.f32 %v8560_v16, 20.0  ;;  %v1725_v4 = vmin.f32 %v8563_v8, 20.0 }
 0x20f   : > { %v2143_v46 = vsel %vm2111_vm2, %v8200_v25, %v2079_v35  ;;  %v2035_v12 = vmul.f32 0.6931472, %v6435_v39  ;;  %6028 = vmatmul.msk.f32.vlgmr.msra.gmra.mxu0 %vm1417_vm10, %v8568_v6  ;;  %v1956_v13 = vadd.f32 1.0, %v1955_v44  ;;  %6438 = vpow2.f32 %v8477_v28  ;;  %v12448_v35 = vld [vmem:[#allocation37_spill] sm:$0xff]  ;;  %v12449_v44 = vld [vmem:[#allocation40_spill] sm:$0xff] }
 0x210   : > { %2258 = vmatpush.msra.mxu1 %v2143_v46  ;;  %v2168_v31 = vsel %vm2136_vm5, %v8305_v34, %v2104_v47  ;;  %vm2040_vm6 = vcmp.lt.f32.partialorder %v2039_v56, 0.0004427343  ;;  %v1958_v62 = vand.u32 2147483647, %v8369_v50  ;;  %6440 = vpow2.f32 %v8488_v49 }
 0x211   : > { %2284 = vmatpush.msra.mxu2 %v2168_v31  ;;  %v2041_v15 = vsel %vm2040_vm6, %v2038_v22, %v2035_v12  ;;  %6032 = vmatmul.msk.f32.vlgmr.msra.gmra.mxu1 %vm1417_vm10, %v8568_v6  ;;  %v1961_v25 = vadd.f32 1.0, %v8373_v59  ;;  %v1964_v63 = vmul.f32 -0.5, %v8373_v59  ;;  %v6437_v27 = vpop.eup %6436  ;;  %6442 = vpow2.f32 %v8500_v36  ;;  %v8602_v36 = vld [vmem:[%s11985_s5 + $0x8] sm:$0xff] }
 0x212   : > { %v2105_v28 = vmul.f32 0.01, %v2041_v15  ;;  %vm2137_vm7 = vcmp.gt.f32.partialorder %v8322_v52, 20.0  ;;  %v1786_v34 = vmul.f32 1.442695, %v1724_v10  ;;  %v1957_v49 = vmul.f32 %v8369_v50, %v1956_v13  ;;  %v12452_v10 = vld [vmem:[#allocation23_spill] sm:$0xff] }
 0x213   : > { %v1788_v32 = vmul.f32 1.442695, %v1725_v4  ;;  %v1954_v54 = vmul.f32 0.6931472, %v6437_v27  ;;  %v1880_v51 = vadd.f32 1.0, %v8336_v53  ;;  %6444 = vlog2.f32 %v1961_v25  ;;  %v12453_v13 = vld [vmem:[#allocation43_spill] sm:$0xff] }
 0x214   : > { %v2169_v14 = vsel %vm2137_vm7, %v8308_v61, %v2105_v28  ;;  %vm1959_vm8 = vcmp.lt.f32.partialorder %v1958_v62, 0.0004427343  ;;  %v1883_v33 = vmul.f32 -0.5, %v8336_v53  ;;  %v1965_v24 = vadd.f32 1.0, %v1964_v63  ;;  %v12456_v27 = vld [vmem:[#allocation39_spill] sm:$0xff] }
 0x215   : > { %2313 = vmatpush.msra.mxu3 %v2169_v14  ;;  %v1960_v52 = vsel %vm1959_vm8, %v1957_v49, %v1954_v54  ;;  %v1967_v21 = vand.u32 2147483647, %v8373_v59  ;;  %6446 = vlog2.f32 %v1880_v51  ;;  %v8605_v50 = vpop.eup %6438  ;;  %vm2128_vm9 = vcmp.gt.f32.partialorder %v8281_v11, 20.0  ;;  %v8647_v49 = vld [vmem:[%s11985_s5 + $0x10] sm:$0xff] }
 0x216   : > { %6448 = vpow2.f32 %v1786_v34  ;;  %v2096_v19 = vmul.f32 0.01, %v1960_v52  ;;  %v1889_v61 = vadd.f32 1.0, %v8357_v7  ;;  %v8609_v29 = vpop.eup %6440  ;;  %vm2129_vm11 = vcmp.gt.f32.partialorder %v8292_v40, 20.0 }
 0x217   : > { %6450 = vpow2.f32 %v1788_v32  ;;  %v1884_v17 = vadd.f32 1.0, %v1883_v33  ;;  %v1886_v56 = vand.u32 2147483647, %v8336_v53  ;;  %v1892_v37 = vmul.f32 -0.5, %v8357_v7  ;;  %6029 = vmatmul.msk.f32.gmra.mxu0 %vm1417_vm10, %v8602_v36  ;;  %v8616_v1 = vpop.eup %6442  ;;  %v12459_v33 = vld [vmem:[#allocation29_spill] sm:$0xff] }
 0x218   : > { %v2160_v3 = vsel %vm2128_vm9, %v12448_v35, %v2096_v19  ;;  %6452 = vlog2.f32 %v1889_v61  ;;  %v1895_v11 = vand.u32 2147483647, %v8357_v7  ;;  %v1808_v39 = vadd.f32 1.0, %v12449_v44 }
 0x219   : > { %2285 = vmatpush.msra.mxu2 %v2160_v3  ;;  %v1966_v47 = vmul.f32 %v8373_v59, %v1965_v24  ;;  %vm8622_vm12 = vcmp.lt.f32.partialorder %v1967_v21, 0.0004427343  ;;  %vm2120_vm13 = vcmp.gt.f32.partialorder %v12452_v10, 20.0  ;;  %v1811_v46 = vmul.f32 -0.5, %v12449_v44  ;;  %6033 = vmatmul.msk.f32.gmra.mxu1 %vm1417_vm10, %v8602_v36  ;;  %v6445_v12 = vpop.eup %6444 }
 0x21a   : > { %v1893_v4 = vadd.f32 1.0, %v1892_v37  ;;  %6454 = vlog2.f32 %v1808_v39  ;;  %v1817_v31 = vadd.f32 1.0, %v12453_v13  ;;  %v1820_v62 = vmul.f32 -0.5, %v12453_v13 }
 0x21b   : > { %v6447_v15 = vpop.eup %6446  ;;  %v1963_v59 = vmul.f32 0.6931472, %v6445_v12  ;;  %v1885_v25 = vmul.f32 %v8336_v53, %v1884_v17  ;;  %vm8633_vm14 = vcmp.lt.f32.partialorder %v1886_v56, 0.0004427343  ;;  %vm2121_vm15 = vcmp.gt.f32.partialorder %v12456_v27, 20.0 }
 0x21c   : > { %v8638_v28 = vpop.eup %6448  ;;  %v1882_v34 = vmul.f32 0.6931472, %v6447_v15  ;;  %vm8640_vm0 = vcmp.lt.f32.partialorder %v1895_v11, 0.0004427343  ;;  %v1812_v54 = vadd.f32 1.0, %v1811_v46  ;;  %6456 = vlog2.f32 %v1817_v31  ;;  %v12460_v11 = vld [vmem:[#allocation38_spill] sm:$0xff] }
 0x21d   : > { %v8649_v53 = vpop.eup %6450  ;;  %v1969_v51 = vsel %vm8622_vm12, %v1966_v47, %v1963_v59  ;;  %v1814_v14 = vand.u32 2147483647, %v12449_v44  ;;  %vm2112_vm1 = vcmp.gt.f32.partialorder %v12459_v33, 20.0  ;;  %v2042_v52 = vadd.f32 1.0, %v8605_v50  ;;  %v12461_v46 = vld [vmem:[#allocation26_spill] sm:$0xff] }
 0x21e   : > { %v6453_v24 = vpop.eup %6452  ;;  %v2097_v21 = vmul.f32 0.01, %v1969_v51  ;;  %v1888_v19 = vsel %vm8633_vm14, %v1885_v25, %v1882_v34  ;;  %v1894_v61 = vmul.f32 %v8357_v7, %v1893_v4  ;;  %v1821_v17 = vadd.f32 1.0, %v1820_v62  ;;  %v12462_v34 = vld [vmem:[#allocation36_spill] sm:$0xff]  ;;  %v8684_v51 = vld [vmem:[%s11985_s5 + $0x18] sm:$0xff] }
 0x21f   : > { %v2088_v56 = vmul.f32 0.01, %v1888_v19  ;;  %v1891_v37 = vmul.f32 0.6931472, %v6453_v24  ;;  %6030 = vmatmul.msk.f32.gmra.mxu0 %vm1417_vm10, %v8647_v49  ;;  %6458 = vlog2.f32 %v2042_v52  ;;  %v2045_v35 = vmul.f32 -0.5, %v8605_v50 }
 0x220   : > { %v6455_v3 = vpop.eup %6454  ;;  %v2161_v39 = vsel %vm2129_vm11, %v12460_v11, %v2097_v21  ;;  %v1813_v47 = vmul.f32 %v12449_v44, %v1812_v54  ;;  %v1823_v22 = vand.u32 2147483647, %v12453_v13  ;;  %v2051_v7 = vadd.f32 1.0, %v8609_v29 }
 0x221   : > { %2314 = vmatpush.msra.mxu3 %v2161_v39  ;;  %v2152_v12 = vsel %vm2120_vm13, %v12461_v46, %v2088_v56  ;;  %v1897_v4 = vsel %vm8640_vm0, %v1894_v61, %v1891_v37  ;;  %v1810_v31 = vmul.f32 0.6931472, %v6455_v3  ;;  %6034 = vmatmul.msk.f32.gmra.mxu1 %vm1417_vm10, %v8647_v49  ;;  %v2046_v40 = vadd.f32 1.0, %v2045_v35  ;;  %v12463_v61 = vld [vmem:[#allocation12_spill] sm:$0xff]  ;;  %v12464_v35 = vld [vmem:[#allocation7_spill] sm:$0xff]  ;;  %v12465_v3 = vld [vmem:[#allocation10_spill] sm:$0xff] }
 0x222   : > { %v6457_v62 = vpop.eup %6456  ;;  %2286 = vmatpush.msra.mxu2 %v2152_v12  ;;  %v2089_v44 = vmul.f32 0.01, %v1897_v4  ;;  %vm1815_vm2 = vcmp.lt.f32.partialorder %v1814_v14, 0.0004427343  ;;  %6460 = vlog2.f32 %v2051_v7  ;;  %v2054_v15 = vmul.f32 -0.5, %v8609_v29 }
 0x223   : > { %v1816_v59 = vsel %vm1815_vm2, %v1813_v47, %v1810_v31  ;;  %v1819_v25 = vmul.f32 0.6931472, %v6457_v62  ;;  %v1822_v10 = vmul.f32 %v12453_v13, %v1821_v17  ;;  %v2048_v63 = vand.u32 2147483647, %v8605_v50 }
 0x224   : > { %v2153_v32 = vsel %vm2121_vm15, %v12462_v34, %v2089_v44  ;;  %v2080_v54 = vmul.f32 0.01, %v1816_v59  ;;  %vm1824_vm3 = vcmp.lt.f32.partialorder %v1823_v22, 0.0004427343  ;;  %v2047_v14 = vmul.f32 %v8605_v50, %v2046_v40 }
 0x225   : > { %v6459_v52 = vpop.eup %6458  ;;  %2315 = vmatpush.msra.mxu3 %v2153_v32  ;;  %v1825_v24 = vsel %vm1824_vm3, %v1822_v10, %v1819_v25  ;;  %v2055_v21 = vadd.f32 1.0, %v2054_v15  ;;  %v1970_v13 = vadd.f32 1.0, %v8486_v0  ;;  %v1973_v19 = vmul.f32 -0.5, %v8486_v0 }
 0x226   : > { %v2144_v27 = vsel %vm2112_vm1, %v12463_v61, %v2080_v54  ;;  %v2081_v17 = vmul.f32 0.01, %v1825_v24  ;;  %v2044_v56 = vmul.f32 0.6931472, %v6459_v52  ;;  %v2057_v37 = vand.u32 2147483647, %v8609_v29 }
 0x227   : > { %2287 = vmatpush.msra.mxu2 %v2144_v27  ;;  %vm2113_vm4 = vcmp.gt.f32.partialorder %v12464_v35, 20.0  ;;  %6031 = vmatmul.msk.f32.gmra.mxu0 %vm1417_vm10, %v8684_v51  ;;  %vm2049_vm5 = vcmp.lt.f32.partialorder %v2048_v63, 0.0004427343  ;;  %6462 = vlog2.f32 %v1970_v13  ;;  %v1974_v39 = vadd.f32 1.0, %v1973_v19 }
 0x228   : > { %v6461_v50 = vpop.eup %6460  ;;  %v2145_v11 = vsel %vm2113_vm4, %v12465_v3, %v2081_v17  ;;  %6036 = vmatmul.msk.f32.vlgmr.msra.gmra.mxu2 %vm1417_vm10, %v8568_v6  ;;  %v2050_v33 = vsel %vm2049_vm5, %v2047_v14, %v2044_v56  ;;  %v1979_v47 = vadd.f32 1.0, %v8495_v43  ;;  %v2056_v46 = vmul.f32 %v8609_v29, %v2055_v21 }
 0x229   : > { %2316 = vmatpush.msra.mxu3 %v2145_v11  ;;  %6035 = vmatmul.msk.f32.gmra.mxu1 %vm1417_vm10, %v8684_v51  ;;  %v2106_v22 = vmul.f32 0.01, %v2050_v33  ;;  %v2053_v7 = vmul.f32 0.6931472, %v6461_v50  ;;  %v1982_v12 = vmul.f32 -0.5, %v8495_v43  ;;  %v1701_v4 = vmin.f32 %v8465_v9, 20.0 }
 0x22a   : > { %6040 = vmatmul.msk.f32.vlgmr.msra.gmra.mxu3 %vm1417_vm10, %v8568_v6  ;;  %vm2138_vm6 = vcmp.gt.f32.partialorder %v8451_v58, 20.0  ;;  %vm2058_vm7 = vcmp.lt.f32.partialorder %v2057_v37, 0.0004427343  ;;  %6464 = vlog2.f32 %v1979_v47  ;;  %v1976_v62 = vand.u32 2147483647, %v8486_v0 }
 0x22b   : > { %v2170_v31 = vsel %vm2138_vm6, %v8437_v57, %v2106_v22  ;;  %v2059_v40 = vsel %vm2058_vm7, %v2056_v46, %v2053_v7  ;;  %v1898_v44 = vadd.f32 1.0, %v8447_v45  ;;  %vm2139_vm8 = vcmp.gt.f32.partialorder %v8459_v5, 20.0 }
 0x22c   : > { %2342 = vmatpush.msrb.mxu0 %v2170_v31  ;;  %v2107_v29 = vmul.f32 0.01, %v2059_v40  ;;  %v1975_v15 = vmul.f32 %v8486_v0, %v1974_v39  ;;  %v1901_v59 = vmul.f32 -0.5, %v8447_v45  ;;  %v1983_v10 = vadd.f32 1.0, %v1982_v12 }
 0x22d   : > { %v6463_v25 = vpop.eup %6462  ;;  %v1985_v58 = vand.u32 2147483647, %v8495_v43  ;;  %6466 = vlog2.f32 %v1898_v44  ;;  %v1907_v57 = vadd.f32 1.0, %v8456_v41  ;;  %v1904_v32 = vand.u32 2147483647, %v8447_v45 }
 0x22e   : > { %v2171_v63 = vsel %vm2139_vm8, %v8445_v2, %v2107_v29  ;;  %v1972_v34 = vmul.f32 0.6931472, %v6463_v25  ;;  %v1910_v54 = vmul.f32 -0.5, %v8456_v41  ;;  %v8719_v14 = vmul.f32 1.442695, %v1701_v4  ;;  %v12468_v4 = vld [vmem:[#allocation50_spill] sm:$0xff] }
 0x22f   : > { %2371 = vmatpush.msrb.mxu1 %v2171_v63  ;;  %vm1977_vm9 = vcmp.lt.f32.partialorder %v1976_v62, 0.0004427343  ;;  %vm2130_vm11 = vcmp.gt.f32.partialorder %v8404_v48, 20.0  ;;  %6468 = vlog2.f32 %v1907_v57  ;;  %v1902_v52 = vadd.f32 1.0, %v1901_v59  ;;  %v12469_v62 = vld [vmem:[#allocation47_spill] sm:$0xff] }
 0x230   : > { %v6465_v5 = vpop.eup %6464  ;;  %6037 = vmatmul.msk.f32.gmra.mxu2 %vm1417_vm10, %v8602_v36  ;;  %v1978_v0 = vsel %vm1977_vm9, %v1975_v15, %v1972_v34  ;;  %v1826_v2 = vadd.f32 1.0, %v8410_v20  ;;  %v1829_v24 = vmul.f32 -0.5, %v8410_v20  ;;  %v1984_v19 = vmul.f32 %v8495_v43, %v1983_v10  ;;  %v12470_v25 = vld [vmem:[#allocation51_spill] sm:$0xff] }
 0x231   : > { %v2098_v21 = vmul.f32 0.01, %v1978_v0  ;;  %v1981_v13 = vmul.f32 0.6931472, %v6465_v5  ;;  %v1911_v61 = vadd.f32 1.0, %v1910_v54  ;;  %vm2131_vm13 = vcmp.gt.f32.partialorder %v8407_v42, 20.0 }
 0x232   : > { %6041 = vmatmul.msk.f32.gmra.mxu3 %vm1417_vm10, %v8602_v36  ;;  %vm1986_vm12 = vcmp.lt.f32.partialorder %v1985_v58, 0.0004427343  ;;  %vm8730_vm14 = vcmp.lt.f32.partialorder %v1904_v32, 0.0004427343  ;;  %6470 = vlog2.f32 %v1826_v2  ;;  %v1913_v43 = vand.u32 2147483647, %v8456_v41 }
 0x233   : > { %v6467_v17 = vpop.eup %6466  ;;  %v2162_v56 = vsel %vm2130_vm11, %v8387_v18, %v2098_v21  ;;  %v1987_v37 = vsel %vm1986_vm12, %v1984_v19, %v1981_v13  ;;  %v1835_v35 = vadd.f32 1.0, %v8415_v60  ;;  %v1903_v11 = vmul.f32 %v8447_v45, %v1902_v52  ;;  %v12472_v2 = vld [vmem:[#allocation44_spill] sm:$0xff]  ;;  %v12474_v19 = vld [vmem:[#allocation41_spill] sm:$0xff] }
 0x234   : > { %2343 = vmatpush.msrb.mxu0 %v2162_v56  ;;  %v2099_v50 = vmul.f32 0.01, %v1987_v37  ;;  %v1900_v3 = vmul.f32 0.6931472, %v6467_v17  ;;  %v1830_v33 = vadd.f32 1.0, %v1829_v24  ;;  %v1912_v47 = vmul.f32 %v8456_v41, %v1911_v61  ;;  %v12473_v24 = vld [vmem:[#allocation45_spill] sm:$0xff] }
 0x235   : > { %v6469_v39 = vpop.eup %6468  ;;  %v1832_v22 = vand.u32 2147483647, %v8410_v20  ;;  %6472 = vlog2.f32 %v1835_v35  ;;  %v1838_v48 = vmul.f32 -0.5, %v8415_v60  ;;  %v2060_v12 = vadd.f32 1.0, %v8638_v28 }
 0x236   : > { %v2163_v18 = vsel %vm2131_vm13, %v8401_v55, %v2099_v50  ;;  %v1906_v7 = vsel %vm8730_vm14, %v1903_v11, %v1900_v3  ;;  %v1909_v46 = vmul.f32 0.6931472, %v6469_v39  ;;  %vm2122_vm15 = vcmp.gt.f32.partialorder %v12468_v4, 20.0  ;;  %v12475_v3 = vld [vmem:[#allocation42_spill] sm:$0xff] }
 0x237   : > { %2372 = vmatpush.msrb.mxu1 %v2163_v18  ;;  %v2090_v45 = vmul.f32 0.01, %v1906_v7  ;;  %vm1914_vm0 = vcmp.lt.f32.partialorder %v1913_v43, 0.0004427343  ;;  %v2063_v41 = vmul.f32 -0.5, %v8638_v28  ;;  %v1831_v55 = vmul.f32 %v8410_v20, %v1830_v33  ;;  %v12471_v20 = vld [vmem:[#allocation49_spill] sm:$0xff] }
 0x238   : > { %v6471_v31 = vpop.eup %6470  ;;  %6038 = vmatmul.msk.f32.gmra.mxu2 %vm1417_vm10, %v8647_v49  ;;  %v1915_v40 = vsel %vm1914_vm0, %v1912_v47, %v1909_v46  ;;  %v1839_v42 = vadd.f32 1.0, %v1838_v48  ;;  %6474 = vlog2.f32 %v2060_v12  ;;  %v1841_v59 = vand.u32 2147483647, %v8415_v60 }
 0x239   : > { %v2154_v44 = vsel %vm2122_vm15, %v12469_v62, %v2090_v45  ;;  %v2091_v29 = vmul.f32 0.01, %v1915_v40  ;;  %v1828_v15 = vmul.f32 0.6931472, %v6471_v31  ;;  %vm2123_vm1 = vcmp.gt.f32.partialorder %v12470_v25, 20.0 }
 0x23a   : > { %6042 = vmatmul.msk.f32.gmra.mxu3 %vm1417_vm10, %v8647_v49  ;;  %2344 = vmatpush.msrb.mxu0 %v2154_v44  ;;  %vm1833_vm2 = vcmp.lt.f32.partialorder %v1832_v22, 0.0004427343  ;;  %v2064_v10 = vadd.f32 1.0, %v2063_v41  ;;  %v2069_v58 = vadd.f32 1.0, %v8649_v53  ;;  %v2066_v32 = vand.u32 2147483647, %v8638_v28 }
 0x23b   : > { %v6473_v57 = vpop.eup %6472  ;;  %v2155_v63 = vsel %vm2123_vm1, %v12471_v20, %v2091_v29  ;;  %v1834_v34 = vsel %vm1833_vm2, %v1831_v55, %v1828_v15  ;;  %v2072_v54 = vmul.f32 -0.5, %v8649_v53  ;;  %v1840_v52 = vmul.f32 %v8415_v60, %v1839_v42  ;;  %v12489_v41 = vld [vmem:[#allocation46_spill] sm:$0xff] }
 0x23c   : > { %2373 = vmatpush.msrb.mxu1 %v2155_v63  ;;  %v2082_v5 = vmul.f32 0.01, %v1834_v34  ;;  %v1837_v0 = vmul.f32 0.6931472, %v6473_v57  ;;  %6476 = vlog2.f32 %v2069_v58  ;;  %vm2114_vm3 = vcmp.gt.f32.partialorder %v12472_v2, 20.0  ;;  %v12479_v58 = vld [vmem:[#allocation58_spill] sm:$0xff] }
 0x23d   : > { %vm1842_vm4 = vcmp.lt.f32.partialorder %v1841_v59, 0.0004427343  ;;  %vm2115_vm5 = vcmp.gt.f32.partialorder %v12473_v24, 20.0  ;;  %v1988_v21 = vadd.f32 1.0, %v8516_v26  ;;  %v2065_v17 = vmul.f32 %v8638_v28, %v2064_v10 }
 0x23e   : > { %v6475_v13 = vpop.eup %6474  ;;  %v2146_v61 = vsel %vm2114_vm3, %v12474_v19, %v2082_v5  ;;  %v1843_v27 = vsel %vm1842_vm4, %v1840_v52, %v1837_v0  ;;  %v1991_v56 = vmul.f32 -0.5, %v8516_v26  ;;  %v2073_v60 = vadd.f32 1.0, %v2072_v54  ;;  %v12482_v0 = vld [vmem:[#allocation61_spill] sm:$0xff] }
 0x23f   : > { %2345 = vmatpush.msrb.mxu0 %v2146_v61  ;;  %v2083_v37 = vmul.f32 0.01, %v1843_v27  ;;  %v2062_v43 = vmul.f32 0.6931472, %v6475_v13  ;;  %6478 = vlog2.f32 %v1988_v21  ;;  %vm2067_vm6 = vcmp.lt.f32.partialorder %v2066_v32, 0.0004427343 }
 0x240   : > { %6039 = vmatmul.msk.f32.gmra.mxu2 %vm1417_vm10, %v8684_v51  ;;  %v2075_v35 = vand.u32 2147483647, %v8649_v53  ;;  %6044 = vmatmul.msk.f32.vlgmr.msrb.gmra.mxu0 %vm1417_vm10, %v8568_v6  ;;  %v1997_v50 = vadd.f32 1.0, %v8616_v1  ;;  %v2000_v28 = vmul.f32 -0.5, %v8616_v1  ;;  %6480 = vpow2.f32 %v8719_v14  ;;  %v12480_v32 = vld [vmem:[#allocation59_spill] sm:$0xff] }
 0x241   : > { %v2147_v11 = vsel %vm2115_vm5, %v12475_v3, %v2083_v37  ;;  %v2068_v33 = vsel %vm2067_vm6, %v2065_v17, %v2062_v43  ;;  %v1994_v39 = vand.u32 2147483647, %v8516_v26  ;;  %vm2140_vm7 = vcmp.gt.f32.partialorder %v8560_v16, 20.0 }
 0x242   : > { %v6477_v47 = vpop.eup %6476  ;;  %6043 = vmatmul.msk.f32.gmra.mxu3 %vm1417_vm10, %v8684_v51  ;;  %2374 = vmatpush.msrb.mxu1 %v2147_v11  ;;  %v2108_v22 = vmul.f32 0.01, %v2068_v33  ;;  %v1992_v48 = vadd.f32 1.0, %v1991_v56  ;;  %6482 = vlog2.f32 %v1997_v50  ;;  %v2074_v14 = vmul.f32 %v8649_v53, %v2073_v60  ;;  %v12478_v53 = vld [vmem:[#allocation62_spill] sm:$0xff]  ;;  %v12483_v56 = vld [vmem:[#allocation60_spill] sm:$0xff] }
 0x243   : > { %v2071_v18 = vmul.f32 0.6931472, %v6477_v47  ;;  %6048 = vmatmul.msk.f32.vlgmr.msrb.gmra.mxu1 %vm1417_vm10, %v8568_v6  ;;  %v2001_v7 = vadd.f32 1.0, %v2000_v28  ;;  %v1916_v46 = vadd.f32 1.0, %v8483_v30  ;;  %vm2076_vm8 = vcmp.lt.f32.partialorder %v2075_v35, 0.0004427343 }
 0x244   : > { %v2172_v12 = vsel %vm2140_vm7, %v8547_v23, %v2108_v22  ;;  %vm2141_vm9 = vcmp.gt.f32.partialorder %v8563_v8, 20.0  ;;  %v1919_v45 = vmul.f32 -0.5, %v8483_v30  ;;  %vm8792_vm11 = vcmp.lt.f32.partialorder %v1994_v39, 0.0004427343  ;;  %v12481_v8 = vld [vmem:[#allocation56_spill] sm:$0xff]  ;;  %v12484_v28 = vld [vmem:[#allocation54_spill] sm:$0xff] }
 0x245   : > { %v6479_v4 = vpop.eup %6478  ;;  %2400 = vmatpush.msrb.mxu2 %v2172_v12  ;;  %v2077_v16 = vsel %vm2076_vm8, %v2074_v14, %v2071_v18  ;;  %6484 = vlog2.f32 %v1916_v46  ;;  %v1925_v31 = vadd.f32 1.0, %v12478_v53  ;;  %v1993_v42 = vmul.f32 %v8516_v26, %v1992_v48  ;;  %v12485_v11 = vld [vmem:[#allocation52_spill] sm:$0xff]  ;;  %v12486_v48 = vld [vmem:[#allocation57_spill] sm:$0xff]  ;;  %v12487_v14 = vld [vmem:[#allocation55_spill] sm:$0xff] }
 0x246   : > { %v2109_v40 = vmul.f32 0.01, %v2077_v16  ;;  %v1990_v55 = vmul.f32 0.6931472, %v6479_v4  ;;  %v2003_v23 = vand.u32 2147483647, %v8616_v1  ;;  %v8799_v62 = vpop.eup %6480  ;;  %v2002_v44 = vmul.f32 %v8616_v1, %v2001_v7 }
 0x247   : > { %v1922_v29 = vand.u32 2147483647, %v8483_v30  ;;  %6486 = vlog2.f32 %v1925_v31  ;;  %v1928_v15 = vmul.f32 -0.5, %v12478_v53  ;;  %v1920_v26 = vadd.f32 1.0, %v1919_v45  ;;  %v12488_v16 = vld [vmem:[#allocation48_spill] sm:$0xff] }
 0x248   : > { %v6483_v59 = vpop.eup %6482  ;;  %v2173_v25 = vsel %vm2141_vm9, %v8552_v38, %v2109_v40  ;;  %v1996_v10 = vsel %vm8792_vm11, %v1993_v42, %v1990_v55  ;;  %v1844_v57 = vadd.f32 1.0, %v12479_v58  ;;  %6045 = vmatmul.msk.f32.gmra.mxu0 %vm1417_vm10, %v8602_v36  ;;  %v1847_v34 = vmul.f32 -0.5, %v12479_v58 }
 0x249   : > { %2429 = vmatpush.msrb.mxu3 %v2173_v25  ;;  %v2100_v1 = vmul.f32 0.01, %v1996_v10  ;;  %v1999_v20 = vmul.f32 0.6931472, %v6483_v59  ;;  %v1929_v63 = vadd.f32 1.0, %v1928_v15  ;;  %vm2132_vm12 = vcmp.gt.f32.partialorder %v12480_v32, 20.0  ;;  %v8860_v15 = vpop.permute.xlu1 %2199 }
 0x24a   : > { %vm2004_vm13 = vcmp.lt.f32.partialorder %v2003_v23, 0.0004427343  ;;  %6488 = vlog2.f32 %v1844_v57  ;;  %vm2133_vm14 = vcmp.gt.f32.partialorder %v12482_v0, 20.0  ;;  %v1931_v52 = vand.u32 2147483647, %v12478_v53  ;;  %v12490_v23 = vld [vmem:[#allocation53_spill] sm:$0xff] }
 0x24b   : > { %v6485_v38 = vpop.eup %6484  ;;  %v2164_v54 = vsel %vm2132_vm12, %v12481_v8, %v2100_v1  ;;  %v2005_v5 = vsel %vm2004_vm13, %v2002_v44, %v1999_v20  ;;  %6049 = vmatmul.msk.f32.gmra.mxu1 %vm1417_vm10, %v8602_v36  ;;  %v1921_v21 = vmul.f32 %v8483_v30, %v1920_v26  ;;  %vm1923_vm15 = vcmp.lt.f32.partialorder %v1922_v29, 0.0004427343  ;;  %v8867_v26 = vpop.permute.xlu0 %2189 }
 0x24c   : > { %2401 = vmatpush.msrb.mxu2 %v2164_v54  ;;  %v2101_v2 = vmul.f32 0.01, %v2005_v5  ;;  %v1918_v24 = vmul.f32 0.6931472, %v6485_v38  ;;  %v1930_v19 = vmul.f32 %v12478_v53, %v1929_v63  ;;  %v1848_v61 = vadd.f32 1.0, %v1847_v34  ;;  %v8875_v1 = vpop.permute.xlu2 %2194 }
 0x24d   : > { %v6487_v13 = vpop.eup %6486  ;;  %v1850_v27 = vand.u32 2147483647, %v12479_v58  ;;  %v1853_v17 = vadd.f32 1.0, %v8799_v62  ;;  %v1856_v35 = vmul.f32 -0.5, %v8799_v62  ;;  %vm1932_vm0 = vcmp.lt.f32.partialorder %v1931_v52, 0.0004427343 }
 0x24e   : > { %v2165_v37 = vsel %vm2133_vm14, %v12483_v56, %v2101_v2  ;;  %v1924_v43 = vsel %vm1923_vm15, %v1921_v21, %v1918_v24  ;;  %v1927_v60 = vmul.f32 0.6931472, %v6487_v13  ;;  %vm2124_vm1 = vcmp.gt.f32.partialorder %v12484_v28, 20.0 }
 0x24f   : > { %2430 = vmatpush.msrb.mxu3 %v2165_v37  ;;  %v2092_v50 = vmul.f32 0.01, %v1924_v43  ;;  %6490 = vlog2.f32 %v1853_v17  ;;  %v1849_v22 = vmul.f32 %v12479_v58, %v1848_v61  ;;  %vm2125_vm2 = vcmp.gt.f32.partialorder %v12486_v48, 20.0 }
 0x250   : > { %v6489_v30 = vpop.eup %6488  ;;  %v1933_v3 = vsel %vm1932_vm0, %v1930_v19, %v1927_v60  ;;  %6046 = vmatmul.msk.f32.gmra.mxu0 %vm1417_vm10, %v8647_v49  ;;  %vm1851_vm3 = vcmp.lt.f32.partialorder %v1850_v27, 0.0004427343  ;;  %v1857_v18 = vadd.f32 1.0, %v1856_v35  ;;  %v1859_v12 = vand.u32 2147483647, %v8799_v62 }
 0x251   : > { %v2156_v33 = vsel %vm2124_vm1, %v12485_v11, %v2092_v50  ;;  %v2093_v39 = vmul.f32 0.01, %v1933_v3  ;;  %v1846_v47 = vmul.f32 0.6931472, %v6489_v30  ;;  %vm2116_vm4 = vcmp.gt.f32.partialorder %v12488_v16, 20.0  ;;  %v8862_v25 = vpop.permute.xlu1 %2184 }
 0x252   : > { %2402 = vmatpush.msrb.mxu2 %v2156_v33  ;;  %v1858_v40 = vmul.f32 %v8799_v62, %v1857_v18  ;;  %vm1860_vm5 = vcmp.lt.f32.partialorder %v1859_v12, 0.0004427343  ;;  %vm2117_vm6 = vcmp.gt.f32.partialorder %v8465_v9, 20.0 }
 0x253   : > { %v2157_v7 = vsel %vm2125_vm2, %v12487_v14, %v2093_v39  ;;  %v1852_v46 = vsel %vm1851_vm3, %v1849_v22, %v1846_v47  ;;  %6050 = vmatmul.msk.f32.gmra.mxu1 %vm1417_vm10, %v8647_v49 }
 0x254   : > { %2431 = vmatpush.msrb.mxu3 %v2157_v7  ;;  %v2084_v45 = vmul.f32 0.01, %v1852_v46 }
 0x255   : > { %v6491_v4 = vpop.eup %6490 }
 0x256   : > { %v2148_v53 = vsel %vm2116_vm4, %v12489_v41, %v2084_v45  ;;  %v1855_v31 = vmul.f32 0.6931472, %v6491_v4 }
 0x257   : > { %2403 = vmatpush.msrb.mxu2 %v2148_v53 }
 0x258   : > { %v1861_v55 = vsel %vm1860_vm5, %v1858_v40, %v1855_v31  ;;  %6052 = vmatmul.msk.f32.vlgmr.msrb.gmra.mxu2 %vm1417_vm10, %v8568_v6  ;;  %6047 = vmatmul.msk.f32.gmra.mxu0 %vm1417_vm10, %v8684_v51 }
 0x259   : > { %v2085_v42 = vmul.f32 0.01, %v1861_v55 }
 0x25b   : > { %v2149_v44 = vsel %vm2117_vm6, %v12490_v23, %v2085_v42  ;;  %6051 = vmatmul.msk.f32.gmra.mxu1 %vm1417_vm10, %v8684_v51 }
 0x25c   : > { %2432 = vmatpush.msrb.mxu3 %v2149_v44 }
 0x25d   : > { %6056 = vmatmul.msk.f32.vlgmr.msrb.gmra.mxu3 %vm1417_vm10, %v8568_v6 }
 0x260   : > { %6053 = vmatmul.msk.f32.gmra.mxu2 %vm1417_vm10, %v8602_v36 }
 0x265   : > { %6057 = vmatmul.msk.f32.gmra.mxu3 %vm1417_vm10, %v8602_v36 }
 0x268   : > { %6054 = vmatmul.msk.f32.gmra.mxu2 %vm1417_vm10, %v8647_v49 }
 0x26d   : > { %6058 = vmatmul.msk.f32.gmra.mxu3 %vm1417_vm10, %v8647_v49 }
 0x270   : > { %6055 = vmatmul.msk.f32.gmra.mxu2 %vm1417_vm10, %v8684_v51 }
 0x275   : > { %6059 = vmatmul.msk.f32.gmra.mxu3 %vm1417_vm10, %v8684_v51 }
 0x28c   : > { %v2231_v9 = vpop.f32.mrf.mxu0 }
 0x28d   : > { %v8865_v10 = vadd.f32 %v2231_v9, %v8862_v25 }
 0x28e   : > { %v2260_v6 = vpop.f32.mrf.mxu1 }
 0x28f   : > { %v8870_v58 = vadd.f32 %v2260_v6, %v8862_v25  ;;  %v8878_v20 = vmul.f32 100.0, %v8865_v10 }
 0x291   : > { %v8884_v32 = vmul.f32 100.0, %v8870_v58  ;;  %v2478_v52 = vmin.f32 %v8878_v20, 20.0  ;;  %vm2894_vm1 = vcmp.gt.f32.partialorder %v8878_v20, 20.0 }
 0x293   : > { %v2479_v13 = vmin.f32 %v8884_v32, 20.0  ;;  %v2510_v60 = vmul.f32 1.442695, %v2478_v52 }
 0x294   : > { %v2234_v62 = vpop.f32.mrf.mxu0 }
 0x295   : > { %v8873_v51 = vadd.f32 %v2234_v62, %v8867_v26  ;;  %v2512_v28 = vmul.f32 1.442695, %v2479_v13  ;;  %6492 = vpow2.f32 %v2510_v60 }
 0x296   : > { %v2263_v29 = vpop.f32.mrf.mxu1 }
 0x297   : > { %v8881_v63 = vadd.f32 %v2263_v29, %v8867_v26  ;;  %v8890_v54 = vmul.f32 100.0, %v8873_v51  ;;  %6494 = vpow2.f32 %v2512_v28 }
 0x299   : > { %v8900_v2 = vmul.f32 100.0, %v8881_v63  ;;  %v2486_v27 = vmin.f32 %v8890_v54, 20.0  ;;  %vm2902_vm0 = vcmp.gt.f32.partialorder %v8890_v54, 20.0 }
 0x29b   : > { %v2487_v35 = vmin.f32 %v8900_v2, 20.0  ;;  %v2526_v33 = vmul.f32 1.442695, %v2486_v27  ;;  %vm2903_vm2 = vcmp.gt.f32.partialorder %v8900_v2, 20.0 }
 0x29c   : > { %v2237_v59 = vpop.f32.mrf.mxu0 }
 0x29d   : > { %v8887_v38 = vadd.f32 %v2237_v59, %v8875_v1  ;;  %v2528_v18 = vmul.f32 1.442695, %v2487_v35  ;;  %6496 = vpow2.f32 %v2526_v33 }
 0x29e   : > { %v2266_v36 = vpop.f32.mrf.mxu1 }
 0x29f   : > { %v8893_v5 = vadd.f32 %v2266_v36, %v8875_v1  ;;  %v8910_v61 = vmul.f32 100.0, %v8887_v38  ;;  %6498 = vpow2.f32 %v2528_v18 }
 0x2a1   : > { %v8917_v56 = vmul.f32 100.0, %v8893_v5  ;;  %v2494_v11 = vmin.f32 %v8910_v61, 20.0  ;;  %vm2910_vm13 = vcmp.gt.f32.partialorder %v8910_v61, 20.0 }
 0x2a3   : > { %v2495_v47 = vmin.f32 %v8917_v56, 20.0  ;;  %v2542_v45 = vmul.f32 1.442695, %v2494_v11  ;;  %vm2911_vm15 = vcmp.gt.f32.partialorder %v8917_v56, 20.0 }
 0x2a4   : > { %v2240_v34 = vpop.f32.mrf.mxu0 }
 0x2a5   : > { %v8896_v0 = vadd.f32 %v2240_v34, %v8860_v15  ;;  %v2544_v41 = vmul.f32 1.442695, %v2495_v47  ;;  %6500 = vpow2.f32 %v2542_v45 }
 0x2a6   : > { %v2269_v8 = vpop.f32.mrf.mxu1 }
 0x2a7   : > { %v8903_v21 = vadd.f32 %v2269_v8, %v8860_v15  ;;  %v8920_v43 = vmul.f32 100.0, %v8896_v0  ;;  %6502 = vpow2.f32 %v2544_v41 }
 0x2a9   : > { %v8927_v30 = vmul.f32 100.0, %v8903_v21  ;;  %v2502_v48 = vmin.f32 %v8920_v43, 20.0  ;;  %vm2918_vm8 = vcmp.gt.f32.partialorder %v8920_v43, 20.0 }
 0x2ab   : > { %v2289_v49 = vpop.f32.mrf.mxu2  ;;  %v2503_v7 = vmin.f32 %v8927_v30, 20.0  ;;  %v2558_v55 = vmul.f32 1.442695, %v2502_v48  ;;  %vm2919_vm9 = vcmp.gt.f32.partialorder %v8927_v30, 20.0 }
 0x2ac   : > { %v8907_v19 = vadd.f32 %v2289_v49, %v8862_v25  ;;  %v8969_v49 = vpop.eup %6492 }
 0x2ad   : > { %v2318_v57 = vpop.f32.mrf.mxu3  ;;  %v2560_v6 = vmul.f32 1.442695, %v2503_v7  ;;  %v8975_v52 = vpop.eup %6494  ;;  %6504 = vpow2.f32 %v2558_v55 }
 0x2ae   : > { %12491 = vst [vmem:[#allocation37_spill] sm:$0xff] %v8907_v19  ;;  %v8914_v17 = vadd.f32 %v2318_v57, %v8862_v25  ;;  %v8930_v3 = vmul.f32 100.0, %v8907_v19  ;;  %v8978_v13 = vpop.eup %6496 }
 0x2af   : > { %6506 = vpow2.f32 %v2560_v6  ;;  %v8988_v33 = vpop.eup %6498 }
 0x2b0   : > { %12492 = vst [vmem:[#allocation40_spill] sm:$0xff] %v8914_v17  ;;  %v8934_v39 = vmul.f32 100.0, %v8914_v17  ;;  %v2480_v12 = vmin.f32 %v8930_v3, 20.0 }
 0x2b1   : > { %12494 = vst [vmem:[#allocation43_spill] sm:$0xff] %v8930_v3 }
 0x2b2   : > { %12495 = vst [vmem:[#allocation39_spill] sm:$0xff] %v8934_v39  ;;  %v2481_v16 = vmin.f32 %v8934_v39, 20.0  ;;  %v2514_v62 = vmul.f32 1.442695, %v2480_v12 }
 0x2b3   : > { %v2292_v24 = vpop.f32.mrf.mxu2 }
 0x2b4   : > { %v8924_v50 = vadd.f32 %v2292_v24, %v8867_v26  ;;  %v2516_v57 = vmul.f32 1.442695, %v2481_v16  ;;  %6508 = vpow2.f32 %v2514_v62 }
 0x2b5   : > { %v2321_v37 = vpop.f32.mrf.mxu3 }
 0x2b6   : > { %12493 = vst [vmem:[#allocation23_spill] sm:$0xff] %v8924_v50  ;;  %v8938_v22 = vadd.f32 %v2321_v37, %v8867_v26  ;;  %v8942_v14 = vmul.f32 100.0, %v8924_v50  ;;  %6510 = vpow2.f32 %v2516_v57 }
 0x2b8   : > { %12496 = vst [vmem:[#allocation29_spill] sm:$0xff] %v8938_v22  ;;  %v8951_v53 = vmul.f32 100.0, %v8938_v22  ;;  %v2488_v9 = vmin.f32 %v8942_v14, 20.0 }
 0x2b9   : > { %12497 = vst [vmem:[#allocation38_spill] sm:$0xff] %v8942_v14 }
 0x2ba   : > { %12499 = vst [vmem:[#allocation36_spill] sm:$0xff] %v8951_v53  ;;  %v2489_v34 = vmin.f32 %v8951_v53, 20.0  ;;  %v2530_v27 = vmul.f32 1.442695, %v2488_v9 }
 0x2bb   : > { %v2295_v46 = vpop.f32.mrf.mxu2 }
 0x2bc   : > { %v8947_v4 = vadd.f32 %v2295_v46, %v8875_v1  ;;  %v2532_v47 = vmul.f32 1.442695, %v2489_v34  ;;  %v8991_v46 = vpop.eup %6500  ;;  %6512 = vpow2.f32 %v2530_v27 }
 0x2bd   : > { %v2324_v31 = vpop.f32.mrf.mxu3  ;;  %v2347_v40 = vpop.f32.mrf.mxu0  ;;  %v2721_v3 = vmul.f32 -0.5, %v8991_v46 }
 0x2be   : > { %12498 = vst [vmem:[#allocation26_spill] sm:$0xff] %v8947_v4  ;;  %v8954_v42 = vmul.f32 100.0, %v8947_v4  ;;  %v8957_v23 = vadd.f32 %v2324_v31, %v8875_v1  ;;  %v8960_v44 = vadd.f32 %v2347_v40, %v8862_v25  ;;  %v9002_v31 = vpop.eup %6502  ;;  %6514 = vpow2.f32 %v2532_v47 }
 0x2bf   : > { %v9004_v55 = vpop.eup %6504 }
 0x2c0   : > { %12500 = vst [vmem:[#allocation12_spill] sm:$0xff] %v8957_v23  ;;  %v8964_v29 = vmul.f32 100.0, %v8957_v23  ;;  %v8967_v59 = vmul.f32 100.0, %v8960_v44  ;;  %v2376_v36 = vpop.f32.mrf.mxu1  ;;  %v2496_v24 = vmin.f32 %v8954_v42, 20.0  ;;  %v9013_v34 = vpop.eup %6506 }
 0x2c1   : > { %12501 = vst [vmem:[#allocation7_spill] sm:$0xff] %v8960_v44  ;;  %v8973_v8 = vadd.f32 %v2376_v36, %v8862_v25  ;;  %v9018_v27 = vpop.eup %6508  ;;  %v2574_v44 = vadd.f32 1.0, %v8969_v49  ;;  %v2802_v17 = vmul.f32 -0.5, %v9013_v34 }
 0x2c2   : > { %12502 = vst [vmem:[#allocation10_spill] sm:$0xff] %v8967_v59  ;;  %v2497_v37 = vmin.f32 %v8964_v29, 20.0  ;;  %v2482_v28 = vmin.f32 %v8967_v59, 20.0  ;;  %v2546_v12 = vmul.f32 1.442695, %v2496_v24 }
 0x2c3   : > { %12503 = vst [vmem:[#allocation50_spill] sm:$0xff] %v8973_v8  ;;  %v8982_v60 = vmul.f32 100.0, %v8973_v8  ;;  %v2298_v35 = vpop.f32.mrf.mxu2 }
 0x2c4   : > { %v8986_v11 = vadd.f32 %v2298_v35, %v8860_v15  ;;  %v2548_v40 = vmul.f32 1.442695, %v2497_v37  ;;  %v2518_v9 = vmul.f32 1.442695, %v2482_v28  ;;  %12509 = vst [vmem:[#allocation41_spill] sm:$0xff] %v9018_v27  ;;  %6516 = vpow2.f32 %v2546_v12 }
 0x2c5   : > { %12504 = vst [vmem:[#allocation47_spill] sm:$0xff] %v8982_v60  ;;  %v2483_v48 = vmin.f32 %v8982_v60, 20.0  ;;  %v2327_v18 = vpop.f32.mrf.mxu3  ;;  %v2350_v7 = vpop.f32.mrf.mxu0 }
 0x2c6   : > { %v8994_v45 = vmul.f32 100.0, %v8986_v11  ;;  %v8997_v16 = vadd.f32 %v2327_v18, %v8860_v15  ;;  %v9000_v41 = vadd.f32 %v2350_v7, %v8867_v26  ;;  %v9022_v7 = vpop.eup %6510  ;;  %6518 = vpow2.f32 %v2548_v40 }
 0x2c7   : > { %v2520_v24 = vmul.f32 1.442695, %v2483_v48  ;;  %12510 = vst [vmem:[#allocation42_spill] sm:$0xff] %v9022_v7  ;;  %6520 = vpow2.f32 %v2518_v9  ;;  %v9027_v60 = vpop.eup %6512 }
 0x2c8   : > { %12505 = vst [vmem:[#allocation51_spill] sm:$0xff] %v8997_v16  ;;  %v2504_v6 = vmin.f32 %v8994_v45, 20.0  ;;  %v9008_v62 = vmul.f32 100.0, %v8997_v16  ;;  %v9011_v36 = vmul.f32 100.0, %v9000_v41  ;;  %v2379_v57 = vpop.f32.mrf.mxu1  ;;  %v9034_v59 = vpop.eup %6514 }
 0x2c9   : > { %12506 = vst [vmem:[#allocation49_spill] sm:$0xff] %v9000_v41  ;;  %v9016_v35 = vadd.f32 %v2379_v57, %v8867_v26  ;;  %6522 = vpow2.f32 %v2520_v24  ;;  %v2577_v24 = vmul.f32 -0.5, %v8969_v49  ;;  %v2793_v41 = vmul.f32 -0.5, %v9004_v55 }
 0x2ca   : > { %12507 = vst [vmem:[#allocation44_spill] sm:$0xff] %v9011_v36  ;;  %v2562_v37 = vmul.f32 1.442695, %v2504_v6  ;;  %v2505_v28 = vmin.f32 %v9008_v62, 20.0  ;;  %v2490_v18 = vmin.f32 %v9011_v36, 20.0  ;;  %v9036_v40 = vpop.eup %6516 }
 0x2cb   : > { %12508 = vst [vmem:[#allocation45_spill] sm:$0xff] %v9016_v35  ;;  %v9025_v8 = vmul.f32 100.0, %v9016_v35  ;;  %v2790_v35 = vadd.f32 1.0, %v9004_v55  ;;  %v9066_v22 = vadd.f32 1.0, %v2577_v24 }
 0x2cc   : > { %v2564_v47 = vmul.f32 1.442695, %v2505_v28  ;;  %v2534_v48 = vmul.f32 1.442695, %v2490_v18  ;;  %6524 = vpow2.f32 %v2562_v37  ;;  %12513 = vst [vmem:[#allocation59_spill] sm:$0xff] %v9034_v59  ;;  %v9042_v18 = vpop.eup %6518 }
 0x2cd   : > { %12511 = vst [vmem:[#allocation62_spill] sm:$0xff] %v9025_v8  ;;  %v2491_v57 = vmin.f32 %v9025_v8, 20.0  ;;  %v2353_v12 = vpop.f32.mrf.mxu0  ;;  %v2796_v8 = vand.u32 2147483647, %v9004_v55 }
 0x2ce   : > { %v9031_v6 = vadd.f32 %v2353_v12, %v8875_v1  ;;  %6526 = vpow2.f32 %v2564_v47  ;;  %v9049_v47 = vpop.eup %6520 }
 0x2cf   : > { %6528 = vpow2.f32 %v2534_v48  ;;  %v2536_v37 = vmul.f32 1.442695, %v2491_v57  ;;  %12516 = vst [vmem:[#allocation60_spill] sm:$0xff] %v9049_v47  ;;  %v9054_v36 = vpop.eup %6522  ;;  %vm9073_vm7 = vcmp.lt.f32.partialorder %v2796_v8, 0.0004427343  ;;  %v2803_v47 = vadd.f32 1.0, %v2802_v17 }
 0x2d0   : > { %12512 = vst [vmem:[#allocation58_spill] sm:$0xff] %v9031_v6  ;;  %v9039_v9 = vmul.f32 100.0, %v9031_v6  ;;  %v2382_v28 = vpop.f32.mrf.mxu1  ;;  %v2799_v6 = vadd.f32 1.0, %v9013_v34  ;;  %6530 = vlog2.f32 %v2574_v44  ;;  %v2722_v17 = vadd.f32 1.0, %v2721_v3 }
 0x2d1   : > { %v9045_v12 = vadd.f32 %v2382_v28, %v8875_v1  ;;  %12517 = vst [vmem:[#allocation54_spill] sm:$0xff] %v9054_v36  ;;  %6532 = vlog2.f32 %v2790_v35  ;;  %v2794_v28 = vadd.f32 1.0, %v2793_v41 }
 0x2d2   : > { %12514 = vst [vmem:[#allocation56_spill] sm:$0xff] %v9039_v9  ;;  %v2498_v48 = vmin.f32 %v9039_v9, 20.0  ;;  %v9060_v19 = vpop.eup %6524  ;;  %6534 = vlog2.f32 %v2799_v6 }
 0x2d3   : > { %12515 = vst [vmem:[#allocation61_spill] sm:$0xff] %v9045_v12  ;;  %v9057_v57 = vmul.f32 100.0, %v9045_v12  ;;  %6536 = vpow2.f32 %v2536_v37  ;;  %v9069_v12 = vadd.f32 1.0, %v8975_v52  ;;  %v2718_v37 = vadd.f32 1.0, %v8991_v46 }
 0x2d4   : > { %v9063_v9 = vpop.eup %6526  ;;  %v2550_v41 = vmul.f32 1.442695, %v2498_v48  ;;  %v2795_v24 = vmul.f32 %v9004_v55, %v2794_v28  ;;  %v2724_v28 = vand.u32 2147483647, %v8991_v46  ;;  %v2814_v20 = vand.u32 2147483647, %v9060_v19 }
 0x2d5   : > { %12518 = vst [vmem:[#allocation52_spill] sm:$0xff] %v9057_v57  ;;  %v2499_v39 = vmin.f32 %v9057_v57, 20.0  ;;  %v2356_v44 = vpop.f32.mrf.mxu0  ;;  %v9071_v35 = vpop.eup %6528  ;;  %v2805_v57 = vand.u32 2147483647, %v9013_v34  ;;  %6538 = vlog2.f32 %v2718_v37 }
 0x2d6   : > { %12519 = vst [vmem:[#allocation57_spill] sm:$0xff] %v9071_v35  ;;  %v9079_v6 = vadd.f32 %v2356_v44, %v8860_v15  ;;  %v9085_v35 = vpop.eup %6530  ;;  %v2727_v44 = vadd.f32 1.0, %v9002_v31  ;;  %vm9110_vm12 = vcmp.lt.f32.partialorder %v2724_v28, 0.0004427343 }
 0x2d7   : > { %v6533_v50 = vpop.eup %6532  ;;  %v2552_v23 = vmul.f32 1.442695, %v2499_v39  ;;  %v2804_v39 = vmul.f32 %v9013_v34, %v2803_v47  ;;  %vm2806_vm11 = vcmp.lt.f32.partialorder %v2805_v57, 0.0004427343  ;;  %v2733_v47 = vand.u32 2147483647, %v9002_v31 }
 0x2d8   : > { %12522 = vst [vmem:[#allocation55_spill] sm:$0xff] %v9079_v6  ;;  %v9089_v8 = vmul.f32 100.0, %v9079_v6  ;;  %v2385_v48 = vpop.f32.mrf.mxu1  ;;  %v6535_v53 = vpop.eup %6534  ;;  %v2792_v7 = vmul.f32 0.6931472, %v6533_v50  ;;  %6540 = vlog2.f32 %v2727_v44  ;;  %v2730_v6 = vmul.f32 -0.5, %v9002_v31 }
 0x2d9   : > { %v9093_v55 = vadd.f32 %v2385_v48, %v8860_v15  ;;  %v9098_v4 = vpop.eup %6536  ;;  %6542 = vpow2.f32 %v2550_v41  ;;  %v2801_v27 = vmul.f32 0.6931472, %v6535_v53  ;;  %v2723_v53 = vmul.f32 %v8991_v46, %v2722_v17 }
 0x2da   : > { %12523 = vst [vmem:[#allocation48_spill] sm:$0xff] %v9089_v8  ;;  %v2506_v14 = vmin.f32 %v9089_v8, 20.0  ;;  %v2798_v50 = vsel %vm9073_vm7, %v2795_v24, %v2792_v7  ;;  %6544 = vpow2.f32 %v2552_v23  ;;  %v2646_v7 = vadd.f32 1.0, %v8978_v13 }
 0x2db   : > { %12524 = vst [vmem:[#allocation46_spill] sm:$0xff] %v9098_v4  ;;  %v2405_v37 = vpop.f32.mrf.mxu2  ;;  %v9102_v48 = vmul.f32 100.0, %v9093_v55  ;;  %v2886_v8 = vmul.f32 0.01, %v2798_v50  ;;  %v2807_v16 = vsel %vm2806_vm11, %v2804_v39, %v2801_v27  ;;  %v2731_v4 = vadd.f32 1.0, %v2730_v6  ;;  %v6539_v59 = vpop.eup %6538 }
 0x2dc   : > { %v9105_v3 = vadd.f32 %v2405_v37, %v8862_v25  ;;  %v2566_v44 = vmul.f32 1.442695, %v2506_v14  ;;  %v2887_v41 = vmul.f32 0.01, %v2807_v16  ;;  %v2720_v36 = vmul.f32 0.6931472, %v6539_v59 }
 0x2dd   : > { %v2950_v14 = vsel %vm2918_vm8, %v8896_v0, %v2886_v8  ;;  %v2507_v23 = vmin.f32 %v9102_v48, 20.0  ;;  %v2649_v57 = vmul.f32 -0.5, %v8978_v13  ;;  %v2732_v24 = vmul.f32 %v9002_v31, %v2731_v4 }
 0x2de   : > { %v9116_v37 = vmul.f32 100.0, %v9105_v3  ;;  %v6541_v27 = vpop.eup %6540  ;;  %3010 = vmatpush.msra.mxu0 %v2950_v14  ;;  %v2951_v46 = vsel %vm2919_vm9, %v8903_v21, %v2887_v41  ;;  %6546 = vpow2.f32 %v2566_v44  ;;  %v2726_v0 = vsel %vm9110_vm12, %v2723_v53, %v2720_v36 }
 0x2df   : > { %v9127_v6 = vpop.eup %6542  ;;  %3039 = vmatpush.msra.mxu1 %v2951_v46  ;;  %v2729_v59 = vmul.f32 0.6931472, %v6541_v27  ;;  %v2878_v8 = vmul.f32 0.01, %v2726_v0  ;;  %vm2734_vm14 = vcmp.lt.f32.partialorder %v2733_v47, 0.0004427343  ;;  %6548 = vlog2.f32 %v2646_v7 }
 0x2e0   : > { %v2434_v16 = vpop.f32.mrf.mxu3  ;;  %v9136_v21 = vpop.eup %6544  ;;  %v2484_v30 = vmin.f32 %v9116_v37, 20.0  ;;  %v2655_v39 = vadd.f32 1.0, %v8988_v33  ;;  %v2650_v61 = vadd.f32 1.0, %v2649_v57  ;;  %v2568_v44 = vmul.f32 1.442695, %v2507_v23 }
 0x2e1   : > { %v9130_v43 = vadd.f32 %v2434_v16, %v8862_v25  ;;  %v2735_v28 = vsel %vm2734_vm14, %v2732_v24, %v2729_v59  ;;  %v2942_v4 = vsel %vm2910_vm13, %v8887_v38, %v2878_v8  ;;  %v2586_v41 = vmul.f32 -0.5, %v8975_v52 }
 0x2e2   : > { %v2879_v31 = vmul.f32 0.01, %v2735_v28  ;;  %3011 = vmatpush.msra.mxu0 %v2942_v4  ;;  %6550 = vlog2.f32 %v2655_v39  ;;  %v2652_v38 = vand.u32 2147483647, %v8978_v13  ;;  %v2658_v14 = vmul.f32 -0.5, %v8988_v33 }
 0x2e3   : > { %v9140_v17 = vmul.f32 100.0, %v9130_v43  ;;  %v2408_v25 = vpop.f32.mrf.mxu2  ;;  %v2522_v23 = vmul.f32 1.442695, %v2484_v30  ;;  %v2576_v56 = vmul.f32 0.6931472, %v9085_v35  ;;  %v2579_v27 = vmul.f32 %v8969_v49, %v9066_v22 }
 0x2e4   : > { %v9144_v50 = vadd.f32 %v2408_v25, %v8867_v26  ;;  %v9150_v53 = vpop.eup %6546  ;;  %v2943_v47 = vsel %vm2911_vm15, %v8893_v5, %v2879_v31  ;;  %v2651_v7 = vmul.f32 %v8978_v13, %v2650_v61  ;;  %v2659_v5 = vadd.f32 1.0, %v2658_v14  ;;  %v9191_v14 = vld [vmem:[%s11987_s7] sm:$0xff] }
 0x2e5   : > { %v2485_v36 = vmin.f32 %v9140_v17, 20.0  ;;  %3040 = vmatpush.msra.mxu1 %v2943_v47  ;;  %v6549_v16 = vpop.eup %6548  ;;  %v12527_v57 = vand.u32 2147483647, %v8969_v49  ;;  %6552 = vlog2.f32 %v9069_v12  ;;  %v2661_v22 = vand.u32 2147483647, %v8988_v33 }
 0x2e6   : > { %v9153_v34 = vmul.f32 100.0, %v9144_v50  ;;  %v2648_v35 = vmul.f32 0.6931472, %v6549_v16  ;;  %6554 = vpow2.f32 %v2568_v44  ;;  %vm2653_vm4 = vcmp.lt.f32.partialorder %v2652_v38, 0.0004427343 }
 0x2e7   : > { %vm2581_vm3 = vcmp.lt.f32.partialorder %v12527_v57, 0.0004427343  ;;  %v2660_v13 = vmul.f32 %v8988_v33, %v2659_v5  ;;  %v2587_v28 = vadd.f32 1.0, %v2586_v41  ;;  %v2808_v12 = vadd.f32 1.0, %v9060_v19 }
 0x2e8   : > { %v2437_v46 = vpop.f32.mrf.mxu3  ;;  %v2582_v59 = vsel %vm2581_vm3, %v2579_v27, %v2576_v56  ;;  %v2492_v24 = vmin.f32 %v9153_v34, 20.0  ;;  %v6551_v8 = vpop.eup %6550  ;;  %v2654_v30 = vsel %vm2653_vm4, %v2651_v7, %v2648_v35  ;;  %v2589_v31 = vand.u32 2147483647, %v8975_v52 }
 0x2e9   : > { %v9169_v0 = vadd.f32 %v2437_v46, %v8867_v26  ;;  %v2862_v49 = vmul.f32 0.01, %v2582_v59  ;;  %v2870_v39 = vmul.f32 0.01, %v2654_v30  ;;  %v2657_v26 = vmul.f32 0.6931472, %v6551_v8 }
 0x2ea   : > { %6556 = vpow2.f32 %v2522_v23  ;;  %v2524_v61 = vmul.f32 1.442695, %v2485_v36  ;;  %vm2662_vm5 = vcmp.lt.f32.partialorder %v2661_v22, 0.0004427343  ;;  %v2538_v23 = vmul.f32 1.442695, %v2492_v24 }
 0x2eb   : > { %v2411_v25 = vpop.f32.mrf.mxu2  ;;  %v9180_v44 = vmul.f32 100.0, %v9169_v0  ;;  %v6553_v33 = vpop.eup %6552  ;;  %v2934_v41 = vsel %vm2902_vm0, %v8873_v51, %v2870_v39  ;;  %v2663_v47 = vsel %vm2662_vm5, %v2660_v13, %v2657_v26  ;;  %6558 = vlog2.f32 %v2808_v12 }
 0x2ec   : > { %v9176_v4 = vadd.f32 %v2411_v25, %v8875_v1  ;;  %3012 = vmatpush.msra.mxu0 %v2934_v41  ;;  %v2871_v36 = vmul.f32 0.01, %v2663_v47  ;;  %v2585_v56 = vmul.f32 0.6931472, %v6553_v33  ;;  %v2588_v27 = vmul.f32 %v8975_v52, %v2587_v28  ;;  %v9194_v16 = vpop.eup %6554 }
 0x2ed   : > { %v2926_v46 = vsel %vm2894_vm1, %v8865_v10, %v2862_v49  ;;  %vm2590_vm6 = vcmp.lt.f32.partialorder %v2589_v31, 0.0004427343  ;;  %v2811_v7 = vmul.f32 -0.5, %v9060_v19  ;;  %v2493_v5 = vmin.f32 %v9180_v44, 20.0 }
 0x2ee   : > { %v9186_v38 = vmul.f32 100.0, %v9176_v4  ;;  %v2935_v57 = vsel %vm2903_vm2, %v8881_v63, %v2871_v36  ;;  %3013 = vmatpush.msra.mxu0 %v2926_v46  ;;  %v2591_v35 = vsel %vm2590_vm6, %v2588_v27, %v2585_v56  ;;  %v2817_v59 = vadd.f32 1.0, %v9063_v9 }
 0x2ef   : > { %3041 = vmatpush.msra.mxu1 %v2935_v57  ;;  %v2863_v22 = vmul.f32 0.01, %v2591_v35  ;;  %6060 = vmatmul.msk.f32.vlgmr.msra.gmra.mxu0 %vm1417_vm10, %v9191_v14  ;;  %v2812_v10 = vadd.f32 1.0, %v2811_v7  ;;  %6560 = vpow2.f32 %v2524_v61  ;;  %vm2895_vm7 = vcmp.gt.f32.partialorder %v8884_v32, 20.0 }
 0x2f0   : > { %v2500_v51 = vmin.f32 %v9186_v38, 20.0  ;;  %v2440_v54 = vpop.f32.mrf.mxu3  ;;  %v9212_v24 = vpop.eup %6556  ;;  %6562 = vpow2.f32 %v2538_v23  ;;  %v9222_v12 = vmul.f32 1.442695, %v2493_v5  ;;  %vm2815_vm8 = vcmp.lt.f32.partialorder %v2814_v20, 0.0004427343 }
 0x2f1   : > { %v9206_v52 = vadd.f32 %v2440_v54, %v8875_v1  ;;  %v2820_v1 = vmul.f32 -0.5, %v9063_v9  ;;  %v6559_v13 = vpop.eup %6558  ;;  %v2927_v30 = vsel %vm2895_vm7, %v8870_v58, %v2863_v22  ;;  %v2813_v28 = vmul.f32 %v9060_v19, %v2812_v10  ;;  %v9235_v19 = vld [vmem:[%s11987_s7 + $0x8] sm:$0xff] }
 0x2f2   : > { %v2554_v8 = vmul.f32 1.442695, %v2500_v51  ;;  %3042 = vmatpush.msra.mxu1 %v2927_v30  ;;  %v2810_v49 = vmul.f32 0.6931472, %v6559_v13  ;;  %6564 = vlog2.f32 %v2817_v59  ;;  %v2736_v39 = vadd.f32 1.0, %v9036_v40 }
 0x2f3   : > { %v9215_v63 = vmul.f32 100.0, %v9206_v52  ;;  %v2414_v2 = vpop.f32.mrf.mxu2  ;;  %6064 = vmatmul.msk.f32.vlgmr.msra.gmra.mxu1 %vm1417_vm10, %v9191_v14  ;;  %vm2920_vm9 = vcmp.gt.f32.partialorder %v8994_v45, 20.0  ;;  %v2821_v58 = vadd.f32 1.0, %v2820_v1  ;;  %v2739_v31 = vmul.f32 -0.5, %v9036_v40 }
 0x2f4   : > { %v9227_v32 = vadd.f32 %v2414_v2, %v8860_v15  ;;  %v2816_v26 = vsel %vm2815_vm8, %v2813_v28, %v2810_v49  ;;  %v2823_v33 = vand.u32 2147483647, %v9063_v9  ;;  %6566 = vlog2.f32 %v2736_v39  ;;  %v9277_v39 = vld [vmem:[%s11987_s7 + $0x10] sm:$0xff] }
 0x2f5   : > { %v2501_v25 = vmin.f32 %v9215_v63, 20.0  ;;  %v2888_v61 = vmul.f32 0.01, %v2816_v26  ;;  %v9241_v23 = vpop.eup %6560  ;;  %6568 = vpow2.f32 %v2554_v8  ;;  %v2742_v56 = vand.u32 2147483647, %v9036_v40  ;;  %v12540_v26 = vld [vmem:[#allocation36_spill] sm:$0xff] }
 0x2f6   : > { %v9239_v41 = vmul.f32 100.0, %v9227_v32  ;;  %v9247_v27 = vpop.eup %6562  ;;  %vm2921_vm11 = vcmp.gt.f32.partialorder %v9008_v62, 20.0  ;;  %v2745_v46 = vadd.f32 1.0, %v9042_v18  ;;  %v2740_v57 = vadd.f32 1.0, %v2739_v31 }
 0x2f7   : > { %v2556_v45 = vmul.f32 1.442695, %v2501_v25  ;;  %v2952_v51 = vsel %vm2920_vm9, %v8986_v11, %v2888_v61  ;;  %6061 = vmatmul.msk.f32.gmra.mxu0 %vm1417_vm10, %v9235_v19  ;;  %v2748_v35 = vmul.f32 -0.5, %v9042_v18  ;;  %v2751_v22 = vand.u32 2147483647, %v9042_v18  ;;  %v12533_v61 = vld [vmem:[#allocation51_spill] sm:$0xff] }
 0x2f8   : > { %v2443_v47 = vpop.f32.mrf.mxu3  ;;  %v2508_v54 = vmin.f32 %v9239_v41, 20.0  ;;  %v6565_v7 = vpop.eup %6564  ;;  %3068 = vmatpush.msra.mxu2 %v2952_v51  ;;  %6570 = vlog2.f32 %v2745_v46  ;;  %v2664_v10 = vadd.f32 1.0, %v9027_v60  ;;  %vm2824_vm12 = vcmp.lt.f32.partialorder %v2823_v33, 0.0004427343 }
 0x2f9   : > { %v9244_v36 = vadd.f32 %v2443_v47, %v8860_v15  ;;  %v2822_v15 = vmul.f32 %v9063_v9, %v2821_v58  ;;  %v2819_v11 = vmul.f32 0.6931472, %v6565_v7  ;;  %6572 = vpow2.f32 %v2556_v45  ;;  %v12532_v58 = vld [vmem:[#allocation59_spill] sm:$0xff] }
 0x2fa   : > { %vm9262_vm13 = vcmp.lt.f32.partialorder %v2742_v56, 0.0004427343  ;;  %vm2912_vm14 = vcmp.gt.f32.partialorder %v8954_v42, 20.0  ;;  %v6567_v9 = vpop.eup %6566  ;;  %v2570_v1 = vmul.f32 1.442695, %v2508_v54  ;;  %v2667_v13 = vmul.f32 -0.5, %v9027_v60 }
 0x2fb   : > { %v9257_v5 = vmul.f32 100.0, %v9244_v36  ;;  %v2825_v59 = vsel %vm2824_vm12, %v2822_v15, %v2819_v11  ;;  %6065 = vmatmul.msk.f32.gmra.mxu1 %vm1417_vm10, %v9235_v19  ;;  %v9271_v8 = vpop.eup %6568  ;;  %v2738_v25 = vmul.f32 0.6931472, %v6567_v9  ;;  %v2741_v49 = vmul.f32 %v9036_v40, %v2740_v57  ;;  %v12534_v57 = vld [vmem:[#allocation41_spill] sm:$0xff]  ;;  %v12535_v11 = vld [vmem:[#allocation26_spill] sm:$0xff] }
 0x2fc   : > { %v2889_v30 = vmul.f32 0.01, %v2825_v59  ;;  %v2749_v28 = vadd.f32 1.0, %v2748_v35  ;;  %vm9279_vm15 = vcmp.lt.f32.partialorder %v2751_v22, 0.0004427343  ;;  %vm2913_vm0 = vcmp.gt.f32.partialorder %v8964_v29, 20.0 }
 0x2fd   : > { %v2509_v2 = vmin.f32 %v9257_v5, 20.0  ;;  %6574 = vlog2.f32 %v2664_v10  ;;  %v2673_v31 = vadd.f32 1.0, %v12532_v58  ;;  %v2744_v40 = vsel %vm9262_vm13, %v2741_v49, %v2738_v25  ;;  %v12536_v10 = vld [vmem:[#allocation38_spill] sm:$0xff] }
 0x2fe   : > { %v2953_v33 = vsel %vm2921_vm11, %v12533_v61, %v2889_v30  ;;  %v2670_v47 = vand.u32 2147483647, %v9027_v60  ;;  %v2676_v45 = vmul.f32 -0.5, %v12532_v58  ;;  %v6571_v56 = vpop.eup %6570  ;;  %v2880_v54 = vmul.f32 0.01, %v2744_v40  ;;  %v12539_v30 = vld [vmem:[#allocation42_spill] sm:$0xff] }
 0x2ff   : > { %3097 = vmatpush.msra.mxu3 %v2953_v33  ;;  %v2572_v51 = vmul.f32 1.442695, %v2509_v2  ;;  %v2668_v46 = vadd.f32 1.0, %v2667_v13  ;;  %6576 = vlog2.f32 %v2673_v31  ;;  %6062 = vmatmul.msk.f32.gmra.mxu0 %vm1417_vm10, %v9277_v39  ;;  %v9294_v7 = vpop.eup %6572  ;;  %v2747_v62 = vmul.f32 0.6931472, %v6571_v56  ;;  %v12541_v40 = vld [vmem:[#allocation12_spill] sm:$0xff] }
 0x300   : > { %6578 = vpow2.f32 %v2570_v1  ;;  %v2750_v15 = vmul.f32 %v9042_v18, %v2749_v28  ;;  %v2592_v35 = vadd.f32 1.0, %v12534_v57  ;;  %v2944_v22 = vsel %vm2912_vm14, %v12535_v11, %v2880_v54  ;;  %v9317_v49 = vld [vmem:[%s11987_s7 + $0x18] sm:$0x1f] }
 0x301   : > { %vm2904_vm1 = vcmp.gt.f32.partialorder %v12536_v10, 20.0  ;;  %v2679_v20 = vand.u32 2147483647, %v12532_v58  ;;  %v2595_v9 = vmul.f32 -0.5, %v12534_v57  ;;  %3069 = vmatpush.msra.mxu2 %v2944_v22  ;;  %vm9306_vm2 = vcmp.lt.f32.partialorder %v2670_v47, 0.0004427343 }
 0x302   : > { %v2753_v59 = vsel %vm9279_vm15, %v2750_v15, %v2747_v62  ;;  %v2677_v18 = vadd.f32 1.0, %v2676_v45  ;;  %6580 = vlog2.f32 %v2592_v35  ;;  %v2669_v13 = vmul.f32 %v9027_v60, %v2668_v46  ;;  %v12544_v1 = vld [vmem:[#allocation23_spill] sm:$0xff] }
 0x303   : > { %v6575_v2 = vpop.eup %6574  ;;  %6582 = vpow2.f32 %v2572_v51  ;;  %v2881_v42 = vmul.f32 0.01, %v2753_v59  ;;  %v2601_v25 = vadd.f32 1.0, %v12539_v30  ;;  %6066 = vmatmul.msk.f32.gmra.mxu1 %vm1417_vm10, %v9277_v39  ;;  %vm2905_vm3 = vcmp.gt.f32.partialorder %v12540_v26, 20.0 }
 0x304   : > { %v2666_v28 = vmul.f32 0.6931472, %v6575_v2  ;;  %v2596_v31 = vadd.f32 1.0, %v2595_v9  ;;  %v2604_v61 = vmul.f32 -0.5, %v12539_v30  ;;  %vm9324_vm4 = vcmp.lt.f32.partialorder %v2679_v20, 0.0004427343 }
 0x305   : > { %v6577_v33 = vpop.eup %6576  ;;  %v2945_v60 = vsel %vm2913_vm0, %v12541_v40, %v2881_v42  ;;  %6584 = vlog2.f32 %v2601_v25  ;;  %v2826_v45 = vadd.f32 1.0, %v9150_v53  ;;  %v2678_v46 = vmul.f32 %v12532_v58, %v2677_v18  ;;  %v12545_v25 = vld [vmem:[#allocation43_spill] sm:$0xff] }
 0x306   : > { %v9329_v56 = vpop.eup %6578  ;;  %3098 = vmatpush.msra.mxu3 %v2945_v60  ;;  %v2672_v51 = vsel %vm9306_vm2, %v2669_v13, %v2666_v28  ;;  %v2675_v54 = vmul.f32 0.6931472, %v6577_v33  ;;  %v2598_v62 = vand.u32 2147483647, %v12534_v57  ;;  %v2607_v15 = vand.u32 2147483647, %v12539_v30 }
 0x307   : > { %v2872_v29 = vmul.f32 0.01, %v2672_v51  ;;  %6063 = vmatmul.msk.f32.gmra.mxu0 %vm1417_vm10, %v9317_v49  ;;  %6586 = vlog2.f32 %v2826_v45  ;;  %v2829_v35 = vmul.f32 -0.5, %v9150_v53  ;;  %v2597_v20 = vmul.f32 %v12534_v57, %v2596_v31  ;;  %v12546_v31 = vld [vmem:[#allocation29_spill] sm:$0xff]  ;;  %v12547_v40 = vld [vmem:[#allocation39_spill] sm:$0xff] }
 0x308   : > { %v6581_v11 = vpop.eup %6580  ;;  %v2681_v22 = vsel %vm9324_vm4, %v2678_v46, %v2675_v54  ;;  %v2605_v9 = vadd.f32 1.0, %v2604_v61  ;;  %v2835_v58 = vadd.f32 1.0, %v9194_v16  ;;  %vm2599_vm5 = vcmp.lt.f32.partialorder %v2598_v62, 0.0004427343 }
 0x309   : > { %v9343_v59 = vpop.eup %6582  ;;  %v2936_v18 = vsel %vm2904_vm1, %v12544_v1, %v2872_v29  ;;  %v2873_v2 = vmul.f32 0.01, %v2681_v22  ;;  %v2594_v42 = vmul.f32 0.6931472, %v6581_v11  ;;  %v2830_v13 = vadd.f32 1.0, %v2829_v35  ;;  %v12548_v29 = vld [vmem:[#allocation37_spill] sm:$0xff] }
 0x30a   : > { %3070 = vmatpush.msra.mxu2 %v2936_v18  ;;  %vm2896_vm6 = vcmp.gt.f32.partialorder %v12545_v25, 20.0  ;;  %6588 = vlog2.f32 %v2835_v58  ;;  %v2838_v28 = vmul.f32 -0.5, %v9194_v16  ;;  %vm2897_vm7 = vcmp.gt.f32.partialorder %v12547_v40, 20.0  ;;  %v12552_v40 = vld [vmem:[#allocation57_spill] sm:$0xff] }
 0x30b   : > { %v6585_v57 = vpop.eup %6584  ;;  %v2937_v61 = vsel %vm2905_vm3, %v12546_v31, %v2873_v2  ;;  %v2600_v33 = vsel %vm2599_vm5, %v2597_v20, %v2594_v42  ;;  %6067 = vmatmul.msk.f32.gmra.mxu1 %vm1417_vm10, %v9317_v49  ;;  %v2832_v10 = vand.u32 2147483647, %v9150_v53  ;;  %v2606_v45 = vmul.f32 %v12539_v30, %v2605_v9  ;;  %v12549_v30 = vld [vmem:[#allocation48_spill] sm:$0xff] }
 0x30c   : > { %3099 = vmatpush.msra.mxu3 %v2937_v61  ;;  %v2864_v60 = vmul.f32 0.01, %v2600_v33  ;;  %v2603_v47 = vmul.f32 0.6931472, %v6585_v57  ;;  %v2754_v51 = vadd.f32 1.0, %v9127_v6  ;;  %v2831_v26 = vmul.f32 %v9150_v53, %v2830_v13  ;;  %v12550_v2 = vld [vmem:[#allocation40_spill] sm:$0xff] }
 0x30d   : > { %v6587_v54 = vpop.eup %6586  ;;  %vm2608_vm8 = vcmp.lt.f32.partialorder %v2607_v15, 0.0004427343  ;;  %v2839_v46 = vadd.f32 1.0, %v2838_v28  ;;  %v2841_v62 = vand.u32 2147483647, %v9194_v16  ;;  %v2757_v20 = vmul.f32 -0.5, %v9127_v6 }
 0x30e   : > { %v2928_v35 = vsel %vm2896_vm6, %v12548_v29, %v2864_v60  ;;  %v2609_v11 = vsel %vm2608_vm8, %v2606_v45, %v2603_v47  ;;  %v2828_v22 = vmul.f32 0.6931472, %v6587_v54  ;;  %vm2833_vm9 = vcmp.lt.f32.partialorder %v2832_v10, 0.0004427343  ;;  %v12551_v61 = vld [vmem:[#allocation55_spill] sm:$0xff]  ;;  %v12553_v45 = vld [vmem:[#allocation56_spill] sm:$0xff] }
 0x30f   : > { %3071 = vmatpush.msra.mxu2 %v2928_v35  ;;  %v2865_v58 = vmul.f32 0.01, %v2609_v11  ;;  %vm2922_vm11 = vcmp.gt.f32.partialorder %v12549_v30, 20.0  ;;  %6590 = vlog2.f32 %v2754_v51  ;;  %v2760_v9 = vand.u32 2147483647, %v9127_v6 }
 0x310   : > { %v6589_v15 = vpop.eup %6588  ;;  %6068 = vmatmul.msk.f32.vlgmr.msra.gmra.mxu2 %vm1417_vm10, %v9191_v14  ;;  %v2834_v53 = vsel %vm2833_vm9, %v2831_v26, %v2828_v22  ;;  %v2763_v1 = vadd.f32 1.0, %v9136_v21  ;;  %v2766_v18 = vmul.f32 -0.5, %v9136_v21  ;;  %v2840_v28 = vmul.f32 %v9194_v16, %v2839_v46  ;;  %v12556_v46 = vld [vmem:[#allocation46_spill] sm:$0xff] }
 0x311   : > { %v2929_v42 = vsel %vm2897_vm7, %v12550_v2, %v2865_v58  ;;  %v2890_v13 = vmul.f32 0.01, %v2834_v53  ;;  %v2837_v25 = vmul.f32 0.6931472, %v6589_v15  ;;  %vm2842_vm12 = vcmp.lt.f32.partialorder %v2841_v62, 0.0004427343 }
 0x312   : > { %3100 = vmatpush.msra.mxu3 %v2929_v42  ;;  %v2758_v57 = vadd.f32 1.0, %v2757_v20  ;;  %6592 = vlog2.f32 %v2763_v1  ;;  %v2769_v31 = vand.u32 2147483647, %v9136_v21  ;;  %v2682_v60 = vadd.f32 1.0, %v12552_v40  ;;  %v12559_v58 = vld [vmem:[#allocation52_spill] sm:$0xff] }
 0x313   : > { %6072 = vmatmul.msk.f32.vlgmr.msra.gmra.mxu3 %vm1417_vm10, %v9191_v14  ;;  %v2954_v33 = vsel %vm2922_vm11, %v12551_v61, %v2890_v13  ;;  %v2843_v10 = vsel %vm2842_vm12, %v2840_v28, %v2837_v25  ;;  %v2685_v47 = vmul.f32 -0.5, %v12552_v40  ;;  %vm2923_vm13 = vcmp.gt.f32.partialorder %v9102_v48, 20.0  ;;  %v12560_v53 = vld [vmem:[#allocation60_spill] sm:$0xff] }
 0x314   : > { %3126 = vmatpush.msrb.mxu0 %v2954_v33  ;;  %v2891_v16 = vmul.f32 0.01, %v2843_v10  ;;  %vm2914_vm14 = vcmp.gt.f32.partialorder %v12553_v45, 20.0  ;;  %v2767_v51 = vadd.f32 1.0, %v2766_v18  ;;  %vm9385_vm15 = vcmp.lt.f32.partialorder %v2760_v9, 0.0004427343 }
 0x315   : > { %v6591_v54 = vpop.eup %6590  ;;  %6594 = vlog2.f32 %v2682_v60  ;;  %v2691_v62 = vadd.f32 1.0, %v12556_v46  ;;  %v2694_v29 = vmul.f32 -0.5, %v12556_v46  ;;  %v2759_v22 = vmul.f32 %v9127_v6, %v2758_v57  ;;  %v12561_v42 = vld [vmem:[#allocation44_spill] sm:$0xff]  ;;  %v12564_v57 = vld [vmem:[#allocation54_spill] sm:$0xff] }
 0x316   : > { %v2955_v35 = vsel %vm2923_vm13, %v9093_v55, %v2891_v16  ;;  %v2756_v11 = vmul.f32 0.6931472, %v6591_v54  ;;  %v2688_v48 = vand.u32 2147483647, %v12552_v40  ;;  %vm9394_vm0 = vcmp.lt.f32.partialorder %v2769_v31, 0.0004427343 }
 0x317   : > { %3155 = vmatpush.msrb.mxu1 %v2955_v35  ;;  %vm2915_vm1 = vcmp.gt.f32.partialorder %v12559_v58, 20.0  ;;  %v2686_v30 = vadd.f32 1.0, %v2685_v47  ;;  %6596 = vlog2.f32 %v2691_v62  ;;  %v2768_v6 = vmul.f32 %v9136_v21, %v2767_v51  ;;  %v12565_v21 = vld [vmem:[#allocation58_spill] sm:$0xff] }
 0x318   : > { %v6593_v15 = vpop.eup %6592  ;;  %6069 = vmatmul.msk.f32.gmra.mxu2 %vm1417_vm10, %v9235_v19  ;;  %v2762_v55 = vsel %vm9385_vm15, %v2759_v22, %v2756_v11  ;;  %v2610_v9 = vadd.f32 1.0, %v12560_v53  ;;  %v2613_v1 = vmul.f32 -0.5, %v12560_v53  ;;  %vm2906_vm2 = vcmp.gt.f32.partialorder %v12561_v42, 20.0  ;;  %v12566_v11 = vld [vmem:[#allocation61_spill] sm:$0xff] }
 0x319   : > { %v2882_v18 = vmul.f32 0.01, %v2762_v55  ;;  %v2765_v2 = vmul.f32 0.6931472, %v6593_v15  ;;  %v2695_v13 = vadd.f32 1.0, %v2694_v29  ;;  %v2619_v31 = vadd.f32 1.0, %v12564_v57 }
 0x31a   : > { %vm9407_vm3 = vcmp.lt.f32.partialorder %v2688_v48, 0.0004427343  ;;  %v2697_v28 = vand.u32 2147483647, %v12556_v46  ;;  %6598 = vlog2.f32 %v2610_v9  ;;  %v2687_v60 = vmul.f32 %v12552_v40, %v2686_v30  ;;  %v12567_v15 = vld [vmem:[#allocation62_spill] sm:$0xff] }
 0x31b   : > { %v6595_v61 = vpop.eup %6594  ;;  %6073 = vmatmul.msk.f32.gmra.mxu3 %vm1417_vm10, %v9235_v19  ;;  %v2946_v33 = vsel %vm2914_vm14, %v12565_v21, %v2882_v18  ;;  %v2771_v10 = vsel %vm9394_vm0, %v2768_v6, %v2765_v2  ;;  %v2622_v47 = vmul.f32 -0.5, %v12564_v57  ;;  %v2614_v54 = vadd.f32 1.0, %v2613_v1  ;;  %v12568_v1 = vld [vmem:[#allocation49_spill] sm:$0xff] }
 0x31c   : > { %3127 = vmatpush.msrb.mxu0 %v2946_v33  ;;  %v2883_v16 = vmul.f32 0.01, %v2771_v10  ;;  %v2684_v51 = vmul.f32 0.6931472, %v6595_v61  ;;  %6600 = vlog2.f32 %v2619_v31  ;;  %v2696_v62 = vmul.f32 %v12556_v46, %v2695_v13  ;;  %v12569_v21 = vld [vmem:[#allocation45_spill] sm:$0xff] }
 0x31d   : > { %v6597_v26 = vpop.eup %6596  ;;  %v2616_v29 = vand.u32 2147483647, %v12560_v53  ;;  %v2623_v35 = vadd.f32 1.0, %v2622_v47  ;;  %v2844_v45 = vadd.f32 1.0, %v9329_v56  ;;  %v2847_v20 = vmul.f32 -0.5, %v9329_v56  ;;  %v12570_v47 = vld [vmem:[#allocation10_spill] sm:$0xff] }
 0x31e   : > { %v2947_v22 = vsel %vm2915_vm1, %v12566_v11, %v2883_v16  ;;  %v2690_v40 = vsel %vm9407_vm3, %v2687_v60, %v2684_v51  ;;  %v2693_v48 = vmul.f32 0.6931472, %v6597_v26  ;;  %vm2698_vm4 = vcmp.lt.f32.partialorder %v2697_v28, 0.0004427343 }
 0x31f   : > { %3156 = vmatpush.msrb.mxu1 %v2947_v22  ;;  %v2874_v30 = vmul.f32 0.01, %v2690_v40  ;;  %vm2907_vm5 = vcmp.gt.f32.partialorder %v12567_v15, 20.0  ;;  %6602 = vlog2.f32 %v2844_v45  ;;  %v2615_v58 = vmul.f32 %v12560_v53, %v2614_v54  ;;  %v12573_v40 = vld [vmem:[#allocation50_spill] sm:$0xff] }
 0x320   : > { %v6599_v46 = vpop.eup %6598  ;;  %6070 = vmatmul.msk.f32.gmra.mxu2 %vm1417_vm10, %v9277_v39  ;;  %v2699_v55 = vsel %vm2698_vm4, %v2696_v62, %v2693_v48  ;;  %v2625_v6 = vand.u32 2147483647, %v12564_v57  ;;  %v2848_v9 = vadd.f32 1.0, %v2847_v20  ;;  %v2853_v25 = vadd.f32 1.0, %v9343_v59  ;;  %v12571_v62 = vld [vmem:[#allocation7_spill] sm:$0xff] }
 0x321   : > { %v2938_v18 = vsel %vm2906_vm2, %v12568_v1, %v2874_v30  ;;  %v2875_v2 = vmul.f32 0.01, %v2699_v55  ;;  %v2612_v13 = vmul.f32 0.6931472, %v6599_v46  ;;  %vm2617_vm6 = vcmp.lt.f32.partialorder %v2616_v29, 0.0004427343 }
 0x322   : > { %v6601_v28 = vpop.eup %6600  ;;  %3128 = vmatpush.msrb.mxu0 %v2938_v18  ;;  %v2624_v31 = vmul.f32 %v12564_v57, %v2623_v35  ;;  %v2850_v61 = vand.u32 2147483647, %v9329_v56  ;;  %v2856_v53 = vmul.f32 -0.5, %v9343_v59  ;;  %6604 = vlog2.f32 %v2853_v25 }
 0x323   : > { %6074 = vmatmul.msk.f32.gmra.mxu3 %vm1417_vm10, %v9277_v39  ;;  %v2939_v42 = vsel %vm2907_vm5, %v12569_v21, %v2875_v2  ;;  %v2618_v33 = vsel %vm2617_vm6, %v2615_v58, %v2612_v13  ;;  %v2621_v10 = vmul.f32 0.6931472, %v6601_v28  ;;  %6606 = vpow2.f32 %v9222_v12  ;;  %v12572_v12 = vld [vmem:[#allocation47_spill] sm:$0xff] }
 0x324   : > { %3157 = vmatpush.msrb.mxu1 %v2939_v42  ;;  %v2866_v60 = vmul.f32 0.01, %v2618_v33  ;;  %vm2898_vm7 = vcmp.gt.f32.partialorder %v12570_v47, 20.0  ;;  %vm2626_vm8 = vcmp.lt.f32.partialorder %v2625_v6, 0.0004427343  ;;  %v2849_v51 = vmul.f32 %v9329_v56, %v2848_v9 }
 0x325   : > { %v6603_v57 = vpop.eup %6602  ;;  %v2627_v16 = vsel %vm2626_vm8, %v2624_v31, %v2621_v10  ;;  %v2857_v54 = vadd.f32 1.0, %v2856_v53  ;;  %v2772_v26 = vadd.f32 1.0, %v9271_v8  ;;  %v2775_v11 = vmul.f32 -0.5, %v9271_v8 }
 0x326   : > { %v2930_v29 = vsel %vm2898_vm7, %v12571_v62, %v2866_v60  ;;  %v2867_v35 = vmul.f32 0.01, %v2627_v16  ;;  %v2846_v45 = vmul.f32 0.6931472, %v6603_v57  ;;  %vm2899_vm9 = vcmp.gt.f32.partialorder %v12572_v12, 20.0  ;;  %v9572_v57 = vpop.permute.xlu1 %2973 }
 0x327   : > { %3129 = vmatpush.msrb.mxu0 %v2930_v29  ;;  %vm2851_vm11 = vcmp.lt.f32.partialorder %v2850_v61, 0.0004427343  ;;  %v2859_v22 = vand.u32 2147483647, %v9343_v59  ;;  %6608 = vlog2.f32 %v2772_v26  ;;  %vm2924_vm12 = vcmp.gt.f32.partialorder %v9239_v41, 20.0 }
 0x328   : > { %v2931_v48 = vsel %vm2899_vm9, %v12573_v40, %v2867_v35  ;;  %6076 = vmatmul.msk.f32.vlgmr.msrb.gmra.mxu0 %vm1417_vm10, %v9191_v14  ;;  %6071 = vmatmul.msk.f32.gmra.mxu2 %vm1417_vm10, %v9317_v49  ;;  %v2852_v56 = vsel %vm2851_vm11, %v2849_v51, %v2846_v45  ;;  %v2781_v20 = vadd.f32 1.0, %v9294_v7  ;;  %v6605_v30 = vpop.eup %6604  ;;  %v2858_v46 = vmul.f32 %v9343_v59, %v2857_v54 }
 0x329   : > { %3158 = vmatpush.msrb.mxu1 %v2931_v48  ;;  %v2892_v15 = vmul.f32 0.01, %v2852_v56  ;;  %v2778_v55 = vand.u32 2147483647, %v9271_v8  ;;  %v2784_v58 = vmul.f32 -0.5, %v9294_v7  ;;  %v9466_v6 = vpop.eup %6606  ;;  %v2776_v1 = vadd.f32 1.0, %v2775_v11 }
 0x32a   : > { %6080 = vmatmul.msk.f32.vlgmr.msrb.gmra.mxu1 %vm1417_vm10, %v9191_v14  ;;  %v2855_v9 = vmul.f32 0.6931472, %v6605_v30  ;;  %6610 = vlog2.f32 %v2781_v20  ;;  %v2700_v41 = vadd.f32 1.0, %v9247_v27  ;;  %vm2860_vm13 = vcmp.lt.f32.partialorder %v2859_v22, 0.0004427343 }
 0x32b   : > { %6075 = vmatmul.msk.f32.gmra.mxu3 %vm1417_vm10, %v9317_v49  ;;  %v2956_v18 = vsel %vm2924_vm12, %v9227_v32, %v2892_v15  ;;  %v2703_v59 = vmul.f32 -0.5, %v9247_v27  ;;  %vm2925_vm14 = vcmp.gt.f32.partialorder %v9257_v5, 20.0  ;;  %v2787_v13 = vand.u32 2147483647, %v9294_v7 }
 0x32c   : > { %3184 = vmatpush.msrb.mxu2 %v2956_v18  ;;  %v2861_v2 = vsel %vm2860_vm13, %v2858_v46, %v2855_v9  ;;  %6612 = vlog2.f32 %v2700_v41  ;;  %vm9477_vm15 = vcmp.lt.f32.partialorder %v2778_v55, 0.0004427343  ;;  %v2785_v61 = vadd.f32 1.0, %v2784_v58 }
 0x32d   : > { %v6609_v25 = vpop.eup %6608  ;;  %v2893_v28 = vmul.f32 0.01, %v2861_v2  ;;  %v2709_v53 = vadd.f32 1.0, %v9466_v6  ;;  %v2777_v21 = vmul.f32 %v9271_v8, %v2776_v1  ;;  %v2704_v42 = vadd.f32 1.0, %v2703_v59 }
 0x32e   : > { %v2774_v32 = vmul.f32 0.6931472, %v6609_v25  ;;  %v2712_v33 = vmul.f32 -0.5, %v9466_v6  ;;  %vm2916_vm0 = vcmp.gt.f32.partialorder %v9186_v38, 20.0  ;;  %v2628_v10 = vadd.f32 1.0, %v9212_v24 }
 0x32f   : > { %v2957_v5 = vsel %vm2925_vm14, %v9244_v36, %v2893_v28  ;;  %6614 = vlog2.f32 %v2709_v53  ;;  %vm9489_vm1 = vcmp.lt.f32.partialorder %v2787_v13, 0.0004427343  ;;  %v2706_v8 = vand.u32 2147483647, %v9247_v27 }
 0x330   : > { %v6611_v60 = vpop.eup %6610  ;;  %3213 = vmatpush.msrb.mxu3 %v2957_v5  ;;  %v2780_v47 = vsel %vm9477_vm15, %v2777_v21, %v2774_v32  ;;  %6077 = vmatmul.msk.f32.gmra.mxu0 %vm1417_vm10, %v9235_v19  ;;  %v2631_v36 = vmul.f32 -0.5, %v9212_v24  ;;  %v2786_v54 = vmul.f32 %v9294_v7, %v2785_v61  ;;  %6616 = vlog2.f32 %v2628_v10 }
 0x331   : > { %v2884_v16 = vmul.f32 0.01, %v2780_v47  ;;  %v2783_v51 = vmul.f32 0.6931472, %v6611_v60  ;;  %v2705_v62 = vmul.f32 %v9247_v27, %v2704_v42  ;;  %v2713_v29 = vadd.f32 1.0, %v2712_v33 }
 0x332   : > { %v6613_v26 = vpop.eup %6612  ;;  %6081 = vmatmul.msk.f32.gmra.mxu1 %vm1417_vm10, %v9235_v19  ;;  %v2715_v35 = vand.u32 2147483647, %v9466_v6  ;;  %v2637_v45 = vadd.f32 1.0, %v9241_v23  ;;  %v2632_v22 = vadd.f32 1.0, %v2631_v36  ;;  %vm2707_vm2 = vcmp.lt.f32.partialorder %v2706_v8, 0.0004427343 }
 0x333   : > { %v2948_v11 = vsel %vm2916_vm0, %v9176_v4, %v2884_v16  ;;  %v2789_v12 = vsel %vm9489_vm1, %v2786_v54, %v2783_v51  ;;  %v2702_v7 = vmul.f32 0.6931472, %v6613_v26  ;;  %v2640_v27 = vmul.f32 -0.5, %v9241_v23  ;;  %v9580_v51 = vpop.permute.xlu0 %2978 }
 0x334   : > { %3185 = vmatpush.msrb.mxu2 %v2948_v11  ;;  %v2885_v40 = vmul.f32 0.01, %v2789_v12  ;;  %6618 = vlog2.f32 %v2637_v45  ;;  %vm2917_vm3 = vcmp.gt.f32.partialorder %v9215_v63, 20.0  ;;  %v2634_v20 = vand.u32 2147483647, %v9212_v24 }
 0x335   : > { %v6615_v48 = vpop.eup %6614  ;;  %v2708_v56 = vsel %vm2707_vm2, %v2705_v62, %v2702_v7  ;;  %v2714_v15 = vmul.f32 %v9466_v6, %v2713_v29  ;;  %vm2908_vm4 = vcmp.gt.f32.partialorder %v9153_v34, 20.0  ;;  %vm2716_vm5 = vcmp.lt.f32.partialorder %v2715_v35, 0.0004427343 }
 0x336   : > { %v2949_v38 = vsel %vm2917_vm3, %v9206_v52, %v2885_v40  ;;  %v2876_v4 = vmul.f32 0.01, %v2708_v56  ;;  %v2711_v30 = vmul.f32 0.6931472, %v6615_v48  ;;  %v6617_v46 = vpop.eup %6616  ;;  %v2633_v55 = vmul.f32 %v9212_v24, %v2632_v22 }
 0x337   : > { %3214 = vmatpush.msrb.mxu3 %v2949_v38  ;;  %v2641_v58 = vadd.f32 1.0, %v2640_v27  ;;  %v2630_v1 = vmul.f32 0.6931472, %v6617_v46  ;;  %v2643_v41 = vand.u32 2147483647, %v9241_v23  ;;  %vm2909_vm7 = vcmp.gt.f32.partialorder %v9180_v44, 20.0 }
 0x338   : > { %v2940_v9 = vsel %vm2908_vm4, %v9144_v50, %v2876_v4  ;;  %v2717_v63 = vsel %vm2716_vm5, %v2714_v15, %v2711_v30  ;;  %6078 = vmatmul.msk.f32.gmra.mxu0 %vm1417_vm10, %v9277_v39  ;;  %vm2635_vm6 = vcmp.lt.f32.partialorder %v2634_v20, 0.0004427343  ;;  %vm2900_vm8 = vcmp.gt.f32.partialorder %v9116_v37, 20.0 }
 0x339   : > { %3186 = vmatpush.msrb.mxu2 %v2940_v9  ;;  %v2877_v52 = vmul.f32 0.01, %v2717_v63  ;;  %v2636_v34 = vsel %vm2635_vm6, %v2633_v55, %v2630_v1  ;;  %v2642_v59 = vmul.f32 %v9241_v23, %v2641_v58  ;;  %vm2644_vm9 = vcmp.lt.f32.partialorder %v2643_v41, 0.0004427343  ;;  %v9548_v23 = vpop.permute.xlu2 %2983 }
 0x33a   : > { %v6619_v6 = vpop.eup %6618  ;;  %6082 = vmatmul.msk.f32.gmra.mxu1 %vm1417_vm10, %v9277_v39  ;;  %v2868_v50 = vmul.f32 0.01, %v2636_v34  ;;  %vm2901_vm11 = vcmp.gt.f32.partialorder %v9140_v17, 20.0  ;;  %vm3979_vm0 = vcmask 1044480  }
 0x33b   : > { %v2941_v24 = vsel %vm2909_vm7, %v9169_v0, %v2877_v52  ;;  %v2639_v18 = vmul.f32 0.6931472, %v6619_v6 }
 0x33c   : > { %3215 = vmatpush.msrb.mxu3 %v2941_v24  ;;  %v2932_v2 = vsel %vm2900_vm8, %v9105_v3, %v2868_v50 }
 0x33d   : > { %v2645_v13 = vsel %vm2644_vm9, %v2642_v59, %v2639_v18  ;;  %3187 = vmatpush.msrb.mxu2 %v2932_v2 }
 0x33e   : > { %v2869_v25 = vmul.f32 0.01, %v2645_v13  ;;  %6084 = vmatmul.msk.f32.vlgmr.msrb.gmra.mxu2 %vm1417_vm10, %v9191_v14 }
 0x340   : > { %v2933_v0 = vsel %vm2901_vm11, %v9130_v43, %v2869_v25  ;;  %6079 = vmatmul.msk.f32.gmra.mxu0 %vm1417_vm10, %v9317_v49 }
 0x341   : > { %3216 = vmatpush.msrb.mxu3 %v2933_v0  ;;  %v9564_v42 = vpop.permute.xlu2 %2968 }
 0x342   : > { %6088 = vmatmul.msk.f32.vlgmr.msrb.gmra.mxu3 %vm1417_vm10, %v9191_v14  ;;  %6083 = vmatmul.msk.f32.gmra.mxu1 %vm1417_vm10, %v9317_v49 }
 0x346   : > { %6085 = vmatmul.msk.f32.gmra.mxu2 %vm1417_vm10, %v9235_v19 }
 0x34a   : > { %6089 = vmatmul.msk.f32.gmra.mxu3 %vm1417_vm10, %v9235_v19 }
 0x34e   : > { %6086 = vmatmul.msk.f32.gmra.mxu2 %vm1417_vm10, %v9277_v39 }
 0x352   : > { %6090 = vmatmul.msk.f32.gmra.mxu3 %vm1417_vm10, %v9277_v39 }
 0x356   : > { %6087 = vmatmul.msk.f32.gmra.mxu2 %vm1417_vm10, %v9317_v49 }
 0x35a   : > { %6091 = vmatmul.msk.f32.gmra.mxu3 %vm1417_vm10, %v9317_v49 }
 0x36c   : > { %v3015_v3 = vpop.f32.mrf.mxu0 }
 0x36d   : > { %v9567_v5 = vadd.f32 %v3015_v3, %v9564_v42 }
 0x36f   : > { %v9575_v8 = vmul.f32 100.0, %v9567_v5 }
 0x370   : > { %v3044_v37 = vpop.f32.mrf.mxu1 }
 0x371   : > { %v9570_v10 = vadd.f32 %v3044_v37, %v9564_v42  ;;  %v3262_v45 = vmin.f32 %v9575_v8, 20.0 }
 0x373   : > { %12578 = vst [vmem:[#allocation53_spill] sm:$0xff] %v9570_v10  ;;  %v9583_v54 = vmul.f32 100.0, %v9570_v10  ;;  %v3294_v20 = vmul.f32 1.442695, %v3262_v45 }
 0x374   : > { %v3018_v43 = vpop.f32.mrf.mxu0 }
 0x375   : > { %v9578_v16 = vadd.f32 %v3018_v43, %v9572_v57  ;;  %v3263_v7 = vmin.f32 %v9583_v54, 20.0 }
 0x377   : > { %v9593_v12 = vmul.f32 100.0, %v9578_v16  ;;  %v3296_v46 = vmul.f32 1.442695, %v3263_v7 }
 0x378   : > { %v3047_v17 = vpop.f32.mrf.mxu1 }
 0x379   : > { %v9586_v29 = vadd.f32 %v3047_v17, %v9572_v57  ;;  %v3270_v30 = vmin.f32 %v9593_v12, 20.0  ;;  %vm3686_vm11 = vcmp.gt.f32.partialorder %v9593_v12, 20.0 }
 0x37b   : > { %v9600_v40 = vmul.f32 100.0, %v9586_v29  ;;  %v3310_v18 = vmul.f32 1.442695, %v3270_v30 }
 0x37c   : > { %v3021_v44 = vpop.f32.mrf.mxu0 }
 0x37d   : > { %v9589_v35 = vadd.f32 %v3021_v44, %v9580_v51  ;;  %v3271_v63 = vmin.f32 %v9600_v40, 20.0 }
 0x37f   : > { %v9603_v27 = vmul.f32 100.0, %v9589_v35  ;;  %v3312_v37 = vmul.f32 1.442695, %v3271_v63 }
 0x380   : > { %v3050_v14 = vpop.f32.mrf.mxu1 }
 0x381   : > { %v9597_v22 = vadd.f32 %v3050_v14, %v9580_v51  ;;  %v3278_v1 = vmin.f32 %v9603_v27, 20.0  ;;  %vm3694_vm3 = vcmp.gt.f32.partialorder %v9603_v27, 20.0 }
 0x383   : > { %v9610_v55 = vmul.f32 100.0, %v9597_v22  ;;  %v3326_v43 = vmul.f32 1.442695, %v3278_v1 }
 0x384   : > { %v3024_v19 = vpop.f32.mrf.mxu0 }
 0x385   : > { %v9551_v28 = vadd.f32 %v3024_v19, %v9548_v23  ;;  %v3279_v25 = vmin.f32 %v9610_v55, 20.0  ;;  %vm3695_vm8 = vcmp.gt.f32.partialorder %v9610_v55, 20.0 }
 0x387   : > { %v9554_v39 = vmul.f32 100.0, %v9551_v28 }
 0x388   : > { %v3053_v31 = vpop.f32.mrf.mxu1 }
 0x389   : > { %v3286_v61 = vmin.f32 %v9554_v39, 20.0  ;;  %v9558_v49 = vadd.f32 %v3053_v31, %v9548_v23  ;;  %vm3702_vm14 = vcmp.gt.f32.partialorder %v9554_v39, 20.0 }
 0x38b   : > { %v3342_v53 = vmul.f32 1.442695, %v3286_v61  ;;  %v9561_v32 = vmul.f32 100.0, %v9558_v49 }
 0x38d   : > { %6620 = vpow2.f32 %v3342_v53  ;;  %v3287_v21 = vmin.f32 %v9561_v32, 20.0  ;;  %vm3703_vm15 = vcmp.gt.f32.partialorder %v9561_v32, 20.0 }
 0x38f   : > { %v3344_v33 = vmul.f32 1.442695, %v3287_v21 }
 0x391   : > { %6622 = vpow2.f32 %v3344_v33 }
 0x393   : > { %v6621_v60 = vpop.eup %6620  ;;  %v3073_v47 = vpop.f32.mrf.mxu2 }
 0x394   : > { %v3574_v36 = vadd.f32 1.0, %v6621_v60  ;;  %v3577_v48 = vmul.f32 -0.5, %v6621_v60  ;;  %v9606_v38 = vadd.f32 %v3073_v47, %v9564_v42  ;;  %v3580_v24 = vand.u32 2147483647, %v6621_v60 }
 0x396   : > { %v3102_v26 = vpop.f32.mrf.mxu3  ;;  %6624 = vlog2.f32 %v3574_v36  ;;  %12579 = vst [vmem:[#allocation59_spill] sm:$0xff] %v9606_v38  ;;  %v3578_v41 = vadd.f32 1.0, %v3577_v48  ;;  %v9621_v34 = vmul.f32 100.0, %v9606_v38  ;;  %vm9634_vm12 = vcmp.lt.f32.partialorder %v3580_v24, 0.0004427343 }
 0x397   : > { %v6623_v62 = vpop.eup %6622  ;;  %v9613_v58 = vadd.f32 %v3102_v26, %v9564_v42  ;;  %v3328_v26 = vmul.f32 1.442695, %v3279_v25 }
 0x398   : > { %v3583_v11 = vadd.f32 1.0, %v6623_v62  ;;  %v3586_v4 = vmul.f32 -0.5, %v6623_v62  ;;  %12582 = vst [vmem:[#allocation26_spill] sm:$0xff] %v9621_v34  ;;  %v3589_v2 = vand.u32 2147483647, %v6623_v62  ;;  %v3579_v17 = vmul.f32 %v6621_v60, %v3578_v41 }
 0x399   : > { %12580 = vst [vmem:[#allocation51_spill] sm:$0xff] %v9613_v58  ;;  %v9628_v0 = vmul.f32 100.0, %v9613_v58  ;;  %v3264_v19 = vmin.f32 %v9621_v34, 20.0 }
 0x39a   : > { %6626 = vlog2.f32 %v3583_v11  ;;  %v3587_v50 = vadd.f32 1.0, %v3586_v4  ;;  %vm9643_vm13 = vcmp.lt.f32.partialorder %v3589_v2, 0.0004427343 }
 0x39b   : > { %v3076_v56 = vpop.f32.mrf.mxu2  ;;  %6628 = vpow2.f32 %v3294_v20  ;;  %12584 = vst [vmem:[#allocation42_spill] sm:$0xff] %v9628_v0 }
 0x39c   : > { %v6625_v15 = vpop.eup %6624  ;;  %v9618_v52 = vadd.f32 %v3076_v56, %v9572_v57  ;;  %6630 = vpow2.f32 %v3296_v46  ;;  %v3588_v61 = vmul.f32 %v6623_v62, %v3587_v50  ;;  %v3265_v62 = vmin.f32 %v9628_v0, 20.0 }
 0x39d   : > { %v3576_v59 = vmul.f32 0.6931472, %v6625_v15  ;;  %6632 = vpow2.f32 %v3310_v18  ;;  %v3298_v15 = vmul.f32 1.442695, %v3264_v19 }
 0x39e   : > { %v3105_v9 = vpop.f32.mrf.mxu3  ;;  %12581 = vst [vmem:[#allocation41_spill] sm:$0xff] %v9618_v52  ;;  %v9631_v44 = vmul.f32 100.0, %v9618_v52  ;;  %6634 = vpow2.f32 %v3312_v37  ;;  %v3300_v24 = vmul.f32 1.442695, %v3265_v62 }
 0x39f   : > { %v9624_v13 = vadd.f32 %v3105_v9, %v9572_v57  ;;  %v3582_v21 = vsel %vm9634_vm12, %v3579_v17, %v3576_v59  ;;  %6636 = vpow2.f32 %v3326_v43 }
 0x3a0   : > { %v6627_v6 = vpop.eup %6626  ;;  %12585 = vst [vmem:[#allocation36_spill] sm:$0xff] %v9631_v44  ;;  %v3272_v48 = vmin.f32 %v9631_v44, 20.0  ;;  %v3670_v46 = vmul.f32 0.01, %v3582_v21  ;;  %6638 = vpow2.f32 %v3328_v26 }
 0x3a1   : > { %12583 = vst [vmem:[#allocation38_spill] sm:$0xff] %v9624_v13  ;;  %v3585_v3 = vmul.f32 0.6931472, %v6627_v6  ;;  %v9648_v60 = vmul.f32 100.0, %v9624_v13  ;;  %v9650_v36 = vpop.eup %6628  ;;  %6640 = vpow2.f32 %v3298_v15 }
 0x3a2   : > { %v9665_v30 = vpop.eup %6630  ;;  %v3314_v18 = vmul.f32 1.442695, %v3272_v48  ;;  %v3734_v25 = vsel %vm3702_vm14, %v9551_v28, %v3670_v46  ;;  %6642 = vpow2.f32 %v3300_v24  ;;  %vm3687_vm14 = vcmp.gt.f32.partialorder %v9600_v40, 20.0 }
 0x3a3   : > { %v3079_v14 = vpop.f32.mrf.mxu2  ;;  %12591 = vst [vmem:[#allocation23_spill] sm:$0xff] %v9648_v60  ;;  %v3591_v45 = vsel %vm9643_vm13, %v3588_v61, %v3585_v3  ;;  %v3273_v1 = vmin.f32 %v9648_v60, 20.0  ;;  %v9677_v50 = vpop.eup %6632  ;;  %6092 = vmatpush.msk.msra.mxu0 %vm3979_vm0, %v3734_v25 }
 0x3a4   : > { %v9639_v53 = vadd.f32 %v3079_v14, %v9580_v51  ;;  %v3671_v63 = vmul.f32 0.01, %v3591_v45  ;;  %v9689_v43 = vpop.eup %6634  ;;  %6644 = vpow2.f32 %v3314_v18 }
 0x3a5   : > { %v3131_v47 = vpop.f32.mrf.mxu0  ;;  %v3316_v39 = vmul.f32 1.442695, %v3273_v1  ;;  %v9694_v31 = vpop.eup %6636 }
 0x3a6   : > { %12588 = vst [vmem:[#allocation12_spill] sm:$0xff] %v9639_v53  ;;  %v9656_v11 = vadd.f32 %v3131_v47, %v9564_v42  ;;  %v3108_v7 = vpop.f32.mrf.mxu3  ;;  %v9660_v20 = vmul.f32 100.0, %v9639_v53  ;;  %v3735_v17 = vsel %vm3703_vm15, %v9558_v49, %v3671_v63  ;;  %v9705_v26 = vpop.eup %6638  ;;  %v3508_v60 = vand.u32 2147483647, %v9694_v31 }
 0x3a7   : > { %v3160_v56 = vpop.f32.mrf.mxu1  ;;  %v9663_v4 = vadd.f32 %v3108_v7, %v9580_v51  ;;  %6097 = vmatpush.msk.msra.mxu1 %vm3979_vm0, %v3735_v17  ;;  %6646 = vpow2.f32 %v3316_v39  ;;  %v9720_v63 = vpop.eup %6640  ;;  %vm3678_vm15 = vcmp.gt.f32.partialorder %v9575_v8, 20.0 }
 0x3a8   : > { %12592 = vst [vmem:[#allocation43_spill] sm:$0xff] %v9656_v11  ;;  %v9668_v9 = vadd.f32 %v3160_v56, %v9564_v42  ;;  %v9672_v41 = vmul.f32 100.0, %v9656_v11  ;;  %v3280_v59 = vmin.f32 %v9660_v20, 20.0  ;;  %v9728_v25 = vpop.eup %6642  ;;  %vm3509_vm6 = vcmp.lt.f32.partialorder %v3508_v60, 0.0004427343 }
 0x3a9   : > { %12593 = vst [vmem:[#allocation29_spill] sm:$0xff] %v9660_v20  ;;  %v9675_v6 = vmul.f32 100.0, %v9663_v4 }
 0x3aa   : > { %12594 = vst [vmem:[#allocation39_spill] sm:$0xff] %v9663_v4  ;;  %v9684_v3 = vmul.f32 100.0, %v9668_v9  ;;  %v3266_v32 = vmin.f32 %v9672_v41, 20.0  ;;  %v3330_v33 = vmul.f32 1.442695, %v3280_v59  ;;  %v3361_v59 = vmul.f32 -0.5, %v9650_v36 }
 0x3ab   : > { %12595 = vst [vmem:[#allocation37_spill] sm:$0xff] %v9668_v9  ;;  %v3082_v2 = vpop.f32.mrf.mxu2  ;;  %v3281_v14 = vmin.f32 %v9675_v6, 20.0 }
 0x3ac   : > { %12596 = vst [vmem:[#allocation48_spill] sm:$0xff] %v9672_v41  ;;  %v9687_v37 = vadd.f32 %v3082_v2, %v9548_v23  ;;  %v3267_v62 = vmin.f32 %v9684_v3, 20.0  ;;  %v3302_v56 = vmul.f32 1.442695, %v3266_v32  ;;  %6648 = vpow2.f32 %v3330_v33  ;;  %v9731_v32 = vpop.eup %6644 }
 0x3ad   : > { %12597 = vst [vmem:[#allocation40_spill] sm:$0xff] %v9675_v6  ;;  %v3134_v19 = vpop.f32.mrf.mxu0  ;;  %v3332_v15 = vmul.f32 1.442695, %v3281_v14  ;;  %v3362_v33 = vadd.f32 1.0, %v3361_v59  ;;  %v9737_v9 = vpop.eup %6646 }
 0x3ae   : > { %12598 = vst [vmem:[#allocation55_spill] sm:$0xff] %v9684_v3  ;;  %v9697_v28 = vadd.f32 %v3134_v19, %v9572_v57  ;;  %v9700_v61 = vmul.f32 100.0, %v9687_v37  ;;  %v3111_v21 = vpop.f32.mrf.mxu3  ;;  %v3304_v17 = vmul.f32 1.442695, %v3267_v62 }
 0x3af   : > { %v3163_v47 = vpop.f32.mrf.mxu1  ;;  %v9703_v49 = vadd.f32 %v3111_v21, %v9548_v23  ;;  %12602 = vst [vmem:[#allocation52_spill] sm:$0xff] %v9720_v63  ;;  %v3358_v21 = vadd.f32 1.0, %v9650_v36 }
 0x3b0   : > { %12599 = vst [vmem:[#allocation57_spill] sm:$0xff] %v9697_v28  ;;  %v9709_v45 = vmul.f32 100.0, %v9697_v28  ;;  %v9712_v7 = vadd.f32 %v3163_v47, %v9572_v57  ;;  %v3288_v48 = vmin.f32 %v9700_v61, 20.0  ;;  %vm3704_vm1 = vcmp.gt.f32.partialorder %v9700_v61, 20.0 }
 0x3b1   : > { %v9718_v46 = vmul.f32 100.0, %v9703_v49  ;;  %12604 = vst [vmem:[#allocation44_spill] sm:$0xff] %v9728_v25 }
 0x3b2   : > { %12600 = vst [vmem:[#allocation56_spill] sm:$0xff] %v9709_v45  ;;  %v3274_v1 = vmin.f32 %v9709_v45, 20.0  ;;  %v9724_v24 = vmul.f32 100.0, %v9712_v7  ;;  %v3346_v18 = vmul.f32 1.442695, %v3288_v48 }
 0x3b3   : > { %12601 = vst [vmem:[#allocation46_spill] sm:$0xff] %v9712_v7  ;;  %v3289_v2 = vmin.f32 %v9718_v46, 20.0  ;;  %vm3705_vm4 = vcmp.gt.f32.partialorder %v9718_v46, 20.0 }
 0x3b4   : > { %12603 = vst [vmem:[#allocation60_spill] sm:$0xff] %v9724_v24  ;;  %v3275_v39 = vmin.f32 %v9724_v24, 20.0  ;;  %6650 = vpow2.f32 %v3346_v18  ;;  %v3318_v47 = vmul.f32 1.442695, %v3274_v1  ;;  %v3433_v18 = vmul.f32 -0.5, %v9677_v50  ;;  %v9747_v1 = vpop.eup %6648 }
 0x3b5   : > { %12605 = vst [vmem:[#allocation54_spill] sm:$0xff] %v9731_v32  ;;  %6652 = vpow2.f32 %v3302_v56  ;;  %v3348_v14 = vmul.f32 1.442695, %v3289_v2  ;;  %v3137_v19 = vpop.f32.mrf.mxu0  ;;  %v3514_v32 = vmul.f32 -0.5, %v9705_v26 }
 0x3b6   : > { %6654 = vpow2.f32 %v3332_v15  ;;  %v9735_v48 = vadd.f32 %v3137_v19, %v9580_v51  ;;  %12607 = vst [vmem:[#allocation61_spill] sm:$0xff] %v9737_v9  ;;  %v3320_v3 = vmul.f32 1.442695, %v3275_v39  ;;  %v3430_v15 = vadd.f32 1.0, %v9677_v50 }
 0x3b7   : > { %6656 = vpow2.f32 %v3348_v14  ;;  %v3166_v62 = vpop.f32.mrf.mxu1  ;;  %v9751_v39 = vadd.f32 1.0, %v9665_v30  ;;  %v9755_v19 = vmul.f32 %v9650_v36, %v3362_v33  ;;  %v3434_v7 = vadd.f32 1.0, %v3433_v18 }
 0x3b8   : > { %12606 = vst [vmem:[#allocation58_spill] sm:$0xff] %v9735_v48  ;;  %6658 = vpow2.f32 %v3304_v17  ;;  %v9741_v56 = vmul.f32 100.0, %v9735_v48  ;;  %v9744_v2 = vadd.f32 %v3166_v62, %v9580_v51  ;;  %v3439_v17 = vadd.f32 1.0, %v9689_v43 }
 0x3b9   : > { %6660 = vlog2.f32 %v3358_v21  ;;  %v9758_v62 = vmul.f32 -0.5, %v9665_v30  ;;  %v3436_v33 = vand.u32 2147483647, %v9677_v50  ;;  %v9784_v13 = vmul.f32 %v9677_v50, %v3434_v7 }
 0x3ba   : > { %12608 = vst [vmem:[#allocation62_spill] sm:$0xff] %v9741_v56  ;;  %v6651_v14 = vpop.eup %6650  ;;  %6662 = vpow2.f32 %v3318_v47  ;;  %v3282_v28 = vmin.f32 %v9741_v56, 20.0  ;;  %v9766_v47 = vmul.f32 100.0, %v9744_v2  ;;  %v3505_v7 = vmul.f32 -0.5, %v9694_v31 }
 0x3bb   : > { %12609 = vst [vmem:[#allocation49_spill] sm:$0xff] %v9744_v2  ;;  %v9760_v11 = vpop.eup %6652  ;;  %6664 = vpow2.f32 %v3320_v3  ;;  %v3592_v41 = vadd.f32 1.0, %v6651_v14  ;;  %v3595_v21 = vmul.f32 -0.5, %v6651_v14  ;;  %v3598_v48 = vand.u32 2147483647, %v6651_v14 }
 0x3bc   : > { %12610 = vst [vmem:[#allocation45_spill] sm:$0xff] %v9760_v11  ;;  %v9762_v59 = vpop.eup %6654  ;;  %6666 = vlog2.f32 %v3430_v15  ;;  %v3502_v3 = vadd.f32 1.0, %v9694_v31  ;;  %v3442_v11 = vmul.f32 -0.5, %v9689_v43  ;;  %v3506_v4 = vadd.f32 1.0, %v3505_v7 }
 0x3bd   : > { %12611 = vst [vmem:[#allocation10_spill] sm:$0xff] %v9762_v59  ;;  %v9769_v24 = vpop.eup %6656  ;;  %6668 = vlog2.f32 %v3592_v41  ;;  %v3140_v45 = vpop.f32.mrf.mxu0  ;;  %v3596_v0 = vadd.f32 1.0, %v3595_v21  ;;  %vm9795_vm2 = vcmp.lt.f32.partialorder %v3598_v48, 0.0004427343  ;;  %vm9821_vm5 = vcmp.lt.f32.partialorder %v3436_v33, 0.0004427343 }
 0x3be   : > { %12612 = vst [vmem:[#allocation7_spill] sm:$0xff] %v9766_v47  ;;  %v9773_v18 = vpop.eup %6658  ;;  %v3601_v58 = vadd.f32 1.0, %v9769_v24  ;;  %v3604_v56 = vmul.f32 -0.5, %v9769_v24  ;;  %6670 = vlog2.f32 %v3439_v17  ;;  %v9781_v41 = vadd.f32 %v3140_v45, %v9548_v23 }
 0x3bf   : > { %12613 = vst [vmem:[#allocation47_spill] sm:$0xff] %v9773_v18  ;;  %v9778_v2 = vpop.eup %6660  ;;  %v3169_v38 = vpop.f32.mrf.mxu1  ;;  %6672 = vlog2.f32 %v3502_v3  ;;  %v3334_v18 = vmul.f32 1.442695, %v3282_v28  ;;  %v3283_v17 = vmin.f32 %v9766_v47, 20.0  ;;  %v9809_v48 = vadd.f32 1.0, %v3442_v11 }
 0x3c0   : > { %v9786_v34 = vpop.eup %6662  ;;  %6674 = vlog2.f32 %v3601_v58  ;;  %v9791_v15 = vadd.f32 %v3169_v38, %v9548_v23  ;;  %v3605_v3 = vadd.f32 1.0, %v3604_v56  ;;  %v9800_v50 = vmul.f32 100.0, %v9781_v41  ;;  %v3746_v56 = vld [vmem:[%s11990_s10] sm:$0xff] }
 0x3c1   : > { %12614 = vst [vmem:[#allocation50_spill] sm:$0xff] %v9786_v34  ;;  %v9793_v21 = vpop.eup %6664  ;;  %v3607_v58 = vand.u32 2147483647, %v9769_v24  ;;  %v3189_v28 = vpop.f32.mrf.mxu2  ;;  %v3511_v38 = vadd.f32 1.0, %v9705_v26  ;;  %v3597_v25 = vmul.f32 %v6651_v14, %v3596_v0  ;;  %3807 = vperm.xlu1 %6231, %v3746_v56   ;;  %3756 = vperm.xlu0 %6229, %v3746_v56   ;;  %v3336_v53 = vmul.f32 1.442695, %v3283_v17 }
 0x3c2   : > { %12615 = vst [vmem:[#allocation63_spill] sm:$0xff] %v9791_v15  ;;  %v6667_v34 = vpop.eup %6666  ;;  %v9805_v47 = vmul.f32 100.0, %v9791_v15  ;;  %v3290_v52 = vmin.f32 %v9800_v50, 20.0  ;;  %v9818_v11 = vadd.f32 %v3189_v28, %v9564_v42  ;;  %v3606_v14 = vmul.f32 %v9769_v24, %v3605_v3 }
 0x3c3   : > { %12616 = vst [vmem:[#allocation64_spill] sm:$0xff] %v9793_v21  ;;  %v6669_v21 = vpop.eup %6668  ;;  %6676 = vlog2.f32 %v3511_v38  ;;  %v3507_v10 = vmul.f32 %v9694_v31, %v3506_v4  ;;  %vm3608_vm7 = vcmp.lt.f32.partialorder %v3607_v58, 0.0004427343  ;;  %v12621_v31 = vand.u32 2147483647, %v9689_v43 }
 0x3c4   : > { %v6671_v44 = vpop.eup %6670  ;;  %v3594_v63 = vmul.f32 0.6931472, %v6669_v21  ;;  %v3291_v9 = vmin.f32 %v9805_v47, 20.0  ;;  %v3350_v20 = vmul.f32 1.442695, %v3290_v52  ;;  %v9831_v24 = vmul.f32 100.0, %v9818_v11 }
 0x3c5   : > { %v6673_v0 = vpop.eup %6672  ;;  %v3218_v7 = vpop.f32.mrf.mxu3  ;;  %vm9840_vm9 = vcmp.lt.f32.partialorder %v12621_v31, 0.0004427343  ;;  %v3360_v55 = vmul.f32 0.6931472, %v9778_v2  ;;  %v3371_v2 = vadd.f32 1.0, %v9758_v62 }
 0x3c6   : > { %v6675_v59 = vpop.eup %6674  ;;  %v3600_v17 = vsel %vm9795_vm2, %v3597_v25, %v3594_v63  ;;  %v3352_v21 = vmul.f32 1.442695, %v3291_v9  ;;  %v3504_v28 = vmul.f32 0.6931472, %v6673_v0  ;;  %6678 = vpow2.f32 %v3350_v20 }
 0x3c7   : > { %v3672_v33 = vmul.f32 0.01, %v3600_v17  ;;  %v3603_v15 = vmul.f32 0.6931472, %v6675_v59  ;;  %v3515_v9 = vadd.f32 1.0, %v3514_v32  ;;  %v12624_v59 = vmov 2  }
 0x3c8   : > { %6680 = vpow2.f32 %v3352_v21  ;;  %v3510_v52 = vsel %vm3509_vm6, %v3507_v10, %v3504_v28  ;;  %v3517_v20 = vand.u32 2147483647, %v9705_v26  ;;  %v3432_v32 = vmul.f32 0.6931472, %v6667_v34 }
 0x3c9   : > { %v3736_v3 = vsel %vm3704_vm1, %v9687_v37, %v3672_v33  ;;  %v3609_v45 = vsel %vm3608_vm7, %v3606_v14, %v3603_v15  ;;  %v3662_v63 = vmul.f32 0.01, %v3510_v52  ;;  %6682 = vpow2.f32 %v3334_v18  ;;  %v3192_v60 = vpop.f32.mrf.mxu2  ;;  %v6677_v10 = vpop.eup %6676  ;;  %6233 = vset.pattern.permute.xlu1 %v12624_v59 }
 0x3ca   : > { %v3673_v4 = vmul.f32 0.01, %v3609_v45  ;;  %6102 = vmatpush.msk.msra.mxu2 %vm3979_vm0, %v3736_v3  ;;  %6684 = vpow2.f32 %v3336_v53  ;;  %v9849_v61 = vadd.f32 %v3192_v60, %v9572_v57  ;;  %v3268_v15 = vmin.f32 %v9831_v24, 20.0  ;;  %3887 = vperm.xlu1 %6233, %v3746_v56  }
 0x3cb   : > { %v3726_v37 = vsel %vm3694_vm3, %v9589_v35, %v3662_v63  ;;  %v9858_v53 = vadd.f32 %v3218_v7, %v9564_v42  ;;  %v3513_v27 = vmul.f32 0.6931472, %v6677_v10  ;;  %v12625_v35 = vand.u32 2147483647, %v9650_v36 }
 0x3cc   : > { %v3737_v18 = vsel %vm3705_vm4, %v9703_v49, %v3673_v4  ;;  %4017 = vmatpush.msra.mxu0 %v3726_v37  ;;  %v6679_v34 = vpop.eup %6678  ;;  %v3516_v38 = vmul.f32 %v9705_v26, %v3515_v9  ;;  %vm9867_vm13 = vcmp.lt.f32.partialorder %v3517_v20, 0.0004427343  ;;  %v9872_v49 = vmul.f32 100.0, %v9849_v61 }
 0x3cd   : > { %vm9862_vm12 = vcmp.lt.f32.partialorder %v12625_v35, 0.0004427343  ;;  %v3221_v42 = vpop.f32.mrf.mxu3  ;;  %v3438_v36 = vsel %vm9821_vm5, %v9784_v13, %v3432_v32  ;;  %6107 = vmatpush.msk.msra.mxu3 %vm3979_vm0, %v3737_v18  ;;  %v3610_v0 = vadd.f32 1.0, %v6679_v34  ;;  %v3613_v14 = vmul.f32 -0.5, %v6679_v34 }
 0x3ce   : > { %v6681_v56 = vpop.eup %6680  ;;  %v3616_v26 = vand.u32 2147483647, %v6679_v34  ;;  %v3441_v7 = vmul.f32 0.6931472, %v6671_v44  ;;  %v3519_v33 = vsel %vm9867_vm13, %v3516_v38, %v3513_v27  ;;  %v9884_v13 = vmul.f32 1.442695, %v3268_v15 }
 0x3cf   : > { %v3619_v17 = vadd.f32 1.0, %v6681_v56  ;;  %v3622_v21 = vmul.f32 -0.5, %v6681_v56  ;;  %v3625_v28 = vand.u32 2147483647, %v6681_v56  ;;  %v9882_v52 = vpop.eup %6682  ;;  %v9887_v6 = vmul.f32 100.0, %v9858_v53 }
 0x3d0   : > { %6686 = vlog2.f32 %v3610_v0  ;;  %v3663_v3 = vmul.f32 0.01, %v3519_v33  ;;  %v9889_v45 = vpop.eup %6684  ;;  %v3614_v44 = vadd.f32 1.0, %v3613_v14  ;;  %v3444_v9 = vmul.f32 %v9689_v43, %v9809_v48 }
 0x3d1   : > { %6688 = vlog2.f32 %v3619_v17  ;;  %v3623_v63 = vadd.f32 1.0, %v3622_v21  ;;  %v3276_v20 = vmin.f32 %v9872_v49, 20.0  ;;  %v9898_v60 = vadd.f32 %v3221_v42, %v9572_v57  ;;  %v3195_v10 = vpop.f32.mrf.mxu2 }
 0x3d2   : > { %v3727_v4 = vsel %vm3695_vm8, %v9597_v22, %v3663_v3  ;;  %v3654_v31 = vmul.f32 0.01, %v3438_v36  ;;  %vm9900_vm1 = vcmp.lt.f32.partialorder %v3616_v26, 0.0004427343  ;;  %vm3706_vm2 = vcmp.gt.f32.partialorder %v9800_v50, 20.0 }
 0x3d3   : > { %vm9905_vm3 = vcmp.lt.f32.partialorder %v3625_v28, 0.0004427343  ;;  %4046 = vmatpush.msra.mxu1 %v3727_v4  ;;  %v3447_v22 = vsel %vm9840_vm9, %v3444_v9, %v3441_v7  ;;  %v9913_v57 = vmul.f32 100.0, %v9898_v60  ;;  %6690 = vlog2.f32 %v9751_v39 }
 0x3d4   : > { %v3718_v43 = vsel %vm3686_vm11, %v9578_v16, %v3654_v31  ;;  %v3655_v48 = vmul.f32 0.01, %v3447_v22  ;;  %v12634_v59 = vmov 0   ;;  %v3615_v18 = vmul.f32 %v6679_v34, %v3614_v44 }
 0x3d5   : > { %6235 = vset.pattern.permute.xlu1 %v12634_v59  ;;  %4018 = vmatpush.msra.mxu0 %v3718_v43  ;;  %v3366_v25 = vsel %vm9862_vm12, %v9755_v19, %v3360_v55  ;;  %v3373_v15 = vand.u32 2147483647, %v9665_v30  ;;  %v3224_v27 = vpop.f32.mrf.mxu3  ;;  %v3624_v38 = vmul.f32 %v6681_v56, %v3623_v63  ;;  %v3322_v12 = vmul.f32 1.442695, %v3276_v20  ;;  %v9934_v19 = vld [vmem:[%s11989_s9] sm:$0xff] }
 0x3d6   : > { %v6687_v35 = vpop.eup %6686  ;;  %v3719_v16 = vsel %vm3687_vm14, %v9586_v29, %v3655_v48  ;;  %v3646_v39 = vmul.f32 0.01, %v3366_v25  ;;  %vm3707_vm4 = vcmp.gt.f32.partialorder %v9805_v47, 20.0  ;;  %v3277_v58 = vmin.f32 %v9913_v57, 20.0  ;;  %v12637_v48 = vld [vmem:[#allocation63_spill] sm:$0xff] }
 0x3d7   : > { %v6689_v46 = vpop.eup %6688  ;;  %v3612_v34 = vmul.f32 0.6931472, %v6687_v35  ;;  %4047 = vmatpush.msra.mxu1 %v3719_v16  ;;  %vm3679_vm5 = vcmp.gt.f32.partialorder %v9583_v54, 20.0  ;;  %vm3966_vm6 = vcmask 236544   ;;  %v9937_v62 = vadd.f32 %v3195_v10, %v9580_v51 }
 0x3d8   : > { %v3621_v29 = vmul.f32 0.6931472, %v6689_v46  ;;  %v3710_v40 = vsel %vm3678_vm15, %v9567_v5, %v3646_v39  ;;  %v3372_v42 = vmul.f32 %v9665_v30, %v3371_v2  ;;  %v9944_v36 = vadd.f32 %v3224_v27, %v9580_v51  ;;  %v12640_v46 = vld [vmem:[#allocation54_spill] sm:$0xff] }
 0x3d9   : > { %v3618_v56 = vsel %vm9900_vm1, %v3615_v18, %v3612_v34  ;;  %4019 = vmatpush.msra.mxu0 %v3710_v40  ;;  %vm9948_vm7 = vcmp.lt.f32.partialorder %v3373_v15, 0.0004427343  ;;  %v9953_v14 = vmul.f32 100.0, %v9937_v62  ;;  %v3520_v26 = vadd.f32 1.0, %v9747_v1  ;;  %v6691_v8 = vpop.eup %6690  ;;  %v3198_v7 = vpop.f32.mrf.mxu2  ;;  %v12639_v15 = vld [vmem:[#allocation10_spill] sm:$0xff] }
 0x3da   : > { %v3674_v5 = vmul.f32 0.01, %v3618_v56  ;;  %v3627_v30 = vsel %vm9905_vm3, %v3624_v38, %v3621_v29  ;;  %6093 = vmatmul.msk.f32.vlgmr.msra.gmra.mxu0 %vm3966_vm6, %v9934_v19  ;;  %v9961_v51 = vmul.f32 100.0, %v9944_v36  ;;  %v3523_v17 = vmul.f32 -0.5, %v9747_v1 }
 0x3db   : > { %v3324_v21 = vmul.f32 1.442695, %v3277_v58  ;;  %v3369_v28 = vmul.f32 0.6931472, %v6691_v8  ;;  %v3284_v33 = vmin.f32 %v9953_v14, 20.0  ;;  %v9966_v3 = vadd.f32 %v3198_v7, %v9548_v23 }
 0x3dc   : > { %v3738_v44 = vsel %vm3706_vm2, %v9781_v41, %v3674_v5  ;;  %v3675_v63 = vmul.f32 0.01, %v3627_v30  ;;  %v3285_v9 = vmin.f32 %v9961_v51, 20.0  ;;  %6692 = vlog2.f32 %v3520_v26  ;;  %v12641_v5 = vld [vmem:[#allocation29_spill] sm:$0xff] }
 0x3dd   : > { %6694 = vpow2.f32 %v9884_v13  ;;  %v3375_v4 = vsel %vm9948_vm7, %v3372_v42, %v3369_v28  ;;  %v3338_v20 = vmul.f32 1.442695, %v3284_v33  ;;  %v9976_v31 = vmul.f32 100.0, %v9966_v3  ;;  %v3227_v10 = vpop.f32.mrf.mxu3  ;;  %6112 = vmatpush.msk.msrb.mxu0 %vm3979_vm0, %v3738_v44  ;;  %v9986_v13 = vld [vmem:[%s11989_s9 + $0x8] sm:$0xff] }
 0x3de   : > { %v3647_v37 = vmul.f32 0.01, %v3375_v4  ;;  %v3340_v32 = vmul.f32 1.442695, %v3285_v9  ;;  %v9980_v41 = vadd.f32 %v3227_v10, %v9548_v23  ;;  %v3524_v50 = vadd.f32 1.0, %v3523_v17  ;;  %v12638_v23 = vld [vmem:[#allocation53_spill] sm:$0xff] }
 0x3df   : > { %v3269_v22 = vmin.f32 %v9887_v6, 20.0  ;;  %6696 = vpow2.f32 %v3322_v12  ;;  %v3292_v55 = vmin.f32 %v9976_v31, 20.0  ;;  %v3526_v43 = vand.u32 2147483647, %v9747_v1  ;;  %v3751_v12 = vld [vmem:[%s11991_s11 + $0x8] sm:$0xff] }
 0x3e0   : > { %v3739_v59 = vsel %vm3707_vm4, %v12637_v48, %v3675_v63  ;;  %6698 = vpow2.f32 %v3324_v21  ;;  %v3711_v18 = vsel %vm3679_vm5, %v12638_v23, %v3647_v37  ;;  %v9997_v25 = vmul.f32 100.0, %v9980_v41  ;;  %4243 = vperm.xlu1 %6235, %v3751_v12   ;;  %v12642_v17 = vld [vmem:[#allocation40_spill] sm:$0xff]  ;;  %v12643_v28 = vld [vmem:[#allocation61_spill] sm:$0xff] }
 0x3e1   : > { %4048 = vmatpush.msra.mxu1 %v3711_v18  ;;  %6700 = vpow2.f32 %v3338_v20  ;;  %v3354_v2 = vmul.f32 1.442695, %v3292_v55  ;;  %v3529_v27 = vadd.f32 1.0, %v12639_v15  ;;  %v3532_v35 = vmul.f32 -0.5, %v12639_v15  ;;  %v10032_v63 = vld [vmem:[%s11989_s9 + $0x10] sm:$0xff]  ;;  %v12644_v4 = vld [vmem:[#allocation12_spill] sm:$0xff] }
 0x3e2   : > { %v6693_v38 = vpop.eup %6692  ;;  %6098 = vmatmul.msk.f32.vlgmr.msra.gmra.mxu1 %vm3966_vm6, %v9934_v19  ;;  %6702 = vpow2.f32 %v3340_v32  ;;  %6094 = vmatmul.msk.f32.gmra.mxu0 %vm3966_vm6, %v9986_v13  ;;  %v3293_v54 = vmin.f32 %v9997_v25, 20.0  ;;  %v3525_v47 = vmul.f32 %v9747_v1, %v3524_v50  ;;  %vm3527_vm8 = vcmp.lt.f32.partialorder %v3526_v43, 0.0004427343  ;;  %v12647_v32 = vld [vmem:[#allocation52_spill] sm:$0xff] }
 0x3e3   : > { %v10010_v16 = vpop.eup %6694  ;;  %6704 = vpow2.f32 %v3354_v2  ;;  %v3522_v39 = vmul.f32 0.6931472, %v6693_v38  ;;  %v3448_v34 = vadd.f32 1.0, %v12640_v46  ;;  %6117 = vmatpush.msk.msrb.mxu1 %vm3979_vm0, %v3739_v59  ;;  %v3535_v29 = vand.u32 2147483647, %v12639_v15  ;;  %v12648_v43 = vld [vmem:[#allocation36_spill] sm:$0xff] }
 0x3e4   : > { %v3356_v58 = vmul.f32 1.442695, %v3293_v54  ;;  %6706 = vlog2.f32 %v3529_v27  ;;  %v3451_v1 = vmul.f32 -0.5, %v12640_v46  ;;  %v10018_v42 = vmul.f32 1.442695, %v3269_v22  ;;  %v3752_v59 = vld [vmem:[%s11991_s11 + $0x10] sm:$0xff] }
 0x3e5   : > { %v10016_v40 = vpop.eup %6696  ;;  %v3528_v56 = vsel %vm3527_vm8, %v3525_v47, %v3522_v39  ;;  %v3533_v0 = vadd.f32 1.0, %v3532_v35  ;;  %6708 = vlog2.f32 %v3448_v34  ;;  %vm3696_vm9 = vcmp.gt.f32.partialorder %v12641_v5, 20.0  ;;  %4248 = vperm.xlu0 %6229, %v3752_v59   ;;  %v10080_v59 = vld [vmem:[%s11989_s9 + $0x18] sm:$0xff]  ;;  %v12658_v27 = vld [vmem:[#allocation44_spill] sm:$0xff] }
 0x3e6   : > { %v10020_v26 = vpop.eup %6698  ;;  %6710 = vpow2.f32 %v3356_v58  ;;  %v3664_v8 = vmul.f32 0.01, %v3528_v56  ;;  %v3454_v30 = vand.u32 2147483647, %v12640_v46  ;;  %vm3697_vm11 = vcmp.gt.f32.partialorder %v12642_v17, 20.0  ;;  %v12653_v58 = vld [vmem:[#allocation23_spill] sm:$0xff] }
 0x3e7   : > { %v10024_v7 = vpop.eup %6700  ;;  %v3452_v21 = vadd.f32 1.0, %v3451_v1  ;;  %v3457_v33 = vadd.f32 1.0, %v12643_v28  ;;  %v3460_v44 = vmul.f32 -0.5, %v12643_v28  ;;  %vm10037_vm12 = vcmp.lt.f32.partialorder %v3535_v29, 0.0004427343 }
 0x3e8   : > { %v10034_v9 = vpop.eup %6702  ;;  %v3728_v20 = vsel %vm3696_vm9, %v12644_v4, %v3664_v8  ;;  %v3463_v37 = vand.u32 2147483647, %v12643_v28  ;;  %v3376_v50 = vadd.f32 1.0, %v12647_v32  ;;  %v3534_v55 = vmul.f32 %v12639_v15, %v3533_v0 }
 0x3e9   : > { %v6705_v22 = vpop.eup %6704  ;;  %4075 = vmatpush.msra.mxu2 %v3728_v20  ;;  %vm3688_vm13 = vcmp.gt.f32.partialorder %v12648_v43, 20.0  ;;  %6712 = vlog2.f32 %v3457_v33  ;;  %v3379_v48 = vmul.f32 -0.5, %v12647_v32  ;;  %vm10051_vm14 = vcmp.lt.f32.partialorder %v3454_v30, 0.0004427343  ;;  %v3753_v43 = vld [vmem:[%s11991_s11 + $0x18] sm:$0xff] }
 0x3ea   : > { %v6707_v23 = vpop.eup %6706  ;;  %6099 = vmatmul.msk.f32.gmra.mxu1 %vm3966_vm6, %v9986_v13  ;;  %v3628_v18 = vadd.f32 1.0, %v6705_v22  ;;  %v3631_v2 = vmul.f32 -0.5, %v6705_v22  ;;  %6095 = vmatmul.msk.f32.gmra.mxu0 %vm3966_vm6, %v10032_v63  ;;  %6714 = vlog2.f32 %v3376_v50  ;;  %v3634_v35 = vand.u32 2147483647, %v6705_v22  ;;  %v12656_v50 = vld [vmem:[#allocation39_spill] sm:$0xff] }
 0x3eb   : > { %v6709_v15 = vpop.eup %6708  ;;  %v3531_v38 = vmul.f32 0.6931472, %v6707_v23  ;;  %v3453_v54 = vmul.f32 %v12640_v46, %v3452_v21  ;;  %v3461_v47 = vadd.f32 1.0, %v3460_v44  ;;  %vm10058_vm15 = vcmp.lt.f32.partialorder %v3463_v37, 0.0004427343  ;;  %v12657_v23 = vld [vmem:[#allocation41_spill] sm:$0xff]  ;;  %4253 = vperm.xlu2 %6234, %v3753_v43  }
 0x3ec   : > { %v6711_v12 = vpop.eup %6710  ;;  %6716 = vlog2.f32 %v3628_v18  ;;  %v3450_v39 = vmul.f32 0.6931472, %v6709_v15  ;;  %vm3689_vm1 = vcmp.gt.f32.partialorder %v12653_v58, 20.0  ;;  %v3380_v0 = vadd.f32 1.0, %v3379_v48 }
 0x3ed   : > { %v3637_v29 = vadd.f32 1.0, %v6711_v12  ;;  %v3640_v1 = vmul.f32 -0.5, %v6711_v12  ;;  %v3537_v56 = vsel %vm10037_vm12, %v3534_v55, %v3531_v38  ;;  %v3632_v8 = vadd.f32 1.0, %v3631_v2 }
 0x3ee   : > { %v3665_v5 = vmul.f32 0.01, %v3537_v56  ;;  %v3456_v46 = vsel %vm10051_vm14, %v3453_v54, %v3450_v39  ;;  %v3382_v30 = vand.u32 2147483647, %v12647_v32  ;;  %vm10068_vm2 = vcmp.lt.f32.partialorder %v3634_v35, 0.0004427343 }
 0x3ef   : > { %v6713_v21 = vpop.eup %6712  ;;  %vm3708_vm3 = vcmp.gt.f32.partialorder %v9976_v31, 20.0  ;;  %6718 = vlog2.f32 %v3637_v29  ;;  %v3656_v44 = vmul.f32 0.01, %v3456_v46  ;;  %v3462_v4 = vmul.f32 %v12643_v28, %v3461_v47  ;;  %v12659_v29 = vld [vmem:[#allocation26_spill] sm:$0xff] }
 0x3f0   : > { %v6715_v20 = vpop.eup %6714  ;;  %v3641_v10 = vadd.f32 1.0, %v3640_v1  ;;  %v3643_v37 = vand.u32 2147483647, %v6711_v12  ;;  %v3729_v55 = vsel %vm3697_vm11, %v12656_v50, %v3665_v5  ;;  %v3459_v48 = vmul.f32 0.6931472, %v6713_v21 }
 0x3f1   : > { %4104 = vmatpush.msra.mxu3 %v3729_v55  ;;  %v3720_v18 = vsel %vm3688_vm13, %v12657_v23, %v3656_v44  ;;  %v3378_v2 = vmul.f32 0.6931472, %v6715_v20  ;;  %v3381_v28 = vmul.f32 %v12647_v32, %v3380_v0  ;;  %v3385_v15 = vadd.f32 1.0, %v12658_v27 }
 0x3f2   : > { %v6717_v35 = vpop.eup %6716  ;;  %v3633_v38 = vmul.f32 %v6705_v22, %v3632_v8  ;;  %4076 = vmatpush.msra.mxu2 %v3720_v18  ;;  %v3465_v17 = vsel %vm10058_vm15, %v3462_v4, %v3459_v48  ;;  %6100 = vmatmul.msk.f32.gmra.mxu1 %vm3966_vm6, %v10032_v63  ;;  %vm3383_vm4 = vcmp.lt.f32.partialorder %v3382_v30, 0.0004427343  ;;  %v3388_v54 = vmul.f32 -0.5, %v12658_v27  ;;  %v12660_v8 = vld [vmem:[#allocation38_spill] sm:$0xff] }
 0x3f3   : > { %v3630_v47 = vmul.f32 0.6931472, %v6717_v35  ;;  %v3657_v32 = vmul.f32 0.01, %v3465_v17  ;;  %v3384_v39 = vsel %vm3383_vm4, %v3381_v28, %v3378_v2  ;;  %6720 = vlog2.f32 %v3385_v15  ;;  %6096 = vmatmul.msk.f32.gmra.mxu0 %vm3966_vm6, %v10080_v59  ;;  %v12664_v2 = vld [vmem:[#allocation42_spill] sm:$0xff]  ;;  %v12680_v17 = vld [vmem:[#allocation60_spill] sm:$0xff] }
 0x3f4   : > { %v3642_v22 = vmul.f32 %v6711_v12, %v3641_v10  ;;  %v3648_v34 = vmul.f32 0.01, %v3384_v39  ;;  %vm3680_vm5 = vcmp.gt.f32.partialorder %v12659_v29, 20.0  ;;  %v3538_v1 = vadd.f32 1.0, %v9882_v52  ;;  %v12661_v12 = vld [vmem:[#allocation59_spill] sm:$0xff]  ;;  %v12665_v28 = vld [vmem:[#allocation50_spill] sm:$0xff] }
 0x3f5   : > { %v6719_v56 = vpop.eup %6718  ;;  %v3636_v0 = vsel %vm10068_vm2, %v3633_v38, %v3630_v47  ;;  %v3721_v5 = vsel %vm3689_vm1, %v12660_v8, %v3657_v32  ;;  %v3391_v46 = vand.u32 2147483647, %v12658_v27  ;;  %v3541_v30 = vmul.f32 -0.5, %v9882_v52  ;;  %v4807_v35 = vld [vmem:[%s11993_s13 + $0x18] sm:$0xff]  ;;  %v3750_v38 = vld [vmem:[%s11991_s11] sm:$0xff] }
 0x3f6   : > { %v3676_v21 = vmul.f32 0.01, %v3636_v0  ;;  %v3639_v44 = vmul.f32 0.6931472, %v6719_v56  ;;  %4105 = vmatpush.msra.mxu3 %v3721_v5  ;;  %v3712_v4 = vsel %vm3680_vm5, %v12661_v12, %v3648_v34  ;;  %v3389_v20 = vadd.f32 1.0, %v3388_v54  ;;  %v12668_v54 = vld [vmem:[#allocation62_spill] sm:$0xff]  ;;  %4825 = vperm.xlu0 %6229, %v4807_v35  }
 0x3f7   : > { %vm3644_vm7 = vcmp.lt.f32.partialorder %v3643_v37, 0.0004427343  ;;  %4077 = vmatpush.msra.mxu2 %v3712_v4  ;;  %6722 = vlog2.f32 %v3538_v1  ;;  %v3542_v10 = vadd.f32 1.0, %v3541_v30  ;;  %v3544_v33 = vand.u32 2147483647, %v9882_v52  ;;  %4238 = vperm.xlu2 %6234, %v3750_v38   ;;  %v12669_v1 = vld [vmem:[#allocation7_spill] sm:$0xff] }
 0x3f8   : > { %v3740_v58 = vsel %vm3708_vm3, %v9966_v3, %v3676_v21  ;;  %v3645_v50 = vsel %vm3644_vm7, %v3642_v22, %v3639_v44  ;;  %6103 = vmatmul.msk.f32.vlgmr.msra.gmra.mxu2 %vm3966_vm6, %v9934_v19  ;;  %v3547_v55 = vadd.f32 1.0, %v9889_v45  ;;  %v3550_v48 = vmul.f32 -0.5, %v9889_v45  ;;  %v12670_v56 = vld [vmem:[#allocation64_spill] sm:$0xff]  ;;  %v12671_v21 = vld [vmem:[#allocation51_spill] sm:$0xff] }
 0x3f9   : > { %v6721_v23 = vpop.eup %6720  ;;  %v3677_v18 = vmul.f32 0.01, %v3645_v50  ;;  %vm3709_vm8 = vcmp.gt.f32.partialorder %v9997_v25, 20.0  ;;  %vm10116_vm9 = vcmp.lt.f32.partialorder %v3391_v46, 0.0004427343  ;;  %vm3681_vm11 = vcmp.gt.f32.partialorder %v12664_v2, 20.0  ;;  %6122 = vmatpush.msk.msrb.mxu2 %vm3979_vm0, %v3740_v58 }
 0x3fa   : > { %v3387_v3 = vmul.f32 0.6931472, %v6721_v23  ;;  %v3390_v31 = vmul.f32 %v12658_v27, %v3389_v20  ;;  %6101 = vmatmul.msk.f32.gmra.mxu1 %vm3966_vm6, %v10080_v59  ;;  %6724 = vlog2.f32 %v3547_v55  ;;  %v3466_v15 = vadd.f32 1.0, %v12665_v28  ;;  %v12678_v37 = vld [vmem:[#allocation47_spill] sm:$0xff] }
 0x3fb   : > { %vm10132_vm12 = vcmp.lt.f32.partialorder %v3544_v33, 0.0004427343  ;;  %vm3698_vm13 = vcmp.gt.f32.partialorder %v12668_v54, 20.0  ;;  %v3553_v27 = vand.u32 2147483647, %v9889_v45  ;;  %v3469_v43 = vmul.f32 -0.5, %v12665_v28 }
 0x3fc   : > { %v3393_v47 = vsel %vm10116_vm9, %v3390_v31, %v3387_v3  ;;  %v3543_v32 = vmul.f32 %v9882_v52, %v3542_v10  ;;  %v3551_v39 = vadd.f32 1.0, %v3550_v48  ;;  %6726 = vlog2.f32 %v3466_v15  ;;  %v12675_v10 = vld [vmem:[#allocation56_spill] sm:$0xff]  ;;  %v12679_v3 = vld [vmem:[#allocation58_spill] sm:$0xff] }
 0x3fd   : > { %v6723_v22 = vpop.eup %6722  ;;  %v3741_v34 = vsel %vm3709_vm8, %v9980_v41, %v3677_v18  ;;  %v3649_v29 = vmul.f32 0.01, %v3393_v47  ;;  %vm3699_vm14 = vcmp.gt.f32.partialorder %v12669_v1, 20.0  ;;  %v3475_v0 = vadd.f32 1.0, %v12670_v56  ;;  %v12674_v41 = vld [vmem:[#allocation45_spill] sm:$0xff]  ;;  %v12684_v18 = vld [vmem:[#allocation48_spill] sm:$0xff] }
 0x3fe   : > { %v3540_v8 = vmul.f32 0.6931472, %v6723_v22  ;;  %v3470_v5 = vadd.f32 1.0, %v3469_v43  ;;  %v3472_v46 = vand.u32 2147483647, %v12665_v28  ;;  %v3478_v30 = vmul.f32 -0.5, %v12670_v56 }
 0x3ff   : > { %v3713_v52 = vsel %vm3681_vm11, %v12671_v21, %v3649_v29  ;;  %vm10152_vm15 = vcmp.lt.f32.partialorder %v3553_v27, 0.0004427343  ;;  %6728 = vlog2.f32 %v3475_v0  ;;  %v3394_v25 = vadd.f32 1.0, %v12674_v41  ;;  %v4804_v22 = vld [vmem:[%s11993_s13] sm:$0xff]  ;;  %v12682_v21 = vld [vmem:[#allocation57_spill] sm:$0xff] }
 0x400   : > { %v6725_v12 = vpop.eup %6724  ;;  %4106 = vmatpush.msra.mxu3 %v3713_v52  ;;  %6104 = vmatmul.msk.f32.gmra.mxu2 %vm3966_vm6, %v9986_v13  ;;  %v3546_v4 = vsel %vm10132_vm12, %v3543_v32, %v3540_v8  ;;  %v3552_v20 = vmul.f32 %v9889_v45, %v3551_v39  ;;  %vm3690_vm1 = vcmp.gt.f32.partialorder %v12675_v10, 20.0  ;;  %v3397_v33 = vmul.f32 -0.5, %v12674_v41 }
 0x401   : > { %6108 = vmatmul.msk.f32.vlgmr.msra.gmra.mxu3 %vm3966_vm6, %v9934_v19  ;;  %v3666_v58 = vmul.f32 0.01, %v3546_v4  ;;  %v3549_v50 = vmul.f32 0.6931472, %v6725_v12  ;;  %v3479_v55 = vadd.f32 1.0, %v3478_v30  ;;  %6730 = vlog2.f32 %v3394_v25  ;;  %4810 = vperm.xlu0 %6229, %v4804_v22  }
 0x402   : > { %v6727_v48 = vpop.eup %6726  ;;  %v3471_v23 = vmul.f32 %v12665_v28, %v3470_v5  ;;  %vm10167_vm2 = vcmp.lt.f32.partialorder %v3472_v46, 0.0004427343  ;;  %v3481_v45 = vand.u32 2147483647, %v12670_v56  ;;  %v3403_v2 = vadd.f32 1.0, %v12678_v37  ;;  %6127 = vmatpush.msk.msrb.mxu3 %vm3979_vm0, %v3741_v34  ;;  %v12681_v34 = vld [vmem:[#allocation49_spill] sm:$0xff] }
 0x403   : > { %v3730_v31 = vsel %vm3698_vm13, %v12679_v3, %v3666_v58  ;;  %v3555_v15 = vsel %vm10152_vm15, %v3552_v20, %v3549_v50  ;;  %v3468_v35 = vmul.f32 0.6931472, %v6727_v48  ;;  %v3398_v38 = vadd.f32 1.0, %v3397_v33  ;;  %v12683_v50 = vld [vmem:[#allocation46_spill] sm:$0xff] }
 0x404   : > { %4133 = vmatpush.msrb.mxu0 %v3730_v31  ;;  %v3667_v28 = vmul.f32 0.01, %v3555_v15  ;;  %vm3691_vm3 = vcmp.gt.f32.partialorder %v12680_v17, 20.0  ;;  %6732 = vlog2.f32 %v3403_v2  ;;  %v3406_v27 = vmul.f32 -0.5, %v12678_v37  ;;  %v12685_v2 = vld [vmem:[#allocation43_spill] sm:$0xff] }
 0x405   : > { %v6729_v43 = vpop.eup %6728  ;;  %v3474_v47 = vsel %vm10167_vm2, %v3471_v23, %v3468_v35  ;;  %v3480_v32 = vmul.f32 %v12670_v56, %v3479_v55  ;;  %v3400_v54 = vand.u32 2147483647, %v12674_v41  ;;  %v3556_v39 = vadd.f32 1.0, %v10024_v7 }
 0x406   : > { %v3731_v29 = vsel %vm3699_vm14, %v12681_v34, %v3667_v28  ;;  %v3658_v0 = vmul.f32 0.01, %v3474_v47  ;;  %v3477_v8 = vmul.f32 0.6931472, %v6729_v43  ;;  %v3407_v5 = vadd.f32 1.0, %v3406_v27 }
 0x407   : > { %v6731_v46 = vpop.eup %6730  ;;  %4162 = vmatpush.msrb.mxu1 %v3731_v29  ;;  %vm3482_vm0 = vcmp.lt.f32.partialorder %v3481_v45, 0.0004427343  ;;  %v3399_v56 = vmul.f32 %v12674_v41, %v3398_v38  ;;  %6734 = vlog2.f32 %v3556_v39  ;;  %v3559_v30 = vmul.f32 -0.5, %v10024_v7  ;;  %v12686_v38 = vld [vmem:[#allocation55_spill] sm:$0xff] }
 0x408   : > { %v3722_v52 = vsel %vm3690_vm1, %v12682_v21, %v3658_v0  ;;  %v3483_v44 = vsel %vm3482_vm0, %v3480_v32, %v3477_v8  ;;  %v3396_v25 = vmul.f32 0.6931472, %v6731_v46  ;;  %v3409_v1 = vand.u32 2147483647, %v12678_v37  ;;  %6105 = vmatmul.msk.f32.gmra.mxu2 %vm3966_vm6, %v10032_v63  ;;  %v12687_v32 = vld [vmem:[#allocation37_spill] sm:$0xff] }
 0x409   : > { %6736 = vpow2.f32 %v10018_v42  ;;  %6109 = vmatmul.msk.f32.gmra.mxu3 %vm3966_vm6, %v9986_v13  ;;  %4134 = vmatpush.msrb.mxu0 %v3722_v52  ;;  %v3659_v41 = vmul.f32 0.01, %v3483_v44  ;;  %vm3401_vm4 = vcmp.lt.f32.partialorder %v3400_v54, 0.0004427343  ;;  %v3562_v12 = vand.u32 2147483647, %v10024_v7 }
 0x40a   : > { %v6733_v4 = vpop.eup %6732  ;;  %v3402_v20 = vsel %vm3401_vm4, %v3399_v56, %v3396_v25  ;;  %v3408_v10 = vmul.f32 %v12678_v37, %v3407_v5  ;;  %v3560_v33 = vadd.f32 1.0, %v3559_v30  ;;  %v3565_v58 = vadd.f32 1.0, %v10034_v9 }
 0x40b   : > { %v3723_v55 = vsel %vm3691_vm3, %v12683_v50, %v3659_v41  ;;  %v3650_v42 = vmul.f32 0.01, %v3402_v20  ;;  %v3405_v48 = vmul.f32 0.6931472, %v6733_v4  ;;  %v3568_v23 = vmul.f32 -0.5, %v10034_v9 }
 0x40c   : > { %4163 = vmatpush.msrb.mxu1 %v3723_v55  ;;  %vm3682_vm5 = vcmp.gt.f32.partialorder %v12684_v18, 20.0  ;;  %vm3410_vm7 = vcmp.lt.f32.partialorder %v3409_v1, 0.0004427343  ;;  %6738 = vlog2.f32 %v3565_v58  ;;  %v3484_v31 = vadd.f32 1.0, %v10016_v40 }
 0x40d   : > { %v6735_v45 = vpop.eup %6734  ;;  %v3714_v3 = vsel %vm3682_vm5, %v12685_v2, %v3650_v42  ;;  %v3411_v37 = vsel %vm3410_vm7, %v3408_v10, %v3405_v48  ;;  %v3487_v15 = vmul.f32 -0.5, %v10016_v40  ;;  %vm3683_vm8 = vcmp.gt.f32.partialorder %v12686_v38, 20.0 }
 0x40e   : > { %4135 = vmatpush.msrb.mxu0 %v3714_v3  ;;  %v3651_v35 = vmul.f32 0.01, %v3411_v37  ;;  %v3558_v28 = vmul.f32 0.6931472, %v6735_v45  ;;  %v3561_v17 = vmul.f32 %v10024_v7, %v3560_v33  ;;  %vm3563_vm9 = vcmp.lt.f32.partialorder %v3562_v12, 0.0004427343 }
 0x40f   : > { %v10216_v27 = vpop.eup %6736  ;;  %6113 = vmatmul.msk.f32.vlgmr.msrb.gmra.mxu0 %vm3966_vm6, %v9934_v19  ;;  %v3569_v43 = vadd.f32 1.0, %v3568_v23  ;;  %6740 = vlog2.f32 %v3484_v31  ;;  %v3493_v47 = vadd.f32 1.0, %v10020_v26  ;;  %v3571_v22 = vand.u32 2147483647, %v10034_v9 }
 0x410   : > { %v3715_v54 = vsel %vm3683_vm8, %v12687_v32, %v3651_v35  ;;  %6106 = vmatmul.msk.f32.gmra.mxu2 %vm3966_vm6, %v10080_v59  ;;  %v3564_v39 = vsel %vm3563_vm9, %v3561_v17, %v3558_v28  ;;  %v3496_v7 = vmul.f32 -0.5, %v10020_v26  ;;  %v3488_v29 = vadd.f32 1.0, %v3487_v15  ;;  %v5585_v15 = vld [vmem:[#allocation2] sm:$0x1] }
 0x411   : > { %4164 = vmatpush.msrb.mxu1 %v3715_v54  ;;  %6110 = vmatmul.msk.f32.gmra.mxu3 %vm3966_vm6, %v10032_v63  ;;  %v3668_v34 = vmul.f32 0.01, %v3564_v39  ;;  %6742 = vlog2.f32 %v3493_v47  ;;  %vm3700_vm11 = vcmp.gt.f32.partialorder %v9953_v14, 20.0  ;;  %v3412_v8 = vadd.f32 1.0, %v10010_v16  ;;  %v12690_v47 = vld [vmem:[#allocation17_spill] sm:$0xff]  ;;  %v12691_v39 = vld [vmem:[#allocation18_spill] sm:$0xff] }
 0x412   : > { %v6739_v0 = vpop.eup %6738  ;;  %6118 = vmatmul.msk.f32.vlgmr.msrb.gmra.mxu1 %vm3966_vm6, %v9934_v19  ;;  %v3415_v5 = vmul.f32 -0.5, %v10010_v16  ;;  %v3570_v30 = vmul.f32 %v10034_v9, %v3569_v43  ;;  %v3490_v21 = vand.u32 2147483647, %v10016_v40  ;;  %vm3572_vm12 = vcmp.lt.f32.partialorder %v3571_v22, 0.0004427343 }
 0x413   : > { %v3732_v46 = vsel %vm3700_vm11, %v9937_v62, %v3668_v34  ;;  %v3567_v56 = vmul.f32 0.6931472, %v6739_v0  ;;  %v3497_v52 = vadd.f32 1.0, %v3496_v7  ;;  %6744 = vlog2.f32 %v3412_v8  ;;  %v4806_v62 = vld [vmem:[%s11993_s13 + $0x10] sm:$0xff] }
 0x414   : > { %4191 = vmatpush.msrb.mxu2 %v3732_v46  ;;  %v3489_v1 = vmul.f32 %v10016_v40, %v3488_v29  ;;  %v3499_v14 = vand.u32 2147483647, %v10020_v26  ;;  %v3421_v41 = vadd.f32 1.0, %v10216_v27  ;;  %v3416_v4 = vadd.f32 1.0, %v3415_v5  ;;  %4820 = vperm.xlu1 %6235, %v4806_v62   ;;  %v12692_v34 = vld [vmem:[#allocation21_spill] sm:$0xff]  ;;  %v12693_v0 = vld [vmem:[#allocation22_spill] sm:$0xff] }
 0x415   : > { %v6741_v44 = vpop.eup %6740  ;;  %v3573_v25 = vsel %vm3572_vm12, %v3570_v30, %v3567_v56  ;;  %v3424_v20 = vmul.f32 -0.5, %v10216_v27  ;;  %vm3701_vm13 = vcmp.gt.f32.partialorder %v9961_v51, 20.0  ;;  %vm3491_vm14 = vcmp.lt.f32.partialorder %v3490_v21, 0.0004427343  ;;  %v12694_v46 = vld [vmem:[#allocation13_spill] sm:$0xff] }
 0x416   : > { %v3669_v12 = vmul.f32 0.01, %v3573_v25  ;;  %v3486_v9 = vmul.f32 0.6931472, %v6741_v44  ;;  %6746 = vlog2.f32 %v3421_v41  ;;  %v3498_v58 = vmul.f32 %v10020_v26, %v3497_v52  ;;  %v12695_v25 = vld [vmem:[#allocation14_spill] sm:$0xff] }
 0x417   : > { %v6743_v10 = vpop.eup %6742  ;;  %6114 = vmatmul.msk.f32.gmra.mxu0 %vm3966_vm6, %v9986_v13  ;;  %v3418_v50 = vand.u32 2147483647, %v10010_v16  ;;  %vm3500_vm15 = vcmp.lt.f32.partialorder %v3499_v14, 0.0004427343  ;;  %vm3692_vm1 = vcmp.gt.f32.partialorder %v9872_v49, 20.0  ;;  %v3417_v23 = vmul.f32 %v10010_v16, %v3416_v4  ;;  %v4805_v49 = vld [vmem:[%s11993_s13 + $0x8] sm:$0xff] }
 0x418   : > { %v3492_v40 = vsel %vm3491_vm14, %v3489_v1, %v3486_v9  ;;  %v3495_v33 = vmul.f32 0.6931472, %v6743_v10  ;;  %v3733_v55 = vsel %vm3701_vm13, %v9944_v36, %v3669_v12  ;;  %v3425_v26 = vadd.f32 1.0, %v3424_v20  ;;  %4815 = vperm.xlu2 %6234, %v4805_v49  }
 0x419   : > { %6111 = vmatmul.msk.f32.gmra.mxu3 %vm3966_vm6, %v10080_v59  ;;  %v3660_v42 = vmul.f32 0.01, %v3492_v40  ;;  %v6745_v48 = vpop.eup %6744  ;;  %v3427_v3 = vand.u32 2147483647, %v10216_v27  ;;  %vm3693_vm2 = vcmp.gt.f32.partialorder %v9913_v57, 20.0  ;;  %vm3684_vm0 = vcmp.gt.f32.partialorder %v9831_v24, 20.0  ;;  %v10293_v24 = vpop.permute.xlu1 %3819 }
 0x41a   : > { %6119 = vmatmul.msk.f32.gmra.mxu1 %vm3966_vm6, %v9986_v13  ;;  %4220 = vmatpush.msrb.mxu3 %v3733_v55  ;;  %v3501_v51 = vsel %vm3500_vm15, %v3498_v58, %v3495_v33  ;;  %v3414_v2 = vmul.f32 0.6931472, %v6745_v48  ;;  %vm3419_vm3 = vcmp.lt.f32.partialorder %v3418_v50, 0.0004427343  ;;  %v3426_v35 = vmul.f32 %v10216_v27, %v3425_v26  ;;  %v12697_v50 = vld [vmem:[#allocation19_spill] sm:$0xff]  ;;  %v12698_v48 = vld [vmem:[#allocation24_spill] sm:$0xff] }
 0x41b   : > { %v3724_v18 = vsel %vm3692_vm1, %v9849_v61, %v3660_v42  ;;  %v3661_v45 = vmul.f32 0.01, %v3501_v51  ;;  %vm3428_vm4 = vcmp.lt.f32.partialorder %v3427_v3, 0.0004427343  ;;  %vm3685_vm5 = vcmp.gt.f32.partialorder %v9887_v6, 20.0 }
 0x41c   : > { %4192 = vmatpush.msrb.mxu2 %v3724_v18  ;;  %v6747_v36 = vpop.eup %6746  ;;  %v3420_v31 = vsel %vm3419_vm3, %v3417_v23, %v3414_v2  ;;  %5588 = vperm.xlu1 %6235, %v5585_v15   ;;  %v3846_v10 = vmul.f32 %v10293_v24, %v12690_v47  ;;  %v12699_v23 = vld [vmem:[#allocation25_spill] sm:$0xff]  ;;  %v3847_v3 = vmul.f32 %v10293_v24, %v12691_v39 }
 0x41d   : > { %v3725_v37 = vsel %vm3693_vm2, %v9898_v60, %v3661_v45  ;;  %v3652_v16 = vmul.f32 0.01, %v3420_v31  ;;  %v3423_v61 = vmul.f32 0.6931472, %v6747_v36  ;;  %v12700_v36 = vld [vmem:[#allocation20_spill] sm:$0xff] }
 0x41e   : > { %4221 = vmatpush.msrb.mxu3 %v3725_v37 }
 0x41f   : > { %6115 = vmatmul.msk.f32.gmra.mxu0 %vm3966_vm6, %v10032_v63  ;;  %v3716_v60 = vsel %vm3684_vm0, %v9818_v11, %v3652_v16  ;;  %v3429_v57 = vsel %vm3428_vm4, %v3426_v35, %v3423_v61  ;;  %v10291_v11 = vpop.permute.xlu2 %3766  ;;  %v12701_v16 = vld [vmem:[#allocation15_spill] sm:$0xff] }
 0x420   : > { %4193 = vmatpush.msrb.mxu2 %v3716_v60  ;;  %v3653_v38 = vmul.f32 0.01, %v3429_v57  ;;  %v3790_v41 = vmul.f32 %v10291_v11, %v12692_v34  ;;  %v3791_v12 = vmul.f32 %v10291_v11, %v12693_v0  ;;  %v3792_v18 = vmul.f32 %v10291_v11, %v12698_v48 }
 0x421   : > { %6123 = vmatmul.msk.f32.vlgmr.msrb.gmra.mxu2 %vm3966_vm6, %v9934_v19  ;;  %v3793_v57 = vmul.f32 %v10291_v11, %v12699_v23 }
 0x422   : > { %6120 = vmatmul.msk.f32.gmra.mxu1 %vm3966_vm6, %v10032_v63  ;;  %v3717_v28 = vsel %vm3685_vm5, %v9858_v53, %v3653_v38  ;;  %v12702_v38 = vld [vmem:[#allocation16_spill] sm:$0xff] }
 0x423   : > { %4222 = vmatpush.msrb.mxu3 %v3717_v28 }
 0x424   : > { %6128 = vmatmul.msk.f32.vlgmr.msrb.gmra.mxu3 %vm3966_vm6, %v9934_v19  ;;  %v10299_v19 = vpop.permute.xlu1 %3899 }
 0x425   : > { %v3926_v49 = vmul.f32 %v10299_v19, %v12694_v46 }
 0x427   : > { %6116 = vmatmul.msk.f32.gmra.mxu0 %vm3966_vm6, %v10080_v59  ;;  %v10295_v53 = vpop.permute.xlu2 %3761 }
 0x428   : > { %v3782_v29 = vmul.f32 %v10295_v53, %v12692_v34  ;;  %v3783_v8 = vmul.f32 %v10295_v53, %v12693_v0  ;;  %v3784_v51 = vmul.f32 %v10295_v53, %v12698_v48  ;;  %v3785_v26 = vmul.f32 %v10295_v53, %v12699_v23 }
 0x429   : > { %6124 = vmatmul.msk.f32.gmra.mxu2 %vm3966_vm6, %v9986_v13 }
 0x42a   : > { %6121 = vmatmul.msk.f32.gmra.mxu1 %vm3966_vm6, %v10080_v59 }
 0x42c   : > { %6129 = vmatmul.msk.f32.gmra.mxu3 %vm3966_vm6, %v9986_v13  ;;  %v10309_v43 = vpop.permute.xlu1 %3811 }
 0x42d   : > { %v3830_v32 = vmul.f32 %v10309_v43, %v12690_v47  ;;  %v3831_v22 = vmul.f32 %v10309_v43, %v12691_v39 }
 0x42f   : > { %v10303_v17 = vpop.permute.xlu2 %3895  ;;  %v3862_v5 = vadd.f32 %v3830_v32, %v3782_v29  ;;  %v3863_v44 = vadd.f32 %v3831_v22, %v3783_v8  ;;  %v12703_v32 = vld [vmem:[#allocation33_spill] sm:$0xff] }
 0x430   : > { %v3918_v62 = vmul.f32 %v10303_v17, %v12694_v46  ;;  %v3919_v9 = vmul.f32 %v10303_v17, %v12695_v25  ;;  %v3920_v61 = vmul.f32 %v10303_v17, %v12701_v16  ;;  %v3921_v28 = vmul.f32 %v10303_v17, %v12702_v38 }
 0x431   : > { %6125 = vmatmul.msk.f32.gmra.mxu2 %vm3966_vm6, %v10032_v63  ;;  %v10385_v22 = vmul.f32 %v10295_v53, %v12703_v32 }
 0x434   : > { %6130 = vmatmul.msk.f32.gmra.mxu3 %vm3966_vm6, %v10032_v63  ;;  %v10305_v63 = vpop.permute.xlu0 %3815  ;;  %v10335_v14 = vpop.permute.xlu1 %3807 }
 0x435   : > { %v3838_v30 = vmul.f32 %v10305_v63, %v12690_v47  ;;  %v3839_v52 = vmul.f32 %v10305_v63, %v12691_v39  ;;  %v3840_v55 = vmul.f32 %v10305_v63, %v12697_v50  ;;  %v3841_v37 = vmul.f32 %v10305_v63, %v12700_v36 }
 0x436   : > { %v3824_v8 = vmul.f32 %v10335_v14, %v12697_v50 }
 0x437   : > { %v10315_v54 = vpop.permute.xlu2 %3891  ;;  %v3870_v33 = vadd.f32 %v3838_v30, %v3790_v41  ;;  %v3871_v58 = vadd.f32 %v3839_v52, %v3791_v12  ;;  %v3872_v60 = vadd.f32 %v3840_v55, %v3792_v18  ;;  %v12705_v30 = vld [vmem:[#allocation31_spill] sm:$0xff]  ;;  %v3927_v41 = vmul.f32 %v10299_v19, %v12695_v25 }
 0x438   : > { %v3910_v56 = vmul.f32 %v10315_v54, %v12694_v46  ;;  %v3911_v1 = vmul.f32 %v10315_v54, %v12695_v25  ;;  %v3842_v52 = vmul.f32 %v10305_v63, %v12705_v30  ;;  %v3794_v12 = vmul.f32 %v10291_v11, %v12703_v32 }
 0x439   : > { %6126 = vmatmul.msk.f32.gmra.mxu2 %vm3966_vm6, %v10080_v59  ;;  %v10363_v45 = vadd.f32 %v3918_v62, %v3870_v33  ;;  %v10371_v31 = vadd.f32 %v3919_v9, %v3871_v58  ;;  %v3873_v62 = vadd.f32 %v3841_v37, %v3793_v57  ;;  %v3833_v33 = vmul.f32 %v10309_v43, %v12700_v36  ;;  %v12706_v58 = vld [vmem:[#allocation28_spill] sm:$0xff] }
 0x43a   : > { %v10351_v40 = vadd.f32 %v3910_v56, %v3862_v5  ;;  %v10355_v42 = vadd.f32 %v3911_v1, %v3863_v44  ;;  %v12704_v5 = vld [vmem:[#allocation27_spill] sm:$0xff]  ;;  %v3922_v55 = vmul.f32 %v10303_v17, %v12706_v58 }
 0x43b   : > { %v10393_v56 = vmul.f32 %v10295_v53, %v12704_v5  ;;  %v3795_v37 = vmul.f32 %v10291_v11, %v12704_v5 }
 0x43c   : > { %6131 = vmatmul.msk.f32.gmra.mxu3 %vm3966_vm6, %v10080_v59  ;;  %v10319_v7 = vpop.permute.xlu0 %3771  ;;  %v10407_v18 = vpop.permute.xlu1 %3887 }
 0x43d   : > { %v3798_v20 = vmul.f32 %v10319_v7, %v12692_v34  ;;  %v3799_v2 = vmul.f32 %v10319_v7, %v12693_v0  ;;  %v3904_v39 = vmul.f32 %v10407_v18, %v12701_v16  ;;  %v3874_v0 = vadd.f32 %v3842_v52, %v3794_v12 }
 0x43e   : > { %v3913_v52 = vmul.f32 %v10315_v54, %v12702_v38 }
 0x43f   : > { %v3878_v15 = vadd.f32 %v3846_v10, %v3798_v20  ;;  %v3879_v1 = vadd.f32 %v3847_v3, %v3799_v2  ;;  %v3832_v10 = vmul.f32 %v10309_v43, %v12697_v50  ;;  %v10409_v2 = vadd.f32 %v3920_v61, %v3872_v60 }
 0x440   : > { %v10411_v3 = vadd.f32 %v3921_v28, %v3873_v62  ;;  %v3825_v60 = vmul.f32 %v10335_v14, %v12700_v36  ;;  %v12710_v28 = vld [vmem:[#allocation35_spill] sm:$0xff] }
 0x441   : > { %v3958_v9 = vadd.f32 %v3926_v49, %v3878_v15  ;;  %v12708_v15 = vld [vmem:[#allocation11_spill] sm:$0xff]  ;;  %v3959_v46 = vadd.f32 %v3927_v41, %v3879_v1  ;;  %v3923_v62 = vmul.f32 %v10303_v17, %v12710_v28  ;;  %v3864_v47 = vadd.f32 %v3832_v10, %v3784_v51  ;;  %v12711_v1 = vld [vmem:[#allocation32_spill] sm:$0xff] }
 0x442   : > { %12707 = vst [vmem:[#allocation54_spill] sm:$0xff] %v10411_v3  ;;  %v3843_v49 = vmul.f32 %v10305_v63, %v12708_v15  ;;  %v10433_v41 = vmul.f32 %v10295_v53, %v12711_v1  ;;  %v10442_v10 = vadd.f32 %v3922_v55, %v3874_v0  ;;  %v3826_v0 = vmul.f32 %v10335_v14, %v12705_v30 }
 0x444   : > { %v10377_v35 = vpop.permute.xlu0 %3756  ;;  %v3875_v12 = vadd.f32 %v3843_v49, %v3795_v37  ;;  %12715 = vst [vmem:[#allocation12_spill] sm:$0xff] %v10442_v10  ;;  %v3796_v37 = vmul.f32 %v10291_v11, %v12711_v1  ;;  %v3827_v10 = vmul.f32 %v10335_v14, %v12708_v15 }
 0x445   : > { %v3776_v29 = vmul.f32 %v10377_v35, %v12698_v48  ;;  %v3777_v61 = vmul.f32 %v10377_v35, %v12699_v23 }
 0x447   : > { %v3856_v25 = vadd.f32 %v3824_v8, %v3776_v29  ;;  %v3912_v29 = vmul.f32 %v10315_v54, %v12701_v16  ;;  %v3865_v8 = vadd.f32 %v3833_v33, %v3785_v26  ;;  %v12716_v26 = vld [vmem:[#allocation9_spill] sm:$0xff] }
 0x448   : > { %v3844_v33 = vmul.f32 %v10305_v63, %v12716_v26 }
 0x449   : > { %v3936_v51 = vadd.f32 %v3904_v39, %v3856_v25  ;;  %v3778_v39 = vmul.f32 %v10377_v35, %v12703_v32 }
 0x44b   : > { %v3858_v1 = vadd.f32 %v3826_v0, %v3778_v39 }
 0x457   : > { %v10297_v6 = vpop.f32.mrf.mxu0 }
 0x458   : > { %12688 = vst [vmem:[#allocation63_spill] sm:$0xff] %v10297_v6  ;;  %v10419_v6 = vpop.permute.xlu2 %4253 }
 0x459   : > { %12709 = vst [vmem:[#allocation29_spill] sm:$0xff] %v10419_v6 }
 0x45f   : > { %v10301_v13 = vpop.f32.mrf.mxu1  ;;  %v10307_v27 = vpop.f32.mrf.mxu0 }
 0x460   : > { %12689 = vst [vmem:[#allocation53_spill] sm:$0xff] %v10301_v13 }
 0x467   : > { %v10311_v59 = vpop.f32.mrf.mxu1  ;;  %v10329_v21 = vpop.f32.mrf.mxu0 }
 0x46f   : > { %v10345_v4 = vpop.f32.mrf.mxu1 }
 0x470   : > { %12696 = vst [vmem:[#allocation10_spill] sm:$0xff] %v10345_v4  ;;  %v4030_v44 = vpop.f32.mrf.mxu0  ;;  %v3857_v4 = vadd.f32 %v3825_v60, %v3777_v61  ;;  %v3835_v61 = vmul.f32 %v10309_v43, %v12708_v15  ;;  %v12719_v60 = vld [vmem:[#allocation6_spill] sm:$0xff] }
 0x471   : > { %v4031_v57 = vadd.f32 %v4030_v44, %v3958_v9  ;;  %v12712_v9 = vld [vmem:[#allocation30_spill] sm:$0xff] }
 0x472   : > { %v10437_v34 = vmul.f32 %v10295_v53, %v12712_v9  ;;  %v3944_v53 = vadd.f32 %v3912_v29, %v3864_v47  ;;  %v3924_v47 = vmul.f32 %v10303_v17, %v12719_v60  ;;  %v3906_v60 = vmul.f32 %v10407_v18, %v12706_v58 }
 0x473   : > { %v10440_v3 = vadd.f32 %v10419_v6, %v4031_v57  ;;  %v3834_v57 = vmul.f32 %v10309_v43, %v12705_v30 }
 0x474   : > { %12713 = vst [vmem:[#allocation40_spill] sm:$0xff] %v10437_v34  ;;  %v3945_v34 = vadd.f32 %v3913_v52, %v3865_v8  ;;  %v3876_v8 = vadd.f32 %v3844_v33, %v3796_v37  ;;  %v3797_v52 = vmul.f32 %v10291_v11, %v12712_v9  ;;  %v10480_v33 = vpop.permute.xlu2 %4238  ;;  %v3867_v37 = vadd.f32 %v3835_v61, %v10393_v56 }
 0x475   : > { %12714 = vst [vmem:[#allocation61_spill] sm:$0xff] %v10440_v3  ;;  %v3907_v56 = vmul.f32 %v10407_v18, %v12710_v28  ;;  %v3938_v61 = vadd.f32 %v3906_v60, %v3858_v1 }
 0x476   : > { %v10497_v39 = vadd.f32 %v3924_v47, %v3876_v8 }
 0x477   : > { %v4059_v13 = vpop.f32.mrf.mxu1 }
 0x478   : > { %v4060_v44 = vadd.f32 %v4059_v13, %v3959_v46  ;;  %v3905_v13 = vmul.f32 %v10407_v18, %v12702_v38  ;;  %v10448_v46 = vadd.f32 %v3923_v62, %v3875_v12  ;;  %v10466_v62 = vmul.f32 100.0, %v10440_v3 }
 0x47a   : > { %12717 = vst [vmem:[#allocation52_spill] sm:$0xff] %v10448_v46  ;;  %v10457_v25 = vadd.f32 %v10419_v6, %v4060_v44  ;;  %v3937_v44 = vadd.f32 %v3905_v13, %v3857_v4  ;;  %v3779_v46 = vmul.f32 %v10377_v35, %v12704_v5  ;;  %v12721_v6 = vld [vmem:[#allocation34_spill] sm:$0xff]  ;;  %v3866_v4 = vadd.f32 %v3834_v57, %v10385_v22 }
 0x47b   : > { %v4079_v20 = vpop.f32.mrf.mxu2  ;;  %12720 = vst [vmem:[#allocation23_spill] sm:$0xff] %v10466_v62  ;;  %v3845_v3 = vmul.f32 %v10305_v63, %v12721_v6  ;;  %v3914_v13 = vmul.f32 %v10315_v54, %v12706_v58 }
 0x47c   : > { %12718 = vst [vmem:[#allocation36_spill] sm:$0xff] %v10457_v25  ;;  %v4080_v29 = vadd.f32 %v4079_v20, %v3936_v51  ;;  %v12722_v20 = vld [vmem:[#allocation8_spill] sm:$0xff]  ;;  %v10483_v11 = vmul.f32 100.0, %v10457_v25  ;;  %v3859_v57 = vadd.f32 %v3827_v10, %v3779_v46  ;;  %v3836_v10 = vmul.f32 %v10309_v43, %v12716_v26 }
 0x47d   : > { %v3925_v51 = vmul.f32 %v10303_v17, %v12722_v20  ;;  %v3915_v17 = vmul.f32 %v10315_v54, %v12710_v28  ;;  %v3877_v20 = vadd.f32 %v3845_v3, %v3797_v52 }
 0x47e   : > { %v10493_v63 = vadd.f32 %v10480_v33, %v4080_v29  ;;  %v3848_v29 = vmul.f32 %v10293_v24, %v12697_v50  ;;  %v4345_v47 = vmin.f32 %v10483_v11, 20.0  ;;  %v10519_v50 = vpop.permute.xlu0 %4248  ;;  %vm4761_vm9 = vcmp.gt.f32.partialorder %v10483_v11, 20.0 }
 0x47f   : > { %v3947_v60 = vadd.f32 %v3915_v17, %v3867_v37 }
 0x480   : > { %12723 = vst [vmem:[#allocation39_spill] sm:$0xff] %v10493_v63  ;;  %v10513_v1 = vmul.f32 100.0, %v10493_v63  ;;  %v4402_v37 = vmul.f32 1.442695, %v4345_v47 }
 0x482   : > { %12725 = vst [vmem:[#allocation44_spill] sm:$0xff] %v10513_v1 }
 0x483   : > { %v4082_v49 = vpop.f32.mrf.mxu2 }
 0x484   : > { %v4108_v55 = vpop.f32.mrf.mxu3  ;;  %v4083_v12 = vadd.f32 %v4082_v49, %v3944_v53  ;;  %v10489_v53 = vpop.permute.xlu1 %4243  ;;  %v4344_v49 = vmin.f32 %v10466_v62, 20.0  ;;  %v3800_v62 = vmul.f32 %v10319_v7, %v12698_v48  ;;  %v10517_v48 = vmul.f32 %v10309_v43, %v12721_v6 }
 0x485   : > { %v4109_v0 = vadd.f32 %v4108_v55, %v3937_v44  ;;  %v3928_v43 = vmul.f32 %v10299_v19, %v12701_v16  ;;  %v3849_v16 = vmul.f32 %v10293_v24, %v12700_v36  ;;  %v10565_v36 = vadd.f32 %v10329_v21, %v10363_v45 }
 0x486   : > { %v10500_v22 = vadd.f32 %v10489_v53, %v4083_v12  ;;  %v3946_v12 = vadd.f32 %v3914_v13, %v3866_v4  ;;  %v4400_v3 = vmul.f32 1.442695, %v4344_v49  ;;  %v10536_v49 = vadd.f32 %v3836_v10, %v10433_v41 }
 0x487   : > { %v10522_v52 = vadd.f32 %v10480_v33, %v4109_v0  ;;  %v10538_v0 = vadd.f32 %v3925_v51, %v3877_v20  ;;  %v3802_v45 = vmul.f32 %v10319_v7, %v12703_v32  ;;  %v3803_v32 = vmul.f32 %v10319_v7, %v12704_v5 }
 0x488   : > { %12724 = vst [vmem:[#allocation41_spill] sm:$0xff] %v10500_v22  ;;  %6748 = vpow2.f32 %v4400_v3  ;;  %v3929_v3 = vmul.f32 %v10299_v19, %v12702_v38 }
 0x489   : > { %12726 = vst [vmem:[#allocation26_spill] sm:$0xff] %v10522_v52  ;;  %v10554_v41 = vmul.f32 100.0, %v10522_v52  ;;  %6750 = vpow2.f32 %v4402_v37 }
 0x48b   : > { %v4085_v25 = vpop.f32.mrf.mxu2  ;;  %12730 = vst [vmem:[#allocation50_spill] sm:$0xff] %v10554_v41 }
 0x48c   : > { %v4111_v8 = vpop.f32.mrf.mxu3  ;;  %v4137_v55 = vpop.f32.mrf.mxu0  ;;  %v4086_v44 = vadd.f32 %v4085_v25, %v10409_v2  ;;  %v10525_v2 = vmul.f32 100.0, %v10500_v22  ;;  %v3939_v25 = vadd.f32 %v3907_v56, %v3859_v57  ;;  %v10542_v57 = vadd.f32 %v10307_v27, %v10351_v40 }
 0x48d   : > { %v4112_v46 = vadd.f32 %v4111_v8, %v3945_v34  ;;  %v4138_v4 = vadd.f32 %v4137_v55, %v3938_v61  ;;  %v3880_v34 = vadd.f32 %v3848_v29, %v3800_v62  ;;  %v4322_v56 = vmin.f32 %v10513_v1, 20.0 }
 0x48e   : > { %12727 = vst [vmem:[#allocation38_spill] sm:$0xff] %v10525_v2  ;;  %v10528_v63 = vadd.f32 %v10519_v50, %v4086_v44  ;;  %v3801_v62 = vmul.f32 %v10319_v7, %v12699_v23  ;;  %v10551_v61 = vadd.f32 %v10311_v59, %v10355_v42  ;;  %v4330_v20 = vmin.f32 %v10525_v2, 20.0  ;;  %v12733_v59 = vld [vmem:[#allocation10_spill] sm:$0xff] }
 0x48f   : > { %v4166_v13 = vpop.f32.mrf.mxu1  ;;  %v10533_v17 = vadd.f32 %v10489_v53, %v4112_v46  ;;  %v10558_v27 = vadd.f32 %v10480_v33, %v4138_v4  ;;  %v3960_v23 = vadd.f32 %v3928_v43, %v3880_v34  ;;  %v10569_v42 = vadd.f32 %v12733_v59, %v10371_v31  ;;  %v12737_v43 = vld [vmem:[#allocation54_spill] sm:$0xff] }
 0x490   : > { %12728 = vst [vmem:[#allocation59_spill] sm:$0xff] %v10528_v63  ;;  %v4167_v40 = vadd.f32 %v4166_v13, %v3939_v25  ;;  %v10561_v51 = vmul.f32 100.0, %v10528_v63  ;;  %v4356_v55 = vmul.f32 1.442695, %v4322_v56  ;;  %v3881_v46 = vadd.f32 %v3849_v16, %v3801_v62  ;;  %v10589_v56 = vpop.eup %6748 }
 0x491   : > { %12729 = vst [vmem:[#allocation42_spill] sm:$0xff] %v10533_v17  ;;  %v10572_v47 = vmul.f32 100.0, %v10533_v17  ;;  %v4323_v25 = vmin.f32 %v10554_v41, 20.0  ;;  %v4372_v21 = vmul.f32 1.442695, %v4330_v20  ;;  %v3850_v31 = vmul.f32 %v10293_v24, %v12705_v30  ;;  %v12738_v20 = vld [vmem:[#allocation29_spill] sm:$0xff]  ;;  %v10601_v59 = vpop.eup %6750 }
 0x492   : > { %12731 = vst [vmem:[#allocation62_spill] sm:$0xff] %v10558_v27  ;;  %v10582_v4 = vmul.f32 100.0, %v10558_v27  ;;  %v10585_v13 = vadd.f32 %v10480_v33, %v4167_v40  ;;  %v4338_v34 = vmin.f32 %v10561_v51, 20.0  ;;  %v3851_v30 = vmul.f32 %v10293_v24, %v12708_v15 }
 0x493   : > { %12732 = vst [vmem:[#allocation7_spill] sm:$0xff] %v10561_v51  ;;  %v4088_v29 = vpop.f32.mrf.mxu2  ;;  %v4331_v62 = vmin.f32 %v10572_v47, 20.0  ;;  %6752 = vpow2.f32 %v4356_v55  ;;  %v4644_v1 = vmul.f32 -0.5, %v10601_v59  ;;  %v10726_v11 = vadd.f32 %v10489_v53, %v10551_v61  ;;  %v12770_v61 = vld [vmem:[#allocation13_spill] sm:$0xff] }
 0x494   : > { %12734 = vst [vmem:[#allocation64_spill] sm:$0xff] %v10572_v47  ;;  %v4114_v8 = vpop.f32.mrf.mxu3  ;;  %v4140_v44 = vpop.f32.mrf.mxu0  ;;  %v4089_v10 = vadd.f32 %v4088_v29, %v3960_v23  ;;  %v3961_v23 = vadd.f32 %v3929_v3, %v3881_v46  ;;  %v3930_v29 = vmul.f32 %v10299_v19, %v12706_v58  ;;  %6754 = vpow2.f32 %v4372_v21 }
 0x495   : > { %12735 = vst [vmem:[#allocation51_spill] sm:$0xff] %v10582_v4  ;;  %v4115_v37 = vadd.f32 %v4114_v8, %v12737_v43  ;;  %v4141_v16 = vadd.f32 %v4140_v44, %v3946_v12  ;;  %v4358_v8 = vmul.f32 1.442695, %v4323_v25  ;;  %v3882_v12 = vadd.f32 %v3850_v31, %v3802_v45  ;;  %v12743_v25 = vld [vmem:[#allocation32_spill] sm:$0xff] }
 0x496   : > { %12736 = vst [vmem:[#allocation45_spill] sm:$0xff] %v10585_v13  ;;  %v10597_v40 = vadd.f32 %v12738_v20, %v4089_v10  ;;  %v4324_v44 = vmin.f32 %v10582_v4, 20.0  ;;  %v10605_v5 = vmul.f32 100.0, %v10585_v13  ;;  %v4388_v15 = vmul.f32 1.442695, %v4338_v34 }
 0x497   : > { %v4169_v38 = vpop.f32.mrf.mxu1  ;;  %v10608_v55 = vadd.f32 %v10519_v50, %v4115_v37  ;;  %v4374_v10 = vmul.f32 1.442695, %v4331_v62  ;;  %v10611_v46 = vadd.f32 %v10489_v53, %v4141_v16  ;;  %v3883_v58 = vadd.f32 %v3851_v30, %v3803_v32  ;;  %v12745_v62 = vld [vmem:[#allocation6_spill] sm:$0xff] }
 0x498   : > { %12739 = vst [vmem:[#allocation56_spill] sm:$0xff] %v10597_v40  ;;  %v4170_v43 = vadd.f32 %v4169_v38, %v3947_v60  ;;  %v3931_v3 = vmul.f32 %v10299_v19, %v12710_v28  ;;  %v10616_v60 = vmul.f32 100.0, %v10597_v40  ;;  %v3780_v21 = vmul.f32 %v10377_v35, %v12743_v25 }
 0x499   : > { %12740 = vst [vmem:[#allocation47_spill] sm:$0xff] %v10605_v5  ;;  %v3828_v45 = vmul.f32 %v10335_v14, %v12716_v26  ;;  %v4632_v31 = vadd.f32 1.0, %v10589_v56  ;;  %6756 = vpow2.f32 %v4358_v8  ;;  %v10626_v38 = vadd.f32 %v3930_v29, %v3882_v12  ;;  %v10630_v16 = vpop.eup %6752 }
 0x49a   : > { %12741 = vst [vmem:[#allocation58_spill] sm:$0xff] %v10608_v55  ;;  %v10624_v34 = vadd.f32 %v10489_v53, %v4170_v43  ;;  %v3908_v28 = vmul.f32 %v10407_v18, %v12745_v62  ;;  %v4360_v32 = vmul.f32 1.442695, %v4324_v44  ;;  %v4325_v30 = vmin.f32 %v10605_v5, 20.0  ;;  %v10636_v8 = vpop.eup %6754  ;;  %v12751_v5 = vld [vmem:[#allocation12_spill] sm:$0xff] }
 0x49b   : > { %12742 = vst [vmem:[#allocation60_spill] sm:$0xff] %v10611_v46  ;;  %6758 = vpow2.f32 %v4388_v15  ;;  %v10634_v13 = vmul.f32 100.0, %v10608_v55  ;;  %v10639_v43 = vmul.f32 100.0, %v10611_v46  ;;  %v10641_v29 = vadd.f32 %v3931_v3, %v3883_v58 }
 0x49c   : > { %12744 = vst [vmem:[#allocation49_spill] sm:$0xff] %v10624_v34  ;;  %v4117_v37 = vpop.f32.mrf.mxu3  ;;  %v4143_v27 = vpop.f32.mrf.mxu0  ;;  %6760 = vpow2.f32 %v4374_v10  ;;  %v4635_v12 = vmul.f32 -0.5, %v10589_v56  ;;  %v4346_v4 = vmin.f32 %v10616_v60, 20.0  ;;  %v3860_v52 = vadd.f32 %v3828_v45, %v3780_v21 }
 0x49d   : > { %12746 = vst [vmem:[#allocation57_spill] sm:$0xff] %v10630_v16  ;;  %v4118_v44 = vadd.f32 %v4117_v37, %v3961_v23  ;;  %6762 = vlog2.f32 %v4632_v31  ;;  %v10646_v15 = vmul.f32 100.0, %v10624_v34  ;;  %v4144_v41 = vadd.f32 %v4143_v27, %v12751_v5  ;;  %v12762_v16 = vld [vmem:[#allocation23_spill] sm:$0xff] }
 0x49e   : > { %12747 = vst [vmem:[#allocation46_spill] sm:$0xff] %v10634_v13  ;;  %v3781_v10 = vmul.f32 %v10377_v35, %v12712_v9  ;;  %v4641_v46 = vadd.f32 1.0, %v10601_v59  ;;  %6764 = vpow2.f32 %v4360_v32  ;;  %v4362_v58 = vmul.f32 1.442695, %v4325_v30 }
 0x49f   : > { %12748 = vst [vmem:[#allocation48_spill] sm:$0xff] %v10636_v8  ;;  %v4339_v3 = vmin.f32 %v10634_v13, 20.0  ;;  %v10654_v17 = vpop.eup %6756  ;;  %v4332_v23 = vmin.f32 %v10639_v43, 20.0  ;;  %v4172_v21 = vpop.f32.mrf.mxu1  ;;  %v4636_v45 = vadd.f32 1.0, %v4635_v12  ;;  %v10659_v27 = vadd.f32 %v10519_v50, %v10565_v36 }
 0x4a0   : > { %12749 = vst [vmem:[#allocation43_spill] sm:$0xff] %v10639_v43  ;;  %6766 = vlog2.f32 %v4641_v46  ;;  %v4404_v31 = vmul.f32 1.442695, %v4346_v4  ;;  %v10664_v37 = vadd.f32 %v12738_v20, %v4118_v44  ;;  %v3940_v32 = vadd.f32 %v3908_v28, %v3860_v52  ;;  %v12756_v44 = vld [vmem:[#allocation52_spill] sm:$0xff] }
 0x4a1   : > { %12750 = vst [vmem:[#allocation55_spill] sm:$0xff] %v10646_v15  ;;  %v10661_v5 = vpop.eup %6758  ;;  %v3829_v30 = vmul.f32 %v10335_v14, %v12721_v6  ;;  %v4333_v43 = vmin.f32 %v10646_v15, 20.0  ;;  %v10672_v46 = vadd.f32 %v10519_v50, %v4144_v41  ;;  %v4638_v36 = vand.u32 2147483647, %v10589_v56  ;;  %v12757_v52 = vld [vmem:[#allocation8_spill] sm:$0xff] }
 0x4a2   : > { %12752 = vst [vmem:[#allocation37_spill] sm:$0xff] %v10654_v17  ;;  %v10668_v34 = vpop.eup %6760  ;;  %v10676_v12 = vmul.f32 100.0, %v10659_v27  ;;  %6768 = vpow2.f32 %v4362_v58  ;;  %v4173_v47 = vadd.f32 %v4172_v21, %v12756_v44  ;;  %v10681_v28 = vmul.f32 %v10407_v18, %v12757_v52 }
 0x4a3   : > { %12753 = vst [vmem:[#allocation19_spill] sm:$0xff] %v10664_v37  ;;  %v6763_v4 = vpop.eup %6762  ;;  %v4645_v22 = vadd.f32 1.0, %v4644_v1  ;;  %v4390_v55 = vmul.f32 1.442695, %v4339_v3  ;;  %v4376_v2 = vmul.f32 1.442695, %v4332_v23  ;;  %v4637_v15 = vmul.f32 %v10589_v56, %v4636_v45 }
 0x4a4   : > { %12754 = vst [vmem:[#allocation24_spill] sm:$0xff] %v10668_v34  ;;  %v4647_v41 = vand.u32 2147483647, %v10601_v59  ;;  %v10685_v17 = vpop.eup %6764  ;;  %v10688_v13 = vmul.f32 100.0, %v10664_v37  ;;  %v4634_v63 = vmul.f32 0.6931472, %v6763_v4  ;;  %v10693_v21 = vadd.f32 %v10519_v50, %v10569_v42 }
 0x4a5   : > { %12755 = vst [vmem:[#allocation25_spill] sm:$0xff] %v10672_v46  ;;  %v4336_v58 = vmin.f32 %v10676_v12, 20.0  ;;  %v4378_v1 = vmul.f32 1.442695, %v4333_v43  ;;  %6770 = vpow2.f32 %v4404_v31  ;;  %v10696_v3 = vmul.f32 100.0, %v10672_v46  ;;  %v4146_v31 = vpop.f32.mrf.mxu0 }
 0x4a6   : > { %12758 = vst [vmem:[#allocation20_spill] sm:$0xff] %v10685_v17  ;;  %v6767_v44 = vpop.eup %6766  ;;  %vm4639_vm6 = vcmp.lt.f32.partialorder %v4638_v36, 0.0004427343  ;;  %v10699_v56 = vadd.f32 %v10519_v50, %v4173_v47  ;;  %v4646_v4 = vmul.f32 %v10601_v59, %v4645_v22  ;;  %6772 = vpow2.f32 %v4390_v55  ;;  %v12764_v47 = vld [vmem:[#allocation61_spill] sm:$0xff] }
 0x4a7   : > { %12759 = vst [vmem:[#allocation15_spill] sm:$0xff] %v10688_v13  ;;  %v4640_v23 = vsel %vm4639_vm6, %v4637_v15, %v4634_v63  ;;  %v4643_v45 = vmul.f32 0.6931472, %v6767_v44  ;;  %vm4760_vm7 = vcmp.gt.f32.partialorder %v12762_v16, 20.0  ;;  %vm4648_vm8 = vcmp.lt.f32.partialorder %v4647_v41, 0.0004427343  ;;  %v4195_v16 = vpop.f32.mrf.mxu2 }
 0x4a8   : > { %12760 = vst [vmem:[#allocation16_spill] sm:$0xff] %v10696_v3  ;;  %v4728_v17 = vmul.f32 0.01, %v4640_v23  ;;  %v10703_v42 = vpop.eup %6768  ;;  %v4347_v43 = vmin.f32 %v10688_v13, 20.0  ;;  %v4384_v37 = vmul.f32 1.442695, %v4336_v58  ;;  %6774 = vpow2.f32 %v4376_v2 }
 0x4a9   : > { %12761 = vst [vmem:[#allocation33_spill] sm:$0xff] %v10699_v56  ;;  %v4649_v46 = vsel %vm4648_vm8, %v4646_v4, %v4643_v45  ;;  %v10707_v36 = vmul.f32 100.0, %v10693_v21  ;;  %v3861_v63 = vadd.f32 %v3829_v30, %v3781_v10  ;;  %v4340_v59 = vmin.f32 %v10696_v3, 20.0  ;;  %v12766_v10 = vld [vmem:[#allocation36_spill] sm:$0xff] }
 0x4aa   : > { %12763 = vst [vmem:[#allocation27_spill] sm:$0xff] %v10703_v42  ;;  %v4792_v15 = vsel %vm4760_vm7, %v12764_v47, %v4728_v17  ;;  %v4729_v22 = vmul.f32 0.01, %v4649_v46  ;;  %v10712_v55 = vmul.f32 100.0, %v10699_v56  ;;  %6776 = vpow2.f32 %v4378_v1  ;;  %v4175_v47 = vpop.f32.mrf.mxu1 }
 0x4ab   : > { %4852 = vmatpush.msra.mxu0 %v4792_v15  ;;  %v4337_v41 = vmin.f32 %v10707_v36, 20.0  ;;  %v10716_v58 = vpop.eup %6770  ;;  %v4147_v2 = vadd.f32 %v4146_v31, %v10626_v38  ;;  %v10722_v17 = vadd.f32 %v10489_v53, %v10542_v57  ;;  %v4406_v46 = vmul.f32 1.442695, %v4347_v43  ;;  %v12768_v38 = vld [vmem:[#allocation21_spill] sm:$0xff] }
 0x4ac   : > { %12765 = vst [vmem:[#allocation31_spill] sm:$0xff] %v10712_v55  ;;  %v4793_v30 = vsel %vm4761_vm9, %v12766_v10, %v4729_v22  ;;  %6778 = vpow2.f32 %v4384_v37  ;;  %v10728_v23 = vpop.eup %6772  ;;  %v4196_v45 = vadd.f32 %v4195_v16, %v3940_v32  ;;  %v3774_v4 = vmul.f32 %v10377_v35, %v12768_v38  ;;  %v12769_v31 = vld [vmem:[#allocation17_spill] sm:$0xff]  ;;  %v12773_v38 = vld [vmem:[#allocation40_spill] sm:$0xff] }
 0x4ad   : > { %4881 = vmatpush.msra.mxu1 %v4793_v30  ;;  %v4386_v44 = vmul.f32 1.442695, %v4337_v41  ;;  %12767 = vst [vmem:[#allocation28_spill] sm:$0xff] %v10728_v23  ;;  %v10731_v1 = vmul.f32 100.0, %v10722_v17  ;;  %v3822_v57 = vmul.f32 %v10335_v14, %v12769_v31  ;;  %v4392_v43 = vmul.f32 1.442695, %v4340_v59 }
 0x4ae   : > { %v4341_v37 = vmin.f32 %v10712_v55, 20.0  ;;  %v10739_v15 = vmul.f32 100.0, %v10726_v11  ;;  %v3902_v22 = vmul.f32 %v10407_v18, %v12770_v61  ;;  %v10743_v32 = vpop.eup %6774  ;;  %v10746_v16 = vadd.f32 %v12738_v20, %v4147_v2 }
 0x4af   : > { %12771 = vst [vmem:[#allocation11_spill] sm:$0xff] %v10743_v32  ;;  %6780 = vpow2.f32 %v4386_v44  ;;  %v4328_v41 = vmin.f32 %v10731_v1, 20.0  ;;  %v3854_v10 = vadd.f32 %v3822_v57, %v3774_v4  ;;  %v3916_v30 = vmul.f32 %v10315_v54, %v12745_v62  ;;  %v4224_v44 = vpop.f32.mrf.mxu3 }
 0x4b0   : > { %12772 = vst [vmem:[#allocation35_spill] sm:$0xff] %v10746_v16  ;;  %6782 = vpow2.f32 %v4406_v46  ;;  %v4329_v59 = vmin.f32 %v10739_v15, 20.0  ;;  %v3869_v31 = vadd.f32 %v10517_v48, %v12773_v38  ;;  %v10754_v56 = vpop.eup %6776  ;;  %v4176_v61 = vadd.f32 %v4175_v47, %v10641_v29  ;;  %v12777_v47 = vld [vmem:[#allocation63_spill] sm:$0xff] }
 0x4b1   : > { %12774 = vst [vmem:[#allocation30_spill] sm:$0xff] %v10754_v56  ;;  %v10758_v2 = vadd.f32 %v10480_v33, %v4196_v45  ;;  %v4368_v55 = vmul.f32 1.442695, %v4328_v41  ;;  %v3934_v42 = vadd.f32 %v3902_v22, %v3854_v10  ;;  %6784 = vpow2.f32 %v4392_v43 }
 0x4b2   : > { %v6779_v4 = vpop.eup %6778  ;;  %v3941_v46 = vadd.f32 %v10681_v28, %v3861_v63  ;;  %v4370_v57 = vmul.f32 1.442695, %v4329_v59  ;;  %v3917_v3 = vmul.f32 %v10315_v54, %v12757_v52  ;;  %v4394_v32 = vmul.f32 1.442695, %v4341_v37  ;;  %v12780_v59 = vld [vmem:[#allocation22_spill] sm:$0xff] }
 0x4b3   : > { %12775 = vst [vmem:[#allocation9_spill] sm:$0xff] %v10758_v2  ;;  %v10764_v48 = vmul.f32 100.0, %v10746_v16  ;;  %v4560_v38 = vadd.f32 1.0, %v6779_v4  ;;  %6786 = vpow2.f32 %v4368_v55  ;;  %v4563_v45 = vmul.f32 -0.5, %v6779_v4 }
 0x4b4   : > { %v4225_v29 = vadd.f32 %v4224_v44, %v3941_v46  ;;  %6788 = vpow2.f32 %v4370_v57  ;;  %v4022_v41 = vadd.f32 %v12777_v47, %v3934_v42  ;;  %v10768_v43 = vadd.f32 %v12738_v20, %v4176_v61  ;;  %v12781_v44 = vld [vmem:[#allocation18_spill] sm:$0xff] }
 0x4b5   : > { %12776 = vst [vmem:[#allocation34_spill] sm:$0xff] %v10764_v48  ;;  %v6781_v22 = vpop.eup %6780  ;;  %v10771_v28 = vmul.f32 100.0, %v10758_v2  ;;  %6790 = vlog2.f32 %v4560_v38  ;;  %v10774_v54 = vadd.f32 %v3916_v30, %v10536_v49  ;;  %v3775_v42 = vmul.f32 %v10377_v35, %v12780_v59  ;;  %v12783_v2 = vld [vmem:[#allocation14_spill] sm:$0xff] }
 0x4b6   : > { %12778 = vst [vmem:[#allocation10_spill] sm:$0xff] %v10768_v43  ;;  %v10776_v63 = vpop.eup %6782  ;;  %v4569_v37 = vadd.f32 1.0, %v6781_v22  ;;  %v4572_v55 = vmul.f32 -0.5, %v6781_v22  ;;  %v10779_v10 = vadd.f32 %v10480_v33, %v4022_v41  ;;  %6792 = vpow2.f32 %v4394_v32 }
 0x4b7   : > { %12779 = vst [vmem:[#allocation54_spill] sm:$0xff] %v10771_v28  ;;  %v4348_v61 = vmin.f32 %v10764_v48, 20.0  ;;  %v3823_v46 = vmul.f32 %v10335_v14, %v12781_v44  ;;  %v10786_v57 = vadd.f32 %v3917_v3, %v3869_v31  ;;  %v10788_v49 = vpop.eup %6784  ;;  %v10791_v30 = vadd.f32 %v10480_v33, %v4225_v29 }
 0x4b8   : > { %12782 = vst [vmem:[#allocation29_spill] sm:$0xff] %v10788_v49  ;;  %v4564_v38 = vadd.f32 1.0, %v4563_v45  ;;  %vm4752_vm11 = vcmp.gt.f32.partialorder %v10676_v12, 20.0  ;;  %6794 = vlog2.f32 %v4569_v37  ;;  %v10795_v47 = vmul.f32 100.0, %v10779_v10 }
 0x4b9   : > { %v6787_v35 = vpop.eup %6786  ;;  %v10798_v32 = vmul.f32 100.0, %v10768_v43  ;;  %v4326_v14 = vmin.f32 %v10771_v28, 20.0  ;;  %v4566_v3 = vand.u32 2147483647, %v6779_v4  ;;  %v4573_v31 = vadd.f32 1.0, %v4572_v55 }
 0x4ba   : > { %v6789_v41 = vpop.eup %6788  ;;  %v4488_v59 = vadd.f32 1.0, %v6787_v35  ;;  %v4491_v44 = vmul.f32 -0.5, %v6787_v35  ;;  %v3855_v29 = vadd.f32 %v3823_v46, %v3775_v42  ;;  %v3903_v45 = vmul.f32 %v10407_v18, %v12783_v2 }
 0x4bb   : > { %v6791_v56 = vpop.eup %6790  ;;  %v4408_v37 = vmul.f32 1.442695, %v4348_v61  ;;  %v4497_v16 = vadd.f32 1.0, %v6789_v41  ;;  %v4500_v48 = vmul.f32 -0.5, %v6789_v41  ;;  %v4320_v49 = vmin.f32 %v10795_v47, 20.0 }
 0x4bc   : > { %v4562_v34 = vmul.f32 0.6931472, %v6791_v56  ;;  %v4565_v43 = vmul.f32 %v6779_v4, %v4564_v38  ;;  %v4575_v51 = vand.u32 2147483647, %v6781_v22  ;;  %6796 = vlog2.f32 %v4488_v59  ;;  %v10804_v28 = vpop.eup %6792  ;;  %v12784_v38 = vld [vmem:[#allocation53_spill] sm:$0xff] }
 0x4bd   : > { %vm4567_vm12 = vcmp.lt.f32.partialorder %v4566_v3, 0.0004427343  ;;  %v4574_v55 = vmul.f32 %v6781_v22, %v4573_v31  ;;  %6798 = vlog2.f32 %v4497_v16  ;;  %v4352_v13 = vmul.f32 1.442695, %v4320_v49  ;;  %v4198_v49 = vpop.f32.mrf.mxu2  ;;  %v4227_v31 = vpop.f32.mrf.mxu3 }
 0x4be   : > { %v6795_v42 = vpop.eup %6794  ;;  %v4568_v46 = vsel %vm4567_vm12, %v4565_v43, %v4562_v34  ;;  %v4492_v40 = vadd.f32 1.0, %v4491_v44  ;;  %v4494_v18 = vand.u32 2147483647, %v6787_v35  ;;  %v3935_v2 = vadd.f32 %v3903_v45, %v3855_v29 }
 0x4bf   : > { %v4720_v61 = vmul.f32 0.01, %v4568_v46  ;;  %v4571_v8 = vmul.f32 0.6931472, %v6795_v42  ;;  %v4501_v23 = vadd.f32 1.0, %v4500_v48  ;;  %6800 = vpow2.f32 %v4352_v13 }
 0x4c0   : > { %v4349_v56 = vmin.f32 %v10798_v32, 20.0  ;;  %v10808_v4 = vmul.f32 100.0, %v10791_v30  ;;  %vm4576_vm13 = vcmp.lt.f32.partialorder %v4575_v51, 0.0004427343  ;;  %v4051_v3 = vadd.f32 %v12784_v38, %v3935_v2 }
 0x4c1   : > { %v4364_v22 = vmul.f32 1.442695, %v4326_v14  ;;  %v4784_v34 = vsel %vm4752_vm11, %v10659_v27, %v4720_v61  ;;  %v4577_v16 = vsel %vm4576_vm13, %v4574_v55, %v4571_v8  ;;  %v4503_v43 = vand.u32 2147483647, %v6789_v41 }
 0x4c2   : > { %v6797_v59 = vpop.eup %6796  ;;  %4853 = vmatpush.msra.mxu0 %v4784_v34  ;;  %v4721_v13 = vmul.f32 0.01, %v4577_v16  ;;  %vm4753_vm14 = vcmp.gt.f32.partialorder %v10707_v36, 20.0  ;;  %v10816_v48 = vadd.f32 %v10480_v33, %v4051_v3  ;;  %v4199_v51 = vadd.f32 %v4198_v49, %v10774_v54 }
 0x4c3   : > { %v6799_v44 = vpop.eup %6798  ;;  %v4490_v14 = vmul.f32 0.6931472, %v6797_v59  ;;  %v4493_v29 = vmul.f32 %v6787_v35, %v4492_v40  ;;  %vm4495_vm15 = vcmp.lt.f32.partialorder %v4494_v18, 0.0004427343  ;;  %v4502_v12 = vmul.f32 %v6789_v41, %v4501_v23 }
 0x4c4   : > { %v4785_v8 = vsel %vm4753_vm14, %v10693_v21, %v4721_v13  ;;  %v4499_v27 = vmul.f32 0.6931472, %v6799_v44  ;;  %v10821_v45 = vmul.f32 100.0, %v10816_v48  ;;  %v4228_v55 = vadd.f32 %v4227_v31, %v10786_v57  ;;  %v10919_v13 = vld [vmem:[%s11992_s12 + $0x8] sm:$0xff] }
 0x4c5   : > { %v6801_v42 = vpop.eup %6800  ;;  %6802 = vpow2.f32 %v4408_v37  ;;  %4882 = vmatpush.msra.mxu1 %v4785_v8  ;;  %v4496_v33 = vsel %vm4495_vm15, %v4493_v29, %v4490_v14  ;;  %vm4504_vm1 = vcmp.lt.f32.partialorder %v4503_v43, 0.0004427343  ;;  %v10825_v36 = vadd.f32 %v10489_v53, %v4199_v51  ;;  %v4230_v38 = vpop.f32.mrf.mxu3 }
 0x4c6   : > { %v4712_v54 = vmul.f32 0.01, %v4496_v33  ;;  %v4505_v40 = vsel %vm4504_vm1, %v4502_v12, %v4499_v27  ;;  %v4416_v35 = vadd.f32 1.0, %v6801_v42  ;;  %v4419_v23 = vmul.f32 -0.5, %v6801_v42 }
 0x4c7   : > { %vm4744_vm2 = vcmp.gt.f32.partialorder %v10731_v1, 20.0  ;;  %v4713_v21 = vmul.f32 0.01, %v4505_v40  ;;  %vm4745_vm3 = vcmp.gt.f32.partialorder %v10739_v15, 20.0  ;;  %v4321_v41 = vmin.f32 %v10821_v45, 20.0  ;;  %v4201_v1 = vpop.f32.mrf.mxu2 }
 0x4c8   : > { %v4776_v57 = vsel %vm4744_vm2, %v10722_v17, %v4712_v54  ;;  %6804 = vlog2.f32 %v4416_v35  ;;  %v4420_v37 = vadd.f32 1.0, %v4419_v23  ;;  %v10832_v46 = vadd.f32 %v10489_v53, %v4228_v55  ;;  %v10885_v35 = vld [vmem:[%s11992_s12] sm:$0xff] }
 0x4c9   : > { %6806 = vpow2.f32 %v4364_v22  ;;  %v4327_v18 = vmin.f32 %v10808_v4, 20.0  ;;  %4854 = vmatpush.msra.mxu0 %v4776_v57  ;;  %v4777_v2 = vsel %vm4745_vm3, %v10726_v11, %v4713_v21  ;;  %v4354_v61 = vmul.f32 1.442695, %v4321_v41 }
 0x4ca   : > { %4883 = vmatpush.msra.mxu1 %v4777_v2  ;;  %v4422_v15 = vand.u32 2147483647, %v6801_v42  ;;  %v10837_v3 = vmul.f32 100.0, %v10825_v36  ;;  %v4202_v17 = vadd.f32 %v4201_v1, %v10497_v39  ;;  %v4231_v34 = vadd.f32 %v4230_v38, %v10538_v0 }
 0x4cb   : > { %v10841_v53 = vpop.eup %6802  ;;  %v4410_v22 = vmul.f32 1.442695, %v4349_v56  ;;  %6808 = vpow2.f32 %v4354_v61  ;;  %v3804_v16 = vmul.f32 %v10319_v7, %v12743_v25  ;;  %v3852_v11 = vmul.f32 %v10293_v24, %v12716_v26 }
 0x4cc   : > { %v4421_v43 = vmul.f32 %v6801_v42, %v4420_v37  ;;  %v10848_v49 = vmul.f32 100.0, %v10832_v46  ;;  %v10851_v31 = vadd.f32 %v10519_v50, %v4202_v17  ;;  %v10854_v39 = vadd.f32 %v10519_v50, %v4231_v34 }
 0x4cd   : > { %v3884_v0 = vadd.f32 %v3852_v11, %v3804_v16  ;;  %v3932_v56 = vmul.f32 %v10299_v19, %v12745_v62  ;;  %v3805_v25 = vmul.f32 %v10319_v7, %v12712_v9  ;;  %v3853_v26 = vmul.f32 %v10293_v24, %v12721_v6  ;;  %v4233_v55 = vpop.f32.mrf.mxu3 }
 0x4ce   : > { %v6805_v59 = vpop.eup %6804  ;;  %vm10862_vm0 = vcmp.lt.f32.partialorder %v4422_v15, 0.0004427343  ;;  %v4334_v51 = vmin.f32 %v10837_v3, 20.0  ;;  %v10868_v50 = vmul.f32 100.0, %v10851_v31  ;;  %v3933_v44 = vmul.f32 %v10299_v19, %v12757_v52 }
 0x4cf   : > { %v10872_v62 = vpop.eup %6806  ;;  %v4366_v14 = vmul.f32 1.442695, %v4327_v18  ;;  %v4418_v7 = vmul.f32 0.6931472, %v6805_v59  ;;  %v10875_v9 = vmul.f32 100.0, %v10854_v39  ;;  %v3885_v24 = vadd.f32 %v3853_v26, %v3805_v25  ;;  %v4204_v52 = vpop.f32.mrf.mxu2 }
 0x4d0   : > { %6810 = vpow2.f32 %v4410_v22  ;;  %vm4736_vm4 = vcmp.gt.f32.partialorder %v10795_v47, 20.0  ;;  %v4335_v6 = vmin.f32 %v10848_v49, 20.0  ;;  %v4342_v8 = vmin.f32 %v10868_v50, 20.0 }
 0x4d1   : > { %v6809_v29 = vpop.eup %6808  ;;  %v4424_v12 = vsel %vm10862_vm0, %v4421_v43, %v4418_v7  ;;  %v3964_v19 = vadd.f32 %v3932_v56, %v3884_v0  ;;  %v3965_v27 = vadd.f32 %v3933_v44, %v3885_v24  ;;  %v4380_v40 = vmul.f32 1.442695, %v4334_v51 }
 0x4d2   : > { %v4704_v42 = vmul.f32 0.01, %v4424_v12  ;;  %v4425_v33 = vadd.f32 1.0, %v6809_v29  ;;  %v4428_v54 = vmul.f32 -0.5, %v6809_v29  ;;  %6812 = vpow2.f32 %v4366_v14 }
 0x4d3   : > { %v4343_v23 = vmin.f32 %v10875_v9, 20.0  ;;  %v4205_v21 = vadd.f32 %v4204_v52, %v3964_v19  ;;  %v4234_v41 = vadd.f32 %v4233_v55, %v3965_v27  ;;  %v4382_v37 = vmul.f32 1.442695, %v4335_v6 }
 0x4d4   : > { %v4768_v57 = vsel %vm4736_vm4, %v10779_v10, %v4704_v42  ;;  %6814 = vlog2.f32 %v4425_v33  ;;  %v4429_v18 = vadd.f32 1.0, %v4428_v54  ;;  %v4396_v2 = vmul.f32 1.442695, %v4342_v8 }
 0x4d5   : > { %4855 = vmatpush.msra.mxu0 %v4768_v57  ;;  %v10892_v61 = vadd.f32 %v12738_v20, %v4205_v21  ;;  %v4650_v1 = vadd.f32 1.0, %v10716_v58  ;;  %v4431_v15 = vand.u32 2147483647, %v6809_v29  ;;  %6816 = vpow2.f32 %v4380_v40  ;;  %v12789_v40 = vld [vmem:[#allocation28_spill] sm:$0xff] }
 0x4d6   : > { %v10895_v38 = vpop.eup %6810  ;;  %6132 = vmatmul.msk.f32.vlgmr.msra.gmra.mxu0 %vm1417_vm10, %v10885_v35  ;;  %v4653_v47 = vmul.f32 -0.5, %v10716_v58  ;;  %v4398_v10 = vmul.f32 1.442695, %v4343_v23  ;;  %v10904_v34 = vadd.f32 %v12738_v20, %v4234_v41  ;;  %v4659_v22 = vadd.f32 1.0, %v10776_v63 }
 0x4d7   : > { %v10901_v17 = vmul.f32 100.0, %v10892_v61  ;;  %6818 = vlog2.f32 %v4650_v1  ;;  %v4662_v16 = vmul.f32 -0.5, %v10776_v63  ;;  %v4430_v43 = vmul.f32 %v6809_v29, %v4429_v18 }
 0x4d8   : > { %6820 = vpow2.f32 %v4382_v37  ;;  %v10908_v11 = vpop.eup %6812  ;;  %vm10911_vm5 = vcmp.lt.f32.partialorder %v4431_v15, 0.0004427343  ;;  %v4654_v26 = vadd.f32 1.0, %v4653_v47  ;;  %v4578_v20 = vadd.f32 1.0, %v10661_v5 }
 0x4d9   : > { %6822 = vpow2.f32 %v4396_v2  ;;  %v4350_v0 = vmin.f32 %v10901_v17, 20.0  ;;  %v10922_v51 = vmul.f32 100.0, %v10904_v34  ;;  %v4656_v44 = vand.u32 2147483647, %v10716_v58 }
 0x4da   : > { %v6815_v56 = vpop.eup %6814  ;;  %6824 = vlog2.f32 %v4659_v22  ;;  %vm4737_vm6 = vcmp.gt.f32.partialorder %v10821_v45, 20.0  ;;  %v4663_v7 = vadd.f32 1.0, %v4662_v16  ;;  %v4581_v24 = vmul.f32 -0.5, %v10661_v5  ;;  %v12791_v16 = vld [vmem:[#allocation56_spill] sm:$0xff] }
 0x4db   : > { %v4427_v59 = vmul.f32 0.6931472, %v6815_v56  ;;  %6826 = vpow2.f32 %v4398_v10  ;;  %v10925_v14 = vpop.eup %6816  ;;  %v4412_v12 = vmul.f32 1.442695, %v4350_v0  ;;  %vm4762_vm7 = vcmp.gt.f32.partialorder %v10616_v60, 20.0  ;;  %v12790_v10 = vld [vmem:[#allocation48_spill] sm:$0xff] }
 0x4dc   : > { %6828 = vlog2.f32 %v4578_v20  ;;  %v4665_v8 = vand.u32 2147483647, %v10776_v63  ;;  %v4655_v55 = vmul.f32 %v10716_v58, %v4654_v26  ;;  %v4582_v42 = vadd.f32 1.0, %v4581_v24  ;;  %v12792_v20 = vld [vmem:[#allocation15_spill] sm:$0xff] }
 0x4dd   : > { %v6819_v6 = vpop.eup %6818  ;;  %v4433_v29 = vsel %vm10911_vm5, %v4430_v43, %v4427_v59  ;;  %v4351_v54 = vmin.f32 %v10922_v51, 20.0  ;;  %vm4657_vm8 = vcmp.lt.f32.partialorder %v4656_v44, 0.0004427343  ;;  %v4587_v23 = vadd.f32 1.0, %v12789_v40  ;;  %v12793_v59 = vld [vmem:[#allocation7_spill] sm:$0xff] }
 0x4de   : > { %v10933_v19 = vpop.eup %6820  ;;  %v4705_v52 = vmul.f32 0.01, %v4433_v29  ;;  %6133 = vmatmul.msk.f32.gmra.mxu0 %vm1417_vm10, %v10919_v13  ;;  %v4652_v27 = vmul.f32 0.6931472, %v6819_v6  ;;  %v4590_v21 = vmul.f32 -0.5, %v12789_v40  ;;  %v4664_v18 = vmul.f32 %v10776_v63, %v4663_v7  ;;  %v10957_v63 = vld [vmem:[%s11992_s12 + $0x10] sm:$0xff] }
 0x4df   : > { %v10938_v33 = vpop.eup %6822  ;;  %v4584_v58 = vand.u32 2147483647, %v10661_v5  ;;  %vm4666_vm9 = vcmp.lt.f32.partialorder %v4665_v8, 0.0004427343  ;;  %6830 = vlog2.f32 %v4587_v23  ;;  %v4583_v45 = vmul.f32 %v10661_v5, %v4582_v42  ;;  %v12794_v7 = vld [vmem:[#allocation24_spill] sm:$0xff]  ;;  %v12795_v60 = vld [vmem:[#allocation19_spill] sm:$0xff] }
 0x4e0   : > { %v6825_v41 = vpop.eup %6824  ;;  %v4769_v57 = vsel %vm4737_vm6, %v10816_v48, %v4705_v52  ;;  %v4658_v37 = vsel %vm4657_vm8, %v4655_v55, %v4652_v27  ;;  %6832 = vpow2.f32 %v4412_v12  ;;  %v4591_v48 = vadd.f32 1.0, %v4590_v21  ;;  %v12796_v42 = vld [vmem:[#allocation57_spill] sm:$0xff] }
 0x4e1   : > { %v10948_v2 = vpop.eup %6826  ;;  %4884 = vmatpush.msra.mxu1 %v4769_v57  ;;  %v4730_v1 = vmul.f32 0.01, %v4658_v37  ;;  %v4661_v15 = vmul.f32 0.6931472, %v6825_v41  ;;  %v4506_v22 = vadd.f32 1.0, %v12790_v10  ;;  %v4509_v25 = vmul.f32 -0.5, %v12790_v10 }
 0x4e2   : > { %v6829_v47 = vpop.eup %6828  ;;  %6136 = vmatmul.msk.f32.vlgmr.msra.gmra.mxu1 %vm1417_vm10, %v10885_v35  ;;  %vm4763_vm11 = vcmp.gt.f32.partialorder %v12792_v20, 20.0  ;;  %vm4585_vm12 = vcmp.lt.f32.partialorder %v4584_v58, 0.0004427343  ;;  %vm4754_vm13 = vcmp.gt.f32.partialorder %v12793_v59, 20.0  ;;  %v4593_v44 = vand.u32 2147483647, %v12789_v40 }
 0x4e3   : > { %v4794_v43 = vsel %vm4762_vm7, %v12791_v16, %v4730_v1  ;;  %v4667_v0 = vsel %vm4666_vm9, %v4664_v18, %v4661_v15  ;;  %v4580_v56 = vmul.f32 0.6931472, %v6829_v47  ;;  %6834 = vlog2.f32 %v4506_v22  ;;  %v12797_v41 = vld [vmem:[#allocation59_spill] sm:$0xff]  ;;  %v12798_v15 = vld [vmem:[#allocation46_spill] sm:$0xff] }
 0x4e4   : > { %4910 = vmatpush.msra.mxu2 %v4794_v43  ;;  %v4731_v26 = vmul.f32 0.01, %v4667_v0  ;;  %v4515_v24 = vadd.f32 1.0, %v12794_v7  ;;  %v4512_v12 = vand.u32 2147483647, %v12790_v10  ;;  %v4518_v8 = vmul.f32 -0.5, %v12794_v7 }
 0x4e5   : > { %v4586_v5 = vsel %vm4585_vm12, %v4583_v45, %v4580_v56  ;;  %v6831_v52 = vpop.eup %6830  ;;  %v4592_v27 = vmul.f32 %v12789_v40, %v4591_v48  ;;  %v4510_v55 = vadd.f32 1.0, %v4509_v25  ;;  %v4434_v23 = vadd.f32 1.0, %v12796_v42  ;;  %v12799_v48 = vld [vmem:[#allocation37_spill] sm:$0xff]  ;;  %v10990_v25 = vld [vmem:[%s11992_s12 + $0x18] sm:$0xff] }
 0x4e6   : > { %6134 = vmatmul.msk.f32.gmra.mxu0 %vm1417_vm10, %v10957_v63  ;;  %v4795_v6 = vsel %vm4763_vm11, %v12795_v60, %v4731_v26  ;;  %v4722_v29 = vmul.f32 0.01, %v4586_v5  ;;  %6836 = vlog2.f32 %v4515_v24  ;;  %v10974_v21 = vpop.eup %6832  ;;  %v4589_v37 = vmul.f32 0.6931472, %v6831_v52  ;;  %v12800_v26 = vld [vmem:[#allocation38_spill] sm:$0xff] }
 0x4e7   : > { %4939 = vmatpush.msra.mxu3 %v4795_v6  ;;  %v4521_v18 = vand.u32 2147483647, %v12794_v7  ;;  %v4437_v58 = vmul.f32 -0.5, %v12796_v42  ;;  %v10979_v1 = vmul.f32 1.442695, %v4351_v54  ;;  %vm4755_vm15 = vcmp.gt.f32.partialorder %v12798_v15, 20.0 }
 0x4e8   : > { %v4786_v57 = vsel %vm4754_vm13, %v12797_v41, %v4722_v29  ;;  %vm4594_vm14 = vcmp.lt.f32.partialorder %v4593_v44, 0.0004427343  ;;  %6838 = vlog2.f32 %v4434_v23  ;;  %v4519_v45 = vadd.f32 1.0, %v4518_v8  ;;  %v12803_v59 = vld [vmem:[#allocation58_spill] sm:$0xff]  ;;  %v12804_v41 = vld [vmem:[#allocation41_spill] sm:$0xff]  ;;  %v12805_v15 = vld [vmem:[#allocation64_spill] sm:$0xff] }
 0x4e9   : > { %4911 = vmatpush.msra.mxu2 %v4786_v57  ;;  %v6835_v40 = vpop.eup %6834  ;;  %v4595_v47 = vsel %vm4594_vm14, %v4592_v27, %v4589_v37  ;;  %v4443_v22 = vadd.f32 1.0, %v12799_v48  ;;  %v4446_v16 = vmul.f32 -0.5, %v12799_v48  ;;  %v4511_v54 = vmul.f32 %v12790_v10, %v4510_v55 }
 0x4ea   : > { %6137 = vmatmul.msk.f32.gmra.mxu1 %vm1417_vm10, %v10919_v13  ;;  %v4723_v43 = vmul.f32 0.01, %v4595_v47  ;;  %v4508_v0 = vmul.f32 0.6931472, %v6835_v40  ;;  %v4438_v56 = vadd.f32 1.0, %v4437_v58  ;;  %vm4746_vm2 = vcmp.gt.f32.partialorder %v12800_v26, 20.0 }
 0x4eb   : > { %vm4513_vm1 = vcmp.lt.f32.partialorder %v4512_v12, 0.0004427343  ;;  %vm10993_vm3 = vcmp.lt.f32.partialorder %v4521_v18, 0.0004427343  ;;  %6840 = vlog2.f32 %v4443_v22  ;;  %v4440_v24 = vand.u32 2147483647, %v12796_v42 }
 0x4ec   : > { %v6837_v5 = vpop.eup %6836  ;;  %v4787_v44 = vsel %vm4755_vm15, %v12803_v59, %v4723_v43  ;;  %v4514_v10 = vsel %vm4513_vm1, %v4511_v54, %v4508_v0  ;;  %v4668_v60 = vadd.f32 1.0, %v10841_v53  ;;  %v4520_v12 = vmul.f32 %v12794_v7, %v4519_v45  ;;  %v12807_v26 = vld [vmem:[#allocation44_spill] sm:$0xff] }
 0x4ed   : > { %4940 = vmatpush.msra.mxu3 %v4787_v44  ;;  %v4714_v6 = vmul.f32 0.01, %v4514_v10  ;;  %v4517_v29 = vmul.f32 0.6931472, %v6837_v5  ;;  %v4447_v8 = vadd.f32 1.0, %v4446_v16  ;;  %v4439_v27 = vmul.f32 %v12796_v42, %v4438_v56  ;;  %v12806_v16 = vld [vmem:[#allocation42_spill] sm:$0xff] }
 0x4ee   : > { %6135 = vmatmul.msk.f32.gmra.mxu0 %vm1417_vm10, %v10990_v25  ;;  %v6839_v52 = vpop.eup %6838  ;;  %v4449_v55 = vand.u32 2147483647, %v12799_v48  ;;  %6842 = vlog2.f32 %v4668_v60  ;;  %v4671_v23 = vmul.f32 -0.5, %v10841_v53  ;;  %v4677_v18 = vadd.f32 1.0, %v10895_v38  ;;  %v12808_v5 = vld [vmem:[#allocation29_spill] sm:$0xff]  ;;  %v12809_v10 = vld [vmem:[#allocation39_spill] sm:$0xff] }
 0x4ef   : > { %v4778_v57 = vsel %vm4746_vm2, %v12804_v41, %v4714_v6  ;;  %v4523_v37 = vsel %vm10993_vm3, %v4520_v12, %v4517_v29  ;;  %v4436_v7 = vmul.f32 0.6931472, %v6839_v52  ;;  %vm4747_vm0 = vcmp.gt.f32.partialorder %v12805_v15, 20.0  ;;  %v12810_v52 = vld [vmem:[#allocation50_spill] sm:$0xff] }
 0x4f0   : > { %4912 = vmatpush.msra.mxu2 %v4778_v57  ;;  %v4715_v58 = vmul.f32 0.01, %v4523_v37  ;;  %vm4441_vm4 = vcmp.lt.f32.partialorder %v4440_v24, 0.0004427343  ;;  %v4680_v42 = vmul.f32 -0.5, %v10895_v38  ;;  %v4448_v45 = vmul.f32 %v12799_v48, %v4447_v8  ;;  %v12812_v41 = vld [vmem:[#allocation26_spill] sm:$0xff] }
 0x4f1   : > { %v6841_v40 = vpop.eup %6840  ;;  %v4442_v47 = vsel %vm4441_vm4, %v4439_v27, %v4436_v7  ;;  %v4672_v22 = vadd.f32 1.0, %v4671_v23  ;;  %6844 = vlog2.f32 %v4677_v18  ;;  %v4674_v56 = vand.u32 2147483647, %v10841_v53  ;;  %v12811_v27 = vld [vmem:[#allocation34_spill] sm:$0xff] }
 0x4f2   : > { %6138 = vmatmul.msk.f32.gmra.mxu1 %vm1417_vm10, %v10957_v63  ;;  %v4779_v43 = vsel %vm4747_vm0, %v12806_v16, %v4715_v58  ;;  %v4706_v0 = vmul.f32 0.01, %v4442_v47  ;;  %v4445_v54 = vmul.f32 0.6931472, %v6841_v40  ;;  %vm4738_vm5 = vcmp.gt.f32.partialorder %v12807_v26, 20.0  ;;  %v12813_v40 = vld [vmem:[#allocation11_spill] sm:$0xff] }
 0x4f3   : > { %4941 = vmatpush.msra.mxu3 %v4779_v43  ;;  %vm4450_vm6 = vcmp.lt.f32.partialorder %v4449_v55, 0.0004427343  ;;  %v4681_v20 = vadd.f32 1.0, %v4680_v42  ;;  %v4596_v59 = vadd.f32 1.0, %v12808_v5  ;;  %v4683_v48 = vand.u32 2147483647, %v10895_v38 }
 0x4f4   : > { %v6843_v44 = vpop.eup %6842  ;;  %v4770_v24 = vsel %vm4738_vm5, %v12809_v10, %v4706_v0  ;;  %v4451_v60 = vsel %vm4450_vm6, %v4448_v45, %v4445_v54  ;;  %v4599_v6 = vmul.f32 -0.5, %v12808_v5  ;;  %v4673_v8 = vmul.f32 %v10841_v53, %v4672_v22  ;;  %v12814_v45 = vld [vmem:[#allocation35_spill] sm:$0xff]  ;;  %v12816_v10 = vld [vmem:[#allocation10_spill] sm:$0xff] }
 0x4f5   : > { %4913 = vmatpush.msra.mxu2 %v4770_v24  ;;  %v4707_v29 = vmul.f32 0.01, %v4451_v60  ;;  %v4670_v12 = vmul.f32 0.6931472, %v6843_v44  ;;  %6846 = vlog2.f32 %v4596_v59  ;;  %vm4739_vm7 = vcmp.gt.f32.partialorder %v12810_v52, 20.0  ;;  %v12815_v44 = vld [vmem:[#allocation30_spill] sm:$0xff] }
 0x4f6   : > { %6140 = vmatmul.msk.f32.vlgmr.msra.gmra.mxu2 %vm1417_vm10, %v10885_v35  ;;  %vm4675_vm8 = vcmp.lt.f32.partialorder %v4674_v56, 0.0004427343  ;;  %vm4764_vm9 = vcmp.gt.f32.partialorder %v12811_v27, 20.0  ;;  %v4605_v55 = vadd.f32 1.0, %v10804_v28  ;;  %v4682_v7 = vmul.f32 %v10895_v38, %v4681_v20  ;;  %v12817_v60 = vld [vmem:[#allocation16_spill] sm:$0xff] }
 0x4f7   : > { %v6845_v23 = vpop.eup %6844  ;;  %v4771_v57 = vsel %vm4739_vm7, %v12812_v41, %v4707_v29  ;;  %v4676_v37 = vsel %vm4675_vm8, %v4673_v8, %v4670_v12  ;;  %v4608_v18 = vmul.f32 -0.5, %v10804_v28  ;;  %v4600_v15 = vadd.f32 1.0, %v4599_v6  ;;  %v12820_v12 = vld [vmem:[#allocation20_spill] sm:$0xff] }
 0x4f8   : > { %4942 = vmatpush.msra.mxu3 %v4771_v57  ;;  %v4732_v53 = vmul.f32 0.01, %v4676_v37  ;;  %v4679_v58 = vmul.f32 0.6931472, %v6845_v23  ;;  %6848 = vlog2.f32 %v4605_v55  ;;  %vm4684_vm11 = vcmp.lt.f32.partialorder %v4683_v48, 0.0004427343 }
 0x4f9   : > { %6144 = vmatmul.msk.f32.vlgmr.msra.gmra.mxu3 %vm1417_vm10, %v10885_v35  ;;  %v4602_v42 = vand.u32 2147483647, %v12808_v5  ;;  %v4524_v47 = vadd.f32 1.0, %v12813_v40  ;;  %v4527_v38 = vmul.f32 -0.5, %v12813_v40  ;;  %6850 = vpow2.f32 %v10979_v1 }
 0x4fa   : > { %6139 = vmatmul.msk.f32.gmra.mxu1 %vm1417_vm10, %v10990_v25  ;;  %v4796_v22 = vsel %vm4764_vm9, %v12814_v45, %v4732_v53  ;;  %v4685_v16 = vsel %vm4684_vm11, %v4682_v7, %v4679_v58  ;;  %v4611_v43 = vand.u32 2147483647, %v10804_v28  ;;  %vm4765_vm12 = vcmp.gt.f32.partialorder %v10798_v32, 20.0  ;;  %v12827_v32 = vld [vmem:[#allocation60_spill] sm:$0xff] }
 0x4fb   : > { %v6847_v0 = vpop.eup %6846  ;;  %4968 = vmatpush.msrb.mxu0 %v4796_v22  ;;  %v4733_v54 = vmul.f32 0.01, %v4685_v16  ;;  %v4609_v56 = vadd.f32 1.0, %v4608_v18  ;;  %6852 = vlog2.f32 %v4524_v47  ;;  %v4601_v20 = vmul.f32 %v12808_v5, %v4600_v15  ;;  %v12821_v18 = vld [vmem:[#allocation25_spill] sm:$0xff]  ;;  %v12822_v15 = vld [vmem:[#allocation27_spill] sm:$0xff] }
 0x4fc   : > { %v4598_v26 = vmul.f32 0.6931472, %v6847_v0  ;;  %v4528_v59 = vadd.f32 1.0, %v4527_v38  ;;  %v4533_v1 = vadd.f32 1.0, %v12815_v44  ;;  %vm4603_vm13 = vcmp.lt.f32.partialorder %v4602_v42, 0.0004427343 }
 0x4fd   : > { %v4797_v24 = vsel %vm4765_vm12, %v12816_v10, %v4733_v54  ;;  %vm4756_vm14 = vcmp.gt.f32.partialorder %v12817_v60, 20.0  ;;  %v4536_v48 = vmul.f32 -0.5, %v12815_v44  ;;  %vm11053_vm15 = vcmp.lt.f32.partialorder %v4611_v43, 0.0004427343  ;;  %v12823_v22 = vld [vmem:[#allocation31_spill] sm:$0xff]  ;;  %v12825_v0 = vld [vmem:[#allocation33_spill] sm:$0xff] }
 0x4fe   : > { %v6849_v6 = vpop.eup %6848  ;;  %4997 = vmatpush.msrb.mxu1 %v4797_v24  ;;  %v4604_v29 = vsel %vm4603_vm13, %v4601_v20, %v4598_v26  ;;  %6854 = vlog2.f32 %v4533_v1  ;;  %v4452_v5 = vadd.f32 1.0, %v12820_v12  ;;  %6141 = vmatmul.msk.f32.gmra.mxu2 %vm1417_vm10, %v10919_v13  ;;  %v4610_v27 = vmul.f32 %v10804_v28, %v4609_v56  ;;  %v12824_v16 = vld [vmem:[#allocation43_spill] sm:$0xff] }
 0x4ff   : > { %v4724_v8 = vmul.f32 0.01, %v4604_v29  ;;  %v4607_v52 = vmul.f32 0.6931472, %v6849_v6  ;;  %v4530_v55 = vand.u32 2147483647, %v12813_v40  ;;  %v11062_v23 = vpop.eup %6850  ;;  %v4529_v41 = vmul.f32 %v12813_v40, %v4528_v59 }
 0x500   : > { %v4539_v57 = vand.u32 2147483647, %v12815_v44  ;;  %6856 = vlog2.f32 %v4452_v5  ;;  %v4455_v37 = vmul.f32 -0.5, %v12820_v12  ;;  %v4537_v28 = vadd.f32 1.0, %v4536_v48  ;;  %v12826_v26 = vld [vmem:[#allocation55_spill] sm:$0xff] }
 0x501   : > { %v6853_v7 = vpop.eup %6852  ;;  %v4788_v53 = vsel %vm4756_vm14, %v12821_v18, %v4724_v8  ;;  %v4613_v58 = vsel %vm11053_vm15, %v4610_v27, %v4607_v52  ;;  %v4461_v42 = vadd.f32 1.0, %v12822_v15  ;;  %6145 = vmatmul.msk.f32.gmra.mxu3 %vm1417_vm10, %v10919_v13  ;;  %v4464_v45 = vmul.f32 -0.5, %v12822_v15  ;;  %v12829_v18 = vld [vmem:[#allocation49_spill] sm:$0xff] }
 0x502   : > { %4969 = vmatpush.msrb.mxu0 %v4788_v53  ;;  %v4725_v40 = vmul.f32 0.01, %v4613_v58  ;;  %v4526_v47 = vmul.f32 0.6931472, %v6853_v7  ;;  %v4456_v38 = vadd.f32 1.0, %v4455_v37  ;;  %vm4757_vm1 = vcmp.gt.f32.partialorder %v12823_v22, 20.0 }
 0x503   : > { %vm4531_vm2 = vcmp.lt.f32.partialorder %v4530_v55, 0.0004427343  ;;  %vm4748_vm3 = vcmp.gt.f32.partialorder %v12824_v16, 20.0  ;;  %6858 = vlog2.f32 %v4461_v42  ;;  %vm4749_vm0 = vcmp.gt.f32.partialorder %v12826_v26, 20.0  ;;  %v12828_v55 = vld [vmem:[#allocation51_spill] sm:$0xff] }
 0x504   : > { %v6855_v43 = vpop.eup %6854  ;;  %v4789_v54 = vsel %vm4757_vm1, %v12825_v0, %v4725_v40  ;;  %v4532_v56 = vsel %vm4531_vm2, %v4529_v41, %v4526_v47  ;;  %v4458_v20 = vand.u32 2147483647, %v12820_v12  ;;  %v4538_v10 = vmul.f32 %v12815_v44, %v4537_v28  ;;  %v12830_v47 = vld [vmem:[#allocation62_spill] sm:$0xff]  ;;  %v12831_v0 = vld [vmem:[#allocation47_spill] sm:$0xff] }
 0x505   : > { %4998 = vmatpush.msrb.mxu1 %v4789_v54  ;;  %v4716_v59 = vmul.f32 0.01, %v4532_v56  ;;  %v4535_v1 = vmul.f32 0.6931472, %v6855_v43  ;;  %v4465_v24 = vadd.f32 1.0, %v4464_v45  ;;  %v4457_v48 = vmul.f32 %v12820_v12, %v4456_v38 }
 0x506   : > { %v6857_v60 = vpop.eup %6856  ;;  %vm4540_vm4 = vcmp.lt.f32.partialorder %v4539_v57, 0.0004427343  ;;  %v4467_v6 = vand.u32 2147483647, %v12822_v15  ;;  %6142 = vmatmul.msk.f32.gmra.mxu2 %vm1417_vm10, %v10957_v63  ;;  %v4686_v29 = vadd.f32 1.0, %v10974_v21  ;;  %v4689_v44 = vmul.f32 -0.5, %v10974_v21 }
 0x507   : > { %v4780_v5 = vsel %vm4748_vm3, %v12827_v32, %v4716_v59  ;;  %v4541_v8 = vsel %vm4540_vm4, %v4538_v10, %v4535_v1  ;;  %v4454_v52 = vmul.f32 0.6931472, %v6857_v60  ;;  %vm4459_vm5 = vcmp.lt.f32.partialorder %v4458_v20, 0.0004427343  ;;  %v12834_v1 = vld [vmem:[#allocation45_spill] sm:$0xff] }
 0x508   : > { %4970 = vmatpush.msrb.mxu0 %v4780_v5  ;;  %v4717_v27 = vmul.f32 0.01, %v4541_v8  ;;  %vm4740_vm6 = vcmp.gt.f32.partialorder %v12828_v55, 20.0  ;;  %6860 = vlog2.f32 %v4686_v29  ;;  %v4466_v57 = vmul.f32 %v12822_v15, %v4465_v24 }
 0x509   : > { %v6859_v12 = vpop.eup %6858  ;;  %v4460_v41 = vsel %vm4459_vm5, %v4457_v48, %v4454_v52  ;;  %6146 = vmatmul.msk.f32.gmra.mxu3 %vm1417_vm10, %v10957_v63  ;;  %v4695_v37 = vadd.f32 1.0, %v11062_v23  ;;  %v4698_v7 = vmul.f32 -0.5, %v11062_v23  ;;  %v4692_v42 = vand.u32 2147483647, %v10974_v21 }
 0x50a   : > { %v4781_v53 = vsel %vm4749_vm0, %v12829_v18, %v4717_v27  ;;  %v4708_v58 = vmul.f32 0.01, %v4460_v41  ;;  %v4463_v28 = vmul.f32 0.6931472, %v6859_v12  ;;  %vm4468_vm7 = vcmp.lt.f32.partialorder %v4467_v6, 0.0004427343 }
 0x50b   : > { %4999 = vmatpush.msrb.mxu1 %v4781_v53  ;;  %v4690_v40 = vadd.f32 1.0, %v4689_v44  ;;  %6862 = vlog2.f32 %v4695_v37  ;;  %v4701_v15 = vand.u32 2147483647, %v11062_v23  ;;  %v4614_v22 = vadd.f32 1.0, %v10938_v33 }
 0x50c   : > { %v4772_v38 = vsel %vm4740_vm6, %v12830_v47, %v4708_v58  ;;  %v4469_v45 = vsel %vm4468_vm7, %v4466_v57, %v4463_v28  ;;  %v4617_v16 = vmul.f32 -0.5, %v10938_v33  ;;  %vm4741_vm8 = vcmp.gt.f32.partialorder %v12831_v0, 20.0 }
 0x50d   : > { %4971 = vmatpush.msrb.mxu0 %v4772_v38  ;;  %v4709_v43 = vmul.f32 0.01, %v4469_v45  ;;  %vm4766_vm9 = vcmp.gt.f32.partialorder %v10901_v17, 20.0  ;;  %v4699_v54 = vadd.f32 1.0, %v4698_v7  ;;  %vm11113_vm11 = vcmp.lt.f32.partialorder %v4692_v42, 0.0004427343 }
 0x50e   : > { %v6861_v56 = vpop.eup %6860  ;;  %6148 = vmatmul.msk.f32.vlgmr.msrb.gmra.mxu0 %vm1417_vm10, %v10885_v35  ;;  %6143 = vmatmul.msk.f32.gmra.mxu2 %vm1417_vm10, %v10990_v25  ;;  %6864 = vlog2.f32 %v4614_v22  ;;  %v4623_v20 = vadd.f32 1.0, %v10948_v2  ;;  %v4626_v59 = vmul.f32 -0.5, %v10948_v2  ;;  %v4691_v60 = vmul.f32 %v10974_v21, %v4690_v40 }
 0x50f   : > { %v4773_v10 = vsel %vm4741_vm8, %v12834_v1, %v4709_v43  ;;  %v4688_v24 = vmul.f32 0.6931472, %v6861_v56  ;;  %v4620_v48 = vand.u32 2147483647, %v10938_v33  ;;  %vm11122_vm12 = vcmp.lt.f32.partialorder %v4701_v15, 0.0004427343 }
 0x510   : > { %5000 = vmatpush.msrb.mxu1 %v4773_v10  ;;  %vm4767_vm13 = vcmp.gt.f32.partialorder %v10922_v51, 20.0  ;;  %v4618_v29 = vadd.f32 1.0, %v4617_v16  ;;  %6866 = vlog2.f32 %v4623_v20  ;;  %v4700_v5 = vmul.f32 %v11062_v23, %v4699_v54 }
 0x511   : > { %v6863_v32 = vpop.eup %6862  ;;  %6152 = vmatmul.msk.f32.vlgmr.msrb.gmra.mxu1 %vm1417_vm10, %v10885_v35  ;;  %6147 = vmatmul.msk.f32.gmra.mxu3 %vm1417_vm10, %v10990_v25  ;;  %v4694_v21 = vsel %vm11113_vm11, %v4691_v60, %v4688_v24  ;;  %v4542_v8 = vadd.f32 1.0, %v10925_v14  ;;  %v4545_v52 = vmul.f32 -0.5, %v10925_v14  ;;  %vm4758_vm14 = vcmp.gt.f32.partialorder %v10868_v50, 20.0 }
 0x512   : > { %v4734_v44 = vmul.f32 0.01, %v4694_v21  ;;  %v4697_v27 = vmul.f32 0.6931472, %v6863_v32  ;;  %v4627_v55 = vadd.f32 1.0, %v4626_v59  ;;  %v4551_v57 = vadd.f32 1.0, %v10933_v19 }
 0x513   : > { %vm11137_vm15 = vcmp.lt.f32.partialorder %v4620_v48, 0.0004427343  ;;  %v4629_v41 = vand.u32 2147483647, %v10948_v2  ;;  %6868 = vlog2.f32 %v4542_v8  ;;  %v4619_v18 = vmul.f32 %v10938_v33, %v4618_v29 }
 0x514   : > { %v6865_v37 = vpop.eup %6864  ;;  %v4798_v23 = vsel %vm4766_vm9, %v10892_v61, %v4734_v44  ;;  %v4703_v7 = vsel %vm11122_vm12, %v4700_v5, %v4697_v27  ;;  %v4554_v53 = vmul.f32 -0.5, %v10933_v19  ;;  %v4546_v42 = vadd.f32 1.0, %v4545_v52  ;;  %v12839_v52 = vld [vmem:[#allocation54_spill] sm:$0xff]  ;;  %v12840_v27 = vld [vmem:[#allocation9_spill] sm:$0xff] }
 0x515   : > { %5026 = vmatpush.msrb.mxu2 %v4798_v23  ;;  %v4735_v58 = vmul.f32 0.01, %v4703_v7  ;;  %v4616_v28 = vmul.f32 0.6931472, %v6865_v37  ;;  %6870 = vlog2.f32 %v4551_v57  ;;  %v4628_v15 = vmul.f32 %v10948_v2, %v4627_v55  ;;  %v11211_v57 = vpop.permute.xlu0 %4825 }
 0x516   : > { %v6867_v40 = vpop.eup %6866  ;;  %6149 = vmatmul.msk.f32.gmra.mxu0 %vm1417_vm10, %v10919_v13  ;;  %v4548_v61 = vand.u32 2147483647, %v10925_v14  ;;  %v4555_v17 = vadd.f32 1.0, %v4554_v53  ;;  %v4470_v47 = vadd.f32 1.0, %v10872_v62  ;;  %v4473_v22 = vmul.f32 -0.5, %v10872_v62 }
 0x517   : > { %v4799_v33 = vsel %vm4767_vm13, %v10904_v34, %v4735_v58  ;;  %v4622_v38 = vsel %vm11137_vm15, %v4619_v18, %v4616_v28  ;;  %v4625_v45 = vmul.f32 0.6931472, %v6867_v40  ;;  %vm4630_vm1 = vcmp.lt.f32.partialorder %v4629_v41, 0.0004427343  ;;  %v11221_v18 = vpop.permute.xlu2 %4815  ;;  %v11229_v58 = vpop.permute.xlu1 %4820 }
 0x518   : > { %5055 = vmatpush.msrb.mxu3 %v4799_v33  ;;  %v4726_v16 = vmul.f32 0.01, %v4622_v38  ;;  %vm4759_vm2 = vcmp.gt.f32.partialorder %v10875_v9, 20.0  ;;  %6872 = vlog2.f32 %v4470_v47  ;;  %v4547_v51 = vmul.f32 %v10925_v14, %v4546_v42 }
 0x519   : > { %v6869_v2 = vpop.eup %6868  ;;  %6153 = vmatmul.msk.f32.gmra.mxu1 %vm1417_vm10, %v10919_v13  ;;  %v4631_v43 = vsel %vm4630_vm1, %v4628_v15, %v4625_v45  ;;  %v4557_v34 = vand.u32 2147483647, %v10933_v19  ;;  %v4474_v0 = vadd.f32 1.0, %v4473_v22  ;;  %v4479_v20 = vadd.f32 1.0, %v10908_v11 }
 0x51a   : > { %v4790_v54 = vsel %vm4758_vm14, %v10851_v31, %v4726_v16  ;;  %v4727_v56 = vmul.f32 0.01, %v4631_v43  ;;  %v4544_v26 = vmul.f32 0.6931472, %v6869_v2  ;;  %vm4549_vm3 = vcmp.lt.f32.partialorder %v4548_v61, 0.0004427343 }
 0x51b   : > { %v6871_v59 = vpop.eup %6870  ;;  %5027 = vmatpush.msrb.mxu2 %v4790_v54  ;;  %v4556_v1 = vmul.f32 %v10933_v19, %v4555_v17  ;;  %v4476_v10 = vand.u32 2147483647, %v10872_v62  ;;  %v4482_v14 = vmul.f32 -0.5, %v10908_v11  ;;  %6874 = vlog2.f32 %v4479_v20 }
 0x51c   : > { %v4791_v24 = vsel %vm4759_vm2, %v10854_v39, %v4727_v56  ;;  %v4550_v60 = vsel %vm4549_vm3, %v4547_v51, %v4544_v26  ;;  %v4553_v50 = vmul.f32 0.6931472, %v6871_v59  ;;  %vm4558_vm0 = vcmp.lt.f32.partialorder %v4557_v34, 0.0004427343 }
 0x51d   : > { %5056 = vmatpush.msrb.mxu3 %v4791_v24  ;;  %v4718_v31 = vmul.f32 0.01, %v4550_v60  ;;  %vm4750_vm4 = vcmp.gt.f32.partialorder %v10837_v3, 20.0  ;;  %v4475_v6 = vmul.f32 %v10872_v62, %v4474_v0  ;;  %v4483_v39 = vadd.f32 1.0, %v4482_v14  ;;  %v11216_v7 = vpop.permute.xlu0 %4810 }
 0x51e   : > { %v6873_v48 = vpop.eup %6872  ;;  %6150 = vmatmul.msk.f32.gmra.mxu0 %vm1417_vm10, %v10957_v63  ;;  %v4559_v19 = vsel %vm4558_vm0, %v4556_v1, %v4553_v50  ;;  %vm4751_vm5 = vcmp.gt.f32.partialorder %v10848_v49, 20.0  ;;  %vm4477_vm6 = vcmp.lt.f32.partialorder %v4476_v10, 0.0004427343  ;;  %v4485_v21 = vand.u32 2147483647, %v10908_v11 }
 0x51f   : > { %v4782_v29 = vsel %vm4750_vm4, %v10825_v36, %v4718_v31  ;;  %v4719_v32 = vmul.f32 0.01, %v4559_v19  ;;  %v4472_v9 = vmul.f32 0.6931472, %v6873_v48  ;;  %vm4742_vm7 = vcmp.gt.f32.partialorder %v12839_v52, 20.0 }
 0x520   : > { %5028 = vmatpush.msrb.mxu2 %v4782_v29  ;;  %v4484_v44 = vmul.f32 %v10908_v11, %v4483_v39  ;;  %vm4486_vm8 = vcmp.lt.f32.partialorder %v4485_v21, 0.0004427343  ;;  %vm4743_vm9 = vcmp.gt.f32.partialorder %v10808_v4, 20.0 }
 0x521   : > { %6154 = vmatmul.msk.f32.gmra.mxu1 %vm1417_vm10, %v10957_v63  ;;  %v4783_v5 = vsel %vm4751_vm5, %v10832_v46, %v4719_v32  ;;  %v4478_v3 = vsel %vm4477_vm6, %v4475_v6, %v4472_v9  ;;  %v6875_v8 = vpop.eup %6874 }
 0x522   : > { %5057 = vmatpush.msrb.mxu3 %v4783_v5  ;;  %v4710_v62 = vmul.f32 0.01, %v4478_v3  ;;  %v4481_v36 = vmul.f32 0.6931472, %v6875_v8 }
 0x524   : > { %v4774_v55 = vsel %vm4742_vm7, %v12840_v27, %v4710_v62  ;;  %v4487_v49 = vsel %vm4486_vm8, %v4484_v44, %v4481_v36 }
 0x525   : > { %5029 = vmatpush.msrb.mxu2 %v4774_v55  ;;  %v4711_v12 = vmul.f32 0.01, %v4487_v49 }
 0x526   : > { %6151 = vmatmul.msk.f32.gmra.mxu0 %vm1417_vm10, %v10990_v25  ;;  %6156 = vmatmul.msk.f32.vlgmr.msrb.gmra.mxu2 %vm1417_vm10, %v10885_v35 }
 0x527   : > { %v4775_v46 = vsel %vm4743_vm9, %v10791_v30, %v4711_v12 }
 0x528   : > { %5058 = vmatpush.msrb.mxu3 %v4775_v46 }
 0x529   : > { %6155 = vmatmul.msk.f32.gmra.mxu1 %vm1417_vm10, %v10990_v25  ;;  %6160 = vmatmul.msk.f32.vlgmr.msrb.gmra.mxu3 %vm1417_vm10, %v10885_v35 }
 0x52e   : > { %6157 = vmatmul.msk.f32.gmra.mxu2 %vm1417_vm10, %v10919_v13 }
 0x531   : > { %6161 = vmatmul.msk.f32.gmra.mxu3 %vm1417_vm10, %v10919_v13 }
 0x536   : > { %6158 = vmatmul.msk.f32.gmra.mxu2 %vm1417_vm10, %v10957_v63 }
 0x539   : > { %6162 = vmatmul.msk.f32.gmra.mxu3 %vm1417_vm10, %v10957_v63 }
 0x53e   : > { %6159 = vmatmul.msk.f32.gmra.mxu2 %vm1417_vm10, %v10990_v25 }
 0x541   : > { %6163 = vmatmul.msk.f32.gmra.mxu3 %vm1417_vm10, %v10990_v25 }
 0x553   : > { %v4857_v30 = vpop.f32.mrf.mxu0 }
 0x554   : > { %v11224_v25 = vadd.f32 %v4857_v30, %v11216_v7 }
 0x556   : > { %v11239_v61 = vmul.f32 100.0, %v11224_v25 }
 0x558   : > { %v5104_v34 = vmin.f32 %v11239_v61, 20.0  ;;  %vm5520_vm7 = vcmp.gt.f32.partialorder %v11239_v61, 20.0 }
 0x55a   : > { %v5136_v60 = vmul.f32 1.442695, %v5104_v34 }
 0x55b   : > { %v4860_v4 = vpop.f32.mrf.mxu0 }
 0x55c   : > { %v11227_v53 = vadd.f32 %v4860_v4, %v11221_v18 }
 0x55e   : > { %v11248_v33 = vmul.f32 100.0, %v11227_v53 }
 0x55f   : > { %v4886_v35 = vpop.f32.mrf.mxu1 }
 0x560   : > { %v11232_v28 = vadd.f32 %v4886_v35, %v11216_v7  ;;  %v5112_v56 = vmin.f32 %v11248_v33, 20.0  ;;  %vm5528_vm4 = vcmp.gt.f32.partialorder %v11248_v33, 20.0 }
 0x562   : > { %v11254_v45 = vmul.f32 100.0, %v11232_v28  ;;  %v5152_v31 = vmul.f32 1.442695, %v5112_v56 }
 0x563   : > { %v4863_v11 = vpop.f32.mrf.mxu0 }
 0x564   : > { %v11235_v42 = vadd.f32 %v4863_v11, %v11229_v58  ;;  %v5105_v59 = vmin.f32 %v11254_v45, 20.0 }
 0x566   : > { %v11260_v2 = vmul.f32 100.0, %v11235_v42  ;;  %v5138_v19 = vmul.f32 1.442695, %v5105_v59 }
 0x567   : > { %v4889_v41 = vpop.f32.mrf.mxu1 }
 0x568   : > { %v11242_v17 = vadd.f32 %v4889_v41, %v11221_v18  ;;  %v5120_v14 = vmin.f32 %v11260_v2, 20.0  ;;  %vm5536_vm1 = vcmp.gt.f32.partialorder %v11260_v2, 20.0 }
 0x56a   : > { %v11267_v0 = vmul.f32 100.0, %v11242_v17  ;;  %v5168_v32 = vmul.f32 1.442695, %v5120_v14 }
 0x56b   : > { %v4866_v13 = vpop.f32.mrf.mxu0 }
 0x56c   : > { %v11214_v23 = vadd.f32 %v4866_v13, %v11211_v57  ;;  %v5113_v50 = vmin.f32 %v11267_v0, 20.0  ;;  %vm5529_vm6 = vcmp.gt.f32.partialorder %v11267_v0, 20.0 }
 0x56e   : > { %v11219_v63 = vmul.f32 100.0, %v11214_v23  ;;  %v5154_v21 = vmul.f32 1.442695, %v5113_v50 }
 0x56f   : > { %v4892_v37 = vpop.f32.mrf.mxu1 }
 0x570   : > { %v5128_v40 = vmin.f32 %v11219_v63, 20.0  ;;  %v11251_v38 = vadd.f32 %v4892_v37, %v11229_v58  ;;  %vm5544_vm11 = vcmp.gt.f32.partialorder %v11219_v63, 20.0 }
 0x572   : > { %v5184_v43 = vmul.f32 1.442695, %v5128_v40  ;;  %v11272_v26 = vmul.f32 100.0, %v11251_v38 }
 0x574   : > { %6876 = vpow2.f32 %v5184_v43  ;;  %v5121_v48 = vmin.f32 %v11272_v26, 20.0  ;;  %vm5537_vm3 = vcmp.gt.f32.partialorder %v11272_v26, 20.0 }
 0x576   : > { %v5170_v3 = vmul.f32 1.442695, %v5121_v48 }
 0x577   : > { %v4895_v15 = vpop.f32.mrf.mxu1 }
 0x578   : > { %v11245_v47 = vadd.f32 %v4895_v15, %v11211_v57 }
 0x579   : > { %v4915_v16 = vpop.f32.mrf.mxu2 }
 0x57a   : > { %v11257_v22 = vmul.f32 100.0, %v11245_v47  ;;  %v11263_v51 = vadd.f32 %v4915_v16, %v11216_v7  ;;  %v6877_v5 = vpop.eup %6876 }
 0x57b   : > { %v5416_v55 = vadd.f32 1.0, %v6877_v5  ;;  %v5419_v12 = vmul.f32 -0.5, %v6877_v5  ;;  %v5422_v37 = vand.u32 2147483647, %v6877_v5 }
 0x57c   : > { %12841 = vst [vmem:[#allocation32_spill] sm:$0xff] %v11263_v51  ;;  %v5129_v54 = vmin.f32 %v11257_v22, 20.0  ;;  %v4944_v20 = vpop.f32.mrf.mxu3  ;;  %v11280_v24 = vmul.f32 100.0, %v11263_v51  ;;  %vm5545_vm13 = vcmp.gt.f32.partialorder %v11257_v22, 20.0 }
 0x57d   : > { %v11276_v10 = vadd.f32 %v4944_v20, %v11216_v7  ;;  %v5420_v59 = vadd.f32 1.0, %v5419_v12  ;;  %vm11335_vm12 = vcmp.lt.f32.partialorder %v5422_v37, 0.0004427343 }
 0x57e   : > { %v5186_v1 = vmul.f32 1.442695, %v5129_v54  ;;  %12843 = vst [vmem:[#allocation12_spill] sm:$0xff] %v11280_v24  ;;  %v5106_v9 = vmin.f32 %v11280_v24, 20.0 }
 0x57f   : > { %12842 = vst [vmem:[#allocation6_spill] sm:$0xff] %v11276_v10  ;;  %v11285_v6 = vmul.f32 100.0, %v11276_v10  ;;  %v5421_v12 = vmul.f32 %v6877_v5, %v5420_v59 }
 0x580   : > { %6878 = vpow2.f32 %v5186_v1  ;;  %v5140_v27 = vmul.f32 1.442695, %v5106_v9 }
 0x581   : > { %12844 = vst [vmem:[#allocation52_spill] sm:$0xff] %v11285_v6  ;;  %v4918_v29 = vpop.f32.mrf.mxu2  ;;  %6880 = vpow2.f32 %v5136_v60  ;;  %v5107_v36 = vmin.f32 %v11285_v6, 20.0 }
 0x582   : > { %v11289_v39 = vadd.f32 %v4918_v29, %v11221_v18  ;;  %6882 = vpow2.f32 %v5152_v31 }
 0x583   : > { %6884 = vpow2.f32 %v5138_v19  ;;  %v5142_v4 = vmul.f32 1.442695, %v5107_v36 }
 0x584   : > { %v11292_v8 = vmul.f32 100.0, %v11289_v39  ;;  %v4947_v62 = vpop.f32.mrf.mxu3  ;;  %6886 = vpow2.f32 %v5168_v32 }
 0x585   : > { %v11298_v44 = vadd.f32 %v4947_v62, %v11221_v18  ;;  %6888 = vpow2.f32 %v5154_v21 }
 0x586   : > { %v11294_v52 = vpop.eup %6878  ;;  %6890 = vpow2.f32 %v5170_v3  ;;  %v5114_v49 = vmin.f32 %v11292_v8, 20.0 }
 0x587   : > { %v5425_v46 = vadd.f32 1.0, %v11294_v52  ;;  %v11302_v30 = vpop.eup %6880  ;;  %v11305_v35 = vmul.f32 100.0, %v11298_v44  ;;  %6892 = vlog2.f32 %v5416_v55  ;;  %v5428_v40 = vmul.f32 -0.5, %v11294_v52 }
 0x588   : > { %v11307_v41 = vpop.eup %6882  ;;  %6894 = vpow2.f32 %v5140_v27  ;;  %v5156_v54 = vmul.f32 1.442695, %v5114_v49  ;;  %v5431_v32 = vand.u32 2147483647, %v11294_v52 }
 0x589   : > { %v4921_v11 = vpop.f32.mrf.mxu2  ;;  %v11313_v15 = vpop.eup %6884  ;;  %6896 = vlog2.f32 %v5425_v46  ;;  %v5115_v14 = vmin.f32 %v11305_v35, 20.0  ;;  %v5429_v29 = vadd.f32 1.0, %v5428_v40 }
 0x58a   : > { %v11310_v13 = vadd.f32 %v4921_v11, %v11229_v58  ;;  %v11315_v43 = vpop.eup %6886  ;;  %6898 = vpow2.f32 %v5142_v4  ;;  %vm11362_vm14 = vcmp.lt.f32.partialorder %v5431_v32, 0.0004427343  ;;  %v5212_v24 = vmul.f32 -0.5, %v11313_v15 }
 0x58b   : > { %v4973_v16 = vpop.f32.mrf.mxu0  ;;  %v11323_v1 = vpop.eup %6888  ;;  %v5344_v36 = vadd.f32 1.0, %v11315_v43  ;;  %6900 = vpow2.f32 %v5156_v54  ;;  %v5158_v11 = vmul.f32 1.442695, %v5115_v14  ;;  %v5347_v40 = vmul.f32 -0.5, %v11315_v43 }
 0x58c   : > { %v11318_v34 = vadd.f32 %v4973_v16, %v11216_v7  ;;  %v11321_v56 = vmul.f32 100.0, %v11310_v13  ;;  %v4950_v20 = vpop.f32.mrf.mxu3  ;;  %v11330_v50 = vpop.eup %6890  ;;  %v5213_v0 = vadd.f32 1.0, %v5212_v24 }
 0x58d   : > { %v11328_v60 = vadd.f32 %v4950_v20, %v11229_v58  ;;  %v6893_v9 = vpop.eup %6892  ;;  %6902 = vlog2.f32 %v5344_v36 }
 0x58e   : > { %12845 = vst [vmem:[#allocation8_spill] sm:$0xff] %v11318_v34  ;;  %v11333_v31 = vmul.f32 100.0, %v11318_v34  ;;  %v5002_v48 = vpop.f32.mrf.mxu1  ;;  %v5122_v3 = vmin.f32 %v11321_v56, 20.0  ;;  %v11348_v27 = vpop.eup %6894  ;;  %v5418_v49 = vmul.f32 0.6931472, %v6893_v9  ;;  %6904 = vpow2.f32 %v5158_v11 }
 0x58f   : > { %v11341_v21 = vadd.f32 %v5002_v48, %v11216_v7  ;;  %v11345_v62 = vmul.f32 100.0, %v11328_v60  ;;  %v6897_v46 = vpop.eup %6896 }
 0x590   : > { %12846 = vst [vmem:[#allocation23_spill] sm:$0xff] %v11333_v31  ;;  %v5108_v55 = vmin.f32 %v11333_v31, 20.0  ;;  %v5424_v48 = vsel %vm11335_vm12, %v5421_v12, %v5418_v49  ;;  %v11366_v5 = vpop.eup %6898  ;;  %v5172_v9 = vmul.f32 1.442695, %v5122_v3  ;;  %v5427_v49 = vmul.f32 0.6931472, %v6897_v46 }
 0x591   : > { %12849 = vst [vmem:[#allocation61_spill] sm:$0xff] %v11341_v21  ;;  %v11353_v4 = vmul.f32 100.0, %v11341_v21  ;;  %v4924_v37 = vpop.f32.mrf.mxu2  ;;  %v5123_v16 = vmin.f32 %v11345_v62, 20.0  ;;  %v5512_v36 = vmul.f32 0.01, %v5424_v48  ;;  %v5430_v21 = vmul.f32 %v11294_v52, %v5429_v29  ;;  %v11382_v52 = vpop.eup %6900 }
 0x592   : > { %v11358_v20 = vadd.f32 %v4924_v37, %v11211_v57  ;;  %v5144_v59 = vmul.f32 1.442695, %v5108_v55  ;;  %v5348_v55 = vadd.f32 1.0, %v5347_v40  ;;  %6906 = vpow2.f32 %v5172_v9 }
 0x593   : > { %12850 = vst [vmem:[#allocation36_spill] sm:$0xff] %v11353_v4  ;;  %v4976_v14 = vpop.f32.mrf.mxu0  ;;  %v5109_v34 = vmin.f32 %v11353_v4, 20.0  ;;  %v5576_v3 = vsel %vm5544_vm11, %v11214_v23, %v5512_v36  ;;  %v5433_v46 = vsel %vm11362_vm14, %v5430_v21, %v5427_v49  ;;  %v6903_v11 = vpop.eup %6902  ;;  %vm5521_vm11 = vcmp.gt.f32.partialorder %v11254_v45, 20.0 }
 0x594   : > { %v11371_v37 = vadd.f32 %v4976_v14, %v11221_v18  ;;  %v11374_v19 = vmul.f32 100.0, %v11358_v20  ;;  %v4953_v32 = vpop.f32.mrf.mxu3  ;;  %v5174_v14 = vmul.f32 1.442695, %v5123_v16  ;;  %5607 = vmatpush.msra.mxu0 %v5576_v3  ;;  %v5513_v63 = vmul.f32 0.01, %v5433_v46 }
 0x595   : > { %v11377_v12 = vadd.f32 %v4953_v32, %v11211_v57  ;;  %6908 = vpow2.f32 %v5144_v59  ;;  %v5146_v40 = vmul.f32 1.442695, %v5109_v34  ;;  %v5353_v16 = vadd.f32 1.0, %v11330_v50 }
 0x596   : > { %12853 = vst [vmem:[#allocation21_spill] sm:$0xff] %v11371_v37  ;;  %v11385_v29 = vmul.f32 100.0, %v11371_v37  ;;  %v5005_v48 = vpop.f32.mrf.mxu1  ;;  %v5130_v4 = vmin.f32 %v11374_v19, 20.0  ;;  %v5577_v21 = vsel %vm5545_vm13, %v11245_v47, %v5513_v63  ;;  %v5346_v49 = vmul.f32 0.6931472, %v6903_v11 }
 0x597   : > { %v11391_v32 = vadd.f32 %v5005_v48, %v11221_v18  ;;  %v11394_v23 = vmul.f32 100.0, %v11377_v12  ;;  %6910 = vpow2.f32 %v5174_v14  ;;  %5627 = vmatpush.msra.mxu1 %v5577_v21  ;;  %v5350_v59 = vand.u32 2147483647, %v11315_v43  ;;  %v11407_v48 = vpop.eup %6904 }
 0x598   : > { %12854 = vst [vmem:[#allocation17_spill] sm:$0xff] %v11385_v29  ;;  %v5116_v36 = vmin.f32 %v11385_v29, 20.0  ;;  %v5188_v54 = vmul.f32 1.442695, %v5130_v4  ;;  %v5356_v34 = vmul.f32 -0.5, %v11330_v50  ;;  %6912 = vlog2.f32 %v5353_v16  ;;  %v11413_v47 = vpop.eup %6906 }
 0x599   : > { %12855 = vst [vmem:[#allocation13_spill] sm:$0xff] %v11391_v32  ;;  %v11399_v3 = vmul.f32 100.0, %v11391_v32  ;;  %v5131_v9 = vmin.f32 %v11394_v23, 20.0  ;;  %v5349_v32 = vmul.f32 %v11315_v43, %v5348_v55  ;;  %6914 = vpow2.f32 %v5146_v40 }
 0x59a   : > { %v5160_v4 = vmul.f32 1.442695, %v5116_v36  ;;  %vm5351_vm15 = vcmp.lt.f32.partialorder %v5350_v59, 0.0004427343  ;;  %6916 = vpow2.f32 %v5188_v54  ;;  %v5357_v36 = vadd.f32 1.0, %v5356_v34 }
 0x59b   : > { %12856 = vst [vmem:[#allocation40_spill] sm:$0xff] %v11399_v3  ;;  %v4979_v46 = vpop.f32.mrf.mxu0  ;;  %v5117_v14 = vmin.f32 %v11399_v3, 20.0  ;;  %v5352_v11 = vsel %vm5351_vm15, %v5349_v32, %v5346_v49  ;;  %v11417_v63 = vpop.eup %6908  ;;  %v5190_v55 = vmul.f32 1.442695, %v5131_v9  ;;  %v5359_v59 = vand.u32 2147483647, %v11330_v50 }
 0x59c   : > { %v11411_v22 = vadd.f32 %v4979_v46, %v11229_v58  ;;  %12857 = vst [vmem:[#allocation63_spill] sm:$0xff] %v11417_v63  ;;  %v5504_v40 = vmul.f32 0.01, %v5352_v11  ;;  %v5272_v46 = vadd.f32 1.0, %v11307_v41  ;;  %v5275_v32 = vmul.f32 -0.5, %v11307_v41 }
 0x59d   : > { %v11428_v54 = vpop.eup %6910  ;;  %6918 = vpow2.f32 %v5160_v4  ;;  %v5162_v31 = vmul.f32 1.442695, %v5117_v14  ;;  %v5281_v34 = vadd.f32 1.0, %v11323_v1  ;;  %v5358_v3 = vmul.f32 %v11330_v50, %v5357_v36 }
 0x59e   : > { %v11420_v21 = vmul.f32 100.0, %v11411_v22  ;;  %v5008_v43 = vpop.f32.mrf.mxu1  ;;  %v5568_v2 = vsel %vm5536_vm1, %v11235_v42, %v5504_v40  ;;  %v6913_v49 = vpop.eup %6912  ;;  %6920 = vlog2.f32 %v5272_v46  ;;  %vm5360_vm2 = vcmp.lt.f32.partialorder %v5359_v59, 0.0004427343 }
 0x59f   : > { %v11423_v16 = vadd.f32 %v5008_v43, %v11229_v58  ;;  %5608 = vmatpush.msra.mxu0 %v5568_v2  ;;  %v11435_v11 = vpop.eup %6914  ;;  %6922 = vpow2.f32 %v5190_v55  ;;  %v5355_v37 = vmul.f32 0.6931472, %v6913_v49  ;;  %v5276_v14 = vadd.f32 1.0, %v5275_v32 }
 0x5a0   : > { %12859 = vst [vmem:[#allocation18_spill] sm:$0xff] %v11435_v11  ;;  %v5124_v43 = vmin.f32 %v11420_v21, 20.0  ;;  %v11439_v4 = vpop.eup %6916  ;;  %6924 = vlog2.f32 %v5281_v34  ;;  %v5284_v40 = vmul.f32 -0.5, %v11323_v1  ;;  %v5278_v50 = vand.u32 2147483647, %v11307_v41 }
 0x5a1   : > { %12858 = vst [vmem:[#allocation22_spill] sm:$0xff] %v11423_v16  ;;  %v11432_v9 = vmul.f32 100.0, %v11423_v16  ;;  %v5361_v29 = vsel %vm5360_vm2, %v5358_v3, %v5355_v37  ;;  %6926 = vpow2.f32 %v5162_v31  ;;  %v5200_v11 = vadd.f32 1.0, %v11302_v30 }
 0x5a2   : > { %v5505_v55 = vmul.f32 0.01, %v5361_v29  ;;  %v5285_v36 = vadd.f32 1.0, %v5284_v40  ;;  %v5176_v59 = vmul.f32 1.442695, %v5124_v43  ;;  %v5277_v31 = vmul.f32 %v11307_v41, %v5276_v14 }
 0x5a3   : > { %v4982_v42 = vpop.f32.mrf.mxu0  ;;  %v5125_v46 = vmin.f32 %v11432_v9, 20.0  ;;  %v11448_v49 = vpop.eup %6918  ;;  %v5287_v29 = vand.u32 2147483647, %v11323_v1  ;;  %6928 = vlog2.f32 %v5200_v11  ;;  %vm5279_vm0 = vcmp.lt.f32.partialorder %v5278_v50, 0.0004427343 }
 0x5a4   : > { %v11444_v2 = vadd.f32 %v4982_v42, %v11211_v57  ;;  %v5203_v42 = vmul.f32 -0.5, %v11302_v30  ;;  %v6921_v10 = vpop.eup %6920  ;;  %v5569_v26 = vsel %vm5537_vm3, %v11251_v38, %v5505_v55  ;;  %v5286_v38 = vmul.f32 %v11323_v1, %v5285_v36 }
 0x5a5   : > { %v11461_v3 = vpop.eup %6922  ;;  %v5178_v43 = vmul.f32 1.442695, %v5125_v46  ;;  %5628 = vmatpush.msra.mxu1 %v5569_v26  ;;  %v5274_v51 = vmul.f32 0.6931472, %v6921_v10  ;;  %v5209_v46 = vadd.f32 1.0, %v11313_v15  ;;  %6930 = vpow2.f32 %v5176_v59 }
 0x5a6   : > { %v11451_v32 = vmul.f32 100.0, %v11444_v2  ;;  %v5011_v34 = vpop.f32.mrf.mxu1  ;;  %v6925_v63 = vpop.eup %6924  ;;  %vm5288_vm5 = vcmp.lt.f32.partialorder %v5287_v29, 0.0004427343  ;;  %v5206_v50 = vand.u32 2147483647, %v11302_v30  ;;  %vm5546_vm13 = vcmp.gt.f32.partialorder %v11374_v19, 20.0 }
 0x5a7   : > { %v11456_v37 = vadd.f32 %v5011_v34, %v11211_v57  ;;  %v5280_v14 = vsel %vm5279_vm0, %v5277_v31, %v5274_v51  ;;  %v5283_v55 = vmul.f32 0.6931472, %v6925_v63  ;;  %v5204_v34 = vadd.f32 1.0, %v5203_v42  ;;  %v11470_v16 = vpop.eup %6926 }
 0x5a8   : > { %v5132_v40 = vmin.f32 %v11451_v32, 20.0  ;;  %v5496_v11 = vmul.f32 0.01, %v5280_v14  ;;  %6932 = vpow2.f32 %v5178_v43  ;;  %vm5207_vm8 = vcmp.lt.f32.partialorder %v5206_v50, 0.0004427343 }
 0x5a9   : > { %v11465_v6 = vmul.f32 100.0, %v11456_v37  ;;  %v5031_v41 = vpop.f32.mrf.mxu2  ;;  %v5289_v26 = vsel %vm5288_vm5, %v5286_v38, %v5283_v55  ;;  %6934 = vlog2.f32 %v5209_v46  ;;  %v6929_v36 = vpop.eup %6928  ;;  %v5205_v42 = vmul.f32 %v11302_v30, %v5204_v34  ;;  %v11505_v46 = vld [vmem:[%s11994_s14] sm:$0x1] }
 0x5aa   : > { %v5192_v10 = vmul.f32 1.442695, %v5132_v40  ;;  %v5560_v51 = vsel %vm5528_vm4, %v11227_v53, %v5496_v11  ;;  %v5497_v1 = vmul.f32 0.01, %v5289_v26  ;;  %v11482_v31 = vadd.f32 %v5031_v41, %v11216_v7 }
 0x5ab   : > { %v5133_v59 = vmin.f32 %v11465_v6, 20.0  ;;  %5609 = vmatpush.msra.mxu0 %v5560_v51  ;;  %v5202_v53 = vmul.f32 0.6931472, %v6929_v36  ;;  %v5434_v30 = vadd.f32 1.0, %v11439_v4  ;;  %v11492_v40 = vpop.eup %6930  ;;  %v5215_v41 = vand.u32 2147483647, %v11313_v15 }
 0x5ac   : > { %v5060_v63 = vpop.f32.mrf.mxu3  ;;  %6936 = vpow2.f32 %v5192_v10  ;;  %v5561_v33 = vsel %vm5529_vm6, %v11242_v17, %v5497_v1  ;;  %v11489_v43 = vmul.f32 100.0, %v11482_v31  ;;  %v5443_v1 = vadd.f32 1.0, %v11461_v3 }
 0x5ad   : > { %v11486_v29 = vadd.f32 %v5060_v63, %v11216_v7  ;;  %5629 = vmatpush.msra.mxu1 %v5561_v33  ;;  %v5208_v38 = vsel %vm5207_vm8, %v5205_v42, %v5202_v53  ;;  %v5437_v7 = vmul.f32 -0.5, %v11439_v4  ;;  %6938 = vlog2.f32 %v5434_v30 }
 0x5ae   : > { %v11499_v55 = vpop.eup %6932  ;;  %v5488_v34 = vmul.f32 0.01, %v5208_v38  ;;  %v5110_v24 = vmin.f32 %v11489_v43, 20.0  ;;  %v5194_v26 = vmul.f32 1.442695, %v5133_v59  ;;  %v5214_v42 = vmul.f32 %v11313_v15, %v5213_v0 }
 0x5af   : > { %12860 = vst [vmem:[#allocation14_spill] sm:$0xff] %v11486_v29  ;;  %v11496_v14 = vmul.f32 100.0, %v11486_v29  ;;  %v6935_v11 = vpop.eup %6934  ;;  %v5438_v51 = vadd.f32 1.0, %v5437_v7  ;;  %vm5216_vm9 = vcmp.lt.f32.partialorder %v5215_v41, 0.0004427343  ;;  %6940 = vlog2.f32 %v5443_v1 }
 0x5b0   : > { %v5552_v63 = vsel %vm5520_vm7, %v11224_v25, %v5488_v34  ;;  %v5211_v36 = vmul.f32 0.6931472, %v6935_v11  ;;  %v5148_v59 = vmul.f32 1.442695, %v5110_v24  ;;  %v5446_v38 = vmul.f32 -0.5, %v11461_v3 }
 0x5b1   : > { %12861 = vst [vmem:[#allocation53_spill] sm:$0xff] %v11496_v14  ;;  %v5034_v17 = vpop.f32.mrf.mxu2  ;;  %v5111_v50 = vmin.f32 %v11496_v14, 20.0  ;;  %5610 = vmatpush.msra.mxu0 %v5552_v63  ;;  %v5440_v61 = vand.u32 2147483647, %v11439_v4  ;;  %6942 = vpow2.f32 %v5194_v26  ;;  %v5439_v0 = vmul.f32 %v11439_v4, %v5438_v51 }
 0x5b2   : > { %v11508_v10 = vadd.f32 %v5034_v17, %v11221_v18  ;;  %v11519_v53 = vpop.eup %6936  ;;  %v5217_v17 = vsel %vm5216_vm9, %v5214_v42, %v5211_v36  ;;  %6164 = vmatmul.msk.f32.vlgmr.msra.gmra.mxu0 %vm1417_vm10, %v11505_v46  ;;  %v5447_v11 = vadd.f32 1.0, %v5446_v38  ;;  %6944 = vpow2.f32 %v5148_v59 }
 0x5b3   : > { %v5150_v7 = vmul.f32 1.442695, %v5111_v50  ;;  %v5489_v15 = vmul.f32 0.01, %v5217_v17  ;;  %v6939_v41 = vpop.eup %6938  ;;  %v5362_v50 = vadd.f32 1.0, %v11413_v47  ;;  %v5365_v26 = vmul.f32 -0.5, %v11413_v47 }
 0x5b4   : > { %v11517_v33 = vmul.f32 100.0, %v11508_v10  ;;  %v5063_v30 = vpop.f32.mrf.mxu3  ;;  %v5436_v63 = vmul.f32 0.6931472, %v6939_v41  ;;  %vm5441_vm12 = vcmp.lt.f32.partialorder %v5440_v61, 0.0004427343  ;;  %v5371_v19 = vadd.f32 1.0, %v11428_v54 }
 0x5b5   : > { %v11525_v25 = vadd.f32 %v5063_v30, %v11221_v18  ;;  %v5553_v18 = vsel %vm5521_vm11, %v11232_v28, %v5489_v15  ;;  %6946 = vpow2.f32 %v5150_v7  ;;  %v5449_v4 = vand.u32 2147483647, %v11461_v3  ;;  %v6941_v51 = vpop.eup %6940 }
 0x5b6   : > { %v5118_v34 = vmin.f32 %v11517_v33, 20.0  ;;  %5630 = vmatpush.msra.mxu1 %v5553_v18  ;;  %v5442_v28 = vsel %vm5441_vm12, %v5439_v0, %v5436_v63  ;;  %6948 = vlog2.f32 %v5362_v50  ;;  %v5448_v30 = vmul.f32 %v11461_v3, %v5447_v11 }
 0x5b7   : > { %v11532_v24 = vmul.f32 100.0, %v11525_v25  ;;  %6165 = vmatmul.msk.f32.vlgmr.msra.gmra.mxu1 %vm1417_vm10, %v11505_v46  ;;  %v5514_v59 = vmul.f32 0.01, %v5442_v28  ;;  %v11546_v38 = vpop.eup %6942  ;;  %v5445_v61 = vmul.f32 0.6931472, %v6941_v51  ;;  %v5366_v15 = vadd.f32 1.0, %v5365_v26 }
 0x5b8   : > { %v5164_v36 = vmul.f32 1.442695, %v5118_v34  ;;  %vm5450_vm14 = vcmp.lt.f32.partialorder %v5449_v4, 0.0004427343  ;;  %v5374_v34 = vmul.f32 -0.5, %v11428_v54  ;;  %v11557_v50 = vpop.eup %6944  ;;  %vm5547_vm15 = vcmp.gt.f32.partialorder %v11394_v23, 20.0 }
 0x5b9   : > { %v5037_v1 = vpop.f32.mrf.mxu2  ;;  %v5119_v42 = vmin.f32 %v11532_v24, 20.0  ;;  %v5578_v0 = vsel %vm5546_vm13, %v11358_v20, %v5514_v59  ;;  %v5451_v3 = vsel %vm5450_vm14, %v5448_v30, %v5445_v61  ;;  %v5368_v11 = vand.u32 2147483647, %v11413_v47 }
 0x5ba   : > { %v11538_v45 = vadd.f32 %v5037_v1, %v11229_v58  ;;  %5647 = vmatpush.msra.mxu2 %v5578_v0  ;;  %6950 = vlog2.f32 %v5371_v19  ;;  %v5515_v20 = vmul.f32 0.01, %v5451_v3  ;;  %v5367_v51 = vmul.f32 %v11413_v47, %v5366_v15 }
 0x5bb   : > { %v11561_v18 = vpop.eup %6946  ;;  %6952 = vpow2.f32 %v5164_v36  ;;  %v5166_v1 = vmul.f32 1.442695, %v5119_v42  ;;  %vm5538_vm1 = vcmp.gt.f32.partialorder %v11321_v56, 20.0  ;;  %v5452_v28 = vadd.f32 1.0, %v11519_v53 }
 0x5bc   : > { %v11549_v17 = vmul.f32 100.0, %v11538_v45  ;;  %v5066_v7 = vpop.f32.mrf.mxu3  ;;  %v6949_v63 = vpop.eup %6948  ;;  %v5579_v59 = vsel %vm5547_vm15, %v11377_v12, %v5515_v20  ;;  %v5375_v42 = vadd.f32 1.0, %v5374_v34  ;;  %v5455_v30 = vmul.f32 -0.5, %v11519_v53 }
 0x5bd   : > { %v11553_v41 = vadd.f32 %v5066_v7, %v11229_v58  ;;  %5667 = vmatpush.msra.mxu3 %v5579_v59  ;;  %v5364_v7 = vmul.f32 0.6931472, %v6949_v63  ;;  %vm11577_vm2 = vcmp.lt.f32.partialorder %v5368_v11, 0.0004427343  ;;  %v5377_v47 = vand.u32 2147483647, %v11428_v54 }
 0x5be   : > { %v5126_v26 = vmin.f32 %v11549_v17, 20.0  ;;  %6954 = vlog2.f32 %v5452_v28  ;;  %v5461_v23 = vadd.f32 1.0, %v11546_v38  ;;  %vm5539_vm3 = vcmp.gt.f32.partialorder %v11345_v62, 20.0 }
 0x5bf   : > { %v11564_v58 = vmul.f32 100.0, %v11553_v41  ;;  %6956 = vpow2.f32 %v5166_v1  ;;  %v5370_v3 = vsel %vm11577_vm2, %v5367_v51, %v5364_v7  ;;  %v5464_v11 = vmul.f32 -0.5, %v11546_v38 }
 0x5c0   : > { %v6951_v19 = vpop.eup %6950  ;;  %v5180_v0 = vmul.f32 1.442695, %v5126_v26  ;;  %v5456_v28 = vadd.f32 1.0, %v5455_v30  ;;  %vm5548_vm0 = vcmp.gt.f32.partialorder %v11451_v32, 20.0  ;;  %v5506_v26 = vmul.f32 0.01, %v5370_v3 }
 0x5c1   : > { %v5040_v4 = vpop.f32.mrf.mxu2  ;;  %v5127_v15 = vmin.f32 %v11564_v58, 20.0  ;;  %v11591_v20 = vpop.eup %6952  ;;  %v5373_v59 = vmul.f32 0.6931472, %v6951_v19  ;;  %vm11599_vm4 = vcmp.lt.f32.partialorder %v5377_v47, 0.0004427343  ;;  %6958 = vlog2.f32 %v5461_v23 }
 0x5c2   : > { %v11574_v36 = vadd.f32 %v5040_v4, %v11211_v57  ;;  %v5376_v4 = vmul.f32 %v11428_v54, %v5375_v42  ;;  %v5458_v29 = vand.u32 2147483647, %v11519_v53  ;;  %v5570_v54 = vsel %vm5538_vm1, %v11310_v13, %v5506_v26 }
 0x5c3   : > { %v5182_v7 = vmul.f32 1.442695, %v5127_v15  ;;  %v5465_v30 = vadd.f32 1.0, %v5464_v11  ;;  %v5293_v47 = vmul.f32 -0.5, %v11382_v52  ;;  %vm5549_vm5 = vcmp.gt.f32.partialorder %v11465_v6, 20.0  ;;  %5648 = vmatpush.msra.mxu2 %v5570_v54 }
 0x5c4   : > { %v11584_v12 = vmul.f32 100.0, %v11574_v36  ;;  %v5069_v34 = vpop.f32.mrf.mxu3  ;;  %v5379_v42 = vsel %vm11599_vm4, %v5376_v4, %v5373_v59  ;;  %6960 = vpow2.f32 %v5180_v0  ;;  %v5457_v3 = vmul.f32 %v11519_v53, %v5456_v28 }
 0x5c5   : > { %v11595_v63 = vadd.f32 %v5069_v34, %v11211_v57  ;;  %v5290_v57 = vadd.f32 1.0, %v11382_v52  ;;  %v6955_v34 = vpop.eup %6954  ;;  %v5507_v19 = vmul.f32 0.01, %v5379_v42  ;;  %v5467_v13 = vand.u32 2147483647, %v11546_v38 }
 0x5c6   : > { %v5134_v1 = vmin.f32 %v11584_v12, 20.0  ;;  %v11614_v23 = vpop.eup %6956  ;;  %v5454_v56 = vmul.f32 0.6931472, %v6955_v34  ;;  %vm5459_vm6 = vcmp.lt.f32.partialorder %v5458_v29, 0.0004427343  ;;  %v5299_v4 = vadd.f32 1.0, %v11407_v48 }
 0x5c7   : > { %v11604_v61 = vmul.f32 100.0, %v11595_v63  ;;  %6962 = vlog2.f32 %v5290_v57  ;;  %v5571_v11 = vsel %vm5539_vm3, %v11328_v60, %v5507_v19  ;;  %v6959_v0 = vpop.eup %6958  ;;  %v5466_v26 = vmul.f32 %v11546_v38, %v5465_v30 }
 0x5c8   : > { %v5196_v15 = vmul.f32 1.442695, %v5134_v1  ;;  %6964 = vpow2.f32 %v5182_v7  ;;  %5668 = vmatpush.msra.mxu3 %v5571_v11  ;;  %v5460_v1 = vsel %vm5459_vm6, %v5457_v3, %v5454_v56  ;;  %v5294_v53 = vadd.f32 1.0, %v5293_v47 }
 0x5c9   : > { %v5135_v14 = vmin.f32 %v11604_v61, 20.0  ;;  %v5302_v28 = vmul.f32 -0.5, %v11407_v48  ;;  %v5516_v59 = vmul.f32 0.01, %v5460_v1  ;;  %v5463_v51 = vmul.f32 0.6931472, %v6959_v0 }
 0x5ca   : > { %6966 = vpow2.f32 %v5196_v15  ;;  %v5296_v7 = vand.u32 2147483647, %v11382_v52  ;;  %vm5468_vm7 = vcmp.lt.f32.partialorder %v5467_v13, 0.0004427343  ;;  %v5380_v60 = vadd.f32 1.0, %v11492_v40  ;;  %v11628_v62 = vpop.eup %6960 }
 0x5cb   : > { %v5198_v57 = vmul.f32 1.442695, %v5135_v14  ;;  %6968 = vlog2.f32 %v5299_v4  ;;  %v5580_v29 = vsel %vm5548_vm0, %v11444_v2, %v5516_v59  ;;  %v5469_v38 = vsel %vm5468_vm7, %v5466_v26, %v5463_v51 }
 0x5cc   : > { %vm5530_vm8 = vcmp.gt.f32.partialorder %v11292_v8, 20.0  ;;  %v5383_v34 = vmul.f32 -0.5, %v11492_v40  ;;  %5687 = vmatpush.msrb.mxu0 %v5580_v29  ;;  %v5517_v42 = vmul.f32 0.01, %v5469_v38  ;;  %v5303_v30 = vadd.f32 1.0, %v5302_v28 }
 0x5cd   : > { %v6963_v54 = vpop.eup %6962  ;;  %v5305_v14 = vand.u32 2147483647, %v11407_v48  ;;  %6970 = vlog2.f32 %v5380_v60  ;;  %v5295_v19 = vmul.f32 %v11382_v52, %v5294_v53  ;;  %vm5297_vm9 = vcmp.lt.f32.partialorder %v5296_v7, 0.0004427343 }
 0x5ce   : > { %v11636_v47 = vpop.eup %6964  ;;  %v5292_v15 = vmul.f32 0.6931472, %v6963_v54  ;;  %v5389_v2 = vadd.f32 1.0, %v11499_v55  ;;  %6972 = vpow2.f32 %v5198_v57  ;;  %v5581_v32 = vsel %vm5549_vm5, %v11456_v37, %v5517_v42 }
 0x5cf   : > { %v5386_v3 = vand.u32 2147483647, %v11492_v40  ;;  %v5392_v56 = vmul.f32 -0.5, %v11499_v55  ;;  %5707 = vmatpush.msrb.mxu1 %v5581_v32  ;;  %vm5531_vm11 = vcmp.gt.f32.partialorder %v11305_v35, 20.0  ;;  %v5384_v4 = vadd.f32 1.0, %v5383_v34 }
 0x5d0   : > { %v11645_v13 = vpop.eup %6966  ;;  %v5298_v11 = vsel %vm5297_vm9, %v5295_v19, %v5292_v15  ;;  %6974 = vlog2.f32 %v5389_v2  ;;  %v5304_v1 = vmul.f32 %v11407_v48, %v5303_v30  ;;  %vm11649_vm12 = vcmp.lt.f32.partialorder %v5305_v14, 0.0004427343 }
 0x5d1   : > { %v6969_v52 = vpop.eup %6968  ;;  %v5498_v0 = vmul.f32 0.01, %v5298_v11  ;;  %v5218_v6 = vadd.f32 1.0, %v11348_v27  ;;  %vm5540_vm13 = vcmp.gt.f32.partialorder %v11420_v21, 20.0  ;;  %v5393_v53 = vadd.f32 1.0, %v5392_v56 }
 0x5d2   : > { %v5301_v37 = vmul.f32 0.6931472, %v6969_v52  ;;  %v5221_v28 = vmul.f32 -0.5, %v11348_v27  ;;  %vm11659_vm14 = vcmp.lt.f32.partialorder %v5386_v3, 0.0004427343  ;;  %v5227_v48 = vadd.f32 1.0, %v11366_v5 }
 0x5d3   : > { %v6971_v59 = vpop.eup %6970  ;;  %v5562_v51 = vsel %vm5530_vm8, %v11289_v39, %v5498_v0  ;;  %6976 = vlog2.f32 %v5218_v6  ;;  %v5385_v29 = vmul.f32 %v11492_v40, %v5384_v4  ;;  %v5395_v38 = vand.u32 2147483647, %v11499_v55  ;;  %v12870_v52 = vld [vmem:[#allocation12_spill] sm:$0xff] }
 0x5d4   : > { %5649 = vmatpush.msra.mxu2 %v5562_v51  ;;  %v5307_v57 = vsel %vm11649_vm12, %v5304_v1, %v5301_v37  ;;  %v5382_v60 = vmul.f32 0.6931472, %v6971_v59  ;;  %v11668_v34 = vpop.eup %6972  ;;  %v5224_v39 = vand.u32 2147483647, %v11348_v27  ;;  %6978 = vlog2.f32 %v5227_v48 }
 0x5d5   : > { %v5499_v8 = vmul.f32 0.01, %v5307_v57  ;;  %v5230_v54 = vmul.f32 -0.5, %v11366_v5  ;;  %v5394_v14 = vmul.f32 %v11499_v55, %v5393_v53  ;;  %v5222_v15 = vadd.f32 1.0, %v5221_v28 }
 0x5d6   : > { %v6975_v42 = vpop.eup %6974  ;;  %v5388_v30 = vsel %vm11659_vm14, %v5385_v29, %v5382_v60  ;;  %v5308_v19 = vadd.f32 1.0, %v11448_v49  ;;  %vm5396_vm15 = vcmp.lt.f32.partialorder %v5395_v38, 0.0004427343  ;;  %vm5541_vm1 = vcmp.gt.f32.partialorder %v11432_v9, 20.0  ;;  %v12873_v29 = vld [vmem:[#allocation63_spill] sm:$0xff]  ;;  %v12874_v9 = vld [vmem:[#allocation32_spill] sm:$0xff] }
 0x5d7   : > { %v5563_v40 = vsel %vm5531_vm11, %v11298_v44, %v5499_v8  ;;  %v5508_v2 = vmul.f32 0.01, %v5388_v30  ;;  %v5391_v32 = vmul.f32 0.6931472, %v6975_v42  ;;  %v5231_v3 = vadd.f32 1.0, %v5230_v54 }
 0x5d8   : > { %5669 = vmatpush.msra.mxu3 %v5563_v40  ;;  %6980 = vlog2.f32 %v5308_v19  ;;  %v5311_v56 = vmul.f32 -0.5, %v11448_v49  ;;  %vm5522_vm2 = vcmp.gt.f32.partialorder %v12870_v52, 20.0  ;;  %v5233_v44 = vand.u32 2147483647, %v11366_v5  ;;  %v12875_v19 = vld [vmem:[#allocation6_spill] sm:$0xff] }
 0x5d9   : > { %v6977_v11 = vpop.eup %6976  ;;  %v5572_v55 = vsel %vm5540_vm13, %v11411_v22, %v5508_v2  ;;  %v5397_v4 = vsel %vm5396_vm15, %v5394_v14, %v5391_v32  ;;  %v5223_v1 = vmul.f32 %v11348_v27, %v5222_v15  ;;  %v5317_v26 = vadd.f32 1.0, %v11470_v16  ;;  %v12871_v22 = vld [vmem:[#allocation22_spill] sm:$0xff]  ;;  %v12872_v27 = vld [vmem:[#allocation52_spill] sm:$0xff] }
 0x5da   : > { %5688 = vmatpush.msrb.mxu0 %v5572_v55  ;;  %v5509_v35 = vmul.f32 0.01, %v5397_v4  ;;  %v5220_v0 = vmul.f32 0.6931472, %v6977_v11  ;;  %v6979_v6 = vpop.eup %6978  ;;  %vm5225_vm3 = vcmp.lt.f32.partialorder %v5224_v39, 0.0004427343  ;;  %v5232_v37 = vmul.f32 %v11366_v5, %v5231_v3 }
 0x5db   : > { %v5312_v53 = vadd.f32 1.0, %v5311_v56  ;;  %v5314_v21 = vand.u32 2147483647, %v11448_v49  ;;  %v5229_v51 = vmul.f32 0.6931472, %v6979_v6  ;;  %v5320_v7 = vmul.f32 -0.5, %v11470_v16 }
 0x5dc   : > { %v5573_v28 = vsel %vm5541_vm1, %v12871_v22, %v5509_v35  ;;  %v5226_v59 = vsel %vm5225_vm3, %v5223_v1, %v5220_v0  ;;  %vm5234_vm0 = vcmp.lt.f32.partialorder %v5233_v44, 0.0004427343  ;;  %vm5523_vm4 = vcmp.gt.f32.partialorder %v12872_v27, 20.0  ;;  %v12876_v32 = vld [vmem:[#allocation18_spill] sm:$0xff]  ;;  %v12877_v11 = vld [vmem:[#allocation17_spill] sm:$0xff]  ;;  %v12878_v55 = vld [vmem:[#allocation40_spill] sm:$0xff] }
 0x5dd   : > { %5708 = vmatpush.msrb.mxu1 %v5573_v28  ;;  %v5490_v48 = vmul.f32 0.01, %v5226_v59  ;;  %6982 = vlog2.f32 %v5317_v26  ;;  %v5235_v60 = vsel %vm5234_vm0, %v5232_v37, %v5229_v51  ;;  %v5323_v5 = vand.u32 2147483647, %v11470_v16  ;;  %v12881_v1 = vld [vmem:[#allocation21_spill] sm:$0xff] }
 0x5de   : > { %v6981_v57 = vpop.eup %6980  ;;  %v5236_v38 = vadd.f32 1.0, %v12873_v29  ;;  %v5239_v8 = vmul.f32 -0.5, %v12873_v29  ;;  %v5491_v54 = vmul.f32 0.01, %v5235_v60  ;;  %v5313_v30 = vmul.f32 %v11448_v49, %v5312_v53 }
 0x5df   : > { %v5554_v39 = vsel %vm5522_vm2, %v12874_v9, %v5490_v48  ;;  %v5310_v42 = vmul.f32 0.6931472, %v6981_v57  ;;  %vm5315_vm5 = vcmp.lt.f32.partialorder %v5314_v21, 0.0004427343  ;;  %v5321_v14 = vadd.f32 1.0, %v5320_v7  ;;  %v12884_v21 = vld [vmem:[#allocation23_spill] sm:$0xff] }
 0x5e0   : > { %5650 = vmatpush.msra.mxu2 %v5554_v39  ;;  %6984 = vlog2.f32 %v5236_v38  ;;  %v5242_v15 = vand.u32 2147483647, %v12873_v29  ;;  %v5555_v40 = vsel %vm5523_vm4, %v12875_v19, %v5491_v54  ;;  %v5245_v3 = vadd.f32 1.0, %v12876_v32 }
 0x5e1   : > { %v5316_v2 = vsel %vm5315_vm5, %v5313_v30, %v5310_v42  ;;  %6166 = vmatmul.msk.f32.vlgmr.msra.gmra.mxu2 %vm1417_vm10, %v11505_v46  ;;  %v5248_v56 = vmul.f32 -0.5, %v12876_v32  ;;  %5670 = vmatpush.msra.mxu3 %v5555_v40  ;;  %vm5532_vm6 = vcmp.gt.f32.partialorder %v12877_v11, 20.0  ;;  %vm5533_vm7 = vcmp.gt.f32.partialorder %v12878_v55, 20.0  ;;  %v12887_v11 = vld [vmem:[#allocation8_spill] sm:$0xff] }
 0x5e2   : > { %v5500_v49 = vmul.f32 0.01, %v5316_v2  ;;  %v5240_v4 = vadd.f32 1.0, %v5239_v8  ;;  %vm11712_vm8 = vcmp.lt.f32.partialorder %v5323_v5, 0.0004427343  ;;  %6167 = vmatmul.msk.f32.vlgmr.msra.gmra.mxu3 %vm1417_vm10, %v11505_v46  ;;  %6986 = vlog2.f32 %v5245_v3  ;;  %v12885_v5 = vld [vmem:[#allocation36_spill] sm:$0xff] }
 0x5e3   : > { %v6983_v52 = vpop.eup %6982  ;;  %v5470_v35 = vadd.f32 1.0, %v11645_v13  ;;  %v5473_v0 = vmul.f32 -0.5, %v11645_v13  ;;  %v5322_v37 = vmul.f32 %v11470_v16, %v5321_v14  ;;  %vm11722_vm9 = vcmp.lt.f32.partialorder %v5242_v15, 0.0004427343 }
 0x5e4   : > { %v5564_v26 = vsel %vm5532_vm6, %v12881_v1, %v5500_v49  ;;  %v5319_v6 = vmul.f32 0.6931472, %v6983_v52  ;;  %vm5524_vm11 = vcmp.gt.f32.partialorder %v12884_v21, 20.0  ;;  %v5249_v22 = vadd.f32 1.0, %v5248_v56 }
 0x5e5   : > { %5689 = vmatpush.msrb.mxu0 %v5564_v26  ;;  %6988 = vlog2.f32 %v5470_v35  ;;  %v5479_v28 = vadd.f32 1.0, %v11668_v34  ;;  %v5241_v7 = vmul.f32 %v12873_v29, %v5240_v4  ;;  %v5251_v48 = vand.u32 2147483647, %v12876_v32  ;;  %v12886_v29 = vld [vmem:[#allocation13_spill] sm:$0xff] }
 0x5e6   : > { %v6985_v59 = vpop.eup %6984  ;;  %v5325_v51 = vsel %vm11712_vm8, %v5322_v37, %v5319_v6  ;;  %v5482_v16 = vmul.f32 -0.5, %v11668_v34  ;;  %v5474_v60 = vadd.f32 1.0, %v5473_v0  ;;  %vm5550_vm12 = vcmp.gt.f32.partialorder %v11584_v12, 20.0  ;;  %v12890_v37 = vld [vmem:[#allocation61_spill] sm:$0xff] }
 0x5e7   : > { %v5501_v27 = vmul.f32 0.01, %v5325_v51  ;;  %v5238_v57 = vmul.f32 0.6931472, %v6985_v59  ;;  %6990 = vlog2.f32 %v5479_v28  ;;  %vm5525_vm13 = vcmp.gt.f32.partialorder %v12885_v5, 20.0 }
 0x5e8   : > { %v5476_v38 = vand.u32 2147483647, %v11645_v13  ;;  %v5398_v8 = vadd.f32 1.0, %v11628_v62  ;;  %v5401_v9 = vmul.f32 -0.5, %v11628_v62  ;;  %v6987_v39 = vpop.eup %6986  ;;  %v5250_v30 = vmul.f32 %v12876_v32, %v5249_v22 }
 0x5e9   : > { %v5565_v54 = vsel %vm5533_vm7, %v12886_v29, %v5501_v27  ;;  %v5244_v42 = vsel %vm11722_vm9, %v5241_v7, %v5238_v57  ;;  %v5485_v14 = vand.u32 2147483647, %v11668_v34  ;;  %v5247_v19 = vmul.f32 0.6931472, %v6987_v39 }
 0x5ea   : > { %5709 = vmatpush.msrb.mxu1 %v5565_v54  ;;  %v5492_v15 = vmul.f32 0.01, %v5244_v42  ;;  %v5483_v40 = vadd.f32 1.0, %v5482_v16  ;;  %6992 = vlog2.f32 %v5398_v8  ;;  %vm5252_vm14 = vcmp.lt.f32.partialorder %v5251_v48, 0.0004427343 }
 0x5eb   : > { %v6989_v2 = vpop.eup %6988  ;;  %v5475_v3 = vmul.f32 %v11645_v13, %v5474_v60  ;;  %v5407_v56 = vadd.f32 1.0, %v11636_v47  ;;  %v5410_v49 = vmul.f32 -0.5, %v11636_v47  ;;  %v5253_v32 = vsel %vm5252_vm14, %v5250_v30, %v5247_v19 }
 0x5ec   : > { %v5556_v55 = vsel %vm5524_vm11, %v12887_v11, %v5492_v15  ;;  %v5472_v4 = vmul.f32 0.6931472, %v6989_v2  ;;  %v5402_v52 = vadd.f32 1.0, %v5401_v9  ;;  %v5493_v35 = vmul.f32 0.01, %v5253_v32 }
 0x5ed   : > { %v6991_v44 = vpop.eup %6990  ;;  %5690 = vmatpush.msrb.mxu0 %v5556_v55  ;;  %vm5477_vm15 = vcmp.lt.f32.partialorder %v5476_v38, 0.0004427343  ;;  %vm11751_vm1 = vcmp.lt.f32.partialorder %v5485_v14, 0.0004427343  ;;  %6994 = vlog2.f32 %v5407_v56  ;;  %v5484_v26 = vmul.f32 %v11668_v34, %v5483_v40 }
 0x5ee   : > { %6168 = vmatmul.msk.f32.vlgmr.msrb.gmra.mxu0 %vm1417_vm10, %v11505_v46  ;;  %v5478_v13 = vsel %vm5477_vm15, %v5475_v3, %v5472_v4  ;;  %v5481_v1 = vmul.f32 0.6931472, %v6991_v44  ;;  %v5404_v6 = vand.u32 2147483647, %v11628_v62  ;;  %v5557_v53 = vsel %vm5525_vm13, %v12890_v37, %v5493_v35 }
 0x5ef   : > { %v5518_v21 = vmul.f32 0.01, %v5478_v13  ;;  %v5411_v22 = vadd.f32 1.0, %v5410_v49  ;;  %v5326_v28 = vadd.f32 1.0, %v11591_v20  ;;  %5710 = vmatpush.msrb.mxu1 %v5557_v53  ;;  %v5403_v7 = vmul.f32 %v11628_v62, %v5402_v52 }
 0x5f0   : > { %v6993_v59 = vpop.eup %6992  ;;  %v5487_v51 = vsel %vm11751_vm1, %v5484_v26, %v5481_v1  ;;  %v5413_v48 = vand.u32 2147483647, %v11636_v47  ;;  %v5329_v34 = vmul.f32 -0.5, %v11591_v20  ;;  %6169 = vmatmul.msk.f32.vlgmr.msrb.gmra.mxu1 %vm1417_vm10, %v11505_v46  ;;  %vm5551_vm2 = vcmp.gt.f32.partialorder %v11604_v61, 20.0 }
 0x5f1   : > { %v5582_v16 = vsel %vm5550_vm12, %v11574_v36, %v5518_v21  ;;  %v5519_v27 = vmul.f32 0.01, %v5487_v51  ;;  %v5400_v57 = vmul.f32 0.6931472, %v6993_v59  ;;  %6996 = vlog2.f32 %v5326_v28  ;;  %v12891_v21 = vld [vmem:[#allocation53_spill] sm:$0xff] }
 0x5f2   : > { %5727 = vmatpush.msrb.mxu2 %v5582_v16  ;;  %vm5405_vm3 = vcmp.lt.f32.partialorder %v5404_v6, 0.0004427343  ;;  %v5335_v62 = vadd.f32 1.0, %v11614_v23  ;;  %v5412_v8 = vmul.f32 %v11636_v47, %v5411_v22  ;;  %v5338_v9 = vmul.f32 -0.5, %v11614_v23 }
 0x5f3   : > { %v6995_v60 = vpop.eup %6994  ;;  %v5583_v5 = vsel %vm5551_vm2, %v11595_v63, %v5519_v27  ;;  %v5406_v38 = vsel %vm5405_vm3, %v5403_v7, %v5400_v57  ;;  %v5330_v39 = vadd.f32 1.0, %v5329_v34  ;;  %vm5542_vm0 = vcmp.gt.f32.partialorder %v11549_v17, 20.0 }
 0x5f4   : > { %5747 = vmatpush.msrb.mxu3 %v5583_v5  ;;  %v5510_v12 = vmul.f32 0.01, %v5406_v38  ;;  %v5409_v36 = vmul.f32 0.6931472, %v6995_v60  ;;  %6998 = vlog2.f32 %v5335_v62  ;;  %vm5414_vm4 = vcmp.lt.f32.partialorder %v5413_v48, 0.0004427343 }
 0x5f5   : > { %v5332_v61 = vand.u32 2147483647, %v11591_v20  ;;  %v5254_v29 = vadd.f32 1.0, %v11557_v50  ;;  %v5257_v42 = vmul.f32 -0.5, %v11557_v50  ;;  %vm5543_vm5 = vcmp.gt.f32.partialorder %v11564_v58, 20.0 }
 0x5f6   : > { %v5574_v54 = vsel %vm5542_vm0, %v11538_v45, %v5510_v12  ;;  %v5415_v63 = vsel %vm5414_vm4, %v5412_v8, %v5409_v36  ;;  %v5339_v14 = vadd.f32 1.0, %v5338_v9  ;;  %v5331_v17 = vmul.f32 %v11591_v20, %v5330_v39 }
 0x5f7   : > { %v6997_v47 = vpop.eup %6996  ;;  %5728 = vmatpush.msrb.mxu2 %v5574_v54  ;;  %v5511_v30 = vmul.f32 0.01, %v5415_v63  ;;  %7000 = vlog2.f32 %v5254_v29  ;;  %v5341_v19 = vand.u32 2147483647, %v11614_v23  ;;  %v5263_v40 = vadd.f32 1.0, %v11561_v18 }
 0x5f8   : > { %v5328_v15 = vmul.f32 0.6931472, %v6997_v47  ;;  %vm5333_vm6 = vcmp.lt.f32.partialorder %v5332_v61, 0.0004427343  ;;  %v5266_v45 = vmul.f32 -0.5, %v11561_v18  ;;  %v5258_v49 = vadd.f32 1.0, %v5257_v42 }
 0x5f9   : > { %v5575_v2 = vsel %vm5543_vm5, %v11553_v41, %v5511_v30  ;;  %7002 = vlog2.f32 %v5263_v40  ;;  %v5340_v55 = vmul.f32 %v11614_v23, %v5339_v14  ;;  %v5260_v20 = vand.u32 2147483647, %v11557_v50 }
 0x5fa   : > { %v6999_v3 = vpop.eup %6998  ;;  %5748 = vmatpush.msrb.mxu3 %v5575_v2  ;;  %v5334_v56 = vsel %vm5333_vm6, %v5331_v17, %v5328_v15  ;;  %vm5534_vm7 = vcmp.gt.f32.partialorder %v11517_v33, 20.0  ;;  %vm5342_vm8 = vcmp.lt.f32.partialorder %v5341_v19, 0.0004427343  ;;  %v5267_v52 = vadd.f32 1.0, %v5266_v45 }
 0x5fb   : > { %v5502_v58 = vmul.f32 0.01, %v5334_v56  ;;  %v5337_v11 = vmul.f32 0.6931472, %v6999_v3  ;;  %v5259_v0 = vmul.f32 %v11557_v50, %v5258_v49  ;;  %v5269_v13 = vand.u32 2147483647, %v11561_v18 }
 0x5fc   : > { %vm5535_vm9 = vcmp.gt.f32.partialorder %v11532_v24, 20.0  ;;  %vm5261_vm11 = vcmp.lt.f32.partialorder %v5260_v20, 0.0004427343  ;;  %vm5526_vm12 = vcmp.gt.f32.partialorder %v11489_v43, 20.0  ;;  %vm5527_vm14 = vcmp.gt.f32.partialorder %v12891_v21, 20.0  ;;  %v5589_v43 = vpop.permute.xlu1 %5588 }
 0x5fd   : > { %v7001_v32 = vpop.eup %7000  ;;  %v5566_v41 = vsel %vm5534_vm7, %v11508_v10, %v5502_v58  ;;  %v5343_v4 = vsel %vm5342_vm8, %v5340_v55, %v5337_v11  ;;  %v5268_v10 = vmul.f32 %v11561_v18, %v5267_v52  ;;  %vm5270_vm13 = vcmp.lt.f32.partialorder %v5269_v13, 0.0004427343 }
 0x5fe   : > { %5729 = vmatpush.msrb.mxu2 %v5566_v41  ;;  %v5503_v44 = vmul.f32 0.01, %v5343_v4  ;;  %v5256_v35 = vmul.f32 0.6931472, %v7001_v32  ;;  %v5591_v28 = vperm.slane %v5589_v43, 0 }
 0x5ff   : > { %v7003_v23 = vpop.eup %7002 }
 0x600   : > { %v5567_v1 = vsel %vm5535_vm9, %v11525_v25, %v5503_v44  ;;  %v5262_v33 = vsel %vm5261_vm11, %v5259_v0, %v5256_v35  ;;  %v5265_v6 = vmul.f32 0.6931472, %v7003_v23  ;;  %v12892_v25 = vld [vmem:[#allocation14_spill] sm:$0xff] }
 0x601   : > { %5749 = vmatpush.msrb.mxu3 %v5567_v1  ;;  %v5494_v26 = vmul.f32 0.01, %v5262_v33 }
 0x602   : > { %v5271_v50 = vsel %vm5270_vm13, %v5268_v10, %v5265_v6 }
 0x603   : > { %v5558_v37 = vsel %vm5526_vm12, %v11482_v31, %v5494_v26  ;;  %v5495_v53 = vmul.f32 0.01, %v5271_v50 }
 0x604   : > { %5730 = vmatpush.msrb.mxu2 %v5558_v37 }
 0x605   : > { %6170 = vmatmul.msk.f32.vlgmr.msrb.gmra.mxu2 %vm1417_vm10, %v11505_v46  ;;  %v5559_v24 = vsel %vm5527_vm14, %v12892_v25, %v5495_v53  ;;  %vm5900_vm14 = vcmask 1042434  }
 0x606   : > { %5750 = vmatpush.msrb.mxu3 %v5559_v24 }
 0x607   : > { %6171 = vmatmul.msk.f32.vlgmr.msrb.gmra.mxu3 %vm1417_vm10, %v11505_v46 }
 0x62f   : > { %v5612_v18 = vpop.f32.mrf.mxu0 }
 0x630   : > { %v11806_v31 = vadd.f32 %v5612_v18, %v5591_v28 }
 0x632   : > { %v11815_v57 = vmul.f32 100.0, %v11806_v31 }
 0x634   : > { %v5632_v22 = vpop.f32.mrf.mxu1  ;;  %v5763_v8 = vmin.f32 %v11815_v57, 20.0  ;;  %vm5867_vm5 = vcmp.gt.f32.partialorder %v11815_v57, 20.0 }
 0x635   : > { %v11808_v7 = vadd.f32 %v5632_v22, %v5591_v28 }
 0x636   : > { %v5771_v29 = vmul.f32 1.442695, %v5763_v8 }
 0x637   : > { %v11820_v62 = vmul.f32 100.0, %v11808_v7 }
 0x638   : > { %7004 = vpow2.f32 %v5771_v29 }
 0x639   : > { %v5764_v12 = vmin.f32 %v11820_v62, 20.0  ;;  %vm5868_vm4 = vcmp.gt.f32.partialorder %v11820_v62, 20.0 }
 0x63b   : > { %v5773_v63 = vmul.f32 1.442695, %v5764_v12 }
 0x63d   : > { %7006 = vpow2.f32 %v5773_v63 }
 0x63e   : > { %v11842_v17 = vpop.eup %7004 }
 0x63f   : > { %v5787_v45 = vadd.f32 1.0, %v11842_v17  ;;  %v5790_v26 = vmul.f32 -0.5, %v11842_v17  ;;  %v5793_v43 = vand.u32 2147483647, %v11842_v17 }
 0x641   : > { %vm11916_vm0 = vcmp.lt.f32.partialorder %v5793_v43, 0.0004427343 }
 0x643   : > { %v7007_v19 = vpop.eup %7006 }
 0x644   : > { %v5796_v56 = vadd.f32 1.0, %v7007_v19  ;;  %v5799_v13 = vmul.f32 -0.5, %v7007_v19  ;;  %v5802_v6 = vand.u32 2147483647, %v7007_v19 }
 0x646   : > { %v5800_v24 = vadd.f32 1.0, %v5799_v13  ;;  %vm11876_vm10 = vcmp.lt.f32.partialorder %v5802_v6, 0.0004427343 }
 0x648   : > { %v5801_v63 = vmul.f32 %v7007_v19, %v5800_v24 }
 0x664   : > { %v5652_v51 = vpop.f32.mrf.mxu2 }
 0x665   : > { %v5672_v48 = vpop.f32.mrf.mxu3  ;;  %v11812_v27 = vadd.f32 %v5652_v51, %v5591_v28  ;;  %v5791_v51 = vadd.f32 1.0, %v5790_v26 }
 0x666   : > { %v11817_v46 = vadd.f32 %v5672_v48, %v5591_v28 }
 0x667   : > { %v11828_v38 = vmul.f32 100.0, %v11812_v27 }
 0x668   : > { %v11832_v9 = vmul.f32 100.0, %v11817_v46 }
 0x669   : > { %v5765_v61 = vmin.f32 %v11828_v38, 20.0  ;;  %vm5869_vm6 = vcmp.gt.f32.partialorder %v11828_v38, 20.0 }
 0x66a   : > { %v5766_v54 = vmin.f32 %v11832_v9, 20.0  ;;  %vm5870_vm7 = vcmp.gt.f32.partialorder %v11832_v9, 20.0 }
 0x66b   : > { %v5692_v59 = vpop.f32.mrf.mxu0  ;;  %v5775_v30 = vmul.f32 1.442695, %v5765_v61 }
 0x66c   : > { %v11810_v34 = vadd.f32 %v5692_v59, %v5591_v28  ;;  %v5777_v14 = vmul.f32 1.442695, %v5766_v54 }
 0x66d   : > { %v5712_v16 = vpop.f32.mrf.mxu1 }
 0x66e   : > { %v11822_v60 = vadd.f32 %v5712_v16, %v5591_v28  ;;  %v11825_v5 = vmul.f32 100.0, %v11810_v34 }
 0x670   : > { %v11836_v36 = vmul.f32 100.0, %v11822_v60  ;;  %v5767_v39 = vmin.f32 %v11825_v5, 20.0  ;;  %vm5871_vm9 = vcmp.gt.f32.partialorder %v11825_v5, 20.0 }
 0x672   : > { %v5768_v42 = vmin.f32 %v11836_v36, 20.0  ;;  %v5779_v47 = vmul.f32 1.442695, %v5767_v39  ;;  %vm5872_vm11 = vcmp.gt.f32.partialorder %v11836_v36, 20.0 }
 0x674   : > { %v5781_v15 = vmul.f32 1.442695, %v5768_v42  ;;  %7008 = vpow2.f32 %v5779_v47 }
 0x675   : > { %7010 = vpow2.f32 %v5775_v30 }
 0x676   : > { %7012 = vpow2.f32 %v5777_v14 }
 0x677   : > { %7014 = vpow2.f32 %v5781_v15 }
 0x678   : > { %7016 = vlog2.f32 %v5787_v45 }
 0x679   : > { %7018 = vlog2.f32 %v5796_v56 }
 0x67a   : > { %v11844_v40 = vpop.eup %7008 }
 0x67b   : > { %v11846_v2 = vpop.eup %7010  ;;  %v5823_v11 = vadd.f32 1.0, %v11844_v40  ;;  %v5826_v37 = vmul.f32 -0.5, %v11844_v40  ;;  %v5829_v18 = vand.u32 2147483647, %v11844_v40 }
 0x67c   : > { %v11849_v3 = vpop.eup %7012  ;;  %v5805_v20 = vadd.f32 1.0, %v11846_v2  ;;  %v5808_v50 = vmul.f32 -0.5, %v11846_v2  ;;  %v5811_v47 = vand.u32 2147483647, %v11846_v2 }
 0x67d   : > { %v11851_v58 = vpop.eup %7014  ;;  %v5814_v32 = vadd.f32 1.0, %v11849_v3  ;;  %7020 = vlog2.f32 %v5823_v11  ;;  %v5817_v53 = vmul.f32 -0.5, %v11849_v3  ;;  %v5827_v39 = vadd.f32 1.0, %v5826_v37 }
 0x67e   : > { %v5832_v52 = vadd.f32 1.0, %v11851_v58  ;;  %7022 = vlog2.f32 %v5805_v20  ;;  %v7017_v33 = vpop.eup %7016  ;;  %v5809_v61 = vadd.f32 1.0, %v5808_v50  ;;  %vm11882_vm15 = vcmp.lt.f32.partialorder %v5829_v18, 0.0004427343 }
 0x67f   : > { %7024 = vlog2.f32 %v5814_v32  ;;  %v7019_v10 = vpop.eup %7018  ;;  %v11880_v12 = vmul.f32 0.6931472, %v7017_v33  ;;  %v5818_v29 = vadd.f32 1.0, %v5817_v53  ;;  %v5820_v30 = vand.u32 2147483647, %v11849_v3 }
 0x680   : > { %7026 = vlog2.f32 %v5832_v52  ;;  %v5798_v48 = vmul.f32 0.6931472, %v7019_v10  ;;  %v5838_v20 = vand.u32 2147483647, %v11851_v58  ;;  %v5810_v52 = vmul.f32 %v11846_v2, %v5809_v61 }
 0x681   : > { %v5828_v13 = vmul.f32 %v11844_v40, %v5827_v39  ;;  %vm11894_vm1 = vcmp.lt.f32.partialorder %v5811_v47, 0.0004427343  ;;  %vm11898_vm2 = vcmp.lt.f32.partialorder %v5820_v30, 0.0004427343  ;;  %v5792_v50 = vmul.f32 %v11842_v17, %v5791_v51 }
 0x682   : > { %vm11909_vm3 = vcmp.lt.f32.partialorder %v5838_v20, 0.0004427343 }
 0x683   : > { %v7021_v25 = vpop.eup %7020 }
 0x684   : > { %v7023_v22 = vpop.eup %7022  ;;  %v5825_v11 = vmul.f32 0.6931472, %v7021_v25 }
 0x685   : > { %v7025_v59 = vpop.eup %7024  ;;  %v5807_v15 = vmul.f32 0.6931472, %v7023_v22 }
 0x686   : > { %v7027_v8 = vpop.eup %7026  ;;  %v5816_v45 = vmul.f32 0.6931472, %v7025_v59  ;;  %v5831_v40 = vsel %vm11882_vm15, %v5828_v13, %v5825_v11  ;;  %vm5898_vm15 = vcmask 1040384  }
 0x687   : > { %v5813_v6 = vsel %vm11894_vm1, %v5810_v52, %v5807_v15  ;;  %v5863_v59 = vmul.f32 0.01, %v5831_v40  ;;  %vm5904_vm1 = vcmask 1044484  }
 0x688   : > { %v5732_v49 = vpop.f32.mrf.mxu2  ;;  %v5861_v24 = vmul.f32 0.01, %v5813_v6 }
 0x689   : > { %v11854_v55 = vadd.f32 %v5732_v49, %v5591_v28  ;;  %v5804_v49 = vsel %vm11876_vm10, %v5801_v63, %v5798_v48  ;;  %v5879_v9 = vsel %vm5871_vm9, %v11810_v34, %v5863_v59 }
 0x68a   : > { %v5752_v4 = vpop.f32.mrf.mxu3  ;;  %v5877_v62 = vsel %vm5869_vm6, %v11812_v27, %v5861_v24  ;;  %v5894_v34 = vrot.slane %v5879_v9, 4 }
 0x68b   : > { %v11859_v41 = vmul.f32 100.0, %v11854_v55  ;;  %v11862_v44 = vadd.f32 %v5752_v4, %v5591_v28  ;;  %v5835_v28 = vmul.f32 -0.5, %v11851_v58  ;;  %v5834_v4 = vmul.f32 0.6931472, %v7027_v8 }
 0x68c   : > { %v5892_v27 = vrot.slane %v5877_v62, 6 }
 0x68d   : > { %v5769_v35 = vmin.f32 %v11859_v41, 20.0  ;;  %v11866_v0 = vmul.f32 100.0, %v11862_v44  ;;  %v5836_v14 = vadd.f32 1.0, %v5835_v28  ;;  %v5795_v28 = vsel %vm11916_vm0, %v5792_v50, %v11880_v12 }
 0x68e   : > { %vm5873_vm12 = vcmp.gt.f32.partialorder %v11859_v41, 20.0  ;;  %v5859_v42 = vmul.f32 0.01, %v5795_v28  ;;  %vm5908_vm0 = vcmask 1045508  }
 0x68f   : > { %v5783_v23 = vmul.f32 1.442695, %v5769_v35  ;;  %v5770_v1 = vmin.f32 %v11866_v0, 20.0  ;;  %v5819_v35 = vmul.f32 %v11849_v3, %v5818_v29  ;;  %v5837_v26 = vmul.f32 %v11851_v58, %v5836_v14 }
 0x690   : > { %v5860_v58 = vmul.f32 0.01, %v5804_v49  ;;  %vm5874_vm10 = vcmp.gt.f32.partialorder %v11866_v0, 20.0  ;;  %v5875_v15 = vsel %vm5867_vm5, %v11806_v31, %v5859_v42 }
 0x691   : > { %7028 = vpow2.f32 %v5783_v23  ;;  %v5785_v21 = vmul.f32 1.442695, %v5770_v1  ;;  %v5822_v2 = vsel %vm11898_vm2, %v5819_v35, %v5816_v45  ;;  %v5840_v53 = vsel %vm11909_vm3, %v5837_v26, %v5834_v4 }
 0x692   : > { %v5862_v18 = vmul.f32 0.01, %v5822_v2  ;;  %v5864_v51 = vmul.f32 0.01, %v5840_v53  ;;  %v5876_v8 = vsel %vm5868_vm4, %v11808_v7, %v5860_v58  ;;  %vm5906_vm2 = vcmask 1046534  }
 0x693   : > { %7030 = vpow2.f32 %v5785_v21  ;;  %v5891_v47 = vrot.slane %v5876_v8, 7  ;;  %vm5902_vm3 = vcmask 1041408   ;;  %vm5910_vm4 = vcmask 1043456  }
 0x694   : > { %v5878_v39 = vsel %vm5870_vm7, %v11817_v46, %v5862_v18 }
 0x695   : > { %v5893_v5 = vrot.slane %v5878_v39, 5  ;;  %v5899_v0 = vsel %vm5898_vm15, %v5875_v15, %v5891_v47 }
 0x697   : > { %v7029_v54 = vpop.eup %7028  ;;  %v5901_v14 = vsel %vm5900_vm14, %v5892_v27, %v5893_v5 }
 0x698   : > { %v5841_v56 = vadd.f32 1.0, %v7029_v54  ;;  %v5844_v32 = vmul.f32 -0.5, %v7029_v54  ;;  %v5847_v21 = vand.u32 2147483647, %v7029_v54 }
 0x699   : > { %v7031_v19 = vpop.eup %7030 }
 0x69a   : > { %7032 = vlog2.f32 %v5841_v56  ;;  %v5850_v33 = vadd.f32 1.0, %v7031_v19  ;;  %v5853_v3 = vmul.f32 -0.5, %v7031_v19  ;;  %v5845_v37 = vadd.f32 1.0, %v5844_v32 }
 0x69b   : > { %v5856_v43 = vand.u32 2147483647, %v7031_v19  ;;  %vm5848_vm8 = vcmp.lt.f32.partialorder %v5847_v21, 0.0004427343  ;;  %v5903_v56 = vsel %vm5902_vm3, %v5899_v0, %v5901_v14 }
 0x69c   : > { %7034 = vlog2.f32 %v5850_v33  ;;  %v5854_v17 = vadd.f32 1.0, %v5853_v3  ;;  %v5846_v16 = vmul.f32 %v7029_v54, %v5845_v37  ;;  %v5880_v54 = vsel %vm5872_vm11, %v11822_v60, %v5864_v51 }
 0x69d   : > { %vm5857_vm13 = vcmp.lt.f32.partialorder %v5856_v43, 0.0004427343  ;;  %v5895_v30 = vrot.slane %v5880_v54, 3 }
 0x69e   : > { %v5855_v38 = vmul.f32 %v7031_v19, %v5854_v17 }
 0x69f   : > { %v5905_v45 = vsel %vm5904_vm1, %v5894_v34, %v5895_v30 }
 0x6a0   : > { %v7033_v22 = vpop.eup %7032 }
 0x6a1   : > { %v5843_v48 = vmul.f32 0.6931472, %v7033_v22 }
 0x6a2   : > { %v7035_v12 = vpop.eup %7034 }
 0x6a3   : > { %v5849_v61 = vsel %vm5848_vm8, %v5846_v16, %v5843_v48  ;;  %v5852_v29 = vmul.f32 0.6931472, %v7035_v12 }
 0x6a4   : > { %v5865_v7 = vmul.f32 0.01, %v5849_v61 }
 0x6a5   : > { %v5858_v63 = vsel %vm5857_vm13, %v5855_v38, %v5852_v29 }
 0x6a6   : > { %v5881_v46 = vsel %vm5873_vm12, %v11854_v55, %v5865_v7  ;;  %v5866_v36 = vmul.f32 0.01, %v5858_v63 }
 0x6a7   : > { %v5896_v60 = vrot.slane %v5881_v46, 2 }
 0x6a8   : > { %v5882_v41 = vsel %vm5874_vm10, %v11862_v44, %v5866_v36 }
 0x6a9   : > { %v5897_v55 = vrot.slane %v5882_v41, 1 }
 0x6ab   : > { %v5907_v44 = vsel %vm5906_vm2, %v5896_v60, %v5897_v55 }
 0x6ac   : > { %v5909_v49 = vsel %vm5908_vm0, %v5905_v45, %v5907_v44 }
 0x6ad   : > { %v5911_v11 = vsel %vm5910_vm4, %v5903_v56, %v5909_v49 }
 0x6ae   : > { %5913 = vst [vmem:[%s517_s21] sm:$0xff] %v5911_v11 }
 0x6af   : > { %7063 = shalt.err (!%p7060_p3)
}
 0x6b0   : > { %6176 = dma.vmem_to_hbm [thread:$0]  (%p7228_p5), %s5928_s22, 128, %s5930_s27, %s5915_s2  }
 0x6b1 PF: > { %p6182_p4 = scmp.ge.s32.totalorder %s7098_s26, 2  ;;  %s5941_s29 = sand.u32 1, %s7086_s23  }
 0x6b2   : > { %s5942_s21 = scalar_lea.sflag [#allocation4], %s5941_s29 }
 0x6b3   : > { %p6179_p7 = pnand %p6182_p4, %p7232_p6 }
 0x6b5   : > { %p6180_p8 = pneg %p6179_p7 }
 0x6b7   : > { %7081 = dma.done.wait (%p6180_p8), %s5942_s21, 128  }
 0x6b8   : > { %7083 = vsyncadd (%p6180_p8), %s5942_s21, 4294967168  ;;  %p28_p9 = scmp.ge.s32.totalorder %s7214_s28, 4   ;;  %s12905_s23 = smov %s7090_s24 }
 0x6b9   : > { %s12906_s24 = smov %s7094_s25  ;;  %s12907_s25 = smov %s7226_s0 }
 0x6ba   : > { %s12908_s26 = smov %s7214_s28  ;;  %30 = sbr.rel (!%p28_p9) target bundleno = 9 (0x9), region = 119 }
 0x6bf   :  { %5948 = vsyncpa [#allocation4], 1 }
 0x6c0   :  { %5950 = vsyncpa [#allocation4 + $0x1], 1 }

</bundles_post_ra>
